<compile_context>
chip_gen: v7x
topology: tpu7x:2x2x1
jax: 0.10.0
libtpu: 0.0.40
codegen_flags: <defaults>
</compile_context>

<pallas_src>
import functools

import jax
import jax.numpy as jnp
from jax.experimental import pallas as pl
from jax.experimental.pallas import tpu as pltpu

T_IN = 750                          # time samples
K_CONV = 39                         # temporal kernel width
PAD = 19                            # temporal padding
T_PAD = T_IN + 2 * PAD              # 788
POOL1 = 5
T_POOL1 = (T_IN - POOL1) // POOL1 + 1       # 150
POOL2 = 4
T_POOL2 = (T_POOL1 - POOL2) // POOL2 + 1    # 37
WIN2 = T_POOL1 - POOL2 + 1          # 147
N_FEAT = 32 * T_POOL2               # 1184
T3_PAD = T_POOL1 + 2 * PAD          # 188
K3 = K_CONV * 32                    # 1248 (conv3 contraction depth)


def _elu(x):
    # nn.ELU(alpha=1.0); clamp the exp argument so huge positives can't make inf
    return jnp.where(x > 0, x, jnp.exp(jnp.minimum(x, 0.0)) - 1.0)


def eegnet_kernel(
    block_b,
    # inputs
    win_ref,                         # (Bt, 2, 39, 750) phase-major conv1 im2col
    w1_ref,                          # (16, 39)
    bn1s_ref, bn1b_ref,              # (16, 1)
    w2e0_ref, w2e1_ref,              # (16, 1) depthwise coeffs, even out-chans
    w2o0_ref, w2o1_ref,              # (16, 1) depthwise coeffs, odd out-chans
    bn2s_ref, bn2b_ref,              # (32, 1)  (permuted channel order)
    w3f_ref,                         # (32, 1248) conv3 weights, flattened taps
    bn3s_ref, bn3b_ref,              # (32, 1)
    wfc0_ref, wfc1_ref,              # (32, 147) fc weights w/ pool2 stride folded in
    bfc_ref,                         # (1, 2)
    # output
    out_ref,                         # (Bt, 2) logits
    # scratch
    pad_scratch,                     # VMEM (32, 188) padded pool1 output
    colmat,                          # VMEM (1248, 150) conv3 im2col
):
    # Zero once per grid step: the interior is fully overwritten per example,
    # only the PAD borders need to be zero (safe under core-parallel grids).
    pad_scratch[...] = jnp.zeros_like(pad_scratch)

    w1 = w1_ref[...]
    bn1s, bn1b = bn1s_ref[...], bn1b_ref[...]
    w2e0, w2e1 = w2e0_ref[...], w2e1_ref[...]
    w2o0, w2o1 = w2o0_ref[...], w2o1_ref[...]
    bn2s, bn2b = bn2s_ref[...], bn2b_ref[...]
    bn3s, bn3b = bn3s_ref[...], bn3b_ref[...]
    w3f = w3f_ref[...]
    wfc0, wfc1 = wfc0_ref[...], wfc1_ref[...]

    rows = []
    for e in range(block_b):
        # --- Conv2d(1->16, (1,39), pad (0,19)) as one MXU dot per EEG row ---
        a0 = jnp.dot(w1, win_ref[e, 0], preferred_element_type=jnp.float32)
        a1 = jnp.dot(w1, win_ref[e, 1], preferred_element_type=jnp.float32)
        a0 = a0 * bn1s + bn1b            # BN1 (inference), (16, 750)
        a1 = a1 * bn1s + bn1b

        # --- Conv2d(16->32, (2,1), groups=16): depthwise across the 2 rows ---
        y = jnp.concatenate([w2e0 * a0 + w2e1 * a1,      # out chans 0,2,...,30
                             w2o0 * a0 + w2o1 * a1],     # out chans 1,3,...,31
                            axis=0)                       # (32, 750), permuted
        # --- BN2 + ELU ---
        y = _elu(y * bn2s + bn2b)

        # --- MaxPool2d((1,5), stride 5): columns are phase-major so the pool
        #     is a max over 5 contiguous 150-wide column groups ---
        p1 = y[:, 0:T_POOL1]
        for r in range(1, POOL1):
            p1 = jnp.maximum(p1, y[:, r * T_POOL1:(r + 1) * T_POOL1])
        # Dropout(0.5) -> identity in eval mode.

        # --- Conv2d(32->32, (1,39), pad (0,19)) as one K=1248 contraction ---
        pad_scratch[:, PAD:PAD + T_POOL1] = p1
        for k in range(K_CONV):
            colmat[k * 32:(k + 1) * 32, :] = pad_scratch[:, k:k + T_POOL1]
        acc3 = jnp.dot(w3f, colmat[...], preferred_element_type=jnp.float32)

        # --- BN3 + ELU ---
        z = _elu(acc3 * bn3s + bn3b)                      # (32, 150)

        # --- MaxPool2d((1,4), stride 4) fused with fc: windowed max, then the
        #     stride-4 column selection is baked into the fc weights ---
        m2 = z[:, 0:WIN2]
        for k in range(1, POOL2):
            m2 = jnp.maximum(m2, z[:, k:k + WIN2])
        # Dropout(0.5) -> identity in eval mode.
        s0 = jnp.sum(m2 * wfc0, axis=1, keepdims=True)    # (32, 1)
        s1 = jnp.sum(m2 * wfc1, axis=1, keepdims=True)
        rows.append(jnp.sum(jnp.concatenate([s0, s1], axis=1),
                            axis=0, keepdims=True))       # (1, 2)

    out_ref[...] = jnp.concatenate(rows, axis=0) + bfc_ref[...]


def init_params(key):
    ks = jax.random.split(key, 17)

    def bn_params(kg, kb, km, kv, c):
        gamma = 1.0 + 0.1 * jax.random.normal(kg, (c,), jnp.float32)
        beta = 0.1 * jax.random.normal(kb, (c,), jnp.float32)
        mean = 0.1 * jax.random.normal(km, (c,), jnp.float32)
        var = 1.0 + 0.5 * jax.random.uniform(kv, (c,), jnp.float32)
        scale = gamma / jnp.sqrt(var + 1e-5)
        shift = beta - mean * scale
        return scale, shift

    params = dict(
        w1=jax.random.normal(ks[0], (16, 1, 1, 39), jnp.float32) * 0.1,
        w2=jax.random.normal(ks[1], (32, 1, 2, 1), jnp.float32) * 0.1,
        w3=jax.random.normal(ks[2], (32, 32, 1, 39), jnp.float32) * 0.05,
        wfc=jax.random.normal(ks[3], (2, N_FEAT), jnp.float32) * 0.05,
        bfc=jax.random.normal(ks[4], (2,), jnp.float32) * 0.1,
    )
    params["bn1s"], params["bn1b"] = bn_params(ks[5], ks[6], ks[7], ks[8], 16)
    params["bn2s"], params["bn2b"] = bn_params(ks[9], ks[10], ks[11], ks[12], 32)
    params["bn3s"], params["bn3b"] = bn_params(ks[13], ks[14], ks[15], ks[16], 32)
    return params


def eegnet_forward(x, params):
    """x: (B, 1, 2, 750) float32, NCHW like the PyTorch module."""
    assert x.shape[1:] == (1, 2, T_IN)
    B = x.shape[0]
    x = x.astype(jnp.float32)

    # ---- batch blocking ----
    block_b = B if B <= 8 else 8
    Bp = ((B + block_b - 1) // block_b) * block_b
    xb = x.reshape(B, 2, T_IN)
    if Bp != B:
        xb = jnp.concatenate(
            [xb, jnp.zeros((Bp - B, 2, T_IN), jnp.float32)], axis=0)

    # ---- glue: zero-pad time and build the phase-major conv1 im2col ----
    x_pad = jnp.pad(xb, ((0, 0), (0, 0), (PAD, PAD)))          # (Bp, 2, 788)
    j = jnp.arange(T_POOL1)
    r = jnp.arange(POOL1)
    col_t = (r[:, None] + POOL1 * j[None, :]).reshape(-1)      # column c=r*150+j -> t=5j+r
    taps = jnp.arange(K_CONV)
    gather_idx = taps[:, None] + col_t[None, :]                # (39, 750), max 783 < 788
    win = x_pad[:, :, gather_idx]                              # (Bp, 2, 39, 750)

    # ---- glue: weight re-layout ----
    # conv2 produces channels in order [0,2,...,30, 1,3,...,31]
    perm = jnp.concatenate([jnp.arange(0, 32, 2), jnp.arange(1, 32, 2)])

    w1_k = params["w1"][:, 0, 0, :]                            # (16, 39)
    w2sq = params["w2"][:, 0, :, 0]                            # (32, 2)
    w2e0, w2e1 = w2sq[0::2, 0:1], w2sq[0::2, 1:2]
    w2o0, w2o1 = w2sq[1::2, 0:1], w2sq[1::2, 1:2]

    bn1s = params["bn1s"].reshape(16, 1)
    bn1b = params["bn1b"].reshape(16, 1)
    bn2s = params["bn2s"][perm].reshape(32, 1)
    bn2b = params["bn2b"][perm].reshape(32, 1)
    bn3s = params["bn3s"].reshape(32, 1)
    bn3b = params["bn3b"].reshape(32, 1)

    # conv3 weights flattened so column k*32+m matches im2col row k*32+m
    # (input channel perm[m], tap k)
    w3p = params["w3"][:, :, 0, :][:, perm, :]                 # (32out, 32in_perm, 39)
    w3f = jnp.transpose(w3p, (0, 2, 1)).reshape(32, K3)        # (32, 1248)

    # fc weights with the pool2 stride-4 column selection folded in
    wfcR = params["wfc"].reshape(2, 32, T_POOL2)               # (2, 32, 37)
    wfcE = jnp.zeros((2, 32, WIN2), jnp.float32)
    wfcE = wfcE.at[:, :, POOL2 * jnp.arange(T_POOL2)].set(wfcR)
    bfc2 = params["bfc"].reshape(1, 2)

    def cspec(shape):
        n = len(shape)
        return pl.BlockSpec(shape, lambda b, _n=n: (0,) * _n)

    kernel = functools.partial(eegnet_kernel, block_b)

    out = pl.pallas_call(
        kernel,
        out_shape=jax.ShapeDtypeStruct((Bp, 2), jnp.float32),
        grid=(Bp // block_b,),
        in_specs=[
            pl.BlockSpec((block_b, 2, K_CONV, T_IN), lambda b: (b, 0, 0, 0)),
            cspec((16, K_CONV)),
            cspec((16, 1)), cspec((16, 1)),
            cspec((16, 1)), cspec((16, 1)), cspec((16, 1)), cspec((16, 1)),
            cspec((32, 1)), cspec((32, 1)),
            cspec((32, K3)),
            cspec((32, 1)), cspec((32, 1)),
            cspec((32, WIN2)), cspec((32, WIN2)),
            cspec((1, 2)),
        ],
        out_specs=pl.BlockSpec((block_b, 2), lambda b: (b, 0)),
        scratch_shapes=[
            pltpu.VMEM((32, T3_PAD), jnp.float32),
            pltpu.VMEM((K3, T_POOL1), jnp.float32),
        ],
        compiler_params=pltpu.CompilerParams(
            dimension_semantics=("parallel",),
            vmem_limit_bytes=32 * 1024 * 1024),
    )(win, w1_k, bn1s, bn1b, w2e0, w2e1, w2o0, w2o1,
      bn2s, bn2b, w3f, bn3s, bn3b, wfcE[0], wfcE[1], bfc2)

    return out[:B]


if __name__ == "__main__":
    key = jax.random.PRNGKey(0)
    kx, kp = jax.random.split(key)
    # fc in_features=1184 forces T=750 (32 * (750//5//4) = 1184); batch=2.
    x = jax.random.normal(kx, (2, 1, 2, T_IN), jnp.float32)
    params = init_params(kp)
    fwd = jax.jit(eegnet_forward)
    out = jax.block_until_ready(fwd(x, params))
    assert out.shape == (2, 2) and out.dtype == jnp.float32
    print("KERNEL_OK")
</pallas_src>

<mosaic_0001>
module attributes {stable_mosaic.version = 11 : i64} {
  func.func @eegnet_kernel(%arg0: i32, %arg1: memref<2x2x39x750xf32, #tpu.memory_space<vmem>>, %arg2: memref<16x39xf32, #tpu.memory_space<vmem>>, %arg3: memref<16x1xf32, #tpu.memory_space<vmem>>, %arg4: memref<16x1xf32, #tpu.memory_space<vmem>>, %arg5: memref<16x1xf32, #tpu.memory_space<vmem>>, %arg6: memref<16x1xf32, #tpu.memory_space<vmem>>, %arg7: memref<16x1xf32, #tpu.memory_space<vmem>>, %arg8: memref<16x1xf32, #tpu.memory_space<vmem>>, %arg9: memref<32x1xf32, #tpu.memory_space<vmem>>, %arg10: memref<32x1xf32, #tpu.memory_space<vmem>>, %arg11: memref<32x1248xf32, #tpu.memory_space<vmem>>, %arg12: memref<32x1xf32, #tpu.memory_space<vmem>>, %arg13: memref<32x1xf32, #tpu.memory_space<vmem>>, %arg14: memref<32x147xf32, #tpu.memory_space<vmem>>, %arg15: memref<32x147xf32, #tpu.memory_space<vmem>>, %arg16: memref<1x2xf32, #tpu.memory_space<vmem>>, %arg17: memref<2x2xf32, #tpu.memory_space<vmem>>, %arg18: memref<32x188xf32, #tpu.memory_space<vmem>>, %arg19: memref<1248x150xf32, #tpu.memory_space<vmem>>) attributes {dimension_semantics = [#tpu.dimension_semantics<parallel>], iteration_bounds = array<i64: 1>, scalar_prefetch = 0 : i64, scratch_operands = 2 : i64, tpu.core_type = #tpu.core_type<tc>, window_params = [{transform_indices = @transform_0, window_bounds = array<i64: 2, 2, 39, 750>}, {pipeline_mode = #tpu.pipeline_mode<synchronous>, transform_indices = @transform_1, window_bounds = array<i64: 16, 39>}, {pipeline_mode = #tpu.pipeline_mode<synchronous>, transform_indices = @transform_2, window_bounds = array<i64: 16, 1>}, {pipeline_mode = #tpu.pipeline_mode<synchronous>, transform_indices = @transform_3, window_bounds = array<i64: 16, 1>}, {pipeline_mode = #tpu.pipeline_mode<synchronous>, transform_indices = @transform_4, window_bounds = array<i64: 16, 1>}, {pipeline_mode = #tpu.pipeline_mode<synchronous>, transform_indices = @transform_5, window_bounds = array<i64: 16, 1>}, {pipeline_mode = #tpu.pipeline_mode<synchronous>, transform_indices = @transform_6, window_bounds = array<i64: 16, 1>}, {pipeline_mode = #tpu.pipeline_mode<synchronous>, transform_indices = @transform_7, window_bounds = array<i64: 16, 1>}, {pipeline_mode = #tpu.pipeline_mode<synchronous>, transform_indices = @transform_8, window_bounds = array<i64: 32, 1>}, {pipeline_mode = #tpu.pipeline_mode<synchronous>, transform_indices = @transform_9, window_bounds = array<i64: 32, 1>}, {pipeline_mode = #tpu.pipeline_mode<synchronous>, transform_indices = @transform_10, window_bounds = array<i64: 32, 1248>}, {pipeline_mode = #tpu.pipeline_mode<synchronous>, transform_indices = @transform_11, window_bounds = array<i64: 32, 1>}, {pipeline_mode = #tpu.pipeline_mode<synchronous>, transform_indices = @transform_12, window_bounds = array<i64: 32, 1>}, {pipeline_mode = #tpu.pipeline_mode<synchronous>, transform_indices = @transform_13, window_bounds = array<i64: 32, 147>}, {pipeline_mode = #tpu.pipeline_mode<synchronous>, transform_indices = @transform_14, window_bounds = array<i64: 32, 147>}, {pipeline_mode = #tpu.pipeline_mode<synchronous>, transform_indices = @transform_15, window_bounds = array<i64: 1, 2>}, {transform_indices = @transform_16, window_bounds = array<i64: 2, 2>}]} {
    %cst = arith.constant 0.000000e+00 : f32
    %0 = vector.broadcast %cst : f32 to vector<32x188xf32>
    %c0 = arith.constant 0 : index
    %c0_0 = arith.constant 0 : index
    %1 = vector.load %arg18[%c0, %c0_0] : memref<32x188xf32, #tpu.memory_space<vmem>>, vector<32x188xf32>
    tpu.vector_store %arg18[%c0, %c0_0], %0 {strides = array<i32>} : memref<32x188xf32, #tpu.memory_space<vmem>>, vector<32x188xf32>,
    %c0_1 = arith.constant 0 : index
    %c0_2 = arith.constant 0 : index
    %2 = vector.load %arg2[%c0_1, %c0_2] : memref<16x39xf32, #tpu.memory_space<vmem>>, vector<16x39xf32>
    %c0_3 = arith.constant 0 : index
    %c0_4 = arith.constant 0 : index
    %3 = vector.load %arg3[%c0_3, %c0_4] : memref<16x1xf32, #tpu.memory_space<vmem>>, vector<16x1xf32>
    %c0_5 = arith.constant 0 : index
    %c0_6 = arith.constant 0 : index
    %4 = vector.load %arg4[%c0_5, %c0_6] : memref<16x1xf32, #tpu.memory_space<vmem>>, vector<16x1xf32>
    %c0_7 = arith.constant 0 : index
    %c0_8 = arith.constant 0 : index
    %5 = vector.load %arg5[%c0_7, %c0_8] : memref<16x1xf32, #tpu.memory_space<vmem>>, vector<16x1xf32>
    %c0_9 = arith.constant 0 : index
    %c0_10 = arith.constant 0 : index
    %6 = vector.load %arg6[%c0_9, %c0_10] : memref<16x1xf32, #tpu.memory_space<vmem>>, vector<16x1xf32>
    %c0_11 = arith.constant 0 : index
    %c0_12 = arith.constant 0 : index
    %7 = vector.load %arg7[%c0_11, %c0_12] : memref<16x1xf32, #tpu.memory_space<vmem>>, vector<16x1xf32>
    %c0_13 = arith.constant 0 : index
    %c0_14 = arith.constant 0 : index
    %8 = vector.load %arg8[%c0_13, %c0_14] : memref<16x1xf32, #tpu.memory_space<vmem>>, vector<16x1xf32>
    %c0_15 = arith.constant 0 : index
    %c0_16 = arith.constant 0 : index
    %9 = vector.load %arg9[%c0_15, %c0_16] : memref<32x1xf32, #tpu.memory_space<vmem>>, vector<32x1xf32>
    %c0_17 = arith.constant 0 : index
    %c0_18 = arith.constant 0 : index
    %10 = vector.load %arg10[%c0_17, %c0_18] : memref<32x1xf32, #tpu.memory_space<vmem>>, vector<32x1xf32>
    %c0_19 = arith.constant 0 : index
    %c0_20 = arith.constant 0 : index
    %11 = vector.load %arg12[%c0_19, %c0_20] : memref<32x1xf32, #tpu.memory_space<vmem>>, vector<32x1xf32>
    %c0_21 = arith.constant 0 : index
    %c0_22 = arith.constant 0 : index
    %12 = vector.load %arg13[%c0_21, %c0_22] : memref<32x1xf32, #tpu.memory_space<vmem>>, vector<32x1xf32>
    %c0_23 = arith.constant 0 : index
    %c0_24 = arith.constant 0 : index
    %13 = vector.load %arg11[%c0_23, %c0_24] : memref<32x1248xf32, #tpu.memory_space<vmem>>, vector<32x1248xf32>
    %c0_25 = arith.constant 0 : index
    %c0_26 = arith.constant 0 : index
    %14 = vector.load %arg14[%c0_25, %c0_26] : memref<32x147xf32, #tpu.memory_space<vmem>>, vector<32x147xf32>
    %c0_27 = arith.constant 0 : index
    %c0_28 = arith.constant 0 : index
    %15 = vector.load %arg15[%c0_27, %c0_28] : memref<32x147xf32, #tpu.memory_space<vmem>>, vector<32x147xf32>
    %c0_29 = arith.constant 0 : index
    %c0_30 = arith.constant 0 : index
    %c0_31 = arith.constant 0 : index
    %c0_32 = arith.constant 0 : index
    %16 = vector.load %arg1[%c0_29, %c0_30, %c0_31, %c0_32] : memref<2x2x39x750xf32, #tpu.memory_space<vmem>>, vector<1x1x39x750xf32>
    %17 = vector.shape_cast %16 : vector<1x1x39x750xf32> to vector<39x750xf32>
    %cst_33 = arith.constant dense<0.000000e+00> : vector<16x750xf32>
    %18 = tpu.matmul %2, %17, %cst_33 {dimension_numbers = #tpu.dot_dimension_numbers<[1], [0], [0], [1], [0, 0, 1, 1], [], []>} : vector<16x39xf32>, vector<39x750xf32>, vector<16x750xf32> -> vector<16x750xf32>
    %c0_34 = arith.constant 0 : index
    %c1 = arith.constant 1 : index
    %c0_35 = arith.constant 0 : index
    %c0_36 = arith.constant 0 : index
    %19 = vector.load %arg1[%c0_34, %c1, %c0_35, %c0_36] : memref<2x2x39x750xf32, #tpu.memory_space<vmem>>, vector<1x1x39x750xf32>
    %20 = vector.shape_cast %19 : vector<1x1x39x750xf32> to vector<39x750xf32>
    %cst_37 = arith.constant dense<0.000000e+00> : vector<16x750xf32>
    %21 = tpu.matmul %2, %20, %cst_37 {dimension_numbers = #tpu.dot_dimension_numbers<[1], [0], [0], [1], [0, 0, 1, 1], [], []>} : vector<16x39xf32>, vector<39x750xf32>, vector<16x750xf32> -> vector<16x750xf32>
    %22 = vector.broadcast %3 : vector<16x1xf32> to vector<16x750xf32>
    %23 = arith.mulf %18, %22 : vector<16x750xf32>
    %24 = vector.broadcast %4 : vector<16x1xf32> to vector<16x750xf32>
    %25 = arith.addf %23, %24 : vector<16x750xf32>
    %26 = vector.broadcast %3 : vector<16x1xf32> to vector<16x750xf32>
    %27 = arith.mulf %21, %26 : vector<16x750xf32>
    %28 = vector.broadcast %4 : vector<16x1xf32> to vector<16x750xf32>
    %29 = arith.addf %27, %28 : vector<16x750xf32>
    %30 = vector.broadcast %5 : vector<16x1xf32> to vector<16x750xf32>
    %31 = arith.mulf %30, %25 : vector<16x750xf32>
    %32 = vector.broadcast %6 : vector<16x1xf32> to vector<16x750xf32>
    %33 = arith.mulf %32, %29 : vector<16x750xf32>
    %34 = arith.addf %31, %33 : vector<16x750xf32>
    %35 = vector.broadcast %7 : vector<16x1xf32> to vector<16x750xf32>
    %36 = arith.mulf %35, %25 : vector<16x750xf32>
    %37 = vector.broadcast %8 : vector<16x1xf32> to vector<16x750xf32>
    %38 = arith.mulf %37, %29 : vector<16x750xf32>
    %39 = arith.addf %36, %38 : vector<16x750xf32>
    %40 = tpu.concatenate %34, %39 in 0 : vector<16x750xf32>, vector<16x750xf32> -> vector<32x750xf32>
    %41 = vector.broadcast %9 : vector<32x1xf32> to vector<32x750xf32>
    %42 = arith.mulf %40, %41 : vector<32x750xf32>
    %43 = vector.broadcast %10 : vector<32x1xf32> to vector<32x750xf32>
    %44 = arith.addf %42, %43 : vector<32x750xf32>
    %cst_38 = arith.constant 0.000000e+00 : f32
    %45 = vector.broadcast %cst_38 : f32 to vector<32x750xf32>
    %46 = arith.cmpf ogt, %44, %45 : vector<32x750xf32>
    %cst_39 = arith.constant 0.000000e+00 : f32
    %47 = vector.broadcast %cst_39 : f32 to vector<32x750xf32>
    %48 = arith.minimumf %44, %47 : vector<32x750xf32>
    %49 = math.exp %48 : vector<32x750xf32>
    %cst_40 = arith.constant 1.000000e+00 : f32
    %50 = vector.broadcast %cst_40 : f32 to vector<32x750xf32>
    %51 = arith.subf %49, %50 : vector<32x750xf32>
    %52 = arith.select %46, %44, %51 : vector<32x750xi1>, vector<32x750xf32>
    %53 = vector.extract_strided_slice %52 {offsets = [0, 0], sizes = [32, 150], strides = [1, 1]} : vector<32x750xf32> to vector<32x150xf32>
    %54 = vector.extract_strided_slice %52 {offsets = [0, 150], sizes = [32, 150], strides = [1, 1]} : vector<32x750xf32> to vector<32x150xf32>
    %55 = arith.maximumf %53, %54 : vector<32x150xf32>
    %56 = vector.extract_strided_slice %52 {offsets = [0, 300], sizes = [32, 150], strides = [1, 1]} : vector<32x750xf32> to vector<32x150xf32>
    %57 = arith.maximumf %55, %56 : vector<32x150xf32>
    %58 = vector.extract_strided_slice %52 {offsets = [0, 450], sizes = [32, 150], strides = [1, 1]} : vector<32x750xf32> to vector<32x150xf32>
    %59 = arith.maximumf %57, %58 : vector<32x150xf32>
    %60 = vector.extract_strided_slice %52 {offsets = [0, 600], sizes = [32, 150], strides = [1, 1]} : vector<32x750xf32> to vector<32x150xf32>
    %61 = arith.maximumf %59, %60 : vector<32x150xf32>
    %c0_41 = arith.constant 0 : index
    %c19 = arith.constant 19 : index
    %62 = vector.load %arg18[%c0_41, %c19] : memref<32x188xf32, #tpu.memory_space<vmem>>, vector<32x150xf32>
    tpu.vector_store %arg18[%c0_41, %c19], %61 {strides = array<i32>} : memref<32x188xf32, #tpu.memory_space<vmem>>, vector<32x150xf32>,
    %c0_42 = arith.constant 0 : index
    %c0_43 = arith.constant 0 : index
    %63 = vector.load %arg18[%c0_42, %c0_43] : memref<32x188xf32, #tpu.memory_space<vmem>>, vector<32x150xf32>
    %c0_44 = arith.constant 0 : index
    %c0_45 = arith.constant 0 : index
    %64 = vector.load %arg19[%c0_44, %c0_45] : memref<1248x150xf32, #tpu.memory_space<vmem>>, vector<32x150xf32>
    tpu.vector_store %arg19[%c0_44, %c0_45], %63 {strides = array<i32>} : memref<1248x150xf32, #tpu.memory_space<vmem>>, vector<32x150xf32>,
    %c0_46 = arith.constant 0 : index
    %c1_47 = arith.constant 1 : index
    %65 = vector.load %arg18[%c0_46, %c1_47] : memref<32x188xf32, #tpu.memory_space<vmem>>, vector<32x150xf32>
    %c32 = arith.constant 32 : index
    %c0_48 = arith.constant 0 : index
    %66 = vector.load %arg19[%c32, %c0_48] : memref<1248x150xf32, #tpu.memory_space<vmem>>, vector<32x150xf32>
    tpu.vector_store %arg19[%c32, %c0_48], %65 {strides = array<i32>} : memref<1248x150xf32, #tpu.memory_space<vmem>>, vector<32x150xf32>,
    %c0_49 = arith.constant 0 : index
    %c2 = arith.constant 2 : index
    %67 = vector.load %arg18[%c0_49, %c2] : memref<32x188xf32, #tpu.memory_space<vmem>>, vector<32x150xf32>
    %c64 = arith.constant 64 : index
    %c0_50 = arith.constant 0 : index
    %68 = vector.load %arg19[%c64, %c0_50] : memref<1248x150xf32, #tpu.memory_space<vmem>>, vector<32x150xf32>
    tpu.vector_store %arg19[%c64, %c0_50], %67 {strides = array<i32>} : memref<1248x150xf32, #tpu.memory_space<vmem>>, vector<32x150xf32>,
    %c0_51 = arith.constant 0 : index
    %c3 = arith.constant 3 : index
    %69 = vector.load %arg18[%c0_51, %c3] : memref<32x188xf32, #tpu.memory_space<vmem>>, vector<32x150xf32>
    %c96 = arith.constant 96 : index
    %c0_52 = arith.constant 0 : index
    %70 = vector.load %arg19[%c96, %c0_52] : memref<1248x150xf32, #tpu.memory_space<vmem>>, vector<32x150xf32>
    tpu.vector_store %arg19[%c96, %c0_52], %69 {strides = array<i32>} : memref<1248x150xf32, #tpu.memory_space<vmem>>, vector<32x150xf32>,
    %c0_53 = arith.constant 0 : index
    %c4 = arith.constant 4 : index
    %71 = vector.load %arg18[%c0_53, %c4] : memref<32x188xf32, #tpu.memory_space<vmem>>, vector<32x150xf32>
    %c128 = arith.constant 128 : index
    %c0_54 = arith.constant 0 : index
    %72 = vector.load %arg19[%c128, %c0_54] : memref<1248x150xf32, #tpu.memory_space<vmem>>, vector<32x150xf32>
    tpu.vector_store %arg19[%c128, %c0_54], %71 {strides = array<i32>} : memref<1248x150xf32, #tpu.memory_space<vmem>>, vector<32x150xf32>,
    %c0_55 = arith.constant 0 : index
    %c5 = arith.constant 5 : index
    %73 = vector.load %arg18[%c0_55, %c5] : memref<32x188xf32, #tpu.memory_space<vmem>>, vector<32x150xf32>
    %c160 = arith.constant 160 : index
    %c0_56 = arith.constant 0 : index
    %74 = vector.load %arg19[%c160, %c0_56] : memref<1248x150xf32, #tpu.memory_space<vmem>>, vector<32x150xf32>
    tpu.vector_store %arg19[%c160, %c0_56], %73 {strides = array<i32>} : memref<1248x150xf32, #tpu.memory_space<vmem>>, vector<32x150xf32>,
    %c0_57 = arith.constant 0 : index
    %c6 = arith.constant 6 : index
    %75 = vector.load %arg18[%c0_57, %c6] : memref<32x188xf32, #tpu.memory_space<vmem>>, vector<32x150xf32>
    %c192 = arith.constant 192 : index
    %c0_58 = arith.constant 0 : index
    %76 = vector.load %arg19[%c192, %c0_58] : memref<1248x150xf32, #tpu.memory_space<vmem>>, vector<32x150xf32>
    tpu.vector_store %arg19[%c192, %c0_58], %75 {strides = array<i32>} : memref<1248x150xf32, #tpu.memory_space<vmem>>, vector<32x150xf32>,
    %c0_59 = arith.constant 0 : index
    %c7 = arith.constant 7 : index
    %77 = vector.load %arg18[%c0_59, %c7] : memref<32x188xf32, #tpu.memory_space<vmem>>, vector<32x150xf32>
    %c224 = arith.constant 224 : index
    %c0_60 = arith.constant 0 : index
    %78 = vector.load %arg19[%c224, %c0_60] : memref<1248x150xf32, #tpu.memory_space<vmem>>, vector<32x150xf32>
    tpu.vector_store %arg19[%c224, %c0_60], %77 {strides = array<i32>} : memref<1248x150xf32, #tpu.memory_space<vmem>>, vector<32x150xf32>,
    %c0_61 = arith.constant 0 : index
    %c8 = arith.constant 8 : index
    %79 = vector.load %arg18[%c0_61, %c8] : memref<32x188xf32, #tpu.memory_space<vmem>>, vector<32x150xf32>
    %c256 = arith.constant 256 : index
    %c0_62 = arith.constant 0 : index
    %80 = vector.load %arg19[%c256, %c0_62] : memref<1248x150xf32, #tpu.memory_space<vmem>>, vector<32x150xf32>
    tpu.vector_store %arg19[%c256, %c0_62], %79 {strides = array<i32>} : memref<1248x150xf32, #tpu.memory_space<vmem>>, vector<32x150xf32>,
    %c0_63 = arith.constant 0 : index
    %c9 = arith.constant 9 : index
    %81 = vector.load %arg18[%c0_63, %c9] : memref<32x188xf32, #tpu.memory_space<vmem>>, vector<32x150xf32>
    %c288 = arith.constant 288 : index
    %c0_64 = arith.constant 0 : index
    %82 = vector.load %arg19[%c288, %c0_64] : memref<1248x150xf32, #tpu.memory_space<vmem>>, vector<32x150xf32>
    tpu.vector_store %arg19[%c288, %c0_64], %81 {strides = array<i32>} : memref<1248x150xf32, #tpu.memory_space<vmem>>, vector<32x150xf32>,
    %c0_65 = arith.constant 0 : index
    %c10 = arith.constant 10 : index
    %83 = vector.load %arg18[%c0_65, %c10] : memref<32x188xf32, #tpu.memory_space<vmem>>, vector<32x150xf32>
    %c320 = arith.constant 320 : index
    %c0_66 = arith.constant 0 : index
    %84 = vector.load %arg19[%c320, %c0_66] : memref<1248x150xf32, #tpu.memory_space<vmem>>, vector<32x150xf32>
    tpu.vector_store %arg19[%c320, %c0_66], %83 {strides = array<i32>} : memref<1248x150xf32, #tpu.memory_space<vmem>>, vector<32x150xf32>,
    %c0_67 = arith.constant 0 : index
    %c11 = arith.constant 11 : index
    %85 = vector.load %arg18[%c0_67, %c11] : memref<32x188xf32, #tpu.memory_space<vmem>>, vector<32x150xf32>
    %c352 = arith.constant 352 : index
    %c0_68 = arith.constant 0 : index
    %86 = vector.load %arg19[%c352, %c0_68] : memref<1248x150xf32, #tpu.memory_space<vmem>>, vector<32x150xf32>
    tpu.vector_store %arg19[%c352, %c0_68], %85 {strides = array<i32>} : memref<1248x150xf32, #tpu.memory_space<vmem>>, vector<32x150xf32>,
    %c0_69 = arith.constant 0 : index
    %c12 = arith.constant 12 : index
    %87 = vector.load %arg18[%c0_69, %c12] : memref<32x188xf32, #tpu.memory_space<vmem>>, vector<32x150xf32>
    %c384 = arith.constant 384 : index
    %c0_70 = arith.constant 0 : index
    %88 = vector.load %arg19[%c384, %c0_70] : memref<1248x150xf32, #tpu.memory_space<vmem>>, vector<32x150xf32>
    tpu.vector_store %arg19[%c384, %c0_70], %87 {strides = array<i32>} : memref<1248x150xf32, #tpu.memory_space<vmem>>, vector<32x150xf32>,
    %c0_71 = arith.constant 0 : index
    %c13 = arith.constant 13 : index
    %89 = vector.load %arg18[%c0_71, %c13] : memref<32x188xf32, #tpu.memory_space<vmem>>, vector<32x150xf32>
    %c416 = arith.constant 416 : index
    %c0_72 = arith.constant 0 : index
    %90 = vector.load %arg19[%c416, %c0_72] : memref<1248x150xf32, #tpu.memory_space<vmem>>, vector<32x150xf32>
    tpu.vector_store %arg19[%c416, %c0_72], %89 {strides = array<i32>} : memref<1248x150xf32, #tpu.memory_space<vmem>>, vector<32x150xf32>,
    %c0_73 = arith.constant 0 : index
    %c14 = arith.constant 14 : index
    %91 = vector.load %arg18[%c0_73, %c14] : memref<32x188xf32, #tpu.memory_space<vmem>>, vector<32x150xf32>
    %c448 = arith.constant 448 : index
    %c0_74 = arith.constant 0 : index
    %92 = vector.load %arg19[%c448, %c0_74] : memref<1248x150xf32, #tpu.memory_space<vmem>>, vector<32x150xf32>
    tpu.vector_store %arg19[%c448, %c0_74], %91 {strides = array<i32>} : memref<1248x150xf32, #tpu.memory_space<vmem>>, vector<32x150xf32>,
    %c0_75 = arith.constant 0 : index
    %c15 = arith.constant 15 : index
    %93 = vector.load %arg18[%c0_75, %c15] : memref<32x188xf32, #tpu.memory_space<vmem>>, vector<32x150xf32>
    %c480 = arith.constant 480 : index
    %c0_76 = arith.constant 0 : index
    %94 = vector.load %arg19[%c480, %c0_76] : memref<1248x150xf32, #tpu.memory_space<vmem>>, vector<32x150xf32>
    tpu.vector_store %arg19[%c480, %c0_76], %93 {strides = array<i32>} : memref<1248x150xf32, #tpu.memory_space<vmem>>, vector<32x150xf32>,
    %c0_77 = arith.constant 0 : index
    %c16 = arith.constant 16 : index
    %95 = vector.load %arg18[%c0_77, %c16] : memref<32x188xf32, #tpu.memory_space<vmem>>, vector<32x150xf32>
    %c512 = arith.constant 512 : index
    %c0_78 = arith.constant 0 : index
    %96 = vector.load %arg19[%c512, %c0_78] : memref<1248x150xf32, #tpu.memory_space<vmem>>, vector<32x150xf32>
    tpu.vector_store %arg19[%c512, %c0_78], %95 {strides = array<i32>} : memref<1248x150xf32, #tpu.memory_space<vmem>>, vector<32x150xf32>,
    %c0_79 = arith.constant 0 : index
    %c17 = arith.constant 17 : index
    %97 = vector.load %arg18[%c0_79, %c17] : memref<32x188xf32, #tpu.memory_space<vmem>>, vector<32x150xf32>
    %c544 = arith.constant 544 : index
    %c0_80 = arith.constant 0 : index
    %98 = vector.load %arg19[%c544, %c0_80] : memref<1248x150xf32, #tpu.memory_space<vmem>>, vector<32x150xf32>
    tpu.vector_store %arg19[%c544, %c0_80], %97 {strides = array<i32>} : memref<1248x150xf32, #tpu.memory_space<vmem>>, vector<32x150xf32>,
    %c0_81 = arith.constant 0 : index
    %c18 = arith.constant 18 : index
    %99 = vector.load %arg18[%c0_81, %c18] : memref<32x188xf32, #tpu.memory_space<vmem>>, vector<32x150xf32>
    %c576 = arith.constant 576 : index
    %c0_82 = arith.constant 0 : index
    %100 = vector.load %arg19[%c576, %c0_82] : memref<1248x150xf32, #tpu.memory_space<vmem>>, vector<32x150xf32>
    tpu.vector_store %arg19[%c576, %c0_82], %99 {strides = array<i32>} : memref<1248x150xf32, #tpu.memory_space<vmem>>, vector<32x150xf32>,
    %c0_83 = arith.constant 0 : index
    %c19_84 = arith.constant 19 : index
    %101 = vector.load %arg18[%c0_83, %c19_84] : memref<32x188xf32, #tpu.memory_space<vmem>>, vector<32x150xf32>
    %c608 = arith.constant 608 : index
    %c0_85 = arith.constant 0 : index
    %102 = vector.load %arg19[%c608, %c0_85] : memref<1248x150xf32, #tpu.memory_space<vmem>>, vector<32x150xf32>
    tpu.vector_store %arg19[%c608, %c0_85], %101 {strides = array<i32>} : memref<1248x150xf32, #tpu.memory_space<vmem>>, vector<32x150xf32>,
    %c0_86 = arith.constant 0 : index
    %c20 = arith.constant 20 : index
    %103 = vector.load %arg18[%c0_86, %c20] : memref<32x188xf32, #tpu.memory_space<vmem>>, vector<32x150xf32>
    %c640 = arith.constant 640 : index
    %c0_87 = arith.constant 0 : index
    %104 = vector.load %arg19[%c640, %c0_87] : memref<1248x150xf32, #tpu.memory_space<vmem>>, vector<32x150xf32>
    tpu.vector_store %arg19[%c640, %c0_87], %103 {strides = array<i32>} : memref<1248x150xf32, #tpu.memory_space<vmem>>, vector<32x150xf32>,
    %c0_88 = arith.constant 0 : index
    %c21 = arith.constant 21 : index
    %105 = vector.load %arg18[%c0_88, %c21] : memref<32x188xf32, #tpu.memory_space<vmem>>, vector<32x150xf32>
    %c672 = arith.constant 672 : index
    %c0_89 = arith.constant 0 : index
    %106 = vector.load %arg19[%c672, %c0_89] : memref<1248x150xf32, #tpu.memory_space<vmem>>, vector<32x150xf32>
    tpu.vector_store %arg19[%c672, %c0_89], %105 {strides = array<i32>} : memref<1248x150xf32, #tpu.memory_space<vmem>>, vector<32x150xf32>,
    %c0_90 = arith.constant 0 : index
    %c22 = arith.constant 22 : index
    %107 = vector.load %arg18[%c0_90, %c22] : memref<32x188xf32, #tpu.memory_space<vmem>>, vector<32x150xf32>
    %c704 = arith.constant 704 : index
    %c0_91 = arith.constant 0 : index
    %108 = vector.load %arg19[%c704, %c0_91] : memref<1248x150xf32, #tpu.memory_space<vmem>>, vector<32x150xf32>
    tpu.vector_store %arg19[%c704, %c0_91], %107 {strides = array<i32>} : memref<1248x150xf32, #tpu.memory_space<vmem>>, vector<32x150xf32>,
    %c0_92 = arith.constant 0 : index
    %c23 = arith.constant 23 : index
    %109 = vector.load %arg18[%c0_92, %c23] : memref<32x188xf32, #tpu.memory_space<vmem>>, vector<32x150xf32>
    %c736 = arith.constant 736 : index
    %c0_93 = arith.constant 0 : index
    %110 = vector.load %arg19[%c736, %c0_93] : memref<1248x150xf32, #tpu.memory_space<vmem>>, vector<32x150xf32>
    tpu.vector_store %arg19[%c736, %c0_93], %109 {strides = array<i32>} : memref<1248x150xf32, #tpu.memory_space<vmem>>, vector<32x150xf32>,
    %c0_94 = arith.constant 0 : index
    %c24 = arith.constant 24 : index
    %111 = vector.load %arg18[%c0_94, %c24] : memref<32x188xf32, #tpu.memory_space<vmem>>, vector<32x150xf32>
    %c768 = arith.constant 768 : index
    %c0_95 = arith.constant 0 : index
    %112 = vector.load %arg19[%c768, %c0_95] : memref<1248x150xf32, #tpu.memory_space<vmem>>, vector<32x150xf32>
    tpu.vector_store %arg19[%c768, %c0_95], %111 {strides = array<i32>} : memref<1248x150xf32, #tpu.memory_space<vmem>>, vector<32x150xf32>,
    %c0_96 = arith.constant 0 : index
    %c25 = arith.constant 25 : index
    %113 = vector.load %arg18[%c0_96, %c25] : memref<32x188xf32, #tpu.memory_space<vmem>>, vector<32x150xf32>
    %c800 = arith.constant 800 : index
    %c0_97 = arith.constant 0 : index
    %114 = vector.load %arg19[%c800, %c0_97] : memref<1248x150xf32, #tpu.memory_space<vmem>>, vector<32x150xf32>
    tpu.vector_store %arg19[%c800, %c0_97], %113 {strides = array<i32>} : memref<1248x150xf32, #tpu.memory_space<vmem>>, vector<32x150xf32>,
    %c0_98 = arith.constant 0 : index
    %c26 = arith.constant 26 : index
    %115 = vector.load %arg18[%c0_98, %c26] : memref<32x188xf32, #tpu.memory_space<vmem>>, vector<32x150xf32>
    %c832 = arith.constant 832 : index
    %c0_99 = arith.constant 0 : index
    %116 = vector.load %arg19[%c832, %c0_99] : memref<1248x150xf32, #tpu.memory_space<vmem>>, vector<32x150xf32>
    tpu.vector_store %arg19[%c832, %c0_99], %115 {strides = array<i32>} : memref<1248x150xf32, #tpu.memory_space<vmem>>, vector<32x150xf32>,
    %c0_100 = arith.constant 0 : index
    %c27 = arith.constant 27 : index
    %117 = vector.load %arg18[%c0_100, %c27] : memref<32x188xf32, #tpu.memory_space<vmem>>, vector<32x150xf32>
    %c864 = arith.constant 864 : index
    %c0_101 = arith.constant 0 : index
    %118 = vector.load %arg19[%c864, %c0_101] : memref<1248x150xf32, #tpu.memory_space<vmem>>, vector<32x150xf32>
    tpu.vector_store %arg19[%c864, %c0_101], %117 {strides = array<i32>} : memref<1248x150xf32, #tpu.memory_space<vmem>>, vector<32x150xf32>,
    %c0_102 = arith.constant 0 : index
    %c28 = arith.constant 28 : index
    %119 = vector.load %arg18[%c0_102, %c28] : memref<32x188xf32, #tpu.memory_space<vmem>>, vector<32x150xf32>
    %c896 = arith.constant 896 : index
    %c0_103 = arith.constant 0 : index
    %120 = vector.load %arg19[%c896, %c0_103] : memref<1248x150xf32, #tpu.memory_space<vmem>>, vector<32x150xf32>
    tpu.vector_store %arg19[%c896, %c0_103], %119 {strides = array<i32>} : memref<1248x150xf32, #tpu.memory_space<vmem>>, vector<32x150xf32>,
    %c0_104 = arith.constant 0 : index
    %c29 = arith.constant 29 : index
    %121 = vector.load %arg18[%c0_104, %c29] : memref<32x188xf32, #tpu.memory_space<vmem>>, vector<32x150xf32>
    %c928 = arith.constant 928 : index
    %c0_105 = arith.constant 0 : index
    %122 = vector.load %arg19[%c928, %c0_105] : memref<1248x150xf32, #tpu.memory_space<vmem>>, vector<32x150xf32>
    tpu.vector_store %arg19[%c928, %c0_105], %121 {strides = array<i32>} : memref<1248x150xf32, #tpu.memory_space<vmem>>, vector<32x150xf32>,
    %c0_106 = arith.constant 0 : index
    %c30 = arith.constant 30 : index
    %123 = vector.load %arg18[%c0_106, %c30] : memref<32x188xf32, #tpu.memory_space<vmem>>, vector<32x150xf32>
    %c960 = arith.constant 960 : index
    %c0_107 = arith.constant 0 : index
    %124 = vector.load %arg19[%c960, %c0_107] : memref<1248x150xf32, #tpu.memory_space<vmem>>, vector<32x150xf32>
    tpu.vector_store %arg19[%c960, %c0_107], %123 {strides = array<i32>} : memref<1248x150xf32, #tpu.memory_space<vmem>>, vector<32x150xf32>,
    %c0_108 = arith.constant 0 : index
    %c31 = arith.constant 31 : index
    %125 = vector.load %arg18[%c0_108, %c31] : memref<32x188xf32, #tpu.memory_space<vmem>>, vector<32x150xf32>
    %c992 = arith.constant 992 : index
    %c0_109 = arith.constant 0 : index
    %126 = vector.load %arg19[%c992, %c0_109] : memref<1248x150xf32, #tpu.memory_space<vmem>>, vector<32x150xf32>
    tpu.vector_store %arg19[%c992, %c0_109], %125 {strides = array<i32>} : memref<1248x150xf32, #tpu.memory_space<vmem>>, vector<32x150xf32>,
    %c0_110 = arith.constant 0 : index
    %c32_111 = arith.constant 32 : index
    %127 = vector.load %arg18[%c0_110, %c32_111] : memref<32x188xf32, #tpu.memory_space<vmem>>, vector<32x150xf32>
    %c1024 = arith.constant 1024 : index
    %c0_112 = arith.constant 0 : index
    %128 = vector.load %arg19[%c1024, %c0_112] : memref<1248x150xf32, #tpu.memory_space<vmem>>, vector<32x150xf32>
    tpu.vector_store %arg19[%c1024, %c0_112], %127 {strides = array<i32>} : memref<1248x150xf32, #tpu.memory_space<vmem>>, vector<32x150xf32>,
    %c0_113 = arith.constant 0 : index
    %c33 = arith.constant 33 : index
    %129 = vector.load %arg18[%c0_113, %c33] : memref<32x188xf32, #tpu.memory_space<vmem>>, vector<32x150xf32>
    %c1056 = arith.constant 1056 : index
    %c0_114 = arith.constant 0 : index
    %130 = vector.load %arg19[%c1056, %c0_114] : memref<1248x150xf32, #tpu.memory_space<vmem>>, vector<32x150xf32>
    tpu.vector_store %arg19[%c1056, %c0_114], %129 {strides = array<i32>} : memref<1248x150xf32, #tpu.memory_space<vmem>>, vector<32x150xf32>,
    %c0_115 = arith.constant 0 : index
    %c34 = arith.constant 34 : index
    %131 = vector.load %arg18[%c0_115, %c34] : memref<32x188xf32, #tpu.memory_space<vmem>>, vector<32x150xf32>
    %c1088 = arith.constant 1088 : index
    %c0_116 = arith.constant 0 : index
    %132 = vector.load %arg19[%c1088, %c0_116] : memref<1248x150xf32, #tpu.memory_space<vmem>>, vector<32x150xf32>
    tpu.vector_store %arg19[%c1088, %c0_116], %131 {strides = array<i32>} : memref<1248x150xf32, #tpu.memory_space<vmem>>, vector<32x150xf32>,
    %c0_117 = arith.constant 0 : index
    %c35 = arith.constant 35 : index
    %133 = vector.load %arg18[%c0_117, %c35] : memref<32x188xf32, #tpu.memory_space<vmem>>, vector<32x150xf32>
    %c1120 = arith.constant 1120 : index
    %c0_118 = arith.constant 0 : index
    %134 = vector.load %arg19[%c1120, %c0_118] : memref<1248x150xf32, #tpu.memory_space<vmem>>, vector<32x150xf32>
    tpu.vector_store %arg19[%c1120, %c0_118], %133 {strides = array<i32>} : memref<1248x150xf32, #tpu.memory_space<vmem>>, vector<32x150xf32>,
    %c0_119 = arith.constant 0 : index
    %c36 = arith.constant 36 : index
    %135 = vector.load %arg18[%c0_119, %c36] : memref<32x188xf32, #tpu.memory_space<vmem>>, vector<32x150xf32>
    %c1152 = arith.constant 1152 : index
    %c0_120 = arith.constant 0 : index
    %136 = vector.load %arg19[%c1152, %c0_120] : memref<1248x150xf32, #tpu.memory_space<vmem>>, vector<32x150xf32>
    tpu.vector_store %arg19[%c1152, %c0_120], %135 {strides = array<i32>} : memref<1248x150xf32, #tpu.memory_space<vmem>>, vector<32x150xf32>,
    %c0_121 = arith.constant 0 : index
    %c37 = arith.constant 37 : index
    %137 = vector.load %arg18[%c0_121, %c37] : memref<32x188xf32, #tpu.memory_space<vmem>>, vector<32x150xf32>
    %c1184 = arith.constant 1184 : index
    %c0_122 = arith.constant 0 : index
    %138 = vector.load %arg19[%c1184, %c0_122] : memref<1248x150xf32, #tpu.memory_space<vmem>>, vector<32x150xf32>
    tpu.vector_store %arg19[%c1184, %c0_122], %137 {strides = array<i32>} : memref<1248x150xf32, #tpu.memory_space<vmem>>, vector<32x150xf32>,
    %c0_123 = arith.constant 0 : index
    %c38 = arith.constant 38 : index
    %139 = vector.load %arg18[%c0_123, %c38] : memref<32x188xf32, #tpu.memory_space<vmem>>, vector<32x150xf32>
    %c1216 = arith.constant 1216 : index
    %c0_124 = arith.constant 0 : index
    %140 = vector.load %arg19[%c1216, %c0_124] : memref<1248x150xf32, #tpu.memory_space<vmem>>, vector<32x150xf32>
    tpu.vector_store %arg19[%c1216, %c0_124], %139 {strides = array<i32>} : memref<1248x150xf32, #tpu.memory_space<vmem>>, vector<32x150xf32>,
    %c0_125 = arith.constant 0 : index
    %c0_126 = arith.constant 0 : index
    %141 = vector.load %arg19[%c0_125, %c0_126] : memref<1248x150xf32, #tpu.memory_space<vmem>>, vector<1248x150xf32>
    %cst_127 = arith.constant dense<0.000000e+00> : vector<32x150xf32>
    %142 = tpu.matmul %13, %141, %cst_127 {dimension_numbers = #tpu.dot_dimension_numbers<[1], [0], [0], [1], [0, 0, 1, 1], [], []>} : vector<32x1248xf32>, vector<1248x150xf32>, vector<32x150xf32> -> vector<32x150xf32>
    %143 = vector.broadcast %11 : vector<32x1xf32> to vector<32x150xf32>
    %144 = arith.mulf %142, %143 : vector<32x150xf32>
    %145 = vector.broadcast %12 : vector<32x1xf32> to vector<32x150xf32>
    %146 = arith.addf %144, %145 : vector<32x150xf32>
    %cst_128 = arith.constant 0.000000e+00 : f32
    %147 = vector.broadcast %cst_128 : f32 to vector<32x150xf32>
    %148 = arith.cmpf ogt, %146, %147 : vector<32x150xf32>
    %cst_129 = arith.constant 0.000000e+00 : f32
    %149 = vector.broadcast %cst_129 : f32 to vector<32x150xf32>
    %150 = arith.minimumf %146, %149 : vector<32x150xf32>
    %151 = math.exp %150 : vector<32x150xf32>
    %cst_130 = arith.constant 1.000000e+00 : f32
    %152 = vector.broadcast %cst_130 : f32 to vector<32x150xf32>
    %153 = arith.subf %151, %152 : vector<32x150xf32>
    %154 = arith.select %148, %146, %153 : vector<32x150xi1>, vector<32x150xf32>
    %155 = vector.extract_strided_slice %154 {offsets = [0, 0], sizes = [32, 147], strides = [1, 1]} : vector<32x150xf32> to vector<32x147xf32>
    %156 = vector.extract_strided_slice %154 {offsets = [0, 1], sizes = [32, 147], strides = [1, 1]} : vector<32x150xf32> to vector<32x147xf32>
    %157 = arith.maximumf %155, %156 : vector<32x147xf32>
    %158 = vector.extract_strided_slice %154 {offsets = [0, 2], sizes = [32, 147], strides = [1, 1]} : vector<32x150xf32> to vector<32x147xf32>
    %159 = arith.maximumf %157, %158 : vector<32x147xf32>
    %160 = vector.extract_strided_slice %154 {offsets = [0, 3], sizes = [32, 147], strides = [1, 1]} : vector<32x150xf32> to vector<32x147xf32>
    %161 = arith.maximumf %159, %160 : vector<32x147xf32>
    %162 = arith.mulf %161, %14 : vector<32x147xf32>
    %cst_131 = arith.constant dense<0.000000e+00> : vector<32xf32>
    %163 = vector.multi_reduction <add>, %162, %cst_131 [1] : vector<32x147xf32> to vector<32xf32>
    %164 = vector.shape_cast %163 : vector<32xf32> to vector<32x1xf32>
    %165 = arith.mulf %161, %15 : vector<32x147xf32>
    %cst_132 = arith.constant dense<0.000000e+00> : vector<32xf32>
    %166 = vector.multi_reduction <add>, %165, %cst_132 [1] : vector<32x147xf32> to vector<32xf32>
    %167 = vector.shape_cast %166 : vector<32xf32> to vector<32x1xf32>
    %168 = tpu.concatenate %164, %167 in 1 : vector<32x1xf32>, vector<32x1xf32> -> vector<32x2xf32>
    %cst_133 = arith.constant dense<0.000000e+00> : vector<2xf32>
    %169 = vector.multi_reduction <add>, %168, %cst_133 [0] : vector<32x2xf32> to vector<2xf32>
    %170 = vector.shape_cast %169 : vector<2xf32> to vector<1x2xf32>
    %c1_134 = arith.constant 1 : index
    %c0_135 = arith.constant 0 : index
    %c0_136 = arith.constant 0 : index
    %c0_137 = arith.constant 0 : index
    %171 = vector.load %arg1[%c1_134, %c0_135, %c0_136, %c0_137] : memref<2x2x39x750xf32, #tpu.memory_space<vmem>>, vector<1x1x39x750xf32>
    %172 = vector.shape_cast %171 : vector<1x1x39x750xf32> to vector<39x750xf32>
    %cst_138 = arith.constant dense<0.000000e+00> : vector<16x750xf32>
    %173 = tpu.matmul %2, %172, %cst_138 {dimension_numbers = #tpu.dot_dimension_numbers<[1], [0], [0], [1], [0, 0, 1, 1], [], []>} : vector<16x39xf32>, vector<39x750xf32>, vector<16x750xf32> -> vector<16x750xf32>
    %c1_139 = arith.constant 1 : index
    %c1_140 = arith.constant 1 : index
    %c0_141 = arith.constant 0 : index
    %c0_142 = arith.constant 0 : index
    %174 = vector.load %arg1[%c1_139, %c1_140, %c0_141, %c0_142] : memref<2x2x39x750xf32, #tpu.memory_space<vmem>>, vector<1x1x39x750xf32>
    %175 = vector.shape_cast %174 : vector<1x1x39x750xf32> to vector<39x750xf32>
    %cst_143 = arith.constant dense<0.000000e+00> : vector<16x750xf32>
    %176 = tpu.matmul %2, %175, %cst_143 {dimension_numbers = #tpu.dot_dimension_numbers<[1], [0], [0], [1], [0, 0, 1, 1], [], []>} : vector<16x39xf32>, vector<39x750xf32>, vector<16x750xf32> -> vector<16x750xf32>
    %177 = vector.broadcast %3 : vector<16x1xf32> to vector<16x750xf32>
    %178 = arith.mulf %173, %177 : vector<16x750xf32>
    %179 = vector.broadcast %4 : vector<16x1xf32> to vector<16x750xf32>
    %180 = arith.addf %178, %179 : vector<16x750xf32>
    %181 = vector.broadcast %3 : vector<16x1xf32> to vector<16x750xf32>
    %182 = arith.mulf %176, %181 : vector<16x750xf32>
    %183 = vector.broadcast %4 : vector<16x1xf32> to vector<16x750xf32>
    %184 = arith.addf %182, %183 : vector<16x750xf32>
    %185 = vector.broadcast %5 : vector<16x1xf32> to vector<16x750xf32>
    %186 = arith.mulf %185, %180 : vector<16x750xf32>
    %187 = vector.broadcast %6 : vector<16x1xf32> to vector<16x750xf32>
    %188 = arith.mulf %187, %184 : vector<16x750xf32>
    %189 = arith.addf %186, %188 : vector<16x750xf32>
    %190 = vector.broadcast %7 : vector<16x1xf32> to vector<16x750xf32>
    %191 = arith.mulf %190, %180 : vector<16x750xf32>
    %192 = vector.broadcast %8 : vector<16x1xf32> to vector<16x750xf32>
    %193 = arith.mulf %192, %184 : vector<16x750xf32>
    %194 = arith.addf %191, %193 : vector<16x750xf32>
    %195 = tpu.concatenate %189, %194 in 0 : vector<16x750xf32>, vector<16x750xf32> -> vector<32x750xf32>
    %196 = vector.broadcast %9 : vector<32x1xf32> to vector<32x750xf32>
    %197 = arith.mulf %195, %196 : vector<32x750xf32>
    %198 = vector.broadcast %10 : vector<32x1xf32> to vector<32x750xf32>
    %199 = arith.addf %197, %198 : vector<32x750xf32>
    %cst_144 = arith.constant 0.000000e+00 : f32
    %200 = vector.broadcast %cst_144 : f32 to vector<32x750xf32>
    %201 = arith.cmpf ogt, %199, %200 : vector<32x750xf32>
    %cst_145 = arith.constant 0.000000e+00 : f32
    %202 = vector.broadcast %cst_145 : f32 to vector<32x750xf32>
    %203 = arith.minimumf %199, %202 : vector<32x750xf32>
    %204 = math.exp %203 : vector<32x750xf32>
    %cst_146 = arith.constant 1.000000e+00 : f32
    %205 = vector.broadcast %cst_146 : f32 to vector<32x750xf32>
    %206 = arith.subf %204, %205 : vector<32x750xf32>
    %207 = arith.select %201, %199, %206 : vector<32x750xi1>, vector<32x750xf32>
    %208 = vector.extract_strided_slice %207 {offsets = [0, 0], sizes = [32, 150], strides = [1, 1]} : vector<32x750xf32> to vector<32x150xf32>
    %209 = vector.extract_strided_slice %207 {offsets = [0, 150], sizes = [32, 150], strides = [1, 1]} : vector<32x750xf32> to vector<32x150xf32>
    %210 = arith.maximumf %208, %209 : vector<32x150xf32>
    %211 = vector.extract_strided_slice %207 {offsets = [0, 300], sizes = [32, 150], strides = [1, 1]} : vector<32x750xf32> to vector<32x150xf32>
    %212 = arith.maximumf %210, %211 : vector<32x150xf32>
    %213 = vector.extract_strided_slice %207 {offsets = [0, 450], sizes = [32, 150], strides = [1, 1]} : vector<32x750xf32> to vector<32x150xf32>
    %214 = arith.maximumf %212, %213 : vector<32x150xf32>
    %215 = vector.extract_strided_slice %207 {offsets = [0, 600], sizes = [32, 150], strides = [1, 1]} : vector<32x750xf32> to vector<32x150xf32>
    %216 = arith.maximumf %214, %215 : vector<32x150xf32>
    %c0_147 = arith.constant 0 : index
    %c19_148 = arith.constant 19 : index
    %217 = vector.load %arg18[%c0_147, %c19_148] : memref<32x188xf32, #tpu.memory_space<vmem>>, vector<32x150xf32>
    tpu.vector_store %arg18[%c0_147, %c19_148], %216 {strides = array<i32>} : memref<32x188xf32, #tpu.memory_space<vmem>>, vector<32x150xf32>,
    %c0_149 = arith.constant 0 : index
    %c0_150 = arith.constant 0 : index
    %218 = vector.load %arg18[%c0_149, %c0_150] : memref<32x188xf32, #tpu.memory_space<vmem>>, vector<32x150xf32>
    %c0_151 = arith.constant 0 : index
    %c0_152 = arith.constant 0 : index
    %219 = vector.load %arg19[%c0_151, %c0_152] : memref<1248x150xf32, #tpu.memory_space<vmem>>, vector<32x150xf32>
    tpu.vector_store %arg19[%c0_151, %c0_152], %218 {strides = array<i32>} : memref<1248x150xf32, #tpu.memory_space<vmem>>, vector<32x150xf32>,
    %c0_153 = arith.constant 0 : index
    %c1_154 = arith.constant 1 : index
    %220 = vector.load %arg18[%c0_153, %c1_154] : memref<32x188xf32, #tpu.memory_space<vmem>>, vector<32x150xf32>
    %c32_155 = arith.constant 32 : index
    %c0_156 = arith.constant 0 : index
    %221 = vector.load %arg19[%c32_155, %c0_156] : memref<1248x150xf32, #tpu.memory_space<vmem>>, vector<32x150xf32>
    tpu.vector_store %arg19[%c32_155, %c0_156], %220 {strides = array<i32>} : memref<1248x150xf32, #tpu.memory_space<vmem>>, vector<32x150xf32>,
    %c0_157 = arith.constant 0 : index
    %c2_158 = arith.constant 2 : index
    %222 = vector.load %arg18[%c0_157, %c2_158] : memref<32x188xf32, #tpu.memory_space<vmem>>, vector<32x150xf32>
    %c64_159 = arith.constant 64 : index
    %c0_160 = arith.constant 0 : index
    %223 = vector.load %arg19[%c64_159, %c0_160] : memref<1248x150xf32, #tpu.memory_space<vmem>>, vector<32x150xf32>
    tpu.vector_store %arg19[%c64_159, %c0_160], %222 {strides = array<i32>} : memref<1248x150xf32, #tpu.memory_space<vmem>>, vector<32x150xf32>,
    %c0_161 = arith.constant 0 : index
    %c3_162 = arith.constant 3 : index
    %224 = vector.load %arg18[%c0_161, %c3_162] : memref<32x188xf32, #tpu.memory_space<vmem>>, vector<32x150xf32>
    %c96_163 = arith.constant 96 : index
    %c0_164 = arith.constant 0 : index
    %225 = vector.load %arg19[%c96_163, %c0_164] : memref<1248x150xf32, #tpu.memory_space<vmem>>, vector<32x150xf32>
    tpu.vector_store %arg19[%c96_163, %c0_164], %224 {strides = array<i32>} : memref<1248x150xf32, #tpu.memory_space<vmem>>, vector<32x150xf32>,
    %c0_165 = arith.constant 0 : index
    %c4_166 = arith.constant 4 : index
    %226 = vector.load %arg18[%c0_165, %c4_166] : memref<32x188xf32, #tpu.memory_space<vmem>>, vector<32x150xf32>
    %c128_167 = arith.constant 128 : index
    %c0_168 = arith.constant 0 : index
    %227 = vector.load %arg19[%c128_167, %c0_168] : memref<1248x150xf32, #tpu.memory_space<vmem>>, vector<32x150xf32>
    tpu.vector_store %arg19[%c128_167, %c0_168], %226 {strides = array<i32>} : memref<1248x150xf32, #tpu.memory_space<vmem>>, vector<32x150xf32>,
    %c0_169 = arith.constant 0 : index
    %c5_170 = arith.constant 5 : index
    %228 = vector.load %arg18[%c0_169, %c5_170] : memref<32x188xf32, #tpu.memory_space<vmem>>, vector<32x150xf32>
    %c160_171 = arith.constant 160 : index
    %c0_172 = arith.constant 0 : index
    %229 = vector.load %arg19[%c160_171, %c0_172] : memref<1248x150xf32, #tpu.memory_space<vmem>>, vector<32x150xf32>
    tpu.vector_store %arg19[%c160_171, %c0_172], %228 {strides = array<i32>} : memref<1248x150xf32, #tpu.memory_space<vmem>>, vector<32x150xf32>,
    %c0_173 = arith.constant 0 : index
    %c6_174 = arith.constant 6 : index
    %230 = vector.load %arg18[%c0_173, %c6_174] : memref<32x188xf32, #tpu.memory_space<vmem>>, vector<32x150xf32>
    %c192_175 = arith.constant 192 : index
    %c0_176 = arith.constant 0 : index
    %231 = vector.load %arg19[%c192_175, %c0_176] : memref<1248x150xf32, #tpu.memory_space<vmem>>, vector<32x150xf32>
    tpu.vector_store %arg19[%c192_175, %c0_176], %230 {strides = array<i32>} : memref<1248x150xf32, #tpu.memory_space<vmem>>, vector<32x150xf32>,
    %c0_177 = arith.constant 0 : index
    %c7_178 = arith.constant 7 : index
    %232 = vector.load %arg18[%c0_177, %c7_178] : memref<32x188xf32, #tpu.memory_space<vmem>>, vector<32x150xf32>
    %c224_179 = arith.constant 224 : index
    %c0_180 = arith.constant 0 : index
    %233 = vector.load %arg19[%c224_179, %c0_180] : memref<1248x150xf32, #tpu.memory_space<vmem>>, vector<32x150xf32>
    tpu.vector_store %arg19[%c224_179, %c0_180], %232 {strides = array<i32>} : memref<1248x150xf32, #tpu.memory_space<vmem>>, vector<32x150xf32>,
    %c0_181 = arith.constant 0 : index
    %c8_182 = arith.constant 8 : index
    %234 = vector.load %arg18[%c0_181, %c8_182] : memref<32x188xf32, #tpu.memory_space<vmem>>, vector<32x150xf32>
    %c256_183 = arith.constant 256 : index
    %c0_184 = arith.constant 0 : index
    %235 = vector.load %arg19[%c256_183, %c0_184] : memref<1248x150xf32, #tpu.memory_space<vmem>>, vector<32x150xf32>
    tpu.vector_store %arg19[%c256_183, %c0_184], %234 {strides = array<i32>} : memref<1248x150xf32, #tpu.memory_space<vmem>>, vector<32x150xf32>,
    %c0_185 = arith.constant 0 : index
    %c9_186 = arith.constant 9 : index
    %236 = vector.load %arg18[%c0_185, %c9_186] : memref<32x188xf32, #tpu.memory_space<vmem>>, vector<32x150xf32>
    %c288_187 = arith.constant 288 : index
    %c0_188 = arith.constant 0 : index
    %237 = vector.load %arg19[%c288_187, %c0_188] : memref<1248x150xf32, #tpu.memory_space<vmem>>, vector<32x150xf32>
    tpu.vector_store %arg19[%c288_187, %c0_188], %236 {strides = array<i32>} : memref<1248x150xf32, #tpu.memory_space<vmem>>, vector<32x150xf32>,
    %c0_189 = arith.constant 0 : index
    %c10_190 = arith.constant 10 : index
    %238 = vector.load %arg18[%c0_189, %c10_190] : memref<32x188xf32, #tpu.memory_space<vmem>>, vector<32x150xf32>
    %c320_191 = arith.constant 320 : index
    %c0_192 = arith.constant 0 : index
    %239 = vector.load %arg19[%c320_191, %c0_192] : memref<1248x150xf32, #tpu.memory_space<vmem>>, vector<32x150xf32>
    tpu.vector_store %arg19[%c320_191, %c0_192], %238 {strides = array<i32>} : memref<1248x150xf32, #tpu.memory_space<vmem>>, vector<32x150xf32>,
    %c0_193 = arith.constant 0 : index
    %c11_194 = arith.constant 11 : index
    %240 = vector.load %arg18[%c0_193, %c11_194] : memref<32x188xf32, #tpu.memory_space<vmem>>, vector<32x150xf32>
    %c352_195 = arith.constant 352 : index
    %c0_196 = arith.constant 0 : index
    %241 = vector.load %arg19[%c352_195, %c0_196] : memref<1248x150xf32, #tpu.memory_space<vmem>>, vector<32x150xf32>
    tpu.vector_store %arg19[%c352_195, %c0_196], %240 {strides = array<i32>} : memref<1248x150xf32, #tpu.memory_space<vmem>>, vector<32x150xf32>,
    %c0_197 = arith.constant 0 : index
    %c12_198 = arith.constant 12 : index
    %242 = vector.load %arg18[%c0_197, %c12_198] : memref<32x188xf32, #tpu.memory_space<vmem>>, vector<32x150xf32>
    %c384_199 = arith.constant 384 : index
    %c0_200 = arith.constant 0 : index
    %243 = vector.load %arg19[%c384_199, %c0_200] : memref<1248x150xf32, #tpu.memory_space<vmem>>, vector<32x150xf32>
    tpu.vector_store %arg19[%c384_199, %c0_200], %242 {strides = array<i32>} : memref<1248x150xf32, #tpu.memory_space<vmem>>, vector<32x150xf32>,
    %c0_201 = arith.constant 0 : index
    %c13_202 = arith.constant 13 : index
    %244 = vector.load %arg18[%c0_201, %c13_202] : memref<32x188xf32, #tpu.memory_space<vmem>>, vector<32x150xf32>
    %c416_203 = arith.constant 416 : index
    %c0_204 = arith.constant 0 : index
    %245 = vector.load %arg19[%c416_203, %c0_204] : memref<1248x150xf32, #tpu.memory_space<vmem>>, vector<32x150xf32>
    tpu.vector_store %arg19[%c416_203, %c0_204], %244 {strides = array<i32>} : memref<1248x150xf32, #tpu.memory_space<vmem>>, vector<32x150xf32>,
    %c0_205 = arith.constant 0 : index
    %c14_206 = arith.constant 14 : index
    %246 = vector.load %arg18[%c0_205, %c14_206] : memref<32x188xf32, #tpu.memory_space<vmem>>, vector<32x150xf32>
    %c448_207 = arith.constant 448 : index
    %c0_208 = arith.constant 0 : index
    %247 = vector.load %arg19[%c448_207, %c0_208] : memref<1248x150xf32, #tpu.memory_space<vmem>>, vector<32x150xf32>
    tpu.vector_store %arg19[%c448_207, %c0_208], %246 {strides = array<i32>} : memref<1248x150xf32, #tpu.memory_space<vmem>>, vector<32x150xf32>,
    %c0_209 = arith.constant 0 : index
    %c15_210 = arith.constant 15 : index
    %248 = vector.load %arg18[%c0_209, %c15_210] : memref<32x188xf32, #tpu.memory_space<vmem>>, vector<32x150xf32>
    %c480_211 = arith.constant 480 : index
    %c0_212 = arith.constant 0 : index
    %249 = vector.load %arg19[%c480_211, %c0_212] : memref<1248x150xf32, #tpu.memory_space<vmem>>, vector<32x150xf32>
    tpu.vector_store %arg19[%c480_211, %c0_212], %248 {strides = array<i32>} : memref<1248x150xf32, #tpu.memory_space<vmem>>, vector<32x150xf32>,
    %c0_213 = arith.constant 0 : index
    %c16_214 = arith.constant 16 : index
    %250 = vector.load %arg18[%c0_213, %c16_214] : memref<32x188xf32, #tpu.memory_space<vmem>>, vector<32x150xf32>
    %c512_215 = arith.constant 512 : index
    %c0_216 = arith.constant 0 : index
    %251 = vector.load %arg19[%c512_215, %c0_216] : memref<1248x150xf32, #tpu.memory_space<vmem>>, vector<32x150xf32>
    tpu.vector_store %arg19[%c512_215, %c0_216], %250 {strides = array<i32>} : memref<1248x150xf32, #tpu.memory_space<vmem>>, vector<32x150xf32>,
    %c0_217 = arith.constant 0 : index
    %c17_218 = arith.constant 17 : index
    %252 = vector.load %arg18[%c0_217, %c17_218] : memref<32x188xf32, #tpu.memory_space<vmem>>, vector<32x150xf32>
    %c544_219 = arith.constant 544 : index
    %c0_220 = arith.constant 0 : index
    %253 = vector.load %arg19[%c544_219, %c0_220] : memref<1248x150xf32, #tpu.memory_space<vmem>>, vector<32x150xf32>
    tpu.vector_store %arg19[%c544_219, %c0_220], %252 {strides = array<i32>} : memref<1248x150xf32, #tpu.memory_space<vmem>>, vector<32x150xf32>,
    %c0_221 = arith.constant 0 : index
    %c18_222 = arith.constant 18 : index
    %254 = vector.load %arg18[%c0_221, %c18_222] : memref<32x188xf32, #tpu.memory_space<vmem>>, vector<32x150xf32>
    %c576_223 = arith.constant 576 : index
    %c0_224 = arith.constant 0 : index
    %255 = vector.load %arg19[%c576_223, %c0_224] : memref<1248x150xf32, #tpu.memory_space<vmem>>, vector<32x150xf32>
    tpu.vector_store %arg19[%c576_223, %c0_224], %254 {strides = array<i32>} : memref<1248x150xf32, #tpu.memory_space<vmem>>, vector<32x150xf32>,
    %c0_225 = arith.constant 0 : index
    %c19_226 = arith.constant 19 : index
    %256 = vector.load %arg18[%c0_225, %c19_226] : memref<32x188xf32, #tpu.memory_space<vmem>>, vector<32x150xf32>
    %c608_227 = arith.constant 608 : index
    %c0_228 = arith.constant 0 : index
    %257 = vector.load %arg19[%c608_227, %c0_228] : memref<1248x150xf32, #tpu.memory_space<vmem>>, vector<32x150xf32>
    tpu.vector_store %arg19[%c608_227, %c0_228], %256 {strides = array<i32>} : memref<1248x150xf32, #tpu.memory_space<vmem>>, vector<32x150xf32>,
    %c0_229 = arith.constant 0 : index
    %c20_230 = arith.constant 20 : index
    %258 = vector.load %arg18[%c0_229, %c20_230] : memref<32x188xf32, #tpu.memory_space<vmem>>, vector<32x150xf32>
    %c640_231 = arith.constant 640 : index
    %c0_232 = arith.constant 0 : index
    %259 = vector.load %arg19[%c640_231, %c0_232] : memref<1248x150xf32, #tpu.memory_space<vmem>>, vector<32x150xf32>
    tpu.vector_store %arg19[%c640_231, %c0_232], %258 {strides = array<i32>} : memref<1248x150xf32, #tpu.memory_space<vmem>>, vector<32x150xf32>,
    %c0_233 = arith.constant 0 : index
    %c21_234 = arith.constant 21 : index
    %260 = vector.load %arg18[%c0_233, %c21_234] : memref<32x188xf32, #tpu.memory_space<vmem>>, vector<32x150xf32>
    %c672_235 = arith.constant 672 : index
    %c0_236 = arith.constant 0 : index
    %261 = vector.load %arg19[%c672_235, %c0_236] : memref<1248x150xf32, #tpu.memory_space<vmem>>, vector<32x150xf32>
    tpu.vector_store %arg19[%c672_235, %c0_236], %260 {strides = array<i32>} : memref<1248x150xf32, #tpu.memory_space<vmem>>, vector<32x150xf32>,
    %c0_237 = arith.constant 0 : index
    %c22_238 = arith.constant 22 : index
    %262 = vector.load %arg18[%c0_237, %c22_238] : memref<32x188xf32, #tpu.memory_space<vmem>>, vector<32x150xf32>
    %c704_239 = arith.constant 704 : index
    %c0_240 = arith.constant 0 : index
    %263 = vector.load %arg19[%c704_239, %c0_240] : memref<1248x150xf32, #tpu.memory_space<vmem>>, vector<32x150xf32>
    tpu.vector_store %arg19[%c704_239, %c0_240], %262 {strides = array<i32>} : memref<1248x150xf32, #tpu.memory_space<vmem>>, vector<32x150xf32>,
    %c0_241 = arith.constant 0 : index
    %c23_242 = arith.constant 23 : index
    %264 = vector.load %arg18[%c0_241, %c23_242] : memref<32x188xf32, #tpu.memory_space<vmem>>, vector<32x150xf32>
    %c736_243 = arith.constant 736 : index
    %c0_244 = arith.constant 0 : index
    %265 = vector.load %arg19[%c736_243, %c0_244] : memref<1248x150xf32, #tpu.memory_space<vmem>>, vector<32x150xf32>
    tpu.vector_store %arg19[%c736_243, %c0_244], %264 {strides = array<i32>} : memref<1248x150xf32, #tpu.memory_space<vmem>>, vector<32x150xf32>,
    %c0_245 = arith.constant 0 : index
    %c24_246 = arith.constant 24 : index
    %266 = vector.load %arg18[%c0_245, %c24_246] : memref<32x188xf32, #tpu.memory_space<vmem>>, vector<32x150xf32>
    %c768_247 = arith.constant 768 : index
    %c0_248 = arith.constant 0 : index
    %267 = vector.load %arg19[%c768_247, %c0_248] : memref<1248x150xf32, #tpu.memory_space<vmem>>, vector<32x150xf32>
    tpu.vector_store %arg19[%c768_247, %c0_248], %266 {strides = array<i32>} : memref<1248x150xf32, #tpu.memory_space<vmem>>, vector<32x150xf32>,
    %c0_249 = arith.constant 0 : index
    %c25_250 = arith.constant 25 : index
    %268 = vector.load %arg18[%c0_249, %c25_250] : memref<32x188xf32, #tpu.memory_space<vmem>>, vector<32x150xf32>
    %c800_251 = arith.constant 800 : index
    %c0_252 = arith.constant 0 : index
    %269 = vector.load %arg19[%c800_251, %c0_252] : memref<1248x150xf32, #tpu.memory_space<vmem>>, vector<32x150xf32>
    tpu.vector_store %arg19[%c800_251, %c0_252], %268 {strides = array<i32>} : memref<1248x150xf32, #tpu.memory_space<vmem>>, vector<32x150xf32>,
    %c0_253 = arith.constant 0 : index
    %c26_254 = arith.constant 26 : index
    %270 = vector.load %arg18[%c0_253, %c26_254] : memref<32x188xf32, #tpu.memory_space<vmem>>, vector<32x150xf32>
    %c832_255 = arith.constant 832 : index
    %c0_256 = arith.constant 0 : index
    %271 = vector.load %arg19[%c832_255, %c0_256] : memref<1248x150xf32, #tpu.memory_space<vmem>>, vector<32x150xf32>
    tpu.vector_store %arg19[%c832_255, %c0_256], %270 {strides = array<i32>} : memref<1248x150xf32, #tpu.memory_space<vmem>>, vector<32x150xf32>,
    %c0_257 = arith.constant 0 : index
    %c27_258 = arith.constant 27 : index
    %272 = vector.load %arg18[%c0_257, %c27_258] : memref<32x188xf32, #tpu.memory_space<vmem>>, vector<32x150xf32>
    %c864_259 = arith.constant 864 : index
    %c0_260 = arith.constant 0 : index
    %273 = vector.load %arg19[%c864_259, %c0_260] : memref<1248x150xf32, #tpu.memory_space<vmem>>, vector<32x150xf32>
    tpu.vector_store %arg19[%c864_259, %c0_260], %272 {strides = array<i32>} : memref<1248x150xf32, #tpu.memory_space<vmem>>, vector<32x150xf32>,
    %c0_261 = arith.constant 0 : index
    %c28_262 = arith.constant 28 : index
    %274 = vector.load %arg18[%c0_261, %c28_262] : memref<32x188xf32, #tpu.memory_space<vmem>>, vector<32x150xf32>
    %c896_263 = arith.constant 896 : index
    %c0_264 = arith.constant 0 : index
    %275 = vector.load %arg19[%c896_263, %c0_264] : memref<1248x150xf32, #tpu.memory_space<vmem>>, vector<32x150xf32>
    tpu.vector_store %arg19[%c896_263, %c0_264], %274 {strides = array<i32>} : memref<1248x150xf32, #tpu.memory_space<vmem>>, vector<32x150xf32>,
    %c0_265 = arith.constant 0 : index
    %c29_266 = arith.constant 29 : index
    %276 = vector.load %arg18[%c0_265, %c29_266] : memref<32x188xf32, #tpu.memory_space<vmem>>, vector<32x150xf32>
    %c928_267 = arith.constant 928 : index
    %c0_268 = arith.constant 0 : index
    %277 = vector.load %arg19[%c928_267, %c0_268] : memref<1248x150xf32, #tpu.memory_space<vmem>>, vector<32x150xf32>
    tpu.vector_store %arg19[%c928_267, %c0_268], %276 {strides = array<i32>} : memref<1248x150xf32, #tpu.memory_space<vmem>>, vector<32x150xf32>,
    %c0_269 = arith.constant 0 : index
    %c30_270 = arith.constant 30 : index
    %278 = vector.load %arg18[%c0_269, %c30_270] : memref<32x188xf32, #tpu.memory_space<vmem>>, vector<32x150xf32>
    %c960_271 = arith.constant 960 : index
    %c0_272 = arith.constant 0 : index
    %279 = vector.load %arg19[%c960_271, %c0_272] : memref<1248x150xf32, #tpu.memory_space<vmem>>, vector<32x150xf32>
    tpu.vector_store %arg19[%c960_271, %c0_272], %278 {strides = array<i32>} : memref<1248x150xf32, #tpu.memory_space<vmem>>, vector<32x150xf32>,
    %c0_273 = arith.constant 0 : index
    %c31_274 = arith.constant 31 : index
    %280 = vector.load %arg18[%c0_273, %c31_274] : memref<32x188xf32, #tpu.memory_space<vmem>>, vector<32x150xf32>
    %c992_275 = arith.constant 992 : index
    %c0_276 = arith.constant 0 : index
    %281 = vector.load %arg19[%c992_275, %c0_276] : memref<1248x150xf32, #tpu.memory_space<vmem>>, vector<32x150xf32>
    tpu.vector_store %arg19[%c992_275, %c0_276], %280 {strides = array<i32>} : memref<1248x150xf32, #tpu.memory_space<vmem>>, vector<32x150xf32>,
    %c0_277 = arith.constant 0 : index
    %c32_278 = arith.constant 32 : index
    %282 = vector.load %arg18[%c0_277, %c32_278] : memref<32x188xf32, #tpu.memory_space<vmem>>, vector<32x150xf32>
    %c1024_279 = arith.constant 1024 : index
    %c0_280 = arith.constant 0 : index
    %283 = vector.load %arg19[%c1024_279, %c0_280] : memref<1248x150xf32, #tpu.memory_space<vmem>>, vector<32x150xf32>
    tpu.vector_store %arg19[%c1024_279, %c0_280], %282 {strides = array<i32>} : memref<1248x150xf32, #tpu.memory_space<vmem>>, vector<32x150xf32>,
    %c0_281 = arith.constant 0 : index
    %c33_282 = arith.constant 33 : index
    %284 = vector.load %arg18[%c0_281, %c33_282] : memref<32x188xf32, #tpu.memory_space<vmem>>, vector<32x150xf32>
    %c1056_283 = arith.constant 1056 : index
    %c0_284 = arith.constant 0 : index
    %285 = vector.load %arg19[%c1056_283, %c0_284] : memref<1248x150xf32, #tpu.memory_space<vmem>>, vector<32x150xf32>
    tpu.vector_store %arg19[%c1056_283, %c0_284], %284 {strides = array<i32>} : memref<1248x150xf32, #tpu.memory_space<vmem>>, vector<32x150xf32>,
    %c0_285 = arith.constant 0 : index
    %c34_286 = arith.constant 34 : index
    %286 = vector.load %arg18[%c0_285, %c34_286] : memref<32x188xf32, #tpu.memory_space<vmem>>, vector<32x150xf32>
    %c1088_287 = arith.constant 1088 : index
    %c0_288 = arith.constant 0 : index
    %287 = vector.load %arg19[%c1088_287, %c0_288] : memref<1248x150xf32, #tpu.memory_space<vmem>>, vector<32x150xf32>
    tpu.vector_store %arg19[%c1088_287, %c0_288], %286 {strides = array<i32>} : memref<1248x150xf32, #tpu.memory_space<vmem>>, vector<32x150xf32>,
    %c0_289 = arith.constant 0 : index
    %c35_290 = arith.constant 35 : index
    %288 = vector.load %arg18[%c0_289, %c35_290] : memref<32x188xf32, #tpu.memory_space<vmem>>, vector<32x150xf32>
    %c1120_291 = arith.constant 1120 : index
    %c0_292 = arith.constant 0 : index
    %289 = vector.load %arg19[%c1120_291, %c0_292] : memref<1248x150xf32, #tpu.memory_space<vmem>>, vector<32x150xf32>
    tpu.vector_store %arg19[%c1120_291, %c0_292], %288 {strides = array<i32>} : memref<1248x150xf32, #tpu.memory_space<vmem>>, vector<32x150xf32>,
    %c0_293 = arith.constant 0 : index
    %c36_294 = arith.constant 36 : index
    %290 = vector.load %arg18[%c0_293, %c36_294] : memref<32x188xf32, #tpu.memory_space<vmem>>, vector<32x150xf32>
    %c1152_295 = arith.constant 1152 : index
    %c0_296 = arith.constant 0 : index
    %291 = vector.load %arg19[%c1152_295, %c0_296] : memref<1248x150xf32, #tpu.memory_space<vmem>>, vector<32x150xf32>
    tpu.vector_store %arg19[%c1152_295, %c0_296], %290 {strides = array<i32>} : memref<1248x150xf32, #tpu.memory_space<vmem>>, vector<32x150xf32>,
    %c0_297 = arith.constant 0 : index
    %c37_298 = arith.constant 37 : index
    %292 = vector.load %arg18[%c0_297, %c37_298] : memref<32x188xf32, #tpu.memory_space<vmem>>, vector<32x150xf32>
    %c1184_299 = arith.constant 1184 : index
    %c0_300 = arith.constant 0 : index
    %293 = vector.load %arg19[%c1184_299, %c0_300] : memref<1248x150xf32, #tpu.memory_space<vmem>>, vector<32x150xf32>
    tpu.vector_store %arg19[%c1184_299, %c0_300], %292 {strides = array<i32>} : memref<1248x150xf32, #tpu.memory_space<vmem>>, vector<32x150xf32>,
    %c0_301 = arith.constant 0 : index
    %c38_302 = arith.constant 38 : index
    %294 = vector.load %arg18[%c0_301, %c38_302] : memref<32x188xf32, #tpu.memory_space<vmem>>, vector<32x150xf32>
    %c1216_303 = arith.constant 1216 : index
    %c0_304 = arith.constant 0 : index
    %295 = vector.load %arg19[%c1216_303, %c0_304] : memref<1248x150xf32, #tpu.memory_space<vmem>>, vector<32x150xf32>
    tpu.vector_store %arg19[%c1216_303, %c0_304], %294 {strides = array<i32>} : memref<1248x150xf32, #tpu.memory_space<vmem>>, vector<32x150xf32>,
    %c0_305 = arith.constant 0 : index
    %c0_306 = arith.constant 0 : index
    %296 = vector.load %arg19[%c0_305, %c0_306] : memref<1248x150xf32, #tpu.memory_space<vmem>>, vector<1248x150xf32>
    %cst_307 = arith.constant dense<0.000000e+00> : vector<32x150xf32>
    %297 = tpu.matmul %13, %296, %cst_307 {dimension_numbers = #tpu.dot_dimension_numbers<[1], [0], [0], [1], [0, 0, 1, 1], [], []>} : vector<32x1248xf32>, vector<1248x150xf32>, vector<32x150xf32> -> vector<32x150xf32>
    %298 = vector.broadcast %11 : vector<32x1xf32> to vector<32x150xf32>
    %299 = arith.mulf %297, %298 : vector<32x150xf32>
    %300 = vector.broadcast %12 : vector<32x1xf32> to vector<32x150xf32>
    %301 = arith.addf %299, %300 : vector<32x150xf32>
    %cst_308 = arith.constant 0.000000e+00 : f32
    %302 = vector.broadcast %cst_308 : f32 to vector<32x150xf32>
    %303 = arith.cmpf ogt, %301, %302 : vector<32x150xf32>
    %cst_309 = arith.constant 0.000000e+00 : f32
    %304 = vector.broadcast %cst_309 : f32 to vector<32x150xf32>
    %305 = arith.minimumf %301, %304 : vector<32x150xf32>
    %306 = math.exp %305 : vector<32x150xf32>
    %cst_310 = arith.constant 1.000000e+00 : f32
    %307 = vector.broadcast %cst_310 : f32 to vector<32x150xf32>
    %308 = arith.subf %306, %307 : vector<32x150xf32>
    %309 = arith.select %303, %301, %308 : vector<32x150xi1>, vector<32x150xf32>
    %310 = vector.extract_strided_slice %309 {offsets = [0, 0], sizes = [32, 147], strides = [1, 1]} : vector<32x150xf32> to vector<32x147xf32>
    %311 = vector.extract_strided_slice %309 {offsets = [0, 1], sizes = [32, 147], strides = [1, 1]} : vector<32x150xf32> to vector<32x147xf32>
    %312 = arith.maximumf %310, %311 : vector<32x147xf32>
    %313 = vector.extract_strided_slice %309 {offsets = [0, 2], sizes = [32, 147], strides = [1, 1]} : vector<32x150xf32> to vector<32x147xf32>
    %314 = arith.maximumf %312, %313 : vector<32x147xf32>
    %315 = vector.extract_strided_slice %309 {offsets = [0, 3], sizes = [32, 147], strides = [1, 1]} : vector<32x150xf32> to vector<32x147xf32>
    %316 = arith.maximumf %314, %315 : vector<32x147xf32>
    %317 = arith.mulf %316, %14 : vector<32x147xf32>
    %cst_311 = arith.constant dense<0.000000e+00> : vector<32xf32>
    %318 = vector.multi_reduction <add>, %317, %cst_311 [1] : vector<32x147xf32> to vector<32xf32>
    %319 = vector.shape_cast %318 : vector<32xf32> to vector<32x1xf32>
    %320 = arith.mulf %316, %15 : vector<32x147xf32>
    %cst_312 = arith.constant dense<0.000000e+00> : vector<32xf32>
    %321 = vector.multi_reduction <add>, %320, %cst_312 [1] : vector<32x147xf32> to vector<32xf32>
    %322 = vector.shape_cast %321 : vector<32xf32> to vector<32x1xf32>
    %323 = tpu.concatenate %319, %322 in 1 : vector<32x1xf32>, vector<32x1xf32> -> vector<32x2xf32>
    %cst_313 = arith.constant dense<0.000000e+00> : vector<2xf32>
    %324 = vector.multi_reduction <add>, %323, %cst_313 [0] : vector<32x2xf32> to vector<2xf32>
    %325 = vector.shape_cast %324 : vector<2xf32> to vector<1x2xf32>
    %326 = tpu.concatenate %170, %325 in 0 : vector<1x2xf32>, vector<1x2xf32> -> vector<2x2xf32>
    %c0_314 = arith.constant 0 : index
    %c0_315 = arith.constant 0 : index
    %327 = vector.load %arg16[%c0_314, %c0_315] : memref<1x2xf32, #tpu.memory_space<vmem>>, vector<1x2xf32>
    %328 = vector.broadcast %327 : vector<1x2xf32> to vector<2x2xf32>
    %329 = arith.addf %326, %328 : vector<2x2xf32>
    %c0_316 = arith.constant 0 : index
    %c0_317 = arith.constant 0 : index
    %330 = vector.load %arg17[%c0_316, %c0_317] : memref<2x2xf32, #tpu.memory_space<vmem>>, vector<2x2xf32>
    tpu.vector_store %arg17[%c0_316, %c0_317], %329 {strides = array<i32>} : memref<2x2xf32, #tpu.memory_space<vmem>>, vector<2x2xf32>,
    return
  }
  func.func @transform_0(%arg0: i32) -> (i32, i32, i32, i32) {
    %c0_i32 = arith.constant 0 : i32
    %c0_i32_0 = arith.constant 0 : i32
    %c0_i32_1 = arith.constant 0 : i32
    %c0_i32_2 = arith.constant 0 : i32
    return %arg0, %c0_i32, %c0_i32_0, %c0_i32_1 : i32, i32, i32, i32
  }
  func.func @transform_1(%arg0: i32) -> (i32, i32) {
    %c0_i32 = arith.constant 0 : i32
    %c0_i32_0 = arith.constant 0 : i32
    %c0_i32_1 = arith.constant 0 : i32
    return %c0_i32, %c0_i32_0 : i32, i32
  }
  func.func @transform_2(%arg0: i32) -> (i32, i32) {
    %c0_i32 = arith.constant 0 : i32
    %c0_i32_0 = arith.constant 0 : i32
    %c0_i32_1 = arith.constant 0 : i32
    return %c0_i32, %c0_i32_0 : i32, i32
  }
  func.func @transform_3(%arg0: i32) -> (i32, i32) {
    %c0_i32 = arith.constant 0 : i32
    %c0_i32_0 = arith.constant 0 : i32
    %c0_i32_1 = arith.constant 0 : i32
    return %c0_i32, %c0_i32_0 : i32, i32
  }
  func.func @transform_4(%arg0: i32) -> (i32, i32) {
    %c0_i32 = arith.constant 0 : i32
    %c0_i32_0 = arith.constant 0 : i32
    %c0_i32_1 = arith.constant 0 : i32
    return %c0_i32, %c0_i32_0 : i32, i32
  }
  func.func @transform_5(%arg0: i32) -> (i32, i32) {
    %c0_i32 = arith.constant 0 : i32
    %c0_i32_0 = arith.constant 0 : i32
    %c0_i32_1 = arith.constant 0 : i32
    return %c0_i32, %c0_i32_0 : i32, i32
  }
  func.func @transform_6(%arg0: i32) -> (i32, i32) {
    %c0_i32 = arith.constant 0 : i32
    %c0_i32_0 = arith.constant 0 : i32
    %c0_i32_1 = arith.constant 0 : i32
    return %c0_i32, %c0_i32_0 : i32, i32
  }
  func.func @transform_7(%arg0: i32) -> (i32, i32) {
    %c0_i32 = arith.constant 0 : i32
    %c0_i32_0 = arith.constant 0 : i32
    %c0_i32_1 = arith.constant 0 : i32
    return %c0_i32, %c0_i32_0 : i32, i32
  }
  func.func @transform_8(%arg0: i32) -> (i32, i32) {
    %c0_i32 = arith.constant 0 : i32
    %c0_i32_0 = arith.constant 0 : i32
    %c0_i32_1 = arith.constant 0 : i32
    return %c0_i32, %c0_i32_0 : i32, i32
  }
  func.func @transform_9(%arg0: i32) -> (i32, i32) {
    %c0_i32 = arith.constant 0 : i32
    %c0_i32_0 = arith.constant 0 : i32
    %c0_i32_1 = arith.constant 0 : i32
    return %c0_i32, %c0_i32_0 : i32, i32
  }
  func.func @transform_10(%arg0: i32) -> (i32, i32) {
    %c0_i32 = arith.constant 0 : i32
    %c0_i32_0 = arith.constant 0 : i32
    %c0_i32_1 = arith.constant 0 : i32
    return %c0_i32, %c0_i32_0 : i32, i32
  }
  func.func @transform_11(%arg0: i32) -> (i32, i32) {
    %c0_i32 = arith.constant 0 : i32
    %c0_i32_0 = arith.constant 0 : i32
    %c0_i32_1 = arith.constant 0 : i32
    return %c0_i32, %c0_i32_0 : i32, i32
  }
  func.func @transform_12(%arg0: i32) -> (i32, i32) {
    %c0_i32 = arith.constant 0 : i32
    %c0_i32_0 = arith.constant 0 : i32
    %c0_i32_1 = arith.constant 0 : i32
    return %c0_i32, %c0_i32_0 : i32, i32
  }
  func.func @transform_13(%arg0: i32) -> (i32, i32) {
    %c0_i32 = arith.constant 0 : i32
    %c0_i32_0 = arith.constant 0 : i32
    %c0_i32_1 = arith.constant 0 : i32
    return %c0_i32, %c0_i32_0 : i32, i32
  }
  func.func @transform_14(%arg0: i32) -> (i32, i32) {
    %c0_i32 = arith.constant 0 : i32
    %c0_i32_0 = arith.constant 0 : i32
    %c0_i32_1 = arith.constant 0 : i32
    return %c0_i32, %c0_i32_0 : i32, i32
  }
  func.func @transform_15(%arg0: i32) -> (i32, i32) {
    %c0_i32 = arith.constant 0 : i32
    %c0_i32_0 = arith.constant 0 : i32
    %c0_i32_1 = arith.constant 0 : i32
    return %c0_i32, %c0_i32_0 : i32, i32
  }
  func.func @transform_16(%arg0: i32) -> (i32, i32) {
    %c0_i32 = arith.constant 0 : i32
    %c0_i32_0 = arith.constant 0 : i32
    return %arg0, %c0_i32 : i32, i32
  }
}

</mosaic_0001>

<bundles_post_ra>
// kernel: eegnet_forward.1
= control target key start
LH: loop header
LB: loop body
LE: loop exit
PB: predicated region body
PF: predicated region fallthrough
CT: control target
= control target key end

     0   :  { %s14168_s0 = inlined_call_operand.vmem [shape: f32[2,2,39,750], index: 0, kind: input, shape index: {}]   ;;  %s14169_s1 = inlined_call_operand.vmem [shape: f32[16,39], index: 1, kind: input, shape index: {}]   ;;  %s14170_s2 = inlined_call_operand.vmem [shape: f32[16,1], index: 2, kind: input, shape index: {}]   ;;  %s14171_s3 = inlined_call_operand.vmem [shape: f32[16,1], index: 3, kind: input, shape index: {}]   ;;  %s14172_s4 = inlined_call_operand.vmem [shape: f32[16,1], index: 4, kind: input, shape index: {}]   ;;  %s14173_s5 = inlined_call_operand.vmem [shape: f32[16,1], index: 5, kind: input, shape index: {}]   ;;  %s14174_s6 = inlined_call_operand.vmem [shape: f32[16,1], index: 6, kind: input, shape index: {}]   ;;  %s14175_s7 = inlined_call_operand.vmem [shape: f32[16,1], index: 7, kind: input, shape index: {}]   ;;  %s14176_s8 = inlined_call_operand.vmem [shape: f32[32,1], index: 8, kind: input, shape index: {}]   ;;  %s14177_s9 = inlined_call_operand.vmem [shape: f32[32,1], index: 9, kind: input, shape index: {}]   ;;  %s14178_s10 = inlined_call_operand.vmem [shape: f32[32,1248], index: 10, kind: input, shape index: {}]   ;;  %s14179_s11 = inlined_call_operand.vmem [shape: f32[32,1], index: 11, kind: input, shape index: {}]   ;;  %s14180_s12 = inlined_call_operand.vmem [shape: f32[32,1], index: 12, kind: input, shape index: {}]   ;;  %s14181_s13 = inlined_call_operand.vmem [shape: f32[32,147], index: 13, kind: input, shape index: {}]   ;;  %s14182_s14 = inlined_call_operand.vmem [shape: f32[32,147], index: 14, kind: input, shape index: {}]   ;;  %s14183_s15 = inlined_call_operand.vmem [shape: f32[1,2], index: 15, kind: input, shape index: {}]   ;;  %s14184_s16 = inlined_call_operand.hbm [shape: f32[2,2], index: 16, kind: output, shape index: {}]  }
   0x1   :  { %14283 = sst [smem:[#allocation25_spill]] %s14168_s0 }
   0x2   :  { %s14284_s23 = sld [smem:[#allocation25_spill]]  ;;  %v9763_v7 = vmov 0.0   ;;  %v9764_v13 = vmov 0   ;;  %vm186_vm0 = vcmask 1046528   ;;  %v9971_v33 = vld [vmem:[%s14169_s1] sm:$0xff]  ;;  %vm179_vm1 = vcmask 318464  }
   0x3   :  { %269 = vmatprep.mubr.f32.mxu0 %v9763_v7  ;;  %54 = vst [vmem:[#allocation2] sm:$0xff] %v9763_v7  ;;  %57 = vst [vmem:[#allocation2 + $0x10] sm:$0xff] %v9763_v7  ;;  %4542 = vmatprep.mubr.f32.mxu1 %v9763_v7  ;;  %v10023_v54 = vld [vmem:[%s14169_s1 + $0x8] sm:$0xff] }
   0x4   :  { %59 = vst [vmem:[#allocation2 + $0x20] sm:$0xff] %v9763_v7  ;;  %61 = vst [vmem:[#allocation2 + $0x30] sm:$0xff] %v9763_v7  ;;  %9569 = vset.pattern.permute.xlu0 %v9764_v13  ;;  %9570 = vset.pattern.permute.xlu1 %v9764_v13 }
   0x8   :  { %v150_v0 = vld [vmem:[%s14284_s23 + $0x8] sm:$0xff]  ;;  %v156_v1 = vld [vmem:[%s14284_s23 + $0x38] sm:$0xff]  ;;  %v149_v5 = vld [vmem:[%s14284_s23] sm:$0xff] }
   0x9   :  { %v8620_v2 = vld [vmem:[%s14284_s23 + $0x1e8] sm:$0xff]  ;;  %v8740_v3 = vpack.c.bf16 %v156_v1, %v150_v0  ;;  %v8626_v4 = vld [vmem:[%s14284_s23 + $0x218] sm:$0xff]  ;;  %v155_v6 = vld [vmem:[%s14284_s23 + $0x30] sm:$0xff] }
   0xa   :  { %v9100_v8 = vpack.c.bf16 %v8626_v4, %v8620_v2  ;;  %v8742_v9 = vpack.c.bf16 %v155_v6, %v149_v5  ;;  %v8619_v10 = vld [vmem:[%s14284_s23 + $0x1e0] sm:$0xff]  ;;  %v8625_v11 = vld [vmem:[%s14284_s23 + $0x210] sm:$0xff]  ;;  %v162_v12 = vld [vmem:[%s14284_s23 + $0x68] sm:$0xff] }
   0xb   :  { %8741 = vmatprep.subr.bf16.mxu0 %v8740_v3  ;;  %v9102_v14 = vpack.c.bf16 %v8625_v11, %v8619_v10  ;;  %v168_v15 = vld [vmem:[%s14284_s23 + $0x98] sm:$0xff]  ;;  %v8632_v16 = vld [vmem:[%s14284_s23 + $0x248] sm:$0xff]  ;;  %v161_v20 = vld [vmem:[%s14284_s23 + $0x60] sm:$0xff] }
   0xc   :  { %v8638_v17 = vld [vmem:[%s14284_s23 + $0x278] sm:$0xff]  ;;  %9101 = vmatprep.subr.bf16.mxu1 %v9100_v8  ;;  %8743 = vmatpush1.bf16.msra.mxu0 %v8742_v9  ;;  %v8744_v18 = vpack.c.bf16 %v168_v15, %v162_v12  ;;  %v167_v21 = vld [vmem:[%s14284_s23 + $0x90] sm:$0xff]  ;;  %v8631_v22 = vld [vmem:[%s14284_s23 + $0x240] sm:$0xff] }
   0xd   :  { %v9104_v19 = vpack.c.bf16 %v8638_v17, %v8632_v16  ;;  %9103 = vmatpush1.bf16.msra.mxu1 %v9102_v14  ;;  %v8746_v23 = vpack.c.bf16 %v167_v21, %v161_v20  ;;  %v8637_v24 = vld [vmem:[%s14284_s23 + $0x270] sm:$0xff]  ;;  %v174_v26 = vld [vmem:[%s14284_s23 + $0xc8] sm:$0x7f]  ;;  %v173_v28 = vld [vmem:[%s14284_s23 + $0xc0] sm:$0x7f] }
   0xe   :  { %8745 = vmatprep.subr.bf16.mxu0 %v8744_v18  ;;  %v9106_v25 = vpack.c.bf16 %v8637_v24, %v8631_v22  ;;  %v8644_v27 = vld [vmem:[%s14284_s23 + $0x2a8] sm:$0x7f]  ;;  %v152_v29 = vld [vmem:[%s14284_s23 + $0x18] sm:$0xff]  ;;  %v8643_v32 = vld [vmem:[%s14284_s23 + $0x2a0] sm:$0x7f] }
   0xf   :  { %9105 = vmatprep.subr.bf16.mxu1 %v9104_v19  ;;  %v158_v30 = vld [vmem:[%s14284_s23 + $0x48] sm:$0xff]  ;;  %v8622_v31 = vld [vmem:[%s14284_s23 + $0x1f8] sm:$0xff]  ;;  %v151_v35 = vld [vmem:[%s14284_s23 + $0x10] sm:$0xff] }
  0x10   :  { %8747 = vmatpush1.bf16.msra.mxu0 %v8746_v23  ;;  %v8628_v34 = vld [vmem:[%s14284_s23 + $0x228] sm:$0xff]  ;;  %v157_v36 = vld [vmem:[%s14284_s23 + $0x40] sm:$0xff]  ;;  %v8621_v37 = vld [vmem:[%s14284_s23 + $0x1f0] sm:$0xff]  ;;  %v8748_v40 = vpack.c.bf16 %v158_v30, %v152_v29 }
  0x11   :  { %9107 = vmatpush1.bf16.msra.mxu1 %v9106_v25  ;;  %8529 = vmatprep.subr.msk.mxu0 %vm186_vm0, %v174_v26  ;;  %v8627_v38 = vld [vmem:[%s14284_s23 + $0x220] sm:$0xff]  ;;  %v164_v39 = vld [vmem:[%s14284_s23 + $0x78] sm:$0xff]  ;;  %v9108_v41 = vpack.c.bf16 %v8628_v34, %v8622_v31  ;;  %v170_v42 = vld [vmem:[%s14284_s23 + $0xa8] sm:$0xff]  ;;  %v8750_v45 = vpack.c.bf16 %v157_v36, %v151_v35 }
  0x12   :  { %8649 = vmatprep.subr.msk.mxu1 %vm186_vm0, %v8644_v27  ;;  %v8634_v43 = vld [vmem:[%s14284_s23 + $0x258] sm:$0xff]  ;;  %v8640_v44 = vld [vmem:[%s14284_s23 + $0x288] sm:$0xff]  ;;  %v9110_v46 = vpack.c.bf16 %v8627_v38, %v8621_v37  ;;  %v8752_v47 = vpack.c.bf16 %v170_v42, %v164_v39  ;;  %v163_v48 = vld [vmem:[%s14284_s23 + $0x70] sm:$0xff] }
  0x13   :  { %v169_v49 = vld [vmem:[%s14284_s23 + $0xa0] sm:$0xff]  ;;  %v9112_v50 = vpack.c.bf16 %v8640_v44, %v8634_v43  ;;  %v8633_v51 = vld [vmem:[%s14284_s23 + $0x250] sm:$0xff]  ;;  %v176_v56 = vld [vmem:[%s14284_s23 + $0xd8] sm:$0x7f] }
  0x14   :  { %8530 = vmatpush1.msk.msra.mxu0 %vm186_vm0, %v173_v28  ;;  %v8639_v52 = vld [vmem:[%s14284_s23 + $0x280] sm:$0xff]  ;;  %v8754_v53 = vpack.c.bf16 %v169_v49, %v163_v48  ;;  %v8646_v57 = vld [vmem:[%s14284_s23 + $0x2b8] sm:$0x7f]  ;;  %v154_v58 = vld [vmem:[%s14284_s23 + $0x28] sm:$0xff] }
  0x15   :  { %8650 = vmatpush1.msk.msra.mxu1 %vm186_vm0, %v8643_v32  ;;  %8531 = vmatmul.mubr.msk.f32.vlgmr.msra.gmra.mrb[0].mxu0 %vm179_vm1, %v9971_v33  ;;  %v9114_v55 = vpack.c.bf16 %v8639_v52, %v8633_v51  ;;  %v160_v59 = vld [vmem:[%s14284_s23 + $0x58] sm:$0xff]  ;;  %v8624_v60 = vld [vmem:[%s14284_s23 + $0x208] sm:$0xff]  ;;  %v153_v62 = vld [vmem:[%s14284_s23 + $0x20] sm:$0xff] }
  0x16   :  { %8749 = vmatprep.subr.bf16.mxu0 %v8748_v40  ;;  %9109 = vmatprep.subr.bf16.mxu1 %v9108_v41  ;;  %v8630_v61 = vld [vmem:[%s14284_s23 + $0x238] sm:$0xff]  ;;  %v159_v63 = vld [vmem:[%s14284_s23 + $0x50] sm:$0xff]  ;;  %v8623_v1 = vld [vmem:[%s14284_s23 + $0x200] sm:$0xff]  ;;  %v8756_v4 = vpack.c.bf16 %v160_v59, %v154_v58 }
  0x17   :  { %8751 = vmatpush1.bf16.msra.mxu0 %v8750_v45  ;;  %8651 = vmatmul.mubr.msk.f32.vlgmr.msra.gmra.mrb[0].mxu1 %vm179_vm1, %v9971_v33  ;;  %v175_v0 = vld [vmem:[%s14284_s23 + $0xd0] sm:$0x7f]  ;;  %v9116_v5 = vpack.c.bf16 %v8630_v61, %v8624_v60  ;;  %v8758_v6 = vpack.c.bf16 %v159_v63, %v153_v62  ;;  %v166_v8 = vld [vmem:[%s14284_s23 + $0x88] sm:$0xff]  ;;  %v172_v9 = vld [vmem:[%s14284_s23 + $0xb8] sm:$0xff] }
  0x18   :  { %9111 = vmatpush1.bf16.msra.mxu1 %v9110_v46  ;;  %8753 = vmatprep.subr.bf16.mxu0 %v8752_v47  ;;  %v8629_v2 = vld [vmem:[%s14284_s23 + $0x230] sm:$0xff]  ;;  %v8636_v10 = vld [vmem:[%s14284_s23 + $0x268] sm:$0xff]  ;;  %v8642_v12 = vld [vmem:[%s14284_s23 + $0x298] sm:$0xff]  ;;  %v8760_v17 = vpack.c.bf16 %v172_v9, %v166_v8 }
  0x19   :  { %9113 = vmatprep.subr.bf16.mxu1 %v9112_v50  ;;  %275 = vmatprep.mubr.f32.mxu0 %v9763_v7  ;;  %v8645_v3 = vld [vmem:[%s14284_s23 + $0x2b0] sm:$0x7f]  ;;  %v9118_v11 = vpack.c.bf16 %v8629_v2, %v8623_v1  ;;  %v165_v13 = vld [vmem:[%s14284_s23 + $0x80] sm:$0xff]  ;;  %v9120_v18 = vpack.c.bf16 %v8642_v12, %v8636_v10  ;;  %v178_v21 = vld [vmem:[%s14284_s23 + $0xe8] sm:$0x7f] }
  0x1a   :  { %4548 = vmatprep.mubr.f32.mxu1 %v9763_v7  ;;  %8532 = vmatmul.mubr.msk.f32.gmra.mrb[2].mxu0 %vm179_vm1, %v10023_v54  ;;  %v171_v14 = vld [vmem:[%s14284_s23 + $0xb0] sm:$0xff]  ;;  %v8635_v15 = vld [vmem:[%s14284_s23 + $0x260] sm:$0xff]  ;;  %v8648_v22 = vld [vmem:[%s14284_s23 + $0x2c8] sm:$0x7f] }
  0x1b   :  { %8755 = vmatpush1.bf16.msra.mxu0 %v8754_v53  ;;  %8652 = vmatmul.mubr.msk.f32.gmra.mrb[2].mxu1 %vm179_vm1, %v10023_v54  ;;  %v8641_v16 = vld [vmem:[%s14284_s23 + $0x290] sm:$0xff]  ;;  %v8762_v19 = vpack.c.bf16 %v171_v14, %v165_v13  ;;  %v8542_v23 = vld [vmem:[%s14284_s23 + $0xf8] sm:$0xff]  ;;  %v8548_v24 = vld [vmem:[%s14284_s23 + $0x128] sm:$0xff] }
  0x1c   :  { %9115 = vmatpush1.bf16.msra.mxu1 %v9114_v55  ;;  %8533 = vmatprep.subr.msk.mxu0 %vm186_vm0, %v176_v56  ;;  %v9122_v20 = vpack.c.bf16 %v8641_v16, %v8635_v15  ;;  %v8662_v25 = vld [vmem:[%s14284_s23 + $0x2d8] sm:$0xff]  ;;  %v8668_v26 = vld [vmem:[%s14284_s23 + $0x308] sm:$0xff]  ;;  %v8541_v27 = vld [vmem:[%s14284_s23 + $0xf0] sm:$0xff]  ;;  %v8764_v34 = vpack.c.bf16 %v8548_v24, %v8542_v23 }
  0x1d   :  { %8653 = vmatprep.subr.msk.mxu1 %vm186_vm0, %v8646_v57  ;;  %346 = vmatprep.mubr.f32.mxu0 %v9763_v7  ;;  %v8547_v28 = vld [vmem:[%s14284_s23 + $0x120] sm:$0xff]  ;;  %v8661_v30 = vld [vmem:[%s14284_s23 + $0x2d0] sm:$0xff]  ;;  %v9124_v35 = vpack.c.bf16 %v8668_v26, %v8662_v25  ;;  %v8554_v37 = vld [vmem:[%s14284_s23 + $0x158] sm:$0xff] }
  0x1e   :  { %4619 = vmatprep.mubr.f32.mxu1 %v9763_v7  ;;  %v177_v29 = vld [vmem:[%s14284_s23 + $0xe0] sm:$0x7f]  ;;  %v8766_v36 = vpack.c.bf16 %v8547_v28, %v8541_v27  ;;  %v8560_v38 = vld [vmem:[%s14284_s23 + $0x188] sm:$0xff]  ;;  %v8674_v39 = vld [vmem:[%s14284_s23 + $0x338] sm:$0xff] }
  0x1f   :  { %8534 = vmatpush1.msk.msra.mxu0 %vm186_vm0, %v175_v0  ;;  %v8667_v31 = vld [vmem:[%s14284_s23 + $0x300] sm:$0xff]  ;;  %v8680_v41 = vld [vmem:[%s14284_s23 + $0x368] sm:$0xff]  ;;  %v8553_v42 = vld [vmem:[%s14284_s23 + $0x150] sm:$0xff]  ;;  %v8768_v46 = vpack.c.bf16 %v8560_v38, %v8554_v37 }
  0x20   :  { %8654 = vmatpush1.msk.msra.mxu1 %vm186_vm0, %v8645_v3  ;;  %8535 = vmatmul.mubr.msk.f32.vlgmr.msra.gmra.mrb[4].mxu0 %vm179_vm1, %v9971_v33  ;;  %v8647_v32 = vld [vmem:[%s14284_s23 + $0x2c0] sm:$0x7f]  ;;  %v9126_v40 = vpack.c.bf16 %v8667_v31, %v8661_v30  ;;  %v8673_v44 = vld [vmem:[%s14284_s23 + $0x330] sm:$0xff]  ;;  %v9128_v47 = vpack.c.bf16 %v8680_v41, %v8674_v39  ;;  %v8566_v50 = vld [vmem:[%s14284_s23 + $0x1b8] sm:$0x7f] }
  0x21   :  { %8757 = vmatprep.subr.bf16.mxu0 %v8756_v4  ;;  %8655 = vmatmul.mubr.msk.f32.vlgmr.msra.gmra.mrb[4].mxu1 %vm179_vm1, %v9971_v33  ;;  %v8559_v43 = vld [vmem:[%s14284_s23 + $0x180] sm:$0xff]  ;;  %v8686_v51 = vld [vmem:[%s14284_s23 + $0x398] sm:$0x7f]  ;;  %v8544_v52 = vld [vmem:[%s14284_s23 + $0x108] sm:$0xff] }
  0x22   :  { %9117 = vmatprep.subr.bf16.mxu1 %v9116_v5  ;;  %8759 = vmatpush1.bf16.msra.mxu0 %v8758_v6  ;;  %v8679_v45 = vld [vmem:[%s14284_s23 + $0x360] sm:$0xff]  ;;  %v8770_v48 = vpack.c.bf16 %v8559_v43, %v8553_v42  ;;  %v8565_v53 = vld [vmem:[%s14284_s23 + $0x1b0] sm:$0x7f]  ;;  %v8550_v55 = vld [vmem:[%s14284_s23 + $0x138] sm:$0xff] }
  0x23   :  { %9119 = vmatpush1.bf16.msra.mxu1 %v9118_v11  ;;  %352 = vmatprep.mubr.f32.mxu0 %v9763_v7  ;;  %v9130_v49 = vpack.c.bf16 %v8679_v45, %v8673_v44  ;;  %v8664_v56 = vld [vmem:[%s14284_s23 + $0x2e8] sm:$0xff]  ;;  %v8670_v57 = vld [vmem:[%s14284_s23 + $0x318] sm:$0xff]  ;;  %v8543_v58 = vld [vmem:[%s14284_s23 + $0x100] sm:$0xff]  ;;  %v8772_v1 = vpack.c.bf16 %v8550_v55, %v8544_v52 }
  0x24   :  { %4625 = vmatprep.mubr.f32.mxu1 %v9763_v7  ;;  %8536 = vmatmul.mubr.msk.f32.gmra.mrb[6].mxu0 %vm179_vm1, %v10023_v54  ;;  %v8549_v59 = vld [vmem:[%s14284_s23 + $0x130] sm:$0xff]  ;;  %v65_v60 = vld [vmem:[%s14170_s2] sm:$0xff]  ;;  %v9132_v2 = vpack.c.bf16 %v8670_v57, %v8664_v56  ;;  %v8556_v4 = vld [vmem:[%s14284_s23 + $0x168] sm:$0xff] }
  0x25   :  { %8761 = vmatprep.subr.bf16.mxu0 %v8760_v17  ;;  %8656 = vmatmul.mubr.msk.f32.gmra.mrb[6].mxu1 %vm179_vm1, %v10023_v54  ;;  %v8663_v61 = vld [vmem:[%s14284_s23 + $0x2e0] sm:$0xff]  ;;  %v8669_v62 = vld [vmem:[%s14284_s23 + $0x310] sm:$0xff]  ;;  %v8774_v3 = vpack.c.bf16 %v8549_v59, %v8543_v58  ;;  %v8562_v5 = vld [vmem:[%s14284_s23 + $0x198] sm:$0xff] }
  0x26   :  { %9121 = vmatprep.subr.bf16.mxu1 %v9120_v18  ;;  %8763 = vmatpush1.bf16.msra.mxu0 %v8762_v19  ;;  %v67_v63 = vld [vmem:[%s14171_s3] sm:$0xff]  ;;  %v8685_v0 = vld [vmem:[%s14284_s23 + $0x390] sm:$0x7f]  ;;  %v8676_v6 = vld [vmem:[%s14284_s23 + $0x348] sm:$0xff]  ;;  %v9134_v8 = vpack.c.bf16 %v8669_v62, %v8663_v61  ;;  %v8776_v14 = vpack.c.bf16 %v8562_v5, %v8556_v4 }
  0x27   :  { %9123 = vmatpush1.bf16.msra.mxu1 %v9122_v20  ;;  %8537 = vmatprep.subr.msk.mxu0 %vm186_vm0, %v178_v21  ;;  %v8682_v9 = vld [vmem:[%s14284_s23 + $0x378] sm:$0xff]  ;;  %v8555_v10 = vld [vmem:[%s14284_s23 + $0x160] sm:$0xff]  ;;  %v8561_v11 = vld [vmem:[%s14284_s23 + $0x190] sm:$0xff] }
  0x28   :  { %8657 = vmatprep.subr.msk.mxu1 %vm186_vm0, %v8648_v22  ;;  %423 = vmatprep.mubr.f32.mxu0 %v9763_v7  ;;  %v8675_v12 = vld [vmem:[%s14284_s23 + $0x340] sm:$0xff]  ;;  %v8681_v13 = vld [vmem:[%s14284_s23 + $0x370] sm:$0xff] }
  0x29   :  { %4696 = vmatprep.mubr.f32.mxu1 %v9763_v7  ;;  %718 = vperm.xlu0 %9569, %v65_v60  }
  0x2a   :  { %8538 = vmatpush1.msk.msra.mxu0 %vm186_vm0, %v177_v29  ;;  %740 = vperm.xlu1 %9570, %v67_v63  }
  0x2b   :  { %8658 = vmatpush1.msk.msra.mxu1 %vm186_vm0, %v8647_v32  ;;  %8539 = vmatmul.mubr.msk.f32.vlgmr.msra.gmra.mrb[8].mxu0 %vm179_vm1, %v9971_v33 }
  0x2c   :  { %8765 = vmatprep.subr.bf16.mxu0 %v8764_v34  ;;  %8659 = vmatmul.mubr.msk.f32.vlgmr.msra.gmra.mrb[8].mxu1 %vm179_vm1, %v9971_v33 }
  0x2d   :  { %9125 = vmatprep.subr.bf16.mxu1 %v9124_v35  ;;  %8767 = vmatpush1.bf16.msra.mxu0 %v8766_v36 }
  0x2e   :  { %9127 = vmatpush1.bf16.msra.mxu1 %v9126_v40  ;;  %429 = vmatprep.mubr.f32.mxu0 %v9763_v7 }
  0x2f   :  { %4702 = vmatprep.mubr.f32.mxu1 %v9763_v7  ;;  %8540 = vmatmul.mubr.msk.f32.gmra.mrb[10].mxu0 %vm179_vm1, %v10023_v54 }
  0x30   :  { %8769 = vmatprep.subr.bf16.mxu0 %v8768_v46  ;;  %8660 = vmatmul.mubr.msk.f32.gmra.mrb[10].mxu1 %vm179_vm1, %v10023_v54 }
  0x31   :  { %9129 = vmatprep.subr.bf16.mxu1 %v9128_v47  ;;  %8771 = vmatpush1.bf16.msra.mxu0 %v8770_v48 }
  0x32   :  { %9131 = vmatpush1.bf16.msra.mxu1 %v9130_v49  ;;  %8571 = vmatprep.subr.msk.mxu0 %vm186_vm0, %v8566_v50 }
  0x33   :  { %8691 = vmatprep.subr.msk.mxu1 %vm186_vm0, %v8686_v51  ;;  %549 = vmatprep.mubr.f32.mxu0 %v9763_v7 }
  0x34   :  { %4822 = vmatprep.mubr.f32.mxu1 %v9763_v7 }
  0x35   :  { %8572 = vmatpush1.msk.msra.mxu0 %vm186_vm0, %v8565_v53 }
  0x36   :  { %8692 = vmatpush1.msk.msra.mxu1 %vm186_vm0, %v8685_v0  ;;  %8573 = vmatmul.mubr.msk.f32.vlgmr.msra.gmra.mrb[12].mxu0 %vm179_vm1, %v9971_v33 }
  0x37   :  { %8773 = vmatprep.subr.bf16.mxu0 %v8772_v1  ;;  %8693 = vmatmul.mubr.msk.f32.vlgmr.msra.gmra.mrb[12].mxu1 %vm179_vm1, %v9971_v33 }
  0x38   :  { %21 = vsyncpa [#allocation5], 0  ;;  %9133 = vmatprep.subr.bf16.mxu1 %v9132_v2  ;;  %8775 = vmatpush1.bf16.msra.mxu0 %v8774_v3  ;;  %v9136_v15 = vpack.c.bf16 %v8682_v9, %v8676_v6  ;;  %v8778_v16 = vpack.c.bf16 %v8561_v11, %v8555_v10  ;;  %v9138_v17 = vpack.c.bf16 %v8681_v13, %v8675_v12  ;;  %v8568_v18 = vld [vmem:[%s14284_s23 + $0x1c8] sm:$0x7f]  ;;  %v8546_v20 = vld [vmem:[%s14284_s23 + $0x118] sm:$0xff]  ;;  %s14188_s28 = smov 40  }
  0x39   :  { %9135 = vmatpush1.bf16.msra.mxu1 %v9134_v8  ;;  %555 = vmatprep.mubr.f32.mxu0 %v9763_v7  ;;  %v8688_v19 = vld [vmem:[%s14284_s23 + $0x3a8] sm:$0x7f]  ;;  %v8567_v21 = vld [vmem:[%s14284_s23 + $0x1c0] sm:$0x7f]  ;;  %v8666_v23 = vld [vmem:[%s14284_s23 + $0x2f8] sm:$0xff]  ;;  %s9770_s29 = smov 127  }
  0x3a   :  { %4828 = vmatprep.mubr.f32.mxu1 %v9763_v7  ;;  %8574 = vmatmul.mubr.msk.f32.gmra.mrb[14].mxu0 %vm179_vm1, %v10023_v54  ;;  %v8552_v22 = vld [vmem:[%s14284_s23 + $0x148] sm:$0xff]  ;;  %v8545_v25 = vld [vmem:[%s14284_s23 + $0x110] sm:$0xff]  ;;  %v8551_v26 = vld [vmem:[%s14284_s23 + $0x140] sm:$0xff]  ;;  %s9771_s30 = smov 126   ;;  %s9772_s0 = smov 125  }
  0x3b   :  { %8777 = vmatprep.subr.bf16.mxu0 %v8776_v14  ;;  %8694 = vmatmul.mubr.msk.f32.gmra.mrb[14].mxu1 %vm179_vm1, %v10023_v54  ;;  %v8672_v24 = vld [vmem:[%s14284_s23 + $0x328] sm:$0xff]  ;;  %v8665_v28 = vld [vmem:[%s14284_s23 + $0x2f0] sm:$0xff]  ;;  %v8671_v29 = vld [vmem:[%s14284_s23 + $0x320] sm:$0xff]  ;;  %v8780_v32 = vpack.c.bf16 %v8552_v22, %v8546_v20  ;;  %v8782_v35 = vpack.c.bf16 %v8551_v26, %v8545_v25  ;;  %s9773_s1 = smov 124   ;;  %s9776_s17 = smov 121  }
  0x3c   :  { %9137 = vmatprep.subr.bf16.mxu1 %v9136_v15  ;;  %8779 = vmatpush1.bf16.msra.mxu0 %v8778_v16  ;;  %v66_v27 = vld [vmem:[%s14170_s2 + $0x8] sm:$0xff]  ;;  %v8687_v31 = vld [vmem:[%s14284_s23 + $0x3a0] sm:$0x7f]  ;;  %v9140_v34 = vpack.c.bf16 %v8672_v24, %v8666_v23  ;;  %v8558_v36 = vld [vmem:[%s14284_s23 + $0x178] sm:$0xff]  ;;  %v9142_v39 = vpack.c.bf16 %v8671_v29, %v8665_v28  ;;  %s14190_s2 = smov 62   ;;  %s9777_s18 = smov 120  }
  0x3d   :  { %9139 = vmatpush1.bf16.msra.mxu1 %v9138_v17  ;;  %8575 = vmatprep.subr.msk.mxu0 %vm186_vm0, %v8568_v18  ;;  %v68_v30 = vld [vmem:[%s14171_s3 + $0x8] sm:$0xff]  ;;  %v8678_v38 = vld [vmem:[%s14284_s23 + $0x358] sm:$0xff]  ;;  %v8557_v41 = vld [vmem:[%s14284_s23 + $0x170] sm:$0xff]  ;;  %s14217_s3 = smov 123   ;;  %s9778_s19 = smov 119  }
  0x3e   :  { %8695 = vmatprep.subr.msk.mxu1 %vm186_vm0, %v8688_v19  ;;  %626 = vmatprep.mubr.f32.mxu0 %v9763_v7  ;;  %v8564_v37 = vld [vmem:[%s14284_s23 + $0x1a8] sm:$0xff]  ;;  %v8563_v42 = vld [vmem:[%s14284_s23 + $0x1a0] sm:$0xff]  ;;  %v8677_v43 = vld [vmem:[%s14284_s23 + $0x350] sm:$0xff]  ;;  %s9779_s20 = smov 118   ;;  %s9780_s21 = smov 117  }
  0x3f   :  { %4899 = vmatprep.mubr.f32.mxu1 %v9763_v7  ;;  %723 = vperm.xlu0 %9569, %v66_v27   ;;  %v8684_v40 = vld [vmem:[%s14284_s23 + $0x388] sm:$0xff]  ;;  %v8683_v44 = vld [vmem:[%s14284_s23 + $0x380] sm:$0xff]  ;;  %v8784_v45 = vpack.c.bf16 %v8564_v37, %v8558_v36  ;;  %v8786_v47 = vpack.c.bf16 %v8563_v42, %v8557_v41  ;;  %v8570_v49 = vld [vmem:[%s14284_s23 + $0x1d8] sm:$0x7f]  ;;  %s14279_s22 = smov 115   ;;  %s14277_s24 = smov 114  }
  0x40   :  { %8576 = vmatpush1.msk.msra.mxu0 %vm186_vm0, %v8567_v21  ;;  %745 = vperm.xlu1 %9570, %v68_v30   ;;  %v9144_v46 = vpack.c.bf16 %v8684_v40, %v8678_v38  ;;  %v9146_v48 = vpack.c.bf16 %v8683_v44, %v8677_v43  ;;  %v8690_v50 = vld [vmem:[%s14284_s23 + $0x3b8] sm:$0x7f]  ;;  %v69_v51 = vld [vmem:[%s14172_s4] sm:$0xff]  ;;  %v8569_v52 = vld [vmem:[%s14284_s23 + $0x1d0] sm:$0x7f]  ;;  %s14275_s25 = smov 113  }
  0x41   :  { %8696 = vmatpush1.msk.msra.mxu1 %vm186_vm0, %v8687_v31  ;;  %8577 = vmatmul.mubr.msk.f32.vlgmr.msra.gmra.mrb[16].mxu0 %vm179_vm1, %v9971_v33  ;;  %v70_v53 = vld [vmem:[%s14172_s4 + $0x8] sm:$0xff]  ;;  %v8689_v55 = vld [vmem:[%s14284_s23 + $0x3b0] sm:$0x7f]  ;;  %v71_v56 = vld [vmem:[%s14173_s5] sm:$0xff]  ;;  %s14273_s4 = smov 112   ;;  %s14233_s26 = smov 111  }
  0x42   :  { %8781 = vmatprep.subr.bf16.mxu0 %v8780_v32  ;;  %8697 = vmatmul.mubr.msk.f32.vlgmr.msra.gmra.mrb[16].mxu1 %vm179_vm1, %v9971_v33  ;;  %v72_v57 = vld [vmem:[%s14173_s5 + $0x8] sm:$0xff]  ;;  %v73_v58 = vld [vmem:[%s14174_s6] sm:$0xff]  ;;  %v79_v61 = vld [vmem:[%s14176_s8 + $0x10] sm:$0xff]  ;;  %s14186_s5 = smov 19   ;;  %s14231_s23 = smov 110  }
  0x43   :  { %9141 = vmatprep.subr.bf16.mxu1 %v9140_v34  ;;  %8783 = vmatpush1.bf16.msra.mxu0 %v8782_v35  ;;  %v74_v59 = vld [vmem:[%s14174_s6 + $0x8] sm:$0xff]  ;;  %v77_v60 = vld [vmem:[%s14176_s8] sm:$0xff]  ;;  %v80_v62 = vld [vmem:[%s14176_s8 + $0x18] sm:$0xff]  ;;  %s14215_s6 = smov 122   ;;  %s14229_s27 = smov 109  }
  0x44   :  { %9143 = vmatpush1.bf16.msra.mxu1 %v9142_v39  ;;  %632 = vmatprep.mubr.f32.mxu0 %v9763_v7  ;;  %v81_v63 = vld [vmem:[%s14177_s9] sm:$0xff]  ;;  %v82_v0 = vld [vmem:[%s14177_s9 + $0x8] sm:$0xff]  ;;  %v83_v1 = vld [vmem:[%s14177_s9 + $0x10] sm:$0xff] }
  0x45   :  { %4905 = vmatprep.mubr.f32.mxu1 %v9763_v7  ;;  %8578 = vmatmul.mubr.msk.f32.gmra.mrb[18].mxu0 %vm179_vm1, %v10023_v54  ;;  %v84_v2 = vld [vmem:[%s14177_s9 + $0x18] sm:$0xff]  ;;  %s14193_s9 = smov 84  }
  0x46   :  { %8785 = vmatprep.subr.bf16.mxu0 %v8784_v45  ;;  %8698 = vmatmul.mubr.msk.f32.gmra.mrb[18].mxu1 %vm179_vm1, %v10023_v54 }
  0x47   :  { %9145 = vmatprep.subr.bf16.mxu1 %v9144_v46  ;;  %8787 = vmatpush1.bf16.msra.mxu0 %v8786_v47 }
  0x48   :  { %9147 = vmatpush1.bf16.msra.mxu1 %v9146_v48  ;;  %8579 = vmatprep.subr.msk.mxu0 %vm186_vm0, %v8570_v49 }
  0x49   :  { %8699 = vmatprep.subr.msk.mxu1 %vm186_vm0, %v8690_v50  ;;  %703 = vmatprep.mubr.f32.mxu0 %v9763_v7 }
  0x4a   :  { %4976 = vmatprep.mubr.f32.mxu1 %v9763_v7  ;;  %786 = vperm.xlu0 %9569, %v69_v51  }
  0x4b   :  { %8580 = vmatpush1.msk.msra.mxu0 %vm186_vm0, %v8569_v52  ;;  %791 = vperm.xlu1 %9570, %v70_v53  }
  0x4c   :  { %8700 = vmatpush1.msk.msra.mxu1 %vm186_vm0, %v8689_v55  ;;  %8581 = vmatmul.mubr.msk.f32.vlgmr.msra.gmra.mrb[20].mxu0 %vm179_vm1, %v9971_v33 }
  0x4d   :  { %8701 = vmatmul.mubr.msk.f32.vlgmr.msra.gmra.mrb[20].mxu1 %vm179_vm1, %v9971_v33  ;;  %709 = vmatprep.mubr.f32.mxu0 %v9763_v7  ;;  %v76_v33 = vld [vmem:[%s14175_s7 + $0x8] sm:$0xff] }
  0x4e   :  { %4982 = vmatprep.mubr.f32.mxu1 %v9763_v7  ;;  %808 = vperm.xlu0 %9569, %v71_v56   ;;  %v75_v7 = vld [vmem:[%s14175_s7] sm:$0xff]  ;;  %s9781_s7 = smov 116  }
  0x4f   :  { %813 = vperm.xlu1 %9570, %v72_v57  }
  0x50   :  { %8582 = vmatmul.mubr.msk.f32.gmra.mrb[22].mxu0 %vm179_vm1, %v10023_v54 }
  0x51   :  { %8702 = vmatmul.mubr.msk.f32.gmra.mrb[22].mxu1 %vm179_vm1, %v10023_v54  ;;  %v78_v54 = vld [vmem:[%s14176_s8 + $0x8] sm:$0xff]  ;;  %s14260_s8 = smov 106  }
  0x52   :  { %842 = vperm.xlu0 %9569, %v73_v58  }
  0x53   :  { %847 = vperm.xlu1 %9570, %v74_v59  }
  0x56   :  { %864 = vperm.xlu0 %9569, %v75_v7  }
  0x57   :  { %869 = vperm.xlu1 %9570, %v76_v33  }
  0x5a   :  { %898 = vperm.xlu0 %9569, %v77_v60  }
  0x5b   :  { %903 = vperm.xlu1 %9570, %v78_v54  }
  0x5e   :  { %908 = vperm.xlu0 %9569, %v79_v61  }
  0x5f   :  { %913 = vperm.xlu1 %9570, %v80_v62  }
  0x62   :  { %942 = vperm.xlu0 %9569, %v81_v63  }
  0x63   :  { %947 = vperm.xlu1 %9570, %v82_v0  }
  0x66   :  { %952 = vperm.xlu0 %9569, %v83_v1  }
  0x67   :  { %957 = vperm.xlu1 %9570, %v84_v2  }
  0xa8   :  { %v10423_v3 = vpop.permute.xlu0 %718 }
  0xa9   :  { %v10425_v6 = vpop.permute.xlu1 %740 }
  0xbe   :  { %v10427_v9 = vpop.permute.xlu0 %723 }
  0xbf   :  { %v10429_v15 = vpop.permute.xlu1 %745 }
  0xc9   :  { %v10431_v16 = vpop.permute.xlu0 %786 }
  0xca   :  { %v10433_v21 = vpop.permute.xlu1 %791 }
  0xcd   :  { %v10437_v24 = vpop.permute.xlu0 %808 }
  0xce   :  { %v10444_v35 = vpop.permute.xlu1 %813 }
  0xd1   :  { %v10448_v38 = vpop.permute.xlu0 %842 }
  0xd2   :  { %v10482_v60 = vpop.permute.xlu1 %847 }
  0xe8   :  { %v271_v4 = vpop.f32.mrb[0].mxu0 }
  0xe9   :  { %v273_v5 = vpop.f32.mrb[1].mxu0  ;;  %v726_v22 = vmul.f32 %v10423_v3, %v271_v4 }
  0xea   :  { %v4544_v8 = vpop.f32.mrb[0].mxu1  ;;  %v727_v23 = vmul.f32 %v10423_v3, %v273_v5 }
  0xeb   :  { %v4546_v10 = vpop.f32.mrb[1].mxu1  ;;  %v4989_v26 = vmul.f32 %v4544_v8, %v10423_v3  ;;  %v748_v31 = vadd.f32 %v10425_v6, %v726_v22 }
  0xec   :  { %v4990_v29 = vmul.f32 %v4546_v10, %v10423_v3  ;;  %v749_v32 = vadd.f32 %v10425_v6, %v727_v23 }
  0xed   :  { %v277_v11 = vpop.f32.mrb[2].mxu0  ;;  %v5001_v36 = vadd.f32 %v4989_v26, %v10425_v6  ;;  %v10453_v41 = vmul.f32 %v10431_v16, %v748_v31  ;;  %v10456_v42 = vmul.f32 %v10448_v38, %v748_v31 }
  0xee   :  { %v279_v12 = vpop.f32.mrb[3].mxu0  ;;  %v4550_v13 = vpop.f32.mrb[2].mxu1  ;;  %v732_v34 = vmul.f32 %v10427_v9, %v277_v11  ;;  %v5002_v39 = vadd.f32 %v4990_v29, %v10425_v6  ;;  %v10459_v43 = vmul.f32 %v10431_v16, %v749_v32  ;;  %v10463_v46 = vmul.f32 %v10448_v38, %v749_v32 }
  0xef   :  { %v4552_v14 = vpop.f32.mrb[3].mxu1  ;;  %v733_v37 = vmul.f32 %v10427_v9, %v279_v12  ;;  %v4995_v40 = vmul.f32 %v4550_v13, %v10427_v9  ;;  %v10469_v52 = vmul.f32 %v5001_v36, %v10431_v16  ;;  %v10475_v58 = vmul.f32 %v5001_v36, %v10448_v38 }
  0xf0   :  { %v4996_v44 = vmul.f32 %v4552_v14, %v10427_v9  ;;  %v754_v47 = vadd.f32 %v10429_v15, %v732_v34  ;;  %v10478_v59 = vmul.f32 %v5002_v39, %v10431_v16  ;;  %v10485_v54 = vmul.f32 %v5002_v39, %v10448_v38 }
  0xf1   :  { %v755_v53 = vadd.f32 %v10429_v15, %v733_v37  ;;  %v5007_v7 = vadd.f32 %v4995_v40, %v10429_v15 }
  0xf2   :  { %v5008_v61 = vadd.f32 %v4996_v44, %v10429_v15  ;;  %v10493_v1 = vmul.f32 %v10433_v21, %v754_v47  ;;  %v10503_v11 = vmul.f32 %v10482_v60, %v754_v47 }
  0xf3   :  { %v348_v17 = vpop.f32.mrb[4].mxu0  ;;  %v10506_v12 = vmul.f32 %v10433_v21, %v755_v53 }
  0xf4   :  { %v4621_v18 = vpop.f32.mrb[4].mxu1  ;;  %v350_v19 = vpop.f32.mrb[5].mxu0  ;;  %v728_v48 = vmul.f32 %v10423_v3, %v348_v17  ;;  %v10523_v23 = vmul.f32 %v5008_v61, %v10433_v21 }
  0xf5   :  { %v4623_v20 = vpop.f32.mrb[5].mxu1  ;;  %v4991_v49 = vmul.f32 %v4621_v18, %v10423_v3  ;;  %v729_v55 = vmul.f32 %v10423_v3, %v350_v19  ;;  %v10513_v18 = vmul.f32 %v10482_v60, %v755_v53  ;;  %v10516_v19 = vmul.f32 %v5007_v7, %v10433_v21 }
  0xf6   :  { %v4992_v56 = vmul.f32 %v4623_v20, %v10423_v3  ;;  %v750_v2 = vadd.f32 %v10425_v6, %v728_v48  ;;  %v10519_v20 = vmul.f32 %v5007_v7, %v10482_v60 }
  0xf7   :  { %v354_v25 = vpop.f32.mrb[6].mxu0  ;;  %v5003_v4 = vadd.f32 %v4991_v49, %v10425_v6  ;;  %v751_v13 = vadd.f32 %v10425_v6, %v729_v55 }
  0xf8   :  { %v4627_v27 = vpop.f32.mrb[6].mxu1  ;;  %v356_v28 = vpop.f32.mrb[7].mxu0  ;;  %v734_v33 = vmul.f32 %v10427_v9, %v354_v25  ;;  %v5004_v14 = vadd.f32 %v4992_v56, %v10425_v6  ;;  %v10526_v25 = vmul.f32 %v5008_v61, %v10482_v60  ;;  %v10534_v29 = vmul.f32 %v10448_v38, %v750_v2 }
  0xf9   :  { %v4629_v30 = vpop.f32.mrb[7].mxu1  ;;  %v4997_v62 = vmul.f32 %v4627_v27, %v10427_v9  ;;  %v735_v63 = vmul.f32 %v10427_v9, %v356_v28  ;;  %v10531_v28 = vmul.f32 %v10431_v16, %v750_v2  ;;  %v10541_v32 = vmul.f32 %v5003_v4, %v10448_v38 }
  0xfa   :  { %v4998_v5 = vmul.f32 %v4629_v30, %v10427_v9  ;;  %v756_v22 = vadd.f32 %v10429_v15, %v734_v33  ;;  %v10537_v30 = vmul.f32 %v5003_v4, %v10431_v16  ;;  %v10544_v34 = vmul.f32 %v10431_v16, %v751_v13 }
  0xfb   :  { %v5009_v26 = vadd.f32 %v4997_v62, %v10429_v15  ;;  %v757_v27 = vadd.f32 %v10429_v15, %v735_v63  ;;  %v10547_v36 = vmul.f32 %v10448_v38, %v751_v13  ;;  %v10550_v37 = vmul.f32 %v5004_v14, %v10431_v16 }
  0xfc   :  { %v5010_v31 = vadd.f32 %v4998_v5, %v10429_v15  ;;  %v10553_v39 = vmul.f32 %v5004_v14, %v10448_v38  ;;  %v10556_v40 = vmul.f32 %v10433_v21, %v756_v22  ;;  %v10559_v44 = vmul.f32 %v10482_v60, %v756_v22  ;;  %v10586_v14 = vpop.permute.xlu0 %864 }
  0xfd   :  { %v10563_v49 = vmul.f32 %v5009_v26, %v10433_v21  ;;  %v10566_v53 = vmul.f32 %v5009_v26, %v10482_v60  ;;  %v10569_v55 = vmul.f32 %v10433_v21, %v757_v27  ;;  %v10573_v61 = vmul.f32 %v10482_v60, %v757_v27 }
  0xfe   :  { %v425_v45 = vpop.f32.mrb[8].mxu0  ;;  %v10576_v62 = vmul.f32 %v5010_v31, %v10433_v21  ;;  %v10581_v4 = vmul.f32 %v5010_v31, %v10482_v60 }
  0xff   :  { %v4698_v50 = vpop.f32.mrb[8].mxu1  ;;  %v427_v51 = vpop.f32.mrb[9].mxu0  ;;  %v730_v47 = vmul.f32 %v10423_v3, %v425_v45  ;;  %14285 = vst [vmem:[#allocation7_spill] sm:$0xff] %v10563_v49  ;;  %14286 = vst [vmem:[#allocation8_spill] sm:$0xff] %v10566_v53 }
 0x100   :  { %v4700_v57 = vpop.f32.mrb[9].mxu1  ;;  %14287 = vst [vmem:[#allocation9_spill] sm:$0xff] %v10569_v55  ;;  %v4993_v56 = vmul.f32 %v4698_v50, %v10423_v3  ;;  %14288 = vst [vmem:[#allocation10_spill] sm:$0xff] %v10573_v61  ;;  %v731_v5 = vmul.f32 %v10423_v3, %v427_v51 }
 0x101   :  { %14289 = vst [vmem:[#allocation11_spill] sm:$0xff] %v10576_v62  ;;  %14290 = vst [vmem:[#allocation12_spill] sm:$0xff] %v10581_v4  ;;  %v752_v22 = vadd.f32 %v10425_v6, %v730_v47  ;;  %v4994_v26 = vmul.f32 %v4700_v57, %v10423_v3 }
 0x102   :  { %v10490_v0 = vpop.f32.mrb[10].mxu0  ;;  %v5005_v31 = vadd.f32 %v4993_v56, %v10425_v6 }
 0x103   :  { %v10498_v8 = vpop.f32.mrb[10].mxu1  ;;  %v10500_v10 = vpop.f32.mrb[11].mxu0 }
 0x104   :  { %v10510_v17 = vpop.f32.mrb[11].mxu1 }
 0x109   :  { %v551_v48 = vpop.f32.mrb[12].mxu0 }
 0x10a   :  { %v4824_v7 = vpop.f32.mrb[12].mxu1  ;;  %v553_v33 = vpop.f32.mrb[13].mxu0  ;;  %v760_v45 = vmul.f32 %v10423_v3, %v551_v48 }
 0x10b   :  { %v5013_v63 = vmul.f32 %v4824_v7, %v10423_v3  ;;  %v4826_v2 = vpop.f32.mrb[13].mxu1  ;;  %v761_v50 = vmul.f32 %v10423_v3, %v553_v33 }
 0x10c   :  { %v5014_v13 = vmul.f32 %v4826_v2, %v10423_v3  ;;  %v772_v27 = vadd.f32 %v760_v45, %v10425_v6 }
 0x10d   :  { %v5025_v48 = vadd.f32 %v5013_v63, %v10425_v6  ;;  %v557_v7 = vpop.f32.mrb[14].mxu0  ;;  %v773_v4 = vadd.f32 %v761_v50, %v10425_v6 }
 0x10e   :  { %v5026_v51 = vadd.f32 %v5014_v13, %v10425_v6  ;;  %v766_v33 = vmul.f32 %v10427_v9, %v557_v7  ;;  %v4830_v2 = vpop.f32.mrb[14].mxu1  ;;  %v559_v62 = vpop.f32.mrb[15].mxu0  ;;  %v816_v61 = vmul.f32 %v10437_v24, %v772_v27  ;;  %v872_v47 = vmul.f32 %v10586_v14, %v772_v27 }
 0x10f   :  { %v5049_v57 = vmul.f32 %v5025_v48, %v10437_v24  ;;  %v5085_v45 = vmul.f32 %v5025_v48, %v10586_v14  ;;  %v4832_v63 = vpop.f32.mrb[15].mxu1  ;;  %v817_v55 = vmul.f32 %v10437_v24, %v773_v4  ;;  %v873_v56 = vmul.f32 %v10586_v14, %v773_v4 }
 0x110   :  { %v5050_v50 = vmul.f32 %v5026_v51, %v10437_v24  ;;  %v5086_v13 = vmul.f32 %v5026_v51, %v10586_v14  ;;  %v10605_v7 = vadd.f32 %v816_v61, %v10453_v41  ;;  %v10608_v53 = vadd.f32 %v872_v47, %v10456_v42 }
 0x111   :  { %v10611_v27 = vadd.f32 %v5049_v57, %v10469_v52  ;;  %v10614_v48 = vadd.f32 %v5085_v45, %v10475_v58  ;;  %v10617_v49 = vadd.f32 %v817_v55, %v10459_v43  ;;  %v10620_v4 = vadd.f32 %v873_v56, %v10463_v46  ;;  %v10635_v55 = vpop.permute.xlu1 %869 }
 0x112   :  { %v10623_v51 = vadd.f32 %v5050_v50, %v10478_v59  ;;  %v10626_v41 = vadd.f32 %v5086_v13, %v10485_v54  ;;  %v10629_v42 = vmul.f32 %v10431_v16, %v752_v22  ;;  %v753_v52 = vadd.f32 %v10425_v6, %v731_v5 }
 0x113   :  { %14291 = vst [vmem:[#allocation13_spill] sm:$0xff] %v10611_v27  ;;  %14292 = vst [vmem:[#allocation14_spill] sm:$0xff] %v10614_v48  ;;  %v5006_v58 = vadd.f32 %v4994_v26, %v10425_v6  ;;  %v736_v43 = vmul.f32 %v10427_v9, %v10490_v0  ;;  %v10638_v46 = vmul.f32 %v10448_v38, %v752_v22 }
 0x114   :  { %14293 = vst [vmem:[#allocation15_spill] sm:$0xff] %v10623_v51  ;;  %14294 = vst [vmem:[#allocation16_spill] sm:$0xff] %v10626_v41  ;;  %v10641_v59 = vmul.f32 %v5005_v31, %v10431_v16  ;;  %v778_v54 = vadd.f32 %v766_v33, %v10429_v15  ;;  %v5019_v61 = vmul.f32 %v4830_v2, %v10427_v9  ;;  %v628_v47 = vpop.f32.mrb[16].mxu0 }
 0x115   :  { %v10646_v5 = vmul.f32 %v5005_v31, %v10448_v38  ;;  %v767_v26 = vmul.f32 %v10427_v9, %v559_v62  ;;  %v5020_v0 = vmul.f32 %v4832_v63, %v10427_v9  ;;  %v762_v57 = vmul.f32 %v10423_v3, %v628_v47  ;;  %v4901_v45 = vpop.f32.mrb[16].mxu1  ;;  %v630_v22 = vpop.f32.mrb[17].mxu0 }
 0x116   :  { %v822_v56 = vmul.f32 %v10444_v35, %v778_v54  ;;  %v878_v50 = vmul.f32 %v10635_v55, %v778_v54  ;;  %v5031_v33 = vadd.f32 %v5019_v61, %v10429_v15  ;;  %v5015_v2 = vmul.f32 %v4901_v45, %v10423_v3  ;;  %v4903_v13 = vpop.f32.mrb[17].mxu1 }
 0x117   :  { %v779_v31 = vadd.f32 %v767_v26, %v10429_v15  ;;  %v5032_v48 = vadd.f32 %v5020_v0, %v10429_v15  ;;  %v774_v62 = vadd.f32 %v762_v57, %v10425_v6  ;;  %v763_v63 = vmul.f32 %v10423_v3, %v630_v22 }
 0x118   :  { %v10660_v47 = vadd.f32 %v822_v56, %v10493_v1  ;;  %v10663_v27 = vadd.f32 %v878_v50, %v10503_v11  ;;  %v5055_v54 = vmul.f32 %v5031_v33, %v10444_v35  ;;  %v5091_v61 = vmul.f32 %v5031_v33, %v10635_v55  ;;  %v634_v45 = vpop.f32.mrb[18].mxu0 }
 0x119   :  { %v823_v41 = vmul.f32 %v10444_v35, %v779_v31  ;;  %v879_v26 = vmul.f32 %v10635_v55, %v779_v31  ;;  %v5056_v0 = vmul.f32 %v5032_v48, %v10444_v35  ;;  %v5092_v57 = vmul.f32 %v5032_v48, %v10635_v55  ;;  %v4907_v22 = vpop.f32.mrb[18].mxu1  ;;  %v636_v51 = vpop.f32.mrb[19].mxu0 }
 0x11a   :  { %14295 = vst [vmem:[#allocation17_spill] sm:$0xff] %v10660_v47  ;;  %14296 = vst [vmem:[#allocation18_spill] sm:$0xff] %v10663_v27  ;;  %v10672_v1 = vmul.f32 %v10431_v16, %v753_v52  ;;  %v10675_v11 = vmul.f32 %v10448_v38, %v753_v52  ;;  %v10678_v56 = vadd.f32 %v5055_v54, %v10516_v19  ;;  %v4909_v33 = vpop.f32.mrb[19].mxu1 }
 0x11b   :  { %v10681_v50 = vadd.f32 %v5091_v61, %v10519_v20  ;;  %v10684_v31 = vadd.f32 %v823_v41, %v10506_v12  ;;  %v10687_v48 = vadd.f32 %v879_v26, %v10513_v18  ;;  %v10690_v27 = vadd.f32 %v5056_v0, %v10523_v23 }
 0x11c   :  { %14297 = vst [vmem:[#allocation19_spill] sm:$0xff] %v10678_v56  ;;  %v10693_v47 = vadd.f32 %v5092_v57, %v10526_v25  ;;  %v10696_v52 = vmul.f32 %v5006_v58, %v10431_v16  ;;  %v10699_v19 = vmul.f32 %v5006_v58, %v10448_v38  ;;  %v818_v20 = vmul.f32 %v10437_v24, %v774_v62 }
 0x11d   :  { %14298 = vst [vmem:[#allocation20_spill] sm:$0xff] %v10681_v50  ;;  %v874_v12 = vmul.f32 %v10586_v14, %v774_v62  ;;  %v758_v41 = vadd.f32 %v10429_v15, %v736_v43  ;;  %v4999_v18 = vmul.f32 %v10498_v8, %v10427_v9  ;;  %v5027_v23 = vadd.f32 %v5015_v2, %v10425_v6  ;;  %v14304_v50 = vld [vmem:[#allocation8_spill] sm:$0xff] }
 0x11e   :  { %14299 = vst [vmem:[#allocation21_spill] sm:$0xff] %v10693_v47  ;;  %v775_v25 = vadd.f32 %v763_v63, %v10425_v6  ;;  %v10709_v54 = vadd.f32 %v818_v20, %v10531_v28  ;;  %v5016_v38 = vmul.f32 %v4903_v13, %v10423_v3  ;;  %v768_v58 = vmul.f32 %v10427_v9, %v634_v45  ;;  %v14307_v47 = vld [vmem:[#allocation10_spill] sm:$0xff] }
 0x11f   :  { %v10712_v16 = vadd.f32 %v874_v12, %v10534_v29  ;;  %v5051_v62 = vmul.f32 %v5027_v23, %v10437_v24  ;;  %v5087_v43 = vmul.f32 %v5027_v23, %v10586_v14  ;;  %v705_v61 = vpop.f32.mrb[20].mxu0  ;;  %v5021_v29 = vmul.f32 %v4907_v22, %v10427_v9 }
 0x120   :  { %v819_v8 = vmul.f32 %v10437_v24, %v775_v25  ;;  %v875_v2 = vmul.f32 %v10586_v14, %v775_v25  ;;  %v5028_v63 = vadd.f32 %v5016_v38, %v10425_v6  ;;  %v780_v28 = vadd.f32 %v768_v58, %v10429_v15  ;;  %v4978_v13 = vpop.f32.mrb[20].mxu1  ;;  %v707_v0 = vpop.f32.mrb[21].mxu0 }
 0x121   :  { %v769_v26 = vmul.f32 %v10427_v9, %v636_v51  ;;  %v10725_v45 = vadd.f32 %v5051_v62, %v10537_v30  ;;  %v10728_v57 = vadd.f32 %v5087_v43, %v10541_v32  ;;  %v4980_v23 = vpop.f32.mrb[21].mxu1  ;;  %v10740_v30 = vpop.permute.xlu0 %898  ;;  %v737_v32 = vmul.f32 %v10427_v9, %v10500_v10 }
 0x122   :  { %v10731_v20 = vadd.f32 %v819_v8, %v10544_v34  ;;  %v10734_v12 = vadd.f32 %v875_v2, %v10547_v36  ;;  %v5052_v25 = vmul.f32 %v5028_v63, %v10437_v24  ;;  %v5088_v22 = vmul.f32 %v5028_v63, %v10586_v14 }
 0x123   :  { %14300 = vst [vmem:[#allocation22_spill] sm:$0xff] %v10728_v57  ;;  %v824_v51 = vmul.f32 %v10444_v35, %v780_v28  ;;  %v880_v38 = vmul.f32 %v10635_v55, %v780_v28  ;;  %v5000_v34 = vmul.f32 %v10510_v17, %v10427_v9  ;;  %v5033_v36 = vadd.f32 %v5021_v29, %v10429_v15  ;;  %v711_v62 = vpop.f32.mrb[22].mxu0  ;;  %v10780_v57 = vpop.permute.xlu1 %903 }
 0x124   :  { %v781_v58 = vadd.f32 %v769_v26, %v10429_v15  ;;  %v10749_v43 = vadd.f32 %v5052_v25, %v10550_v37  ;;  %v10752_v8 = vadd.f32 %v5088_v22, %v10553_v39  ;;  %v4984_v10 = vpop.f32.mrb[22].mxu1  ;;  %v713_v28 = vpop.f32.mrb[23].mxu0  ;;  %v804_v39 = vmul.f32 %v10433_v21, %v758_v41 }
 0x125   :  { %v10755_v2 = vadd.f32 %v824_v51, %v10556_v40  ;;  %v10758_v63 = vadd.f32 %v880_v38, %v10559_v44  ;;  %v5057_v17 = vmul.f32 %v5033_v36, %v10444_v35  ;;  %v5093_v29 = vmul.f32 %v5033_v36, %v10635_v55  ;;  %v4986_v25 = vpop.f32.mrb[23].mxu1  ;;  %v14303_v51 = vld [vmem:[#allocation7_spill] sm:$0xff]  ;;  %v14306_v36 = vld [vmem:[#allocation9_spill] sm:$0xff] }
 0x126   :  { %14301 = vst [vmem:[#allocation23_spill] sm:$0xff] %v10749_v43  ;;  %14302 = vst [vmem:[#allocation24_spill] sm:$0xff] %v10752_v8  ;;  %v825_v26 = vmul.f32 %v10444_v35, %v781_v58  ;;  %v881_v37 = vmul.f32 %v10635_v55, %v781_v58  ;;  %v860_v22 = vmul.f32 %v10482_v60, %v758_v41 }
 0x127   :  { %v5022_v40 = vmul.f32 %v4909_v33, %v10427_v9  ;;  %v764_v44 = vmul.f32 %v10423_v3, %v705_v61  ;;  %v10769_v38 = vadd.f32 %v5057_v17, %v14303_v51  ;;  %v10772_v56 = vadd.f32 %v5093_v29, %v14304_v50  ;;  %v10786_v51 = vpop.permute.xlu0 %908 }
 0x128   :  { %v10775_v8 = vadd.f32 %v825_v26, %v14306_v36  ;;  %v10778_v58 = vadd.f32 %v881_v37, %v14307_v47  ;;  %v5017_v61 = vmul.f32 %v4978_v13, %v10423_v3  ;;  %v765_v17 = vmul.f32 %v10423_v3, %v707_v0 }
 0x129   :  { %14305 = vst [vmem:[#allocation7_spill] sm:$0xff] %v10772_v56  ;;  %v5034_v41 = vadd.f32 %v5022_v40, %v10429_v15  ;;  %v776_v33 = vadd.f32 %v764_v44, %v10425_v6  ;;  %v5011_v50 = vadd.f32 %v4999_v18, %v10429_v15  ;;  %v759_v29 = vadd.f32 %v10429_v15, %v737_v32  ;;  %v14308_v56 = vld [vmem:[#allocation11_spill] sm:$0xff] }
 0x12a   :  { %v5018_v26 = vmul.f32 %v4980_v23, %v10423_v3  ;;  %v770_v47 = vmul.f32 %v10427_v9, %v711_v62  ;;  %v5029_v0 = vadd.f32 %v5017_v61, %v10425_v6  ;;  %v777_v36 = vadd.f32 %v765_v17, %v10425_v6  ;;  %v14309_v23 = vld [vmem:[#allocation12_spill] sm:$0xff] }
 0x12b   :  { %v5058_v37 = vmul.f32 %v5034_v41, %v10444_v35  ;;  %v5094_v40 = vmul.f32 %v5034_v41, %v10635_v55  ;;  %v820_v44 = vmul.f32 %v10437_v24, %v776_v33  ;;  %v876_v13 = vmul.f32 %v10586_v14, %v776_v33 }
 0x12c   :  { %v5030_v18 = vadd.f32 %v5018_v26, %v10425_v6  ;;  %v782_v32 = vadd.f32 %v770_v47, %v10429_v15  ;;  %v5053_v33 = vmul.f32 %v5029_v0, %v10437_v24  ;;  %v5089_v61 = vmul.f32 %v5029_v0, %v10586_v14  ;;  %v10816_v26 = vpop.permute.xlu1 %913 }
 0x12d   :  { %v10801_v3 = vadd.f32 %v5058_v37, %v14308_v56  ;;  %v10804_v62 = vadd.f32 %v5094_v40, %v14309_v23  ;;  %v10807_v41 = vadd.f32 %v820_v44, %v10629_v42  ;;  %v10810_v43 = vadd.f32 %v876_v13, %v10638_v46  ;;  %v10823_v37 = vpop.permute.xlu0 %942 }
 0x12e   :  { %v821_v6 = vmul.f32 %v10437_v24, %v777_v36  ;;  %v877_v17 = vmul.f32 %v10586_v14, %v777_v36  ;;  %v5012_v56 = vadd.f32 %v5000_v34, %v10429_v15  ;;  %v5054_v47 = vmul.f32 %v5030_v18, %v10437_v24 }
 0x12f   :  { %v5090_v42 = vmul.f32 %v5030_v18, %v10586_v14  ;;  %v917_v46 = vmul.f32 %v10740_v30, %v10617_v49  ;;  %v10826_v40 = vadd.f32 %v5053_v33, %v10641_v59  ;;  %v10829_v44 = vadd.f32 %v5089_v61, %v10646_v5 }
 0x130   :  { %v10832_v13 = vadd.f32 %v821_v6, %v10672_v1  ;;  %v10835_v34 = vadd.f32 %v877_v17, %v10675_v11  ;;  %v10838_v24 = vadd.f32 %v5054_v47, %v10696_v52  ;;  %v826_v49 = vmul.f32 %v10444_v35, %v782_v32 }
 0x131   :  { %v10841_v14 = vadd.f32 %v5090_v42, %v10699_v19  ;;  %v882_v59 = vmul.f32 %v10635_v55, %v782_v32  ;;  %v5047_v0 = vmul.f32 %v5011_v50, %v10433_v21  ;;  %v5083_v5 = vmul.f32 %v5011_v50, %v10482_v60  ;;  %v10870_v61 = vpop.permute.xlu0 %952 }
 0x132   :  { %v5023_v1 = vmul.f32 %v4984_v10, %v10427_v9  ;;  %v771_v36 = vmul.f32 %v10427_v9, %v713_v28  ;;  %v805_v11 = vmul.f32 %v10433_v21, %v759_v29  ;;  %v861_v52 = vmul.f32 %v10482_v60, %v759_v29  ;;  %v10861_v10 = vpop.permute.xlu1 %947 }
 0x133   :  { %v10851_v18 = vadd.f32 %v826_v49, %v804_v39  ;;  %v10853_v19 = vadd.f32 %v882_v59, %v860_v22  ;;  %v5024_v33 = vmul.f32 %v4986_v25, %v10427_v9  ;;  %v10859_v50 = vadd.f32 %v10823_v37, %v917_v46 }
 0x134   :  { %v5035_v23 = vadd.f32 %v5023_v1, %v10429_v15  ;;  %v783_v32 = vadd.f32 %v771_v36, %v10429_v15  ;;  %v5048_v28 = vmul.f32 %v5012_v56, %v10433_v21  ;;  %v929_v29 = vmul.f32 %v10786_v51, %v10620_v4 }
 0x135   :  { %v923_v39 = vmul.f32 %v10780_v57, %v10684_v31  ;;  %v918_v22 = vmul.f32 %v10740_v30, %v10709_v54  ;;  %v5036_v21 = vadd.f32 %v5024_v33, %v10429_v15  ;;  %v1009_v4 = vmin.f32 %v10859_v50, 0.0 }
 0x136   :  { %v5059_v9 = vmul.f32 %v5035_v23, %v10444_v35  ;;  %v5095_v25 = vmul.f32 %v5035_v23, %v10635_v55  ;;  %v827_v6 = vmul.f32 %v10444_v35, %v783_v32  ;;  %v883_v17 = vmul.f32 %v10635_v55, %v783_v32 }
 0x137   :  { %v10879_v47 = vadd.f32 %v10870_v61, %v929_v29  ;;  %v935_v31 = vmul.f32 %v10816_v26, %v10687_v48  ;;  %v5084_v59 = vmul.f32 %v5012_v56, %v10482_v60  ;;  %v5060_v15 = vmul.f32 %v5036_v21, %v10444_v35  ;;  %v10898_v48 = vpop.permute.xlu1 %957 }
 0x138   :  { %v10883_v54 = vadd.f32 %v5059_v9, %v5047_v0  ;;  %v10885_v42 = vadd.f32 %v5095_v25, %v5083_v5  ;;  %v10887_v46 = vadd.f32 %v827_v6, %v805_v11  ;;  %v10889_v49 = vadd.f32 %v883_v17, %v861_v52 }
 0x139   :  { %v5096_v1 = vmul.f32 %v5036_v21, %v10635_v55  ;;  %v1034_v36 = vmul.f32 1.442695, %v1009_v4  ;;  %v1021_v23 = vmin.f32 %v10879_v47, 0.0  ;;  %v10896_v32 = vadd.f32 %v10861_v10, %v923_v39 }
 0x13a   :  { %v10900_v0 = vadd.f32 %v5060_v15, %v5048_v28  ;;  %v962_v11 = vadd.f32 %v10823_v37, %v918_v22  ;;  %v10907_v55 = vadd.f32 %v10898_v48, %v935_v31  ;;  %v930_v28 = vmul.f32 %v10786_v51, %v10712_v16 }
 0x13b   :  { %v10902_v5 = vadd.f32 %v5096_v1, %v5084_v59  ;;  %9571 = vpow2.f32 %v1034_v36  ;;  %v1058_v60 = vmul.f32 1.442695, %v1021_v23  ;;  %v1015_v35 = vmin.f32 %v10896_v32, 0.0 }
 0x13c   :  { %v1010_v56 = vmin.f32 %v962_v11, 0.0  ;;  %v1027_v33 = vmin.f32 %v10907_v55, 0.0  ;;  %v919_v39 = vmul.f32 %v10740_v30, %v10731_v20  ;;  %v931_v22 = vmul.f32 %v10786_v51, %v10734_v12 }
 0x13d   :  { %14310 = vst [vmem:[#allocation8_spill] sm:$0xff] %v10902_v5  ;;  %9573 = vpow2.f32 %v1058_v60  ;;  %v1046_v52 = vmul.f32 1.442695, %v1015_v35  ;;  %v924_v25 = vmul.f32 %v10780_v57, %v10755_v2  ;;  %v974_v6 = vadd.f32 %v10870_v61, %v930_v28 }
 0x13e   :  { %v1036_v29 = vmul.f32 1.442695, %v1010_v56  ;;  %v1070_v9 = vmul.f32 1.442695, %v1027_v33  ;;  %v10920_v17 = vadd.f32 %v10823_v37, %v919_v39  ;;  %v10923_v21 = vadd.f32 %v10870_v61, %v931_v22 }
 0x13f   :  { %9575 = vpow2.f32 %v1046_v52  ;;  %v936_v16 = vmul.f32 %v10816_v26, %v10758_v63  ;;  %v1022_v20 = vmin.f32 %v974_v6, 0.0  ;;  %v10929_v4 = vadd.f32 %v10861_v10, %v924_v25 }
 0x140   :  { %9577 = vpow2.f32 %v1036_v29  ;;  %v1011_v12 = vmin.f32 %v10920_v17, 0.0  ;;  %v1023_v2 = vmin.f32 %v10923_v21, 0.0  ;;  %vm985_vm2 = vcmp.gt.f32.partialorder %v10859_v50, 0.0 }
 0x141   :  { %9579 = vpow2.f32 %v1070_v9  ;;  %v1060_v59 = vmul.f32 1.442695, %v1022_v20  ;;  %v10934_v36 = vadd.f32 %v10898_v48, %v936_v16  ;;  %v1016_v23 = vmin.f32 %v10929_v4, 0.0 }
 0x142   :  { %v1038_v15 = vmul.f32 1.442695, %v1011_v12  ;;  %v1062_v63 = vmul.f32 1.442695, %v1023_v2  ;;  %v925_v60 = vmul.f32 %v10780_v57, %v10775_v8  ;;  %vm997_vm3 = vcmp.gt.f32.partialorder %v10879_v47, 0.0 }
 0x143   :  { %9581 = vpow2.f32 %v1060_v59  ;;  %v1028_v29 = vmin.f32 %v10934_v36, 0.0  ;;  %v1048_v39 = vmul.f32 1.442695, %v1016_v23  ;;  %vm986_vm4 = vcmp.gt.f32.partialorder %v962_v11, 0.0 }
 0x144   :  { %9583 = vpow2.f32 %v1038_v15  ;;  %v10947_v8 = vadd.f32 %v10861_v10, %v925_v60  ;;  %vm991_vm5 = vcmp.gt.f32.partialorder %v10896_v32, 0.0  ;;  %v920_v12 = vmul.f32 %v10740_v30, %v10807_v41 }
 0x145   :  { %v9572_v31 = vpop.eup %9571  ;;  %9585 = vpow2.f32 %v1062_v63  ;;  %vm1003_vm6 = vcmp.gt.f32.partialorder %v10907_v55, 0.0  ;;  %vm998_vm7 = vcmp.gt.f32.partialorder %v974_v6, 0.0  ;;  %vm987_vm8 = vcmp.gt.f32.partialorder %v10920_v17, 0.0 }
 0x146   :  { %v8584_v1 = vadd.f32 -1.0, %v9572_v31  ;;  %9587 = vpow2.f32 %v1048_v39  ;;  %vm999_vm9 = vcmp.gt.f32.partialorder %v10923_v21, 0.0  ;;  %vm992_vm10 = vcmp.gt.f32.partialorder %v10929_v4, 0.0 }
 0x147   :  { %v9574_v35 = vpop.eup %9573  ;;  %vm1004_vm11 = vcmp.gt.f32.partialorder %v10934_v36, 0.0  ;;  %vm993_vm12 = vcmp.gt.f32.partialorder %v10947_v8, 0.0 }
 0x148   :  { %v10940_v56 = vsel %vm985_vm2, %v10859_v50, %v8584_v1  ;;  %v8596_v52 = vadd.f32 -1.0, %v9574_v35  ;;  %v937_v50 = vmul.f32 %v10816_v26, %v10778_v58  ;;  %v1072_v58 = vmul.f32 1.442695, %v1028_v29 }
 0x149   :  { %1136 = vrot.lane.b32.xlu0 %v10940_v56, %s14260_s8  ;;  %v9576_v33 = vpop.eup %9575  ;;  %v10971_v1 = vadd.f32 %v10823_v37, %v920_v12  ;;  %v921_v29 = vmul.f32 %v10740_v30, %v10832_v13  ;;  %v933_v13 = vmul.f32 %v10786_v51, %v10835_v34 }
 0x14a   :  { %v9578_v28 = vpop.eup %9577  ;;  %v10952_v22 = vsel %vm997_vm3, %v10879_v47, %v8596_v52  ;;  %v8590_v9 = vadd.f32 -1.0, %v9576_v33  ;;  %v1017_v47 = vmin.f32 %v10947_v8, 0.0  ;;  %v10962_v2 = vadd.f32 %v10898_v48, %v937_v50 }
 0x14b   :  { %v8585_v25 = vadd.f32 -1.0, %v9578_v28  ;;  %v9580_v16 = vpop.eup %9579  ;;  %9589 = vpow2.f32 %v1072_v58  ;;  %vm988_vm14 = vcmp.gt.f32.partialorder %v10971_v1, 0.0 }
 0x14c   :  { %v10965_v31 = vsel %vm991_vm5, %v10896_v32, %v8590_v9  ;;  %v8602_v59 = vadd.f32 -1.0, %v9580_v16  ;;  %v1050_v63 = vmul.f32 1.442695, %v1017_v47  ;;  %v1029_v23 = vmin.f32 %v10962_v2, 0.0 }
 0x14d   :  { %1144 = vrot.lane.b32.xlu0 %v10952_v22, %s14260_s8  ;;  %v1106_v20 = vsel %vm986_vm4, %v962_v11, %v8585_v25  ;;  %v9582_v15 = vpop.eup %9581  ;;  %v932_v32 = vmul.f32 %v10786_v51, %v10810_v43  ;;  %v1012_v43 = vmin.f32 %v10971_v1, 0.0  ;;  %v10997_v16 = vadd.f32 %v10823_v37, %v921_v29 }
 0x14e   :  { %1138 = vrot.lane.b32.xlu1 %v1106_v20, %s14260_s8  ;;  %v9584_v11 = vpop.eup %9583  ;;  %v8597_v41 = vadd.f32 -1.0, %v9582_v15  ;;  %v10977_v60 = vsel %vm1003_vm6, %v10907_v55, %v8602_v59  ;;  %9591 = vpow2.f32 %v1050_v63  ;;  %v1074_v28 = vmul.f32 1.442695, %v1029_v23 }
 0x14f   :  { %v8586_v52 = vadd.f32 -1.0, %v9584_v11  ;;  %v9586_v33 = vpop.eup %9585  ;;  %v10987_v55 = vadd.f32 %v10870_v61, %v932_v32  ;;  %v1040_v9 = vmul.f32 1.442695, %v1012_v43  ;;  %v1013_v47 = vmin.f32 %v10997_v16, 0.0 }
 0x150   :  { %v1118_v35 = vsel %vm998_vm7, %v974_v6, %v8597_v41  ;;  %v8598_v39 = vadd.f32 -1.0, %v9586_v33  ;;  %v9588_v50 = vpop.eup %9587  ;;  %9593 = vpow2.f32 %v1074_v28  ;;  %v926_v59 = vmul.f32 %v10780_v57, %v10851_v18 }
 0x151   :  { %1140 = vrot.lane.b32.xlu0 %v10965_v31, %s14260_s8  ;;  %v1107_v6 = vsel %vm987_vm8, %v10920_v17, %v8586_v52  ;;  %v1024_v25 = vmin.f32 %v10987_v55, 0.0  ;;  %v8591_v12 = vadd.f32 -1.0, %v9588_v50  ;;  %9595 = vpow2.f32 %v1040_v9 }
 0x152   :  { %1146 = vrot.lane.b32.xlu1 %v1118_v35, %s14260_s8  ;;  %v1119_v17 = vsel %vm999_vm9, %v10923_v21, %v8598_v39  ;;  %v1042_v63 = vmul.f32 1.442695, %v1013_v47  ;;  %v11015_v23 = vadd.f32 %v10861_v10, %v926_v59  ;;  %v938_v18 = vmul.f32 %v10816_v26, %v10853_v19 }
 0x153   :  { %v1064_v34 = vmul.f32 1.442695, %v1024_v25  ;;  %v1112_v21 = vsel %vm992_vm10, %v10929_v4, %v8591_v12  ;;  %v927_v28 = vmul.f32 %v10780_v57, %v10887_v46  ;;  %vm1005_vm13 = vcmp.gt.f32.partialorder %v10962_v2, 0.0 }
 0x154   :  { %v1018_v33 = vmin.f32 %v11015_v23, 0.0  ;;  %v982_v29 = vadd.f32 %v10898_v48, %v938_v18  ;;  %vm1000_vm15 = vcmp.gt.f32.partialorder %v10987_v55, 0.0  ;;  %vm989_vm0 = vcmp.gt.f32.partialorder %v10997_v16, 0.0 }
 0x155   :  { %1148 = vrot.lane.b32.xlu0 %v10977_v60, %s14260_s8  ;;  %v9590_v58 = vpop.eup %9589  ;;  %9597 = vpow2.f32 %v1064_v34  ;;  %v971_v50 = vadd.f32 %v10861_v10, %v927_v28  ;;  %vm994_vm2 = vcmp.gt.f32.partialorder %v11015_v23, 0.0  ;;  %vm55_vm6 = vcmask 490496  }
 0x156   :  { %1179 = vrot.lane.b32.xlu1 %v1107_v6, %s14193_s9  ;;  %v8603_v15 = vadd.f32 -1.0, %v9590_v58  ;;  %9599 = vpow2.f32 %v1042_v63  ;;  %v1030_v39 = vmin.f32 %v982_v29, 0.0  ;;  %vm1006_vm3 = vcmp.gt.f32.partialorder %v982_v29, 0.0 }
 0x157   :  { %vm995_vm4 = vcmp.gt.f32.partialorder %v971_v50, 0.0  ;;  %vm14220_vm7 = vcmask 867328   ;;  %vm14207_vm8 = vcmask 687104   ;;  %vm14204_vm10 = vcmask 506880  }
 0x158   :  { %v9592_v11 = vpop.eup %9591  ;;  %v1124_v4 = vsel %vm1004_vm11, %v10934_v36, %v8603_v15  ;;  %v1076_v25 = vmul.f32 1.442695, %v1030_v39 }
 0x159   :  { %1177 = vrot.lane.b32.xlu0 %v1106_v20, %s14193_s9  ;;  %v11004_v20 = vadd.f32 %v10870_v61, %v933_v13  ;;  %v8592_v32 = vadd.f32 -1.0, %v9592_v11  ;;  %v939_v13 = vmul.f32 %v10816_v26, %v10889_v49 }
 0x15a   :  { %1187 = vrot.lane.b32.xlu1 %v1119_v17, %s14193_s9 }
 0x15b   :  { %v1025_v41 = vmin.f32 %v11004_v20, 0.0  ;;  %v1113_v19 = vsel %vm993_vm12, %v10947_v8, %v8592_v32  ;;  %v983_v12 = vadd.f32 %v10898_v48, %v939_v13  ;;  %vm1001_vm1 = vcmp.gt.f32.partialorder %v11004_v20, 0.0 }
 0x15c   :  { %vm14201_vm12 = vcmask 326656  }
 0x15d   :  { %1185 = vrot.lane.b32.xlu0 %v1118_v35, %s14193_s9  ;;  %v9594_v35 = vpop.eup %9593  ;;  %v1066_v52 = vmul.f32 1.442695, %v1025_v41  ;;  %vm1007_vm5 = vcmp.gt.f32.partialorder %v983_v12, 0.0 }
 0x15e   :  { %1142 = vrot.lane.b32.xlu1 %v1112_v21, %s14260_s8  ;;  %v8604_v36 = vadd.f32 -1.0, %v9594_v35  ;;  %v9596_v43 = vpop.eup %9595 }
 0x15f   :  { %9601 = vpow2.f32 %v1066_v52  ;;  %v8587_v9 = vadd.f32 -1.0, %v9596_v43  ;;  %v9598_v8 = vpop.eup %9597 }
 0x160   :  { %v1125_v46 = vsel %vm1005_vm13, %v10962_v2, %v8604_v36  ;;  %v8599_v34 = vadd.f32 -1.0, %v9598_v8  ;;  %v9600_v47 = vpop.eup %9599  ;;  %v1031_v2 = vmin.f32 %v983_v12, 0.0 }
 0x161   :  { %1218 = vrot.lane.b32.xlu0 %v1107_v6, %s14190_s2  ;;  %v1052_v6 = vmul.f32 1.442695, %v1018_v33  ;;  %v1108_v58 = vsel %vm988_vm14, %v10971_v1, %v8587_v9  ;;  %v8588_v15 = vadd.f32 -1.0, %v9600_v47 }
 0x162   :  { %1150 = vrot.lane.b32.xlu1 %v1124_v4, %s14260_s8  ;;  %v1078_v1 = vmul.f32 1.442695, %v1031_v2 }
 0x163   :  { %9603 = vpow2.f32 %v1052_v6  ;;  %v1109_v11 = vsel %vm989_vm0, %v10997_v16, %v8588_v15  ;;  %vm14195_vm0 = vcmask 1047704  }
 0x164   :  { %9605 = vpow2.f32 %v1076_v25 }
 0x165   :  { %1226 = vrot.lane.b32.xlu0 %v1119_v17, %s14190_s2  ;;  %v1019_v17 = vmin.f32 %v971_v50, 0.0 }
 0x166   :  { %1183 = vrot.lane.b32.xlu1 %v1113_v19, %s14193_s9 }
 0x167   :  { %v1054_v49 = vmul.f32 1.442695, %v1019_v17 }
 0x169   :  { %1181 = vrot.lane.b32.xlu0 %v1112_v21, %s14193_s9  ;;  %v9602_v59 = vpop.eup %9601  ;;  %v1120_v21 = vsel %vm1000_vm15, %v10987_v55, %v8599_v34  ;;  %9607 = vpow2.f32 %v1054_v49  ;;  %vm14198_vm15 = vcmask 154624  }
 0x16a   :  { %1191 = vrot.lane.b32.xlu1 %v1125_v46, %s14193_s9  ;;  %v8600_v41 = vadd.f32 -1.0, %v9602_v59  ;;  %9609 = vpow2.f32 %v1078_v1  ;;  %v14311_v59 = vld [vmem:[#allocation17_spill] sm:$0xff] }
 0x16c   :  { %v1121_v55 = vsel %vm1001_vm1, %v11004_v20, %v8600_v41  ;;  %vm14192_vm1 = vcmask 334848  }
 0x16d   :  { %1189 = vrot.lane.b32.xlu0 %v1124_v4, %s14193_s9  ;;  %v9604_v63 = vpop.eup %9603  ;;  %s14199_s9 = smov 104  }
 0x16e   :  { %1220 = vrot.lane.b32.xlu1 %v1108_v58, %s14190_s2  ;;  %v8593_v18 = vadd.f32 -1.0, %v9604_v63  ;;  %v9606_v4 = vpop.eup %9605 }
 0x16f   :  { %v8605_v32 = vadd.f32 -1.0, %v9606_v4 }
 0x170   :  { %v1114_v16 = vsel %vm994_vm2, %v11015_v23, %v8593_v18  ;;  %vm1352_vm2 = vcmask 179200  }
 0x171   :  { %1222 = vrot.lane.b32.xlu0 %v1113_v19, %s14190_s2  ;;  %v1126_v52 = vsel %vm1006_vm3, %v982_v29, %v8605_v32  ;;  %v916_v29 = vmul.f32 %v10740_v30, %v10605_v7  ;;  %vm1392_vm3 = vcmask 1039360  }
 0x172   :  { %1228 = vrot.lane.b32.xlu1 %v1120_v21, %s14190_s2 }
 0x173   :  { %v9608_v35 = vpop.eup %9607  ;;  %v960_v9 = vadd.f32 %v10823_v37, %v916_v29 }
 0x174   :  { %v8594_v33 = vadd.f32 -1.0, %v9608_v35  ;;  %v9610_v20 = vpop.eup %9609 }
 0x175   :  { %1230 = vrot.lane.b32.xlu0 %v1125_v46, %s14190_s2  ;;  %v8606_v19 = vadd.f32 -1.0, %v9610_v20  ;;  %v1008_v17 = vmin.f32 %v960_v9, 0.0  ;;  %vm984_vm9 = vcmp.gt.f32.partialorder %v960_v9, 0.0 }
 0x176   :  { %1261 = vrot.lane.b32.xlu1 %v1109_v11, %s14188_s28  ;;  %v1115_v28 = vsel %vm995_vm4, %v971_v50, %v8594_v33  ;;  %v928_v50 = vmul.f32 %v10786_v51, %v10608_v53  ;;  %v14312_v11 = vld [vmem:[#allocation18_spill] sm:$0xff]  ;;  %vm1445_vm4 = vcmask 1031168  }
 0x177   :  { %v1127_v23 = vsel %vm1007_vm5, %v983_v12, %v8606_v19  ;;  %v1032_v47 = vmul.f32 1.442695, %v1008_v17  ;;  %v934_v41 = vmul.f32 %v10816_v26, %v14312_v11  ;;  %vm1498_vm5 = vcmask 1022976  }
 0x178   :  { %v972_v12 = vadd.f32 %v10870_v61, %v928_v50 }
 0x179   :  { %1259 = vrot.lane.b32.xlu0 %v1108_v58, %s14188_s28  ;;  %9611 = vpow2.f32 %v1032_v47 }
 0x17a   :  { %1269 = vrot.lane.b32.xlu1 %v1121_v55, %s14188_s28  ;;  %v1020_v49 = vmin.f32 %v972_v12, 0.0  ;;  %vm996_vm11 = vcmp.gt.f32.partialorder %v972_v12, 0.0 }
 0x17c   :  { %v1056_v15 = vmul.f32 1.442695, %v1020_v49 }
 0x17d   :  { %1267 = vrot.lane.b32.xlu0 %v1120_v21, %s14188_s28  ;;  %v922_v21 = vmul.f32 %v10780_v57, %v14311_v59 }
 0x17e   :  { %1224 = vrot.lane.b32.xlu1 %v1114_v16, %s14190_s2  ;;  %9613 = vpow2.f32 %v1056_v15 }
 0x17f   :  { %v11083_v63 = vadd.f32 %v10861_v10, %v922_v21 }
 0x181   :  { %1263 = vrot.lane.b32.xlu0 %v1114_v16, %s14188_s28  ;;  %v1014_v4 = vmin.f32 %v11083_v63, 0.0  ;;  %v11091_v16 = vadd.f32 %v10898_v48, %v934_v41  ;;  %vm990_vm13 = vcmp.gt.f32.partialorder %v11083_v63, 0.0 }
 0x182   :  { %1232 = vrot.lane.b32.xlu1 %v1126_v52, %s14190_s2  ;;  %s14196_s2 = smov 105  }
 0x183   :  { %v9612_v32 = vpop.eup %9611  ;;  %v1044_v33 = vmul.f32 1.442695, %v1014_v4  ;;  %v1026_v20 = vmin.f32 %v11091_v16, 0.0  ;;  %vm1002_vm14 = vcmp.gt.f32.partialorder %v11091_v16, 0.0 }
 0x184   :  { %v8583_v19 = vadd.f32 -1.0, %v9612_v32 }
 0x185   :  { %1271 = vrot.lane.b32.xlu0 %v1126_v52, %s14188_s28  ;;  %9615 = vpow2.f32 %v1044_v33  ;;  %v1068_v47 = vmul.f32 1.442695, %v1026_v20 }
 0x186   :  { %1265 = vrot.lane.b32.xlu1 %v1115_v28, %s14188_s28  ;;  %v9699_v28 = vld [vmem:[#allocation2] sm:$0xff]  ;;  %v1104_v49 = vsel %vm984_vm9, %v960_v9, %v8583_v19  ;;  %vm1604_vm9 = vcmask 1006592  }
 0x187   :  { %56 = vst.msk [vmem:[#allocation2 + $0x8] sm:$0xff] %vm55_vm6, %v9699_v28  ;;  %58 = vst.msk [vmem:[#allocation2 + $0x18] sm:$0xff] %vm55_vm6, %v9699_v28  ;;  %9617 = vpow2.f32 %v1068_v47 }
 0x188   :  { %60 = vst.msk [vmem:[#allocation2 + $0x28] sm:$0xff] %vm55_vm6, %v9699_v28  ;;  %62 = vst.msk [vmem:[#allocation2 + $0x38] sm:$0xff] %vm55_vm6, %v9699_v28  ;;  %vm1551_vm6 = vcmask 1014784  }
 0x18a   :  { %1273 = vrot.lane.b32.xlu1 %v1127_v23, %s14188_s28  ;;  %v9614_v23 = vpop.eup %9613  ;;  %s14225_s28 = smov 107  }
 0x18b   :  { %v8595_v21 = vadd.f32 -1.0, %v9614_v23 }
 0x18d   :  { %v1116_v33 = vsel %vm996_vm11, %v972_v12, %v8595_v21  ;;  %vm1657_vm11 = vcmask 998400  }
 0x1bb   :  { %v1137_v36 = vpop.permute.xlu0 %1136 }
 0x1bf   :  { %v1145_v43 = vpop.permute.xlu0 %1144 }
 0x1c0   :  { %v1139_v6 = vpop.permute.xlu1 %1138 }
 0x1c1   :  { %v1153_v17 = vsel %vm14220_vm7, %v1137_v36, %v1139_v6  ;;  %v1166_v59 = vmax.f32 %v10940_v56, %v1139_v6 }
 0x1c2   :  { %v1165_v11 = vmax.f32 %v1104_v49, %v1153_v17 }
 0x1c3   :  { %v11062_v39 = vpop.permute.xlu0 %1140 }
 0x1c4   :  { %v11068_v46 = vpop.permute.xlu1 %1146 }
 0x1c5   :  { %v1155_v32 = vsel %vm14220_vm7, %v1145_v43, %v11068_v46  ;;  %v1170_v56 = vmax.f32 %v10952_v22, %v11068_v46  ;;  %v9616_v22 = vpop.eup %9615 }
 0x1c6   :  { %v9618_v21 = vpop.eup %9617 }
 0x1c7   :  { %v11066_v13 = vpop.permute.xlu0 %1148 }
 0x1c8   :  { %v1180_v25 = vpop.permute.xlu1 %1179 }
 0x1c9   :  { %v1207_v28 = vmax.f32 %v1166_v59, %v1180_v25 }
 0x1cb   :  { %v1178_v8 = vpop.permute.xlu0 %1177 }
 0x1cc   :  { %v1188_v34 = vpop.permute.xlu1 %1187  ;;  %v1194_v15 = vsel %vm14207_vm8, %v1178_v8, %v1180_v25  ;;  %v1169_v8 = vmax.f32 %v1116_v33, %v1155_v32 }
 0x1cd   :  { %v1206_v36 = vmax.f32 %v1165_v11, %v1194_v15  ;;  %v1211_v17 = vmax.f32 %v1170_v56, %v1188_v34 }
 0x1cf   :  { %v1186_v58 = vpop.permute.xlu0 %1185 }
 0x1d0   :  { %v11074_v7 = vpop.permute.xlu1 %1142  ;;  %v1196_v6 = vsel %vm14207_vm8, %v1186_v58, %v1188_v34 }
 0x1d1   :  { %v1210_v49 = vmax.f32 %v1169_v8, %v1196_v6  ;;  %v1154_v11 = vsel %vm14220_vm7, %v11062_v39, %v11074_v7  ;;  %v1168_v32 = vmax.f32 %v10965_v31, %v11074_v7 }
 0x1d3   :  { %v1219_v2 = vpop.permute.xlu0 %1218 }
 0x1d4   :  { %v11078_v1 = vpop.permute.xlu1 %1150 }
 0x1d5   :  { %v1156_v6 = vsel %vm14220_vm7, %v11066_v13, %v11078_v1  ;;  %v1172_v7 = vmax.f32 %v10977_v60, %v11078_v1 }
 0x1d7   :  { %v1227_v53 = vpop.permute.xlu0 %1226 }
 0x1d8   :  { %v11087_v18 = vpop.permute.xlu1 %1183 }
 0x1d9   :  { %v1209_v39 = vmax.f32 %v1168_v32, %v11087_v18 }
 0x1db   :  { %v11085_v55 = vpop.permute.xlu0 %1181 }
 0x1dc   :  { %v11095_v52 = vpop.permute.xlu1 %1191 }
 0x1df   :  { %v11093_v35 = vpop.permute.xlu0 %1189 }
 0x1e0   :  { %v1221_v50 = vpop.permute.xlu1 %1220 }
 0x1e1   :  { %v1235_v5 = vsel %vm14204_vm10, %v1219_v2, %v1221_v50  ;;  %v1248_v9 = vmax.f32 %v1207_v28, %v1221_v50  ;;  %v8601_v28 = vadd.f32 -1.0, %v9618_v21 }
 0x1e2   :  { %v1247_v20 = vmax.f32 %v1206_v36, %v1235_v5  ;;  %v1195_v36 = vsel %vm14207_vm8, %v11085_v55, %v11087_v18  ;;  %v1197_v55 = vsel %vm14207_vm8, %v11093_v35, %v11095_v52  ;;  %v1213_v18 = vmax.f32 %v1172_v7, %v11095_v52 }
 0x1e3   :  { %v1223_v29 = vpop.permute.xlu0 %1222  ;;  %v1122_v31 = vsel %vm1002_vm14, %v11091_v16, %v8601_v28  ;;  %vm1763_vm14 = vcmask 982016   ;;  %vm14209_vm8 = vcmask 932864  }
 0x1e4   :  { %v1229_v4 = vpop.permute.xlu1 %1228 }
 0x1e5   :  { %v1237_v43 = vsel %vm14204_vm10, %v1227_v53, %v1229_v4  ;;  %v1252_v59 = vmax.f32 %v1211_v17, %v1229_v4  ;;  %v8589_v53 = vadd.f32 -1.0, %v9616_v22 }
 0x1e6   :  { %v1251_v46 = vmax.f32 %v1210_v49, %v1237_v43 }
 0x1e7   :  { %v1231_v41 = vpop.permute.xlu0 %1230  ;;  %v1110_v4 = vsel %vm990_vm13, %v11083_v63, %v8589_v53  ;;  %vm1710_vm13 = vcmask 990208  }
 0x1e8   :  { %v1262_v23 = vpop.permute.xlu1 %1261  ;;  %v1167_v33 = vmax.f32 %v1110_v4, %v1154_v11 }
 0x1e9   :  { %v1289_v2 = vmax.f32 %v1248_v9, %v1262_v23 }
 0x1ea   :  { %v1208_v63 = vmax.f32 %v1167_v33, %v1195_v36 }
 0x1eb   :  { %v1260_v19 = vpop.permute.xlu0 %1259  ;;  %1306 = vrot.lane.b32.xlu1 %v1289_v2, %s14186_s5 }
 0x1ec   :  { %v1276_v25 = vsel %vm14201_vm12, %v1260_v19, %v1262_v23  ;;  %v1270_v58 = vpop.permute.xlu1 %1269  ;;  %v1171_v19 = vmax.f32 %v1122_v31, %v1156_v6 }
 0x1ed   :  { %v1288_v47 = vmax.f32 %v1247_v20, %v1276_v25  ;;  %v1293_v34 = vmax.f32 %v1252_v59, %v1270_v58 }
 0x1ee   :  { %v1212_v25 = vmax.f32 %v1171_v19, %v1197_v55 }
 0x1ef   :  { %v1268_v12 = vpop.permute.xlu0 %1267  ;;  %1304 = vrot.lane.b32.xlu0 %v1288_v47, %s14186_s5  ;;  %1314 = vrot.lane.b32.xlu1 %v1293_v34, %s14186_s5 }
 0x1f0   :  { %v1278_v5 = vsel %vm14201_vm12, %v1268_v12, %v1270_v58  ;;  %v1225_v15 = vpop.permute.xlu1 %1224 }
 0x1f1   :  { %v1292_v50 = vmax.f32 %v1251_v46, %v1278_v5  ;;  %v1236_v9 = vsel %vm14204_vm10, %v1223_v29, %v1225_v15  ;;  %v1250_v20 = vmax.f32 %v1209_v39, %v1225_v15 }
 0x1f2   :  { %v1249_v13 = vmax.f32 %v1208_v63, %v1236_v9 }
 0x1f3   :  { %1312 = vrot.lane.b32.xlu0 %v1292_v50, %s14186_s5  ;;  %v1264_v8 = vpop.permute.xlu0 %1263 }
 0x1f4   :  { %v1233_v56 = vpop.permute.xlu1 %1232 }
 0x1f5   :  { %v1238_v29 = vsel %vm14204_vm10, %v1231_v41, %v1233_v56  ;;  %v1254_v2 = vmax.f32 %v1213_v18, %v1233_v56  ;;  %vm14208_vm10 = vcmask 941056  }
 0x1f6   :  { %v1253_v1 = vmax.f32 %v1212_v25, %v1238_v29 }
 0x1f7   :  { %v1272_v60 = vpop.permute.xlu0 %1271 }
 0x1f8   :  { %v1266_v23 = vpop.permute.xlu1 %1265 }
 0x1f9   :  { %v1277_v17 = vsel %vm14201_vm12, %v1264_v8, %v1266_v23  ;;  %v1291_v43 = vmax.f32 %v1250_v20, %v1266_v23 }
 0x1fa   :  { %v1290_v16 = vmax.f32 %v1249_v13, %v1277_v17 }
 0x1fb   :  { %1310 = vrot.lane.b32.xlu1 %v1291_v43, %s14186_s5 }
 0x1fc   :  { %1308 = vrot.lane.b32.xlu0 %v1290_v16, %s14186_s5  ;;  %v1274_v35 = vpop.permute.xlu1 %1273 }
 0x1fd   :  { %v1279_v49 = vsel %vm14201_vm12, %v1272_v60, %v1274_v35  ;;  %v1295_v47 = vmax.f32 %v1254_v2, %v1274_v35  ;;  %vm14236_vm12 = vcmask 949248  }
 0x1fe   :  { %v1294_v59 = vmax.f32 %v1253_v1, %v1279_v49 }
 0x1ff   :  { %1318 = vrot.lane.b32.xlu1 %v1295_v47, %s14186_s5 }
 0x200   :  { %1316 = vrot.lane.b32.xlu0 %v1294_v59, %s14186_s5  ;;  %s14227_s5 = smov 108  }
 0x25d   :  { %v1307_v52 = vpop.permute.xlu1 %1306 }
 0x261   :  { %v1305_v41 = vpop.permute.xlu0 %1304  ;;  %v1315_v46 = vpop.permute.xlu1 %1314 }
 0x262   :  { %v1321_v22 = vsel %vm14198_vm15, %v1305_v41, %v1307_v52  ;;  %1334 = vst.msk [vmem:[#allocation2] sm:$0xff] %vm14195_vm0, %v1305_v41 }
 0x263   :  { %1336 = vst.msk [vmem:[#allocation2 + $0x8] sm:$0xff] %vm14192_vm1, %v1321_v22 }
 0x265   :  { %v1313_v12 = vpop.permute.xlu0 %1312 }
 0x266   :  { %v1323_v58 = vsel %vm14198_vm15, %v1313_v12, %v1315_v46  ;;  %1339 = vst.msk [vmem:[#allocation2 + $0x20] sm:$0xff] %vm14195_vm0, %v1313_v12 }
 0x267   :  { %1340 = vst.msk [vmem:[#allocation2 + $0x28] sm:$0xff] %vm14192_vm1, %v1323_v58 }
 0x269   :  { %v11150_v5 = vld [vmem:[#allocation2] sm:$0xff] }
 0x26a   :  { %1376 = vrot.lane.b32.xlu0 %v11150_v5, %s9770_s29  ;;  %v11154_v34 = vld [vmem:[#allocation2 + $0x8] sm:$0xff] }
 0x26b   :  { %1378 = vrot.lane.b32.xlu1 %v11154_v34, %s9770_s29  ;;  %1353 = vst.msk [vmem:[#allocation3 + $0x8] sm:$0xff] %vm1352_vm2, %v11154_v34 }
 0x26d   :  { %v11160_v50 = vld [vmem:[#allocation2 + $0x20] sm:$0xff]  ;;  %v1311_v21 = vpop.permute.xlu1 %1310 }
 0x26e   :  { %1384 = vrot.lane.b32.xlu0 %v11160_v50, %s9770_s29  ;;  %v11164_v53 = vld [vmem:[#allocation2 + $0x28] sm:$0xff]  ;;  %v1309_v15 = vpop.permute.xlu0 %1308 }
 0x26f   :  { %1386 = vrot.lane.b32.xlu1 %v11164_v53, %s9770_s29  ;;  %1357 = vst.msk [vmem:[#allocation3 + $0x28] sm:$0xff] %vm1352_vm2, %v11164_v53  ;;  %v1322_v11 = vsel %vm14198_vm15, %v1309_v15, %v1311_v21 }
 0x270   :  { %1337 = vst.msk [vmem:[#allocation2 + $0x10] sm:$0xff] %vm14195_vm0, %v1309_v15 }
 0x271   :  { %1338 = vst.msk [vmem:[#allocation2 + $0x18] sm:$0xff] %vm14192_vm1, %v1322_v11  ;;  %v1319_v4 = vpop.permute.xlu1 %1318 }
 0x272   :  { %1429 = vrot.lane.b32.xlu0 %v11150_v5, %s9771_s30  ;;  %v1317_v32 = vpop.permute.xlu0 %1316  ;;  %v3374_v6 = vld [vmem:[#allocation3 + $0x8] sm:$0xff] }
 0x273   :  { %1431 = vrot.lane.b32.xlu1 %v11154_v34, %s9771_s30  ;;  %v1324_v28 = vsel %vm14198_vm15, %v1317_v32, %v1319_v4  ;;  %1341 = vst.msk [vmem:[#allocation2 + $0x30] sm:$0xff] %vm14195_vm0, %v1317_v32  ;;  %vm14269_vm0 = vcmask 965632   ;;  %vm14235_vm15 = vcmask 957440  }
 0x274   :  { %1342 = vst.msk [vmem:[#allocation2 + $0x38] sm:$0xff] %vm14192_vm1, %v1324_v28  ;;  %vm14270_vm1 = vcmask 973824  }
 0x276   :  { %1437 = vrot.lane.b32.xlu0 %v11160_v50, %s9771_s30  ;;  %v3378_v31 = vld [vmem:[#allocation3 + $0x28] sm:$0xff] }
 0x277   :  { %1439 = vrot.lane.b32.xlu1 %v11164_v53, %s9771_s30  ;;  %v11200_v56 = vld [vmem:[#allocation2 + $0x10] sm:$0xff] }
 0x278   :  { %v11186_v36 = vld [vmem:[#allocation2 + $0x18] sm:$0xff]  ;;  %v8790_v63 = vpack.c.bf16 %v11200_v56, %v11150_v5 }
 0x279   :  { %1355 = vst.msk [vmem:[#allocation3 + $0x18] sm:$0xff] %vm1352_vm2, %v11186_v36 }
 0x27a   :  { %1482 = vrot.lane.b32.xlu0 %v11150_v5, %s9772_s0  ;;  %v11208_v8 = vld [vmem:[#allocation2 + $0x30] sm:$0xff] }
 0x27b   :  { %1484 = vrot.lane.b32.xlu1 %v11154_v34, %s9772_s0  ;;  %v11194_v33 = vld [vmem:[#allocation2 + $0x38] sm:$0xff]  ;;  %v8794_v20 = vpack.c.bf16 %v11208_v8, %v11160_v50 }
 0x27c   :  { %1359 = vst.msk [vmem:[#allocation3 + $0x38] sm:$0xff] %vm1352_vm2, %v11194_v33 }
 0x27e   :  { %1490 = vrot.lane.b32.xlu0 %v11160_v50, %s9772_s0 }
 0x27f   :  { %1492 = vrot.lane.b32.xlu1 %v11164_v53, %s9772_s0 }
 0x280   :  { %v3376_v39 = vld [vmem:[#allocation3 + $0x18] sm:$0xff] }
 0x281   :  { %v8788_v9 = vpack.c.bf16 %v3376_v39, %v3374_v6 }
 0x282   :  { %1535 = vrot.lane.b32.xlu0 %v11150_v5, %s9773_s1 }
 0x283   :  { %1537 = vrot.lane.b32.xlu1 %v11154_v34, %s9773_s1  ;;  %8789 = vmatprep.subr.bf16.mxu0 %v8788_v9  ;;  %v3380_v7 = vld [vmem:[#allocation3 + $0x38] sm:$0xff] }
 0x284   :  { %8791 = vmatpush1.bf16.msra.mxu0 %v8790_v63  ;;  %v8792_v55 = vpack.c.bf16 %v3380_v7, %v3378_v31 }
 0x286   :  { %1543 = vrot.lane.b32.xlu0 %v11160_v50, %s9773_s1  ;;  %8793 = vmatprep.subr.bf16.mxu0 %v8792_v55 }
 0x287   :  { %1545 = vrot.lane.b32.xlu1 %v11164_v53, %s9773_s1 }
 0x288   :  { %8795 = vmatpush1.bf16.msra.mxu0 %v8794_v20 }
 0x28a   :  { %1588 = vrot.lane.b32.xlu0 %v11150_v5, %s14217_s3 }
 0x28b   :  { %1590 = vrot.lane.b32.xlu1 %v11154_v34, %s14217_s3 }
 0x28e   :  { %1596 = vrot.lane.b32.xlu0 %v11160_v50, %s14217_s3 }
 0x28f   :  { %1598 = vrot.lane.b32.xlu1 %v11164_v53, %s14217_s3 }
 0x292   :  { %1641 = vrot.lane.b32.xlu0 %v11150_v5, %s14215_s6 }
 0x293   :  { %1643 = vrot.lane.b32.xlu1 %v11154_v34, %s14215_s6 }
 0x296   :  { %1649 = vrot.lane.b32.xlu0 %v11160_v50, %s14215_s6 }
 0x297   :  { %1651 = vrot.lane.b32.xlu1 %v11164_v53, %s14215_s6 }
 0x29a   :  { %1694 = vrot.lane.b32.xlu0 %v11150_v5, %s9776_s17 }
 0x29b   :  { %1696 = vrot.lane.b32.xlu1 %v11154_v34, %s9776_s17 }
 0x29e   :  { %1702 = vrot.lane.b32.xlu0 %v11160_v50, %s9776_s17 }
 0x29f   :  { %1704 = vrot.lane.b32.xlu1 %v11164_v53, %s9776_s17 }
 0x2a2   :  { %1747 = vrot.lane.b32.xlu0 %v11150_v5, %s9777_s18 }
 0x2a3   :  { %1749 = vrot.lane.b32.xlu1 %v11154_v34, %s9777_s18 }
 0x2a6   :  { %1755 = vrot.lane.b32.xlu0 %v11160_v50, %s9777_s18 }
 0x2a7   :  { %1757 = vrot.lane.b32.xlu1 %v11164_v53, %s9777_s18 }
 0x2aa   :  { %1800 = vrot.lane.b32.xlu0 %v11150_v5, %s9778_s19 }
 0x2ab   :  { %1802 = vrot.lane.b32.xlu1 %v11154_v34, %s9778_s19 }
 0x2ae   :  { %1808 = vrot.lane.b32.xlu0 %v11160_v50, %s9778_s19 }
 0x2af   :  { %1810 = vrot.lane.b32.xlu1 %v11164_v53, %s9778_s19 }
 0x2b2   :  { %1853 = vrot.lane.b32.xlu0 %v11150_v5, %s9779_s20 }
 0x2b3   :  { %1855 = vrot.lane.b32.xlu1 %v11154_v34, %s9779_s20 }
 0x2b6   :  { %1861 = vrot.lane.b32.xlu0 %v11160_v50, %s9779_s20 }
 0x2b7   :  { %1863 = vrot.lane.b32.xlu1 %v11164_v53, %s9779_s20 }
 0x2ba   :  { %1906 = vrot.lane.b32.xlu0 %v11150_v5, %s9780_s21 }
 0x2bb   :  { %1908 = vrot.lane.b32.xlu1 %v11154_v34, %s9780_s21 }
 0x2be   :  { %1914 = vrot.lane.b32.xlu0 %v11160_v50, %s9780_s21 }
 0x2bf   :  { %1916 = vrot.lane.b32.xlu1 %v11164_v53, %s9780_s21 }
 0x2c2   :  { %1959 = vrot.lane.b32.xlu0 %v11150_v5, %s9781_s7 }
 0x2c3   :  { %1961 = vrot.lane.b32.xlu1 %v11154_v34, %s9781_s7 }
 0x2c6   :  { %1967 = vrot.lane.b32.xlu0 %v11160_v50, %s9781_s7 }
 0x2c7   :  { %1969 = vrot.lane.b32.xlu1 %v11164_v53, %s9781_s7 }
 0x2ca   :  { %2012 = vrot.lane.b32.xlu0 %v11150_v5, %s14279_s22 }
 0x2cb   :  { %2014 = vrot.lane.b32.xlu1 %v11154_v34, %s14279_s22 }
 0x2ce   :  { %2020 = vrot.lane.b32.xlu0 %v11160_v50, %s14279_s22 }
 0x2cf   :  { %2022 = vrot.lane.b32.xlu1 %v11164_v53, %s14279_s22 }
 0x2d2   :  { %2065 = vrot.lane.b32.xlu0 %v11150_v5, %s14277_s24 }
 0x2d3   :  { %2067 = vrot.lane.b32.xlu1 %v11154_v34, %s14277_s24 }
 0x2d6   :  { %2073 = vrot.lane.b32.xlu0 %v11160_v50, %s14277_s24 }
 0x2d7   :  { %2075 = vrot.lane.b32.xlu1 %v11164_v53, %s14277_s24 }
 0x2da   :  { %2118 = vrot.lane.b32.xlu0 %v11150_v5, %s14275_s25 }
 0x2db   :  { %2120 = vrot.lane.b32.xlu1 %v11154_v34, %s14275_s25 }
 0x2dc   :  { %v1377_v19 = vpop.permute.xlu0 %1376 }
 0x2dd   :  { %v1379_v13 = vpop.permute.xlu1 %1378 }
 0x2de   :  { %v1393_v23 = vsel %vm1392_vm3, %v1377_v19, %v1379_v13  ;;  %1406 = vst.msk [vmem:[#allocation3 + $0x48] sm:$0xff] %vm1352_vm2, %v1379_v13  ;;  %2126 = vrot.lane.b32.xlu0 %v11160_v50, %s14275_s25 }
 0x2df   :  { %1405 = vst [vmem:[#allocation3 + $0x40] sm:$0xff] %v1393_v23  ;;  %2128 = vrot.lane.b32.xlu1 %v11164_v53, %s14275_s25 }
 0x2e0   :  { %v1385_v18 = vpop.permute.xlu0 %1384 }
 0x2e1   :  { %v1387_v29 = vpop.permute.xlu1 %1386 }
 0x2e2   :  { %v1395_v17 = vsel %vm1392_vm3, %v1385_v18, %v1387_v29  ;;  %1410 = vst.msk [vmem:[#allocation3 + $0x68] sm:$0xff] %vm1352_vm2, %v1387_v29  ;;  %2171 = vrot.lane.b32.xlu0 %v11150_v5, %s14273_s4 }
 0x2e3   :  { %1409 = vst [vmem:[#allocation3 + $0x60] sm:$0xff] %v1395_v17  ;;  %2173 = vrot.lane.b32.xlu1 %v11154_v34, %s14273_s4 }
 0x2e4   :  { %v1430_v43 = vpop.permute.xlu0 %1429 }
 0x2e5   :  { %v1432_v25 = vpop.permute.xlu1 %1431 }
 0x2e6   :  { %v1446_v16 = vsel %vm1445_vm4, %v1430_v43, %v1432_v25  ;;  %1459 = vst.msk [vmem:[#allocation3 + $0x88] sm:$0xff] %vm1352_vm2, %v1432_v25  ;;  %2179 = vrot.lane.b32.xlu0 %v11160_v50, %s14273_s4 }
 0x2e7   :  { %1458 = vst [vmem:[#allocation3 + $0x80] sm:$0xff] %v1446_v16  ;;  %2181 = vrot.lane.b32.xlu1 %v11164_v53, %s14273_s4 }
 0x2e8   :  { %v1438_v2 = vpop.permute.xlu0 %1437 }
 0x2e9   :  { %v1440_v60 = vpop.permute.xlu1 %1439 }
 0x2ea   :  { %v1448_v1 = vsel %vm1445_vm4, %v1438_v2, %v1440_v60  ;;  %1463 = vst.msk [vmem:[#allocation3 + $0xa8] sm:$0xff] %vm1352_vm2, %v1440_v60  ;;  %2224 = vrot.lane.b32.xlu0 %v11150_v5, %s14233_s26 }
 0x2eb   :  { %1462 = vst [vmem:[#allocation3 + $0xa0] sm:$0xff] %v1448_v1  ;;  %2226 = vrot.lane.b32.xlu1 %v11154_v34, %s14233_s26 }
 0x2ec   :  { %v1483_v35 = vpop.permute.xlu0 %1482 }
 0x2ed   :  { %v1485_v49 = vpop.permute.xlu1 %1484 }
 0x2ee   :  { %v1499_v47 = vsel %vm1498_vm5, %v1483_v35, %v1485_v49  ;;  %1512 = vst.msk [vmem:[#allocation3 + $0xc8] sm:$0xff] %vm1352_vm2, %v1485_v49  ;;  %2232 = vrot.lane.b32.xlu0 %v11160_v50, %s14233_s26 }
 0x2ef   :  { %1511 = vst [vmem:[#allocation3 + $0xc0] sm:$0xff] %v1499_v47  ;;  %2234 = vrot.lane.b32.xlu1 %v11164_v53, %s14233_s26 }
 0x2f0   :  { %v1491_v59 = vpop.permute.xlu0 %1490 }
 0x2f1   :  { %v1493_v52 = vpop.permute.xlu1 %1492 }
 0x2f2   :  { %v1501_v41 = vsel %vm1498_vm5, %v1491_v59, %v1493_v52  ;;  %1516 = vst.msk [vmem:[#allocation3 + $0xe8] sm:$0xff] %vm1352_vm2, %v1493_v52  ;;  %2277 = vrot.lane.b32.xlu0 %v11150_v5, %s14231_s23 }
 0x2f3   :  { %1515 = vst [vmem:[#allocation3 + $0xe0] sm:$0xff] %v1501_v41  ;;  %2279 = vrot.lane.b32.xlu1 %v11154_v34, %s14231_s23 }
 0x2f4   :  { %v1536_v22 = vpop.permute.xlu0 %1535 }
 0x2f5   :  { %v1538_v46 = vpop.permute.xlu1 %1537 }
 0x2f6   :  { %v1552_v12 = vsel %vm1551_vm6, %v1536_v22, %v1538_v46  ;;  %1565 = vst.msk [vmem:[#allocation3 + $0x108] sm:$0xff] %vm1352_vm2, %v1538_v46  ;;  %2285 = vrot.lane.b32.xlu0 %v11160_v50, %s14231_s23 }
 0x2f7   :  { %1564 = vst [vmem:[#allocation3 + $0x100] sm:$0xff] %v1552_v12  ;;  %2287 = vrot.lane.b32.xlu1 %v11164_v53, %s14231_s23 }
 0x2f8   :  { %v1544_v58 = vpop.permute.xlu0 %1543 }
 0x2f9   :  { %v1546_v21 = vpop.permute.xlu1 %1545 }
 0x2fa   :  { %v1554_v15 = vsel %vm1551_vm6, %v1544_v58, %v1546_v21  ;;  %1569 = vst.msk [vmem:[#allocation3 + $0x128] sm:$0xff] %vm1352_vm2, %v1546_v21  ;;  %2330 = vrot.lane.b32.xlu0 %v11150_v5, %s14229_s27 }
 0x2fb   :  { %1568 = vst [vmem:[#allocation3 + $0x120] sm:$0xff] %v1554_v15  ;;  %2332 = vrot.lane.b32.xlu1 %v11154_v34, %s14229_s27 }
 0x2fc   :  { %v1589_v11 = vpop.permute.xlu0 %1588 }
 0x2fd   :  { %v1591_v4 = vpop.permute.xlu1 %1590 }
 0x2fe   :  { %v1605_v32 = vsel %vm1604_vm9, %v1589_v11, %v1591_v4  ;;  %1618 = vst.msk [vmem:[#allocation3 + $0x148] sm:$0xff] %vm1352_vm2, %v1591_v4  ;;  %2338 = vrot.lane.b32.xlu0 %v11160_v50, %s14229_s27 }
 0x2ff   :  { %1617 = vst [vmem:[#allocation3 + $0x140] sm:$0xff] %v1605_v32  ;;  %2340 = vrot.lane.b32.xlu1 %v11164_v53, %s14229_s27 }
 0x300   :  { %v1597_v28 = vpop.permute.xlu0 %1596 }
 0x301   :  { %v1599_v6 = vpop.permute.xlu1 %1598 }
 0x302   :  { %v1607_v39 = vsel %vm1604_vm9, %v1597_v28, %v1599_v6  ;;  %1622 = vst.msk [vmem:[#allocation3 + $0x168] sm:$0xff] %vm1352_vm2, %v1599_v6  ;;  %2383 = vrot.lane.b32.xlu0 %v11150_v5, %s14227_s5 }
 0x303   :  { %1621 = vst [vmem:[#allocation3 + $0x160] sm:$0xff] %v1607_v39  ;;  %2385 = vrot.lane.b32.xlu1 %v11154_v34, %s14227_s5 }
 0x304   :  { %v1642_v9 = vpop.permute.xlu0 %1641 }
 0x305   :  { %v1644_v63 = vpop.permute.xlu1 %1643 }
 0x306   :  { %v1658_v31 = vsel %vm1657_vm11, %v1642_v9, %v1644_v63  ;;  %1671 = vst.msk [vmem:[#allocation3 + $0x188] sm:$0xff] %vm1352_vm2, %v1644_v63  ;;  %2391 = vrot.lane.b32.xlu0 %v11160_v50, %s14227_s5 }
 0x307   :  { %1670 = vst [vmem:[#allocation3 + $0x180] sm:$0xff] %v1658_v31  ;;  %2393 = vrot.lane.b32.xlu1 %v11164_v53, %s14227_s5 }
 0x308   :  { %v1650_v7 = vpop.permute.xlu0 %1649 }
 0x309   :  { %v1652_v55 = vpop.permute.xlu1 %1651 }
 0x30a   :  { %v1660_v20 = vsel %vm1657_vm11, %v1650_v7, %v1652_v55  ;;  %1675 = vst.msk [vmem:[#allocation3 + $0x1a8] sm:$0xff] %vm1352_vm2, %v1652_v55  ;;  %2436 = vrot.lane.b32.xlu0 %v11150_v5, %s14225_s28 }
 0x30b   :  { %1674 = vst [vmem:[#allocation3 + $0x1a0] sm:$0xff] %v1660_v20  ;;  %2438 = vrot.lane.b32.xlu1 %v11154_v34, %s14225_s28 }
 0x30c   :  { %v1695_v19 = vpop.permute.xlu0 %1694 }
 0x30d   :  { %v1697_v13 = vpop.permute.xlu1 %1696 }
 0x30e   :  { %v1711_v23 = vsel %vm1710_vm13, %v1695_v19, %v1697_v13  ;;  %1724 = vst.msk [vmem:[#allocation3 + $0x1c8] sm:$0xff] %vm1352_vm2, %v1697_v13  ;;  %2444 = vrot.lane.b32.xlu0 %v11160_v50, %s14225_s28 }
 0x30f   :  { %1723 = vst [vmem:[#allocation3 + $0x1c0] sm:$0xff] %v1711_v23  ;;  %2446 = vrot.lane.b32.xlu1 %v11164_v53, %s14225_s28 }
 0x310   :  { %v1703_v18 = vpop.permute.xlu0 %1702 }
 0x311   :  { %v1705_v29 = vpop.permute.xlu1 %1704 }
 0x312   :  { %v1713_v17 = vsel %vm1710_vm13, %v1703_v18, %v1705_v29  ;;  %1728 = vst.msk [vmem:[#allocation3 + $0x1e8] sm:$0xff] %vm1352_vm2, %v1705_v29  ;;  %2489 = vrot.lane.b32.xlu0 %v11150_v5, %s14260_s8 }
 0x313   :  { %1727 = vst [vmem:[#allocation3 + $0x1e0] sm:$0xff] %v1713_v17  ;;  %2491 = vrot.lane.b32.xlu1 %v11154_v34, %s14260_s8 }
 0x314   :  { %v1748_v43 = vpop.permute.xlu0 %1747 }
 0x315   :  { %v1750_v25 = vpop.permute.xlu1 %1749 }
 0x316   :  { %v1764_v16 = vsel %vm1763_vm14, %v1748_v43, %v1750_v25  ;;  %1777 = vst.msk [vmem:[#allocation3 + $0x208] sm:$0xff] %vm1352_vm2, %v1750_v25  ;;  %2497 = vrot.lane.b32.xlu0 %v11160_v50, %s14260_s8 }
 0x317   :  { %1776 = vst [vmem:[#allocation3 + $0x200] sm:$0xff] %v1764_v16  ;;  %2499 = vrot.lane.b32.xlu1 %v11164_v53, %s14260_s8 }
 0x318   :  { %v1756_v2 = vpop.permute.xlu0 %1755 }
 0x319   :  { %v1758_v60 = vpop.permute.xlu1 %1757 }
 0x31a   :  { %v1766_v1 = vsel %vm1763_vm14, %v1756_v2, %v1758_v60  ;;  %1781 = vst.msk [vmem:[#allocation3 + $0x228] sm:$0xff] %vm1352_vm2, %v1758_v60  ;;  %2541 = vrot.lane.b32.xlu0 %v11150_v5, %s14196_s2 }
 0x31b   :  { %1780 = vst [vmem:[#allocation3 + $0x220] sm:$0xff] %v1766_v1  ;;  %2543 = vrot.lane.b32.xlu1 %v11154_v34, %s14196_s2 }
 0x31c   :  { %v1801_v35 = vpop.permute.xlu0 %1800 }
 0x31d   :  { %v1803_v49 = vpop.permute.xlu1 %1802 }
 0x31e   :  { %v1817_v47 = vsel %vm14270_vm1, %v1801_v35, %v1803_v49  ;;  %1830 = vst.msk [vmem:[#allocation3 + $0x248] sm:$0xff] %vm1352_vm2, %v1803_v49  ;;  %2549 = vrot.lane.b32.xlu0 %v11160_v50, %s14196_s2 }
 0x31f   :  { %1829 = vst [vmem:[#allocation3 + $0x240] sm:$0xff] %v1817_v47  ;;  %2551 = vrot.lane.b32.xlu1 %v11164_v53, %s14196_s2  ;;  %s14202_s2 = smov 103  }
 0x320   :  { %v1809_v59 = vpop.permute.xlu0 %1808 }
 0x321   :  { %v1811_v52 = vpop.permute.xlu1 %1810 }
 0x322   :  { %v1819_v41 = vsel %vm14270_vm1, %v1809_v59, %v1811_v52  ;;  %1834 = vst.msk [vmem:[#allocation3 + $0x268] sm:$0xff] %vm1352_vm2, %v1811_v52  ;;  %2594 = vrot.lane.b32.xlu0 %v11150_v5, %s14199_s9 }
 0x323   :  { %1833 = vst [vmem:[#allocation3 + $0x260] sm:$0xff] %v1819_v41  ;;  %2596 = vrot.lane.b32.xlu1 %v11154_v34, %s14199_s9 }
 0x324   :  { %v1854_v22 = vpop.permute.xlu0 %1853 }
 0x325   :  { %v1856_v46 = vpop.permute.xlu1 %1855 }
 0x326   :  { %v1870_v12 = vsel %vm14269_vm0, %v1854_v22, %v1856_v46  ;;  %1883 = vst.msk [vmem:[#allocation3 + $0x288] sm:$0xff] %vm1352_vm2, %v1856_v46  ;;  %2602 = vrot.lane.b32.xlu0 %v11160_v50, %s14199_s9 }
 0x327   :  { %1882 = vst [vmem:[#allocation3 + $0x280] sm:$0xff] %v1870_v12  ;;  %2604 = vrot.lane.b32.xlu1 %v11164_v53, %s14199_s9  ;;  %s14205_s9 = smov 102  }
 0x328   :  { %v1862_v58 = vpop.permute.xlu0 %1861 }
 0x329   :  { %v1864_v21 = vpop.permute.xlu1 %1863 }
 0x32a   :  { %v1872_v15 = vsel %vm14269_vm0, %v1862_v58, %v1864_v21  ;;  %1887 = vst.msk [vmem:[#allocation3 + $0x2a8] sm:$0xff] %vm1352_vm2, %v1864_v21  ;;  %2647 = vrot.lane.b32.xlu0 %v11150_v5, %s14202_s2 }
 0x32b   :  { %1886 = vst [vmem:[#allocation3 + $0x2a0] sm:$0xff] %v1872_v15  ;;  %2649 = vrot.lane.b32.xlu1 %v11154_v34, %s14202_s2 }
 0x32c   :  { %v1907_v11 = vpop.permute.xlu0 %1906 }
 0x32d   :  { %v1909_v4 = vpop.permute.xlu1 %1908 }
 0x32e   :  { %v1923_v32 = vsel %vm14235_vm15, %v1907_v11, %v1909_v4  ;;  %1936 = vst.msk [vmem:[#allocation3 + $0x2c8] sm:$0xff] %vm1352_vm2, %v1909_v4  ;;  %2655 = vrot.lane.b32.xlu0 %v11160_v50, %s14202_s2 }
 0x32f   :  { %1935 = vst [vmem:[#allocation3 + $0x2c0] sm:$0xff] %v1923_v32  ;;  %2657 = vrot.lane.b32.xlu1 %v11164_v53, %s14202_s2  ;;  %s14241_s2 = smov 101  }
 0x330   :  { %v1915_v28 = vpop.permute.xlu0 %1914 }
 0x331   :  { %v1917_v6 = vpop.permute.xlu1 %1916 }
 0x332   :  { %v1925_v39 = vsel %vm14235_vm15, %v1915_v28, %v1917_v6  ;;  %1940 = vst.msk [vmem:[#allocation3 + $0x2e8] sm:$0xff] %vm1352_vm2, %v1917_v6  ;;  %2700 = vrot.lane.b32.xlu0 %v11150_v5, %s14205_s9 }
 0x333   :  { %1939 = vst [vmem:[#allocation3 + $0x2e0] sm:$0xff] %v1925_v39  ;;  %2702 = vrot.lane.b32.xlu1 %v11154_v34, %s14205_s9 }
 0x334   :  { %v1960_v9 = vpop.permute.xlu0 %1959 }
 0x335   :  { %v1962_v63 = vpop.permute.xlu1 %1961 }
 0x336   :  { %v1976_v31 = vsel %vm14236_vm12, %v1960_v9, %v1962_v63  ;;  %1989 = vst.msk [vmem:[#allocation3 + $0x308] sm:$0xff] %vm1352_vm2, %v1962_v63  ;;  %2708 = vrot.lane.b32.xlu0 %v11160_v50, %s14205_s9 }
 0x337   :  { %1988 = vst [vmem:[#allocation3 + $0x300] sm:$0xff] %v1976_v31  ;;  %2710 = vrot.lane.b32.xlu1 %v11164_v53, %s14205_s9  ;;  %s14237_s9 = smov 100  }
 0x338   :  { %v1968_v7 = vpop.permute.xlu0 %1967 }
 0x339   :  { %v1970_v55 = vpop.permute.xlu1 %1969 }
 0x33a   :  { %v1978_v20 = vsel %vm14236_vm12, %v1968_v7, %v1970_v55  ;;  %1993 = vst.msk [vmem:[#allocation3 + $0x328] sm:$0xff] %vm1352_vm2, %v1970_v55  ;;  %2753 = vrot.lane.b32.xlu0 %v11150_v5, %s14241_s2 }
 0x33b   :  { %1992 = vst [vmem:[#allocation3 + $0x320] sm:$0xff] %v1978_v20  ;;  %2755 = vrot.lane.b32.xlu1 %v11154_v34, %s14241_s2 }
 0x33c   :  { %v2013_v19 = vpop.permute.xlu0 %2012 }
 0x33d   :  { %v2015_v13 = vpop.permute.xlu1 %2014 }
 0x33e   :  { %v2029_v23 = vsel %vm14208_vm10, %v2013_v19, %v2015_v13  ;;  %2042 = vst.msk [vmem:[#allocation3 + $0x348] sm:$0xff] %vm1352_vm2, %v2015_v13  ;;  %2761 = vrot.lane.b32.xlu0 %v11160_v50, %s14241_s2 }
 0x33f   :  { %2041 = vst [vmem:[#allocation3 + $0x340] sm:$0xff] %v2029_v23  ;;  %2763 = vrot.lane.b32.xlu1 %v11164_v53, %s14241_s2 }
 0x340   :  { %v2021_v18 = vpop.permute.xlu0 %2020 }
 0x341   :  { %v2023_v29 = vpop.permute.xlu1 %2022 }
 0x342   :  { %v2031_v17 = vsel %vm14208_vm10, %v2021_v18, %v2023_v29  ;;  %2046 = vst.msk [vmem:[#allocation3 + $0x368] sm:$0xff] %vm1352_vm2, %v2023_v29  ;;  %2806 = vrot.lane.b32.xlu0 %v11150_v5, %s14237_s9  ;;  %vm14210_vm10 = vcmask 924672  }
 0x343   :  { %2045 = vst [vmem:[#allocation3 + $0x360] sm:$0xff] %v2031_v17  ;;  %2808 = vrot.lane.b32.xlu1 %v11154_v34, %s14237_s9 }
 0x344   :  { %v2066_v50 = vpop.permute.xlu0 %2065 }
 0x345   :  { %v2068_v43 = vpop.permute.xlu1 %2067 }
 0x346   :  { %v2082_v25 = vsel %vm14209_vm8, %v2066_v50, %v2068_v43  ;;  %2095 = vst.msk [vmem:[#allocation3 + $0x388] sm:$0xff] %vm1352_vm2, %v2068_v43  ;;  %1380 = vrot.lane.b32.xlu0 %v11200_v56, %s9770_s29 }
 0x347   :  { %2094 = vst [vmem:[#allocation3 + $0x380] sm:$0xff] %v2082_v25  ;;  %1382 = vrot.lane.b32.xlu1 %v11186_v36, %s9770_s29 }
 0x348   :  { %v2074_v53 = vpop.permute.xlu0 %2073 }
 0x349   :  { %v2076_v5 = vpop.permute.xlu1 %2075 }
 0x34a   :  { %v2084_v16 = vsel %vm14209_vm8, %v2074_v53, %v2076_v5  ;;  %2099 = vst.msk [vmem:[#allocation3 + $0x3a8] sm:$0xff] %vm1352_vm2, %v2076_v5  ;;  %1388 = vrot.lane.b32.xlu0 %v11208_v8, %s9770_s29  ;;  %vm14211_vm8 = vcmask 916480   ;;  %v11543_v53 = vld [vmem:[#allocation2 + $0x10] sm:$0xff] }
 0x34b   :  { %2098 = vst [vmem:[#allocation3 + $0x3a0] sm:$0xff] %v2084_v16  ;;  %1390 = vrot.lane.b32.xlu1 %v11194_v33, %s9770_s29  ;;  %v11549_v16 = vld [vmem:[#allocation2 + $0x18] sm:$0xff] }
 0x34c   :  { %v2119_v34 = vpop.permute.xlu0 %2118 }
 0x34d   :  { %v2121_v2 = vpop.permute.xlu1 %2120 }
 0x34e   :  { %v2135_v60 = vsel %vm14210_vm10, %v2119_v34, %v2121_v2  ;;  %2148 = vst.msk [vmem:[#allocation3 + $0x3c8] sm:$0xff] %vm1352_vm2, %v2121_v2  ;;  %1433 = vrot.lane.b32.xlu0 %v11200_v56, %s9771_s30 }
 0x34f   :  { %2147 = vst [vmem:[#allocation3 + $0x3c0] sm:$0xff] %v2135_v60  ;;  %1435 = vrot.lane.b32.xlu1 %v11186_v36, %s9771_s30  ;;  %v11557_v60 = vld [vmem:[#allocation2 + $0x38] sm:$0xff] }
 0x350   :  { %v2127_v1 = vpop.permute.xlu0 %2126 }
 0x351   :  { %v2129_v35 = vpop.permute.xlu1 %2128 }
 0x352   :  { %v2137_v49 = vsel %vm14210_vm10, %v2127_v1, %v2129_v35  ;;  %2152 = vst.msk [vmem:[#allocation3 + $0x3e8] sm:$0xff] %vm1352_vm2, %v2129_v35  ;;  %1441 = vrot.lane.b32.xlu0 %v11208_v8, %s9771_s30  ;;  %vm14212_vm10 = vcmask 908288  }
 0x353   :  { %2151 = vst [vmem:[#allocation3 + $0x3e0] sm:$0xff] %v2137_v49  ;;  %1443 = vrot.lane.b32.xlu1 %v11194_v33, %s9771_s30 }
 0x354   :  { %v2172_v47 = vpop.permute.xlu0 %2171 }
 0x355   :  { %v2174_v59 = vpop.permute.xlu1 %2173 }
 0x356   :  { %v2188_v52 = vsel %vm14211_vm8, %v2172_v47, %v2174_v59  ;;  %2201 = vst.msk [vmem:[#allocation3 + $0x408] sm:$0xff] %vm1352_vm2, %v2174_v59  ;;  %1486 = vrot.lane.b32.xlu0 %v11200_v56, %s9772_s0  ;;  %v11567_v59 = vld [vmem:[#allocation2 + $0x30] sm:$0xff] }
 0x357   :  { %2200 = vst [vmem:[#allocation3 + $0x400] sm:$0xff] %v2188_v52  ;;  %1488 = vrot.lane.b32.xlu1 %v11186_v36, %s9772_s0 }
 0x358   :  { %v2180_v41 = vpop.permute.xlu0 %2179 }
 0x359   :  { %v2182_v22 = vpop.permute.xlu1 %2181 }
 0x35a   :  { %v2190_v46 = vsel %vm14211_vm8, %v2180_v41, %v2182_v22  ;;  %2205 = vst.msk [vmem:[#allocation3 + $0x428] sm:$0xff] %vm1352_vm2, %v2182_v22  ;;  %1494 = vrot.lane.b32.xlu0 %v11208_v8, %s9772_s0  ;;  %vm14213_vm8 = vcmask 900096  }
 0x35b   :  { %2204 = vst [vmem:[#allocation3 + $0x420] sm:$0xff] %v2190_v46  ;;  %1496 = vrot.lane.b32.xlu1 %v11194_v33, %s9772_s0 }
 0x35c   :  { %v2225_v12 = vpop.permute.xlu0 %2224 }
 0x35d   :  { %v2227_v58 = vpop.permute.xlu1 %2226 }
 0x35e   :  { %v2241_v21 = vsel %vm14212_vm10, %v2225_v12, %v2227_v58  ;;  %2254 = vst.msk [vmem:[#allocation3 + $0x448] sm:$0xff] %vm1352_vm2, %v2227_v58  ;;  %1539 = vrot.lane.b32.xlu0 %v11200_v56, %s9773_s1 }
 0x35f   :  { %2253 = vst [vmem:[#allocation3 + $0x440] sm:$0xff] %v2241_v21  ;;  %1541 = vrot.lane.b32.xlu1 %v11186_v36, %s9773_s1 }
 0x360   :  { %v2233_v15 = vpop.permute.xlu0 %2232 }
 0x361   :  { %v2235_v11 = vpop.permute.xlu1 %2234 }
 0x362   :  { %v2243_v4 = vsel %vm14212_vm10, %v2233_v15, %v2235_v11  ;;  %2258 = vst.msk [vmem:[#allocation3 + $0x468] sm:$0xff] %vm1352_vm2, %v2235_v11  ;;  %1547 = vrot.lane.b32.xlu0 %v11208_v8, %s9773_s1  ;;  %vm14214_vm10 = vcmask 891904  }
 0x363   :  { %2257 = vst [vmem:[#allocation3 + $0x460] sm:$0xff] %v2243_v4  ;;  %1549 = vrot.lane.b32.xlu1 %v11194_v33, %s9773_s1 }
 0x364   :  { %v2278_v32 = vpop.permute.xlu0 %2277 }
 0x365   :  { %v2280_v28 = vpop.permute.xlu1 %2279 }
 0x366   :  { %v2294_v6 = vsel %vm14213_vm8, %v2278_v32, %v2280_v28  ;;  %2307 = vst.msk [vmem:[#allocation3 + $0x488] sm:$0xff] %vm1352_vm2, %v2280_v28  ;;  %1592 = vrot.lane.b32.xlu0 %v11200_v56, %s14217_s3 }
 0x367   :  { %2306 = vst [vmem:[#allocation3 + $0x480] sm:$0xff] %v2294_v6  ;;  %1594 = vrot.lane.b32.xlu1 %v11186_v36, %s14217_s3 }
 0x368   :  { %v2286_v39 = vpop.permute.xlu0 %2285 }
 0x369   :  { %v2288_v9 = vpop.permute.xlu1 %2287 }
 0x36a   :  { %v2296_v63 = vsel %vm14213_vm8, %v2286_v39, %v2288_v9  ;;  %2311 = vst.msk [vmem:[#allocation3 + $0x4a8] sm:$0xff] %vm1352_vm2, %v2288_v9  ;;  %1600 = vrot.lane.b32.xlu0 %v11208_v8, %s14217_s3  ;;  %vm14268_vm8 = vcmask 883712  }
 0x36b   :  { %2310 = vst [vmem:[#allocation3 + $0x4a0] sm:$0xff] %v2296_v63  ;;  %1602 = vrot.lane.b32.xlu1 %v11194_v33, %s14217_s3  ;;  %s14313_s3 = smov 105  }
 0x36c   :  { %v2331_v31 = vpop.permute.xlu0 %2330 }
 0x36d   :  { %v2333_v7 = vpop.permute.xlu1 %2332 }
 0x36e   :  { %v2347_v55 = vsel %vm14214_vm10, %v2331_v31, %v2333_v7  ;;  %2360 = vst.msk [vmem:[#allocation3 + $0x4c8] sm:$0xff] %vm1352_vm2, %v2333_v7  ;;  %1645 = vrot.lane.b32.xlu0 %v11200_v56, %s14215_s6 }
 0x36f   :  { %2359 = vst [vmem:[#allocation3 + $0x4c0] sm:$0xff] %v2347_v55  ;;  %1647 = vrot.lane.b32.xlu1 %v11186_v36, %s14215_s6 }
 0x370   :  { %v2339_v20 = vpop.permute.xlu0 %2338 }
 0x371   :  { %v2341_v19 = vpop.permute.xlu1 %2340 }
 0x372   :  { %v2349_v13 = vsel %vm14214_vm10, %v2339_v20, %v2341_v19  ;;  %2364 = vst.msk [vmem:[#allocation3 + $0x4e8] sm:$0xff] %vm1352_vm2, %v2341_v19  ;;  %1653 = vrot.lane.b32.xlu0 %v11208_v8, %s14215_s6  ;;  %vm14219_vm10 = vcmask 875520  }
 0x373   :  { %2363 = vst [vmem:[#allocation3 + $0x4e0] sm:$0xff] %v2349_v13  ;;  %1655 = vrot.lane.b32.xlu1 %v11194_v33, %s14215_s6  ;;  %s14245_s6 = smov 97  }
 0x374   :  { %v2384_v23 = vpop.permute.xlu0 %2383 }
 0x375   :  { %v2386_v18 = vpop.permute.xlu1 %2385 }
 0x376   :  { %v2400_v29 = vsel %vm14268_vm8, %v2384_v23, %v2386_v18  ;;  %2413 = vst.msk [vmem:[#allocation3 + $0x508] sm:$0xff] %vm1352_vm2, %v2386_v18  ;;  %1698 = vrot.lane.b32.xlu0 %v11200_v56, %s9776_s17  ;;  %v94_v56 = vld [vmem:[%s14178_s10 + $0x8] sm:$0xff] }
 0x377   :  { %2412 = vst [vmem:[#allocation3 + $0x500] sm:$0xff] %v2400_v29  ;;  %1700 = vrot.lane.b32.xlu1 %v11186_v36, %s9776_s17  ;;  %3761 = vmatprep.mubr.f32.mxu0 %v94_v56 }
 0x378   :  { %v2392_v17 = vpop.permute.xlu0 %2391  ;;  %7877 = vmatprep.mubr.f32.mxu1 %v94_v56 }
 0x379   :  { %v2394_v50 = vpop.permute.xlu1 %2393 }
 0x37a   :  { %v2402_v43 = vsel %vm14268_vm8, %v2392_v17, %v2394_v50  ;;  %2417 = vst.msk [vmem:[#allocation3 + $0x528] sm:$0xff] %vm1352_vm2, %v2394_v50  ;;  %1706 = vrot.lane.b32.xlu0 %v11208_v8, %s9776_s17 }
 0x37b   :  { %2416 = vst [vmem:[#allocation3 + $0x520] sm:$0xff] %v2402_v43  ;;  %1708 = vrot.lane.b32.xlu1 %v11194_v33, %s9776_s17 }
 0x37c   :  { %v2437_v25 = vpop.permute.xlu0 %2436 }
 0x37d   :  { %v2439_v36 = vpop.permute.xlu1 %2438 }
 0x37e   :  { %v2453_v5 = vsel %vm14219_vm10, %v2437_v25, %v2439_v36  ;;  %2466 = vst.msk [vmem:[#allocation3 + $0x548] sm:$0xff] %vm1352_vm2, %v2439_v36  ;;  %1751 = vrot.lane.b32.xlu0 %v11543_v53, %s9777_s18 }
 0x37f   :  { %2465 = vst [vmem:[#allocation3 + $0x540] sm:$0xff] %v2453_v5  ;;  %1753 = vrot.lane.b32.xlu1 %v11549_v16, %s9777_s18 }
 0x380   :  { %v2445_v33 = vpop.permute.xlu0 %2444 }
 0x381   :  { %v2447_v34 = vpop.permute.xlu1 %2446 }
 0x382   :  { %v2455_v2 = vsel %vm14219_vm10, %v2445_v33, %v2447_v34  ;;  %2470 = vst.msk [vmem:[#allocation3 + $0x568] sm:$0xff] %vm1352_vm2, %v2447_v34  ;;  %1759 = vrot.lane.b32.xlu0 %v11208_v8, %s9777_s18  ;;  %vm14221_vm10 = vcmask 859136  }
 0x383   :  { %2469 = vst [vmem:[#allocation3 + $0x560] sm:$0xff] %v2455_v2  ;;  %1761 = vrot.lane.b32.xlu1 %v11557_v60, %s9777_s18 }
 0x384   :  { %v2490_v1 = vpop.permute.xlu0 %2489 }
 0x385   :  { %v2492_v35 = vpop.permute.xlu1 %2491 }
 0x386   :  { %v2505_v49 = vsel %vm14220_vm7, %v2490_v1, %v2492_v35  ;;  %2518 = vst.msk [vmem:[#allocation3 + $0x588] sm:$0xff] %vm1352_vm2, %v2492_v35  ;;  %1804 = vrot.lane.b32.xlu0 %v11543_v53, %s9778_s19 }
 0x387   :  { %2517 = vst [vmem:[#allocation3 + $0x580] sm:$0xff] %v2505_v49  ;;  %1806 = vrot.lane.b32.xlu1 %v11549_v16, %s9778_s19 }
 0x388   :  { %v2498_v8 = vpop.permute.xlu0 %2497 }
 0x389   :  { %v2500_v47 = vpop.permute.xlu1 %2499 }
 0x38a   :  { %v2507_v52 = vsel %vm14220_vm7, %v2498_v8, %v2500_v47  ;;  %2522 = vst.msk [vmem:[#allocation3 + $0x5a8] sm:$0xff] %vm1352_vm2, %v2500_v47  ;;  %1812 = vrot.lane.b32.xlu0 %v11567_v59, %s9778_s19  ;;  %vm14222_vm7 = vcmask 850944  }
 0x38b   :  { %2521 = vst [vmem:[#allocation3 + $0x5a0] sm:$0xff] %v2507_v52  ;;  %1814 = vrot.lane.b32.xlu1 %v11557_v60, %s9778_s19 }
 0x38c   :  { %v2542_v41 = vpop.permute.xlu0 %2541 }
 0x38d   :  { %v2544_v22 = vpop.permute.xlu1 %2543 }
 0x38e   :  { %v2558_v46 = vsel %vm14221_vm10, %v2542_v41, %v2544_v22  ;;  %2571 = vst.msk [vmem:[#allocation3 + $0x5c8] sm:$0xff] %vm1352_vm2, %v2544_v22  ;;  %1857 = vrot.lane.b32.xlu0 %v11543_v53, %s9779_s20  ;;  %v3382_v41 = vld [vmem:[#allocation3 + $0x48] sm:$0xff] }
 0x38f   :  { %2570 = vst [vmem:[#allocation3 + $0x5c0] sm:$0xff] %v2558_v46  ;;  %1859 = vrot.lane.b32.xlu1 %v11549_v16, %s9779_s20 }
 0x390   :  { %v2550_v12 = vpop.permute.xlu0 %2549 }
 0x391   :  { %v2552_v58 = vpop.permute.xlu1 %2551 }
 0x392   :  { %v2560_v21 = vsel %vm14221_vm10, %v2550_v12, %v2552_v58  ;;  %2575 = vst.msk [vmem:[#allocation3 + $0x5e8] sm:$0xff] %vm1352_vm2, %v2552_v58  ;;  %1865 = vrot.lane.b32.xlu0 %v11567_v59, %s9779_s20  ;;  %vm14223_vm10 = vcmask 842752   ;;  %v3381_v12 = vld [vmem:[#allocation3 + $0x40] sm:$0xff] }
 0x393   :  { %2574 = vst [vmem:[#allocation3 + $0x5e0] sm:$0xff] %v2560_v21  ;;  %1867 = vrot.lane.b32.xlu1 %v11557_v60, %s9779_s20 }
 0x394   :  { %v2595_v15 = vpop.permute.xlu0 %2594 }
 0x395   :  { %v2597_v11 = vpop.permute.xlu1 %2596 }
 0x396   :  { %v2611_v4 = vsel %vm14222_vm7, %v2595_v15, %v2597_v11  ;;  %2624 = vst.msk [vmem:[#allocation3 + $0x608] sm:$0xff] %vm1352_vm2, %v2597_v11  ;;  %1910 = vrot.lane.b32.xlu0 %v11543_v53, %s9780_s21 }
 0x397   :  { %2623 = vst [vmem:[#allocation3 + $0x600] sm:$0xff] %v2611_v4  ;;  %1912 = vrot.lane.b32.xlu1 %v11549_v16, %s9780_s21  ;;  %v3386_v4 = vld [vmem:[#allocation3 + $0x68] sm:$0xff] }
 0x398   :  { %v2603_v32 = vpop.permute.xlu0 %2602 }
 0x399   :  { %v2605_v28 = vpop.permute.xlu1 %2604 }
 0x39a   :  { %v2613_v6 = vsel %vm14222_vm7, %v2603_v32, %v2605_v28  ;;  %2628 = vst.msk [vmem:[#allocation3 + $0x628] sm:$0xff] %vm1352_vm2, %v2605_v28  ;;  %1918 = vrot.lane.b32.xlu0 %v11567_v59, %s9780_s21  ;;  %vm14224_vm7 = vcmask 834560  }
 0x39b   :  { %2627 = vst [vmem:[#allocation3 + $0x620] sm:$0xff] %v2613_v6  ;;  %1920 = vrot.lane.b32.xlu1 %v11557_v60, %s9780_s21  ;;  %v3385_v6 = vld [vmem:[#allocation3 + $0x60] sm:$0xff] }
 0x39c   :  { %v2648_v39 = vpop.permute.xlu0 %2647 }
 0x39d   :  { %v2650_v9 = vpop.permute.xlu1 %2649 }
 0x39e   :  { %v2664_v63 = vsel %vm14223_vm10, %v2648_v39, %v2650_v9  ;;  %2677 = vst.msk [vmem:[#allocation3 + $0x648] sm:$0xff] %vm1352_vm2, %v2650_v9  ;;  %1963 = vrot.lane.b32.xlu0 %v11543_v53, %s9781_s7 }
 0x39f   :  { %2676 = vst [vmem:[#allocation3 + $0x640] sm:$0xff] %v2664_v63  ;;  %1965 = vrot.lane.b32.xlu1 %v11549_v16, %s9781_s7 }
 0x3a0   :  { %v2656_v31 = vpop.permute.xlu0 %2655 }
 0x3a1   :  { %v2658_v7 = vpop.permute.xlu1 %2657 }
 0x3a2   :  { %v2666_v55 = vsel %vm14223_vm10, %v2656_v31, %v2658_v7  ;;  %2681 = vst.msk [vmem:[#allocation3 + $0x668] sm:$0xff] %vm1352_vm2, %v2658_v7  ;;  %1971 = vrot.lane.b32.xlu0 %v11567_v59, %s9781_s7  ;;  %vm14252_vm10 = vcmask 826368   ;;  %v3390_v7 = vld [vmem:[#allocation3 + $0x88] sm:$0xff] }
 0x3a3   :  { %2680 = vst [vmem:[#allocation3 + $0x660] sm:$0xff] %v2666_v55  ;;  %1973 = vrot.lane.b32.xlu1 %v11557_v60, %s9781_s7 }
 0x3a4   :  { %v2701_v20 = vpop.permute.xlu0 %2700 }
 0x3a5   :  { %v2703_v19 = vpop.permute.xlu1 %2702 }
 0x3a6   :  { %v2717_v13 = vsel %vm14224_vm7, %v2701_v20, %v2703_v19  ;;  %2730 = vst.msk [vmem:[#allocation3 + $0x688] sm:$0xff] %vm1352_vm2, %v2703_v19  ;;  %2016 = vrot.lane.b32.xlu0 %v11543_v53, %s14279_s22  ;;  %v3389_v19 = vld [vmem:[#allocation3 + $0x80] sm:$0xff] }
 0x3a7   :  { %2729 = vst [vmem:[#allocation3 + $0x680] sm:$0xff] %v2717_v13  ;;  %2018 = vrot.lane.b32.xlu1 %v11549_v16, %s14279_s22 }
 0x3a8   :  { %v2709_v23 = vpop.permute.xlu0 %2708 }
 0x3a9   :  { %v2711_v18 = vpop.permute.xlu1 %2710 }
 0x3aa   :  { %v2719_v29 = vsel %vm14224_vm7, %v2709_v23, %v2711_v18  ;;  %2734 = vst.msk [vmem:[#allocation3 + $0x6a8] sm:$0xff] %vm1352_vm2, %v2711_v18  ;;  %2024 = vrot.lane.b32.xlu0 %v11567_v59, %s14279_s22  ;;  %vm14251_vm7 = vcmask 818176  }
 0x3ab   :  { %2733 = vst [vmem:[#allocation3 + $0x6a0] sm:$0xff] %v2719_v29  ;;  %2026 = vrot.lane.b32.xlu1 %v11557_v60, %s14279_s22 }
 0x3ac   :  { %v2754_v17 = vpop.permute.xlu0 %2753 }
 0x3ad   :  { %v2756_v50 = vpop.permute.xlu1 %2755 }
 0x3ae   :  { %v2770_v43 = vsel %vm14252_vm10, %v2754_v17, %v2756_v50  ;;  %2783 = vst.msk [vmem:[#allocation3 + $0x6c8] sm:$0xff] %vm1352_vm2, %v2756_v50  ;;  %2069 = vrot.lane.b32.xlu0 %v11543_v53, %s14277_s24  ;;  %v3394_v17 = vld [vmem:[#allocation3 + $0xa8] sm:$0xff] }
 0x3af   :  { %2782 = vst [vmem:[#allocation3 + $0x6c0] sm:$0xff] %v2770_v43  ;;  %2071 = vrot.lane.b32.xlu1 %v11549_v16, %s14277_s24 }
 0x3b0   :  { %v2762_v56 = vpop.permute.xlu0 %2761 }
 0x3b1   :  { %v2764_v25 = vpop.permute.xlu1 %2763 }
 0x3b2   :  { %v2772_v36 = vsel %vm14252_vm10, %v2762_v56, %v2764_v25  ;;  %2787 = vst.msk [vmem:[#allocation3 + $0x6e8] sm:$0xff] %vm1352_vm2, %v2764_v25  ;;  %2077 = vrot.lane.b32.xlu0 %v11567_v59, %s14277_s24  ;;  %v3393_v56 = vld [vmem:[#allocation3 + $0xa0] sm:$0xff] }
 0x3b3   :  { %2786 = vst [vmem:[#allocation3 + $0x6e0] sm:$0xff] %v2772_v36  ;;  %2079 = vrot.lane.b32.xlu1 %v11557_v60, %s14277_s24 }
 0x3b4   :  { %v2807_v5 = vpop.permute.xlu0 %2806 }
 0x3b5   :  { %v2809_v33 = vpop.permute.xlu1 %2808 }
 0x3b6   :  { %v2823_v34 = vsel %vm14251_vm7, %v2807_v5, %v2809_v33  ;;  %2836 = vst.msk [vmem:[#allocation3 + $0x708] sm:$0xff] %vm1352_vm2, %v2809_v33  ;;  %2122 = vrot.lane.b32.xlu0 %v11543_v53, %s14275_s25 }
 0x3b7   :  { %2835 = vst [vmem:[#allocation3 + $0x700] sm:$0xff] %v2823_v34  ;;  %2124 = vrot.lane.b32.xlu1 %v11549_v16, %s14275_s25  ;;  %v3398_v34 = vld [vmem:[#allocation3 + $0xc8] sm:$0xff] }
 0x3b8   :  { %v1381_v2 = vpop.permute.xlu0 %1380 }
 0x3b9   :  { %v1383_v1 = vpop.permute.xlu1 %1382 }
 0x3ba   :  { %1408 = vst.msk [vmem:[#allocation3 + $0x58] sm:$0xff] %vm1352_vm2, %v1383_v1  ;;  %2130 = vrot.lane.b32.xlu0 %v11567_v59, %s14275_s25  ;;  %v1394_v8 = vsel %vm1392_vm3, %v1381_v2, %v1383_v1 }
 0x3bb   :  { %2132 = vrot.lane.b32.xlu1 %v11557_v60, %s14275_s25  ;;  %v8798_v58 = vpack.c.bf16 %v1394_v8, %v3381_v12  ;;  %v3401_v12 = vld [vmem:[#allocation3 + $0xe0] sm:$0xff]  ;;  %s14462_s25 = smov 96  }
 0x3bc   :  { %v1389_v35 = vpop.permute.xlu0 %1388 }
 0x3bd   :  { %v1391_v49 = vpop.permute.xlu1 %1390 }
 0x3be   :  { %1412 = vst.msk [vmem:[#allocation3 + $0x78] sm:$0xff] %vm1352_vm2, %v1391_v49  ;;  %2175 = vrot.lane.b32.xlu0 %v11543_v53, %s14273_s4  ;;  %v1396_v21 = vsel %vm1392_vm3, %v1389_v35, %v1391_v49  ;;  %v3397_v35 = vld [vmem:[#allocation3 + $0xc0] sm:$0xff] }
 0x3bf   :  { %2177 = vrot.lane.b32.xlu1 %v11549_v16, %s14273_s4  ;;  %v8802_v39 = vpack.c.bf16 %v1396_v21, %v3385_v6  ;;  %v3405_v6 = vld [vmem:[#allocation3 + $0x100] sm:$0xff] }
 0x3c0   :  { %v1434_v47 = vpop.permute.xlu0 %1433 }
 0x3c1   :  { %v1436_v52 = vpop.permute.xlu1 %1435  ;;  %v3384_v22 = vld [vmem:[#allocation3 + $0x58] sm:$0xff] }
 0x3c2   :  { %1461 = vst.msk [vmem:[#allocation3 + $0x98] sm:$0xff] %vm1352_vm2, %v1436_v52  ;;  %2183 = vrot.lane.b32.xlu0 %v11567_v59, %s14273_s4  ;;  %v8796_v46 = vpack.c.bf16 %v3384_v22, %v3382_v41  ;;  %v1447_v9 = vsel %vm1445_vm4, %v1434_v47, %v1436_v52  ;;  %v3402_v41 = vld [vmem:[#allocation3 + $0xe8] sm:$0xff] }
 0x3c3   :  { %2185 = vrot.lane.b32.xlu1 %v11557_v60, %s14273_s4  ;;  %v8806_v13 = vpack.c.bf16 %v1447_v9, %v3389_v19  ;;  %v3409_v19 = vld [vmem:[#allocation3 + $0x120] sm:$0xff]  ;;  %s14386_s4 = smov 112  }
 0x3c4   :  { %v1442_v15 = vpop.permute.xlu0 %1441  ;;  %8797 = vmatprep.subr.bf16.mxu0 %v8796_v46 }
 0x3c5   :  { %v1444_v11 = vpop.permute.xlu1 %1443  ;;  %8799 = vmatpush1.bf16.msra.mxu0 %v8798_v58  ;;  %v3388_v32 = vld [vmem:[#allocation3 + $0x78] sm:$0xff] }
 0x3c6   :  { %1465 = vst.msk [vmem:[#allocation3 + $0xb8] sm:$0xff] %vm1352_vm2, %v1444_v11  ;;  %2228 = vrot.lane.b32.xlu0 %v11543_v53, %s14233_s26  ;;  %v8800_v28 = vpack.c.bf16 %v3388_v32, %v3386_v4  ;;  %v1449_v23 = vsel %vm1445_vm4, %v1442_v15, %v1444_v11  ;;  %v3406_v4 = vld [vmem:[#allocation3 + $0x108] sm:$0xff] }
 0x3c7   :  { %2230 = vrot.lane.b32.xlu1 %v11549_v16, %s14233_s26  ;;  %v8810_v25 = vpack.c.bf16 %v1449_v23, %v3393_v56  ;;  %v3413_v56 = vld [vmem:[#allocation3 + $0x140] sm:$0xff] }
 0x3c8   :  { %v1487_v63 = vpop.permute.xlu0 %1486  ;;  %8801 = vmatprep.subr.bf16.mxu0 %v8800_v28 }
 0x3c9   :  { %v1489_v31 = vpop.permute.xlu1 %1488  ;;  %8803 = vmatpush1.bf16.msra.mxu0 %v8802_v39  ;;  %v3392_v55 = vld [vmem:[#allocation3 + $0x98] sm:$0xff] }
 0x3ca   :  { %1514 = vst.msk [vmem:[#allocation3 + $0xd8] sm:$0xff] %vm1352_vm2, %v1489_v31  ;;  %2236 = vrot.lane.b32.xlu0 %v11567_v59, %s14233_s26  ;;  %v8804_v20 = vpack.c.bf16 %v3392_v55, %v3390_v7  ;;  %v1500_v36 = vsel %vm1498_vm5, %v1487_v63, %v1489_v31  ;;  %v3410_v7 = vld [vmem:[#allocation3 + $0x128] sm:$0xff] }
 0x3cb   :  { %2238 = vrot.lane.b32.xlu1 %v11557_v60, %s14233_s26  ;;  %v8814_v49 = vpack.c.bf16 %v1500_v36, %v3397_v35  ;;  %v3417_v35 = vld [vmem:[#allocation3 + $0x160] sm:$0xff]  ;;  %s14316_s26 = smov 102  }
 0x3cc   :  { %v1495_v18 = vpop.permute.xlu0 %1494  ;;  %8805 = vmatprep.subr.bf16.mxu0 %v8804_v20 }
 0x3cd   :  { %v1497_v29 = vpop.permute.xlu1 %1496  ;;  %8807 = vmatpush1.bf16.msra.mxu0 %v8806_v13  ;;  %v3396_v50 = vld [vmem:[#allocation3 + $0xb8] sm:$0xff] }
 0x3ce   :  { %1518 = vst.msk [vmem:[#allocation3 + $0xf8] sm:$0xff] %vm1352_vm2, %v1497_v29  ;;  %2281 = vrot.lane.b32.xlu0 %v11543_v53, %s14231_s23  ;;  %v8808_v43 = vpack.c.bf16 %v3396_v50, %v3394_v17  ;;  %v1502_v8 = vsel %vm1498_vm5, %v1495_v18, %v1497_v29  ;;  %v3414_v17 = vld [vmem:[#allocation3 + $0x148] sm:$0xff] }
 0x3cf   :  { %2283 = vrot.lane.b32.xlu1 %v11549_v16, %s14231_s23  ;;  %v8818_v58 = vpack.c.bf16 %v1502_v8, %v3401_v12  ;;  %v3421_v12 = vld [vmem:[#allocation3 + $0x180] sm:$0xff] }
 0x3d0   :  { %v1540_v5 = vpop.permute.xlu0 %1539  ;;  %8809 = vmatprep.subr.bf16.mxu0 %v8808_v43 }
 0x3d1   :  { %v1542_v33 = vpop.permute.xlu1 %1541  ;;  %8811 = vmatpush1.bf16.msra.mxu0 %v8810_v25  ;;  %v3400_v2 = vld [vmem:[#allocation3 + $0xd8] sm:$0xff] }
 0x3d2   :  { %1567 = vst.msk [vmem:[#allocation3 + $0x118] sm:$0xff] %vm1352_vm2, %v1542_v33  ;;  %2289 = vrot.lane.b32.xlu0 %v11567_v59, %s14231_s23  ;;  %v8812_v1 = vpack.c.bf16 %v3400_v2, %v3398_v34  ;;  %v1553_v21 = vsel %vm1551_vm6, %v1540_v5, %v1542_v33  ;;  %v3418_v34 = vld [vmem:[#allocation3 + $0x168] sm:$0xff] }
 0x3d3   :  { %2291 = vrot.lane.b32.xlu1 %v11557_v60, %s14231_s23  ;;  %v8822_v39 = vpack.c.bf16 %v1553_v21, %v3405_v6  ;;  %v3425_v6 = vld [vmem:[#allocation3 + $0x1a0] sm:$0xff]  ;;  %s14315_s23 = smov 103  }
 0x3d4   :  { %v1548_v47 = vpop.permute.xlu0 %1547  ;;  %8813 = vmatprep.subr.bf16.mxu0 %v8812_v1 }
 0x3d5   :  { %v1550_v52 = vpop.permute.xlu1 %1549  ;;  %8815 = vmatpush1.bf16.msra.mxu0 %v8814_v49  ;;  %v3404_v22 = vld [vmem:[#allocation3 + $0xf8] sm:$0xff] }
 0x3d6   :  { %1571 = vst.msk [vmem:[#allocation3 + $0x138] sm:$0xff] %vm1352_vm2, %v1550_v52  ;;  %2334 = vrot.lane.b32.xlu0 %v11543_v53, %s14229_s27  ;;  %v8816_v46 = vpack.c.bf16 %v3404_v22, %v3402_v41  ;;  %v1555_v9 = vsel %vm1551_vm6, %v1548_v47, %v1550_v52  ;;  %v3422_v41 = vld [vmem:[#allocation3 + $0x188] sm:$0xff] }
 0x3d7   :  { %2336 = vrot.lane.b32.xlu1 %v11549_v16, %s14229_s27  ;;  %v8826_v13 = vpack.c.bf16 %v1555_v9, %v3409_v19  ;;  %v3429_v19 = vld [vmem:[#allocation3 + $0x1c0] sm:$0xff] }
 0x3d8   :  { %v1593_v15 = vpop.permute.xlu0 %1592  ;;  %8817 = vmatprep.subr.bf16.mxu0 %v8816_v46 }
 0x3d9   :  { %v1595_v11 = vpop.permute.xlu1 %1594  ;;  %8819 = vmatpush1.bf16.msra.mxu0 %v8818_v58  ;;  %v3408_v32 = vld [vmem:[#allocation3 + $0x118] sm:$0xff] }
 0x3da   :  { %1620 = vst.msk [vmem:[#allocation3 + $0x158] sm:$0xff] %vm1352_vm2, %v1595_v11  ;;  %2342 = vrot.lane.b32.xlu0 %v11567_v59, %s14229_s27  ;;  %v8820_v28 = vpack.c.bf16 %v3408_v32, %v3406_v4  ;;  %v1606_v23 = vsel %vm1604_vm9, %v1593_v15, %v1595_v11  ;;  %v3426_v4 = vld [vmem:[#allocation3 + $0x1a8] sm:$0xff] }
 0x3db   :  { %2344 = vrot.lane.b32.xlu1 %v11557_v60, %s14229_s27  ;;  %v8830_v25 = vpack.c.bf16 %v1606_v23, %v3413_v56  ;;  %v3433_v56 = vld [vmem:[#allocation3 + $0x1e0] sm:$0xff]  ;;  %s14243_s27 = smov 96  }
 0x3dc   :  { %v1601_v63 = vpop.permute.xlu0 %1600  ;;  %8821 = vmatprep.subr.bf16.mxu0 %v8820_v28 }
 0x3dd   :  { %v1603_v31 = vpop.permute.xlu1 %1602  ;;  %8823 = vmatpush1.bf16.msra.mxu0 %v8822_v39  ;;  %v3412_v55 = vld [vmem:[#allocation3 + $0x138] sm:$0xff] }
 0x3de   :  { %1624 = vst.msk [vmem:[#allocation3 + $0x178] sm:$0xff] %vm1352_vm2, %v1603_v31  ;;  %2387 = vrot.lane.b32.xlu0 %v11543_v53, %s14227_s5  ;;  %v8824_v20 = vpack.c.bf16 %v3412_v55, %v3410_v7  ;;  %v1608_v36 = vsel %vm1604_vm9, %v1601_v63, %v1603_v31  ;;  %v3430_v7 = vld [vmem:[#allocation3 + $0x1c8] sm:$0xff] }
 0x3df   :  { %2389 = vrot.lane.b32.xlu1 %v11549_v16, %s14227_s5  ;;  %v8834_v49 = vpack.c.bf16 %v1608_v36, %v3417_v35 }
 0x3e0   :  { %v1646_v18 = vpop.permute.xlu0 %1645  ;;  %8825 = vmatprep.subr.bf16.mxu0 %v8824_v20 }
 0x3e1   :  { %v1648_v29 = vpop.permute.xlu1 %1647  ;;  %8827 = vmatpush1.bf16.msra.mxu0 %v8826_v13  ;;  %v3416_v50 = vld [vmem:[#allocation3 + $0x158] sm:$0xff] }
 0x3e2   :  { %1673 = vst.msk [vmem:[#allocation3 + $0x198] sm:$0xff] %vm1352_vm2, %v1648_v29  ;;  %2395 = vrot.lane.b32.xlu0 %v11567_v59, %s14227_s5  ;;  %v8828_v43 = vpack.c.bf16 %v3416_v50, %v3414_v17  ;;  %v1659_v8 = vsel %vm1657_vm11, %v1646_v18, %v1648_v29  ;;  %v3434_v17 = vld [vmem:[#allocation3 + $0x1e8] sm:$0xff] }
 0x3e3   :  { %2397 = vrot.lane.b32.xlu1 %v11557_v60, %s14227_s5  ;;  %v8838_v58 = vpack.c.bf16 %v1659_v8, %v3421_v12  ;;  %v104_v8 = vld [vmem:[%s14178_s10 + $0x58] sm:$0xff]  ;;  %s14314_s5 = smov 104  }
 0x3e4   :  { %v1654_v5 = vpop.permute.xlu0 %1653  ;;  %8829 = vmatprep.subr.bf16.mxu0 %v8828_v43 }
 0x3e5   :  { %v1656_v33 = vpop.permute.xlu1 %1655  ;;  %8831 = vmatpush1.bf16.msra.mxu0 %v8830_v25  ;;  %v3420_v2 = vld [vmem:[#allocation3 + $0x178] sm:$0xff] }
 0x3e6   :  { %1677 = vst.msk [vmem:[#allocation3 + $0x1b8] sm:$0xff] %vm1352_vm2, %v1656_v33  ;;  %2440 = vrot.lane.b32.xlu0 %v11543_v53, %s14225_s28  ;;  %v8832_v1 = vpack.c.bf16 %v3420_v2, %v3418_v34  ;;  %v1661_v21 = vsel %vm1657_vm11, %v1654_v5, %v1656_v33  ;;  %v3438_v34 = vld [vmem:[#allocation3 + $0x208] sm:$0xff] }
 0x3e7   :  { %2442 = vrot.lane.b32.xlu1 %v11549_v16, %s14225_s28  ;;  %v8842_v39 = vpack.c.bf16 %v1661_v21, %v3425_v6 }
 0x3e8   :  { %v1699_v47 = vpop.permute.xlu0 %1698  ;;  %8833 = vmatprep.subr.bf16.mxu0 %v8832_v1  ;;  %v93_v1 = vld [vmem:[%s14178_s10] sm:$0xff] }
 0x3e9   :  { %v1701_v52 = vpop.permute.xlu1 %1700  ;;  %8835 = vmatpush1.bf16.msra.mxu0 %v8834_v49  ;;  %v3424_v22 = vld [vmem:[#allocation3 + $0x198] sm:$0xff]  ;;  %v3437_v49 = vld [vmem:[#allocation3 + $0x200] sm:$0xff] }
 0x3ea   :  { %1726 = vst.msk [vmem:[#allocation3 + $0x1d8] sm:$0xff] %vm1352_vm2, %v1701_v52  ;;  %2448 = vrot.lane.b32.xlu0 %v11567_v59, %s14225_s28  ;;  %v8836_v46 = vpack.c.bf16 %v3424_v22, %v3422_v41  ;;  %v1712_v9 = vsel %vm1710_vm13, %v1699_v47, %v1701_v52 }
 0x3eb   :  { %2450 = vrot.lane.b32.xlu1 %v11557_v60, %s14225_s28  ;;  %v8846_v13 = vpack.c.bf16 %v1712_v9, %v3429_v19  ;;  %s14239_s28 = smov 99  }
 0x3ec   :  { %v1707_v15 = vpop.permute.xlu0 %1706  ;;  %8837 = vmatprep.subr.bf16.mxu0 %v8836_v46  ;;  %v3442_v46 = vld [vmem:[#allocation3 + $0x228] sm:$0xff] }
 0x3ed   :  { %v1709_v11 = vpop.permute.xlu1 %1708  ;;  %8839 = vmatpush1.bf16.msra.mxu0 %v8838_v58  ;;  %v3428_v32 = vld [vmem:[#allocation3 + $0x1b8] sm:$0xff]  ;;  %v103_v58 = vld [vmem:[%s14178_s10 + $0x50] sm:$0xff] }
 0x3ee   :  { %1730 = vst.msk [vmem:[#allocation3 + $0x1f8] sm:$0xff] %vm1352_vm2, %v1709_v11  ;;  %2493 = vrot.lane.b32.xlu0 %v11543_v53, %s14260_s8  ;;  %v8840_v28 = vpack.c.bf16 %v3428_v32, %v3426_v4  ;;  %v1714_v23 = vsel %vm1710_vm13, %v1707_v15, %v1709_v11  ;;  %v3441_v15 = vld [vmem:[#allocation3 + $0x220] sm:$0xff]  ;;  %v114_v11 = vld [vmem:[%s14178_s10 + $0xa8] sm:$0xff] }
 0x3ef   :  { %2495 = vrot.lane.b32.xlu1 %v11549_v16, %s14260_s8  ;;  %v8850_v25 = vpack.c.bf16 %v1714_v23, %v3433_v56  ;;  %v96_v56 = vld [vmem:[%s14178_s10 + $0x18] sm:$0xff] }
 0x3f0   :  { %v1752_v63 = vpop.permute.xlu0 %1751  ;;  %8841 = vmatprep.subr.bf16.mxu0 %v8840_v28 }
 0x3f1   :  { %v1754_v31 = vpop.permute.xlu1 %1753  ;;  %8843 = vmatpush1.bf16.msra.mxu0 %v8842_v39  ;;  %v3432_v55 = vld [vmem:[#allocation3 + $0x1d8] sm:$0xff]  ;;  %v3446_v39 = vld [vmem:[#allocation3 + $0x248] sm:$0xff] }
 0x3f2   :  { %1779 = vst.msk [vmem:[#allocation3 + $0x218] sm:$0xff] %vm1352_vm2, %v1754_v31  ;;  %2501 = vrot.lane.b32.xlu0 %v11567_v59, %s14260_s8  ;;  %v8844_v20 = vpack.c.bf16 %v3432_v55, %v3430_v7  ;;  %v1765_v36 = vsel %vm1763_vm14, %v1752_v63, %v1754_v31  ;;  %v113_v63 = vld [vmem:[%s14178_s10 + $0xa0] sm:$0xff]  ;;  %v124_v55 = vld [vmem:[%s14178_s10 + $0xf8] sm:$0xff] }
 0x3f3   :  { %2503 = vrot.lane.b32.xlu1 %v11557_v60, %s14260_s8  ;;  %v8854_v47 = vpack.c.bf16 %v1765_v36, %v3437_v49  ;;  %v3445_v7 = vld [vmem:[#allocation3 + $0x240] sm:$0xff] }
 0x3f4   :  { %v1760_v18 = vpop.permute.xlu0 %1759  ;;  %8845 = vmatprep.subr.bf16.mxu0 %v8844_v20 }
 0x3f5   :  { %v1762_v29 = vpop.permute.xlu1 %1761  ;;  %8847 = vmatpush1.bf16.msra.mxu0 %v8846_v13  ;;  %v3436_v50 = vld [vmem:[#allocation3 + $0x1f8] sm:$0xff] }
 0x3f6   :  { %1783 = vst.msk [vmem:[#allocation3 + $0x238] sm:$0xff] %vm1352_vm2, %v1762_v29  ;;  %2545 = vrot.lane.b32.xlu0 %v11543_v53, %s14313_s3  ;;  %v8848_v43 = vpack.c.bf16 %v3436_v50, %v3434_v17  ;;  %v1767_v52 = vsel %vm1763_vm14, %v1760_v18, %v1762_v29  ;;  %v3450_v18 = vld [vmem:[#allocation3 + $0x268] sm:$0xff]  ;;  %v123_v17 = vld [vmem:[%s14178_s10 + $0xf0] sm:$0xff] }
 0x3f7   :  { %2547 = vrot.lane.b32.xlu1 %v11549_v16, %s14313_s3  ;;  %v8858_v4 = vpack.c.bf16 %v1767_v52, %v3441_v15 }
 0x3f8   :  { %v1805_v5 = vpop.permute.xlu0 %1804  ;;  %8849 = vmatprep.subr.bf16.mxu0 %v8848_v43  ;;  %v3449_v43 = vld [vmem:[#allocation3 + $0x260] sm:$0xff] }
 0x3f9   :  { %v1807_v33 = vpop.permute.xlu1 %1806  ;;  %8851 = vmatpush1.bf16.msra.mxu0 %v8850_v25  ;;  %v3440_v2 = vld [vmem:[#allocation3 + $0x218] sm:$0xff] }
 0x3fa   :  { %1832 = vst.msk [vmem:[#allocation3 + $0x258] sm:$0xff] %vm1352_vm2, %v1807_v33  ;;  %2553 = vrot.lane.b32.xlu0 %v11567_v59, %s14313_s3  ;;  %v8852_v35 = vpack.c.bf16 %v3440_v2, %v3438_v34  ;;  %v1818_v32 = vsel %vm14270_vm1, %v1805_v5, %v1807_v33  ;;  %v3454_v34 = vld [vmem:[#allocation3 + $0x288] sm:$0xff] }
 0x3fb   :  { %2555 = vrot.lane.b32.xlu1 %v11557_v60, %s14313_s3  ;;  %v8862_v20 = vpack.c.bf16 %v1818_v32, %v3445_v7 }
 0x3fc   :  { %v1813_v41 = vpop.permute.xlu0 %1812  ;;  %8853 = vmatprep.subr.bf16.mxu0 %v8852_v35  ;;  %3762 = vmatmul.mubr.f32.vlgmr.msra.gmra.mrb[24].mxu0 %v93_v1  ;;  %v3453_v35 = vld [vmem:[#allocation3 + $0x280] sm:$0xff] }
 0x3fd   :  { %v1815_v22 = vpop.permute.xlu1 %1814  ;;  %8855 = vmatpush1.bf16.msra.mxu0 %v8854_v47  ;;  %v3444_v12 = vld [vmem:[#allocation3 + $0x238] sm:$0xff]  ;;  %3767 = vmatprep.mubr.f32.mxu0 %v104_v8 }
 0x3fe   :  { %1836 = vst.msk [vmem:[#allocation3 + $0x278] sm:$0xff] %vm1352_vm2, %v1815_v22  ;;  %2598 = vrot.lane.b32.xlu0 %v11543_v53, %s14314_s5  ;;  %v8856_v21 = vpack.c.bf16 %v3444_v12, %v3442_v46  ;;  %v1820_v19 = vsel %vm14270_vm1, %v1813_v41, %v1815_v22  ;;  %v3458_v41 = vld [vmem:[#allocation3 + $0x2a8] sm:$0xff]  ;;  %v3457_v12 = vld [vmem:[#allocation3 + $0x2a0] sm:$0xff] }
 0x3ff   :  { %2600 = vrot.lane.b32.xlu1 %v11549_v16, %s14314_s5  ;;  %v8866_v25 = vpack.c.bf16 %v1820_v19, %v3449_v43 }
 0x400   :  { %v1858_v28 = vpop.permute.xlu0 %1857  ;;  %8857 = vmatprep.subr.bf16.mxu0 %v8856_v21  ;;  %3768 = vmatmul.mubr.f32.gmra.mrb[26].mxu0 %v103_v58 }
 0x401   :  { %v1860_v6 = vpop.permute.xlu1 %1859  ;;  %8859 = vmatpush1.bf16.msra.mxu0 %v8858_v4  ;;  %v3448_v9 = vld [vmem:[#allocation3 + $0x258] sm:$0xff]  ;;  %3773 = vmatprep.mubr.f32.mxu0 %v114_v11  ;;  %v3462_v4 = vld [vmem:[#allocation3 + $0x2c8] sm:$0xff] }
 0x402   :  { %1885 = vst.msk [vmem:[#allocation3 + $0x298] sm:$0xff] %vm1352_vm2, %v1860_v6  ;;  %2606 = vrot.lane.b32.xlu0 %v11567_v59, %s14314_s5  ;;  %v8860_v31 = vpack.c.bf16 %v3448_v9, %v3446_v39  ;;  %v1871_v36 = vsel %vm14269_vm0, %v1858_v28, %v1860_v6  ;;  %v3461_v28 = vld [vmem:[#allocation3 + $0x2c0] sm:$0xff] }
 0x403   :  { %2608 = vrot.lane.b32.xlu1 %v11557_v60, %s14314_s5  ;;  %v8870_v49 = vpack.c.bf16 %v1871_v36, %v3453_v35 }
 0x404   :  { %v1866_v13 = vpop.permute.xlu0 %1865  ;;  %8861 = vmatprep.subr.bf16.mxu0 %v8860_v31  ;;  %3774 = vmatmul.mubr.f32.gmra.mrb[28].mxu0 %v113_v63  ;;  %v11802_v63 = vld [vmem:[#allocation2 + $0x10] sm:$0xff]  ;;  %v3466_v31 = vld [vmem:[#allocation3 + $0x2e8] sm:$0xff] }
 0x405   :  { %v1868_v23 = vpop.permute.xlu1 %1867  ;;  %8863 = vmatpush1.bf16.msra.mxu0 %v8862_v20  ;;  %v3452_v29 = vld [vmem:[#allocation3 + $0x278] sm:$0xff]  ;;  %3779 = vmatprep.mubr.f32.mxu0 %v124_v55 }
 0x406   :  { %1889 = vst.msk [vmem:[#allocation3 + $0x2b8] sm:$0xff] %vm1352_vm2, %v1868_v23  ;;  %2651 = vrot.lane.b32.xlu0 %v11543_v53, %s14315_s23  ;;  %v8864_v50 = vpack.c.bf16 %v3452_v29, %v3450_v18  ;;  %v1873_v8 = vsel %vm14269_vm0, %v1866_v13, %v1868_v23  ;;  %v11807_v55 = vld [vmem:[#allocation2 + $0x18] sm:$0xff]  ;;  %v3470_v29 = vld [vmem:[#allocation3 + $0x308] sm:$0xff]  ;;  %vm14359_vm0 = vcmask 506880  }
 0x407   :  { %2653 = vrot.lane.b32.xlu1 %v11549_v16, %s14315_s23  ;;  %v8874_v58 = vpack.c.bf16 %v1873_v8, %v3457_v12 }
 0x408   :  { %v1911_v5 = vpop.permute.xlu0 %1910  ;;  %8865 = vmatprep.subr.bf16.mxu0 %v8864_v50  ;;  %3780 = vmatmul.mubr.f32.gmra.mrb[30].mxu0 %v123_v17  ;;  %v11815_v50 = vld [vmem:[#allocation2 + $0x38] sm:$0xff] }
 0x409   :  { %v1913_v33 = vpop.permute.xlu1 %1912  ;;  %8867 = vmatpush1.bf16.msra.mxu0 %v8866_v25  ;;  %v3456_v2 = vld [vmem:[#allocation3 + $0x298] sm:$0xff]  ;;  %3850 = vmatprep.mubr.f32.mxu0 %v96_v56  ;;  %v3469_v56 = vld [vmem:[#allocation3 + $0x300] sm:$0xff] }
 0x40a   :  { %1938 = vst.msk [vmem:[#allocation3 + $0x2d8] sm:$0xff] %vm1352_vm2, %v1913_v33  ;;  %2659 = vrot.lane.b32.xlu0 %v11567_v59, %s14315_s23  ;;  %v8868_v1 = vpack.c.bf16 %v3456_v2, %v3454_v34  ;;  %v1924_v21 = vsel %vm14235_vm15, %v1911_v5, %v1913_v33  ;;  %v3474_v34 = vld [vmem:[#allocation3 + $0x328] sm:$0xff] }
 0x40b   :  { %2661 = vrot.lane.b32.xlu1 %v11557_v60, %s14315_s23 }
 0x40c   :  { %v1919_v47 = vpop.permute.xlu0 %1918  ;;  %8869 = vmatprep.subr.bf16.mxu0 %v8868_v1  ;;  %v3473_v1 = vld [vmem:[#allocation3 + $0x320] sm:$0xff] }
 0x40d   :  { %v1921_v52 = vpop.permute.xlu1 %1920  ;;  %8871 = vmatpush1.bf16.msra.mxu0 %v8870_v49  ;;  %v3460_v22 = vld [vmem:[#allocation3 + $0x2b8] sm:$0xff] }
 0x40e   :  { %1942 = vst.msk [vmem:[#allocation3 + $0x2f8] sm:$0xff] %vm1352_vm2, %v1921_v52  ;;  %2704 = vrot.lane.b32.xlu0 %v11543_v53, %s14316_s26  ;;  %v8872_v46 = vpack.c.bf16 %v3460_v22, %v3458_v41  ;;  %v1926_v6 = vsel %vm14235_vm15, %v1919_v47, %v1921_v52  ;;  %vm14317_vm15 = vcmask 941056   ;;  %v11826_v52 = vld [vmem:[#allocation2 + $0x20] sm:$0xff]  ;;  %v3478_v41 = vld [vmem:[#allocation3 + $0x348] sm:$0xff] }
 0x40f   :  { %2706 = vrot.lane.b32.xlu1 %v11549_v16, %s14316_s26  ;;  %v8878_v16 = vpack.c.bf16 %v1924_v21, %v3461_v28 }
 0x410   :  { %v1964_v15 = vpop.permute.xlu0 %1963  ;;  %8873 = vmatprep.subr.bf16.mxu0 %v8872_v46  ;;  %v11831_v46 = vld [vmem:[#allocation2 + $0x28] sm:$0xff] }
 0x411   :  { %v1966_v11 = vpop.permute.xlu1 %1965  ;;  %8875 = vmatpush1.bf16.msra.mxu0 %v8874_v58  ;;  %v3464_v32 = vld [vmem:[#allocation3 + $0x2d8] sm:$0xff]  ;;  %v3477_v58 = vld [vmem:[#allocation3 + $0x340] sm:$0xff] }
 0x412   :  { %1991 = vst.msk [vmem:[#allocation3 + $0x318] sm:$0xff] %vm1352_vm2, %v1966_v11  ;;  %2712 = vrot.lane.b32.xlu0 %v11567_v59, %s14316_s26  ;;  %v8876_v53 = vpack.c.bf16 %v3464_v32, %v3462_v4  ;;  %v1977_v13 = vsel %vm14236_vm12, %v1964_v15, %v1966_v11  ;;  %v11836_v32 = vld [vmem:[#allocation2 + $0x30] sm:$0xff] }
 0x413   :  { %2714 = vrot.lane.b32.xlu1 %v11557_v60, %s14316_s26  ;;  %v3465_v60 = vld [vmem:[#allocation3 + $0x2e0] sm:$0xff]  ;;  %v8886_v25 = vpack.c.bf16 %v1977_v13, %v3469_v56  ;;  %v11849_v13 = vld [vmem:[#allocation2 + $0x8] sm:$0xff] }
 0x414   :  { %v1972_v39 = vpop.permute.xlu0 %1971  ;;  %8877 = vmatprep.subr.bf16.mxu0 %v8876_v53  ;;  %v8882_v19 = vpack.c.bf16 %v1926_v6, %v3465_v60  ;;  %v3482_v53 = vld [vmem:[#allocation3 + $0x368] sm:$0xff]  ;;  %v3481_v6 = vld [vmem:[#allocation3 + $0x360] sm:$0xff] }
 0x415   :  { %v1974_v9 = vpop.permute.xlu1 %1973  ;;  %8879 = vmatpush1.bf16.msra.mxu0 %v8878_v16  ;;  %v3468_v7 = vld [vmem:[#allocation3 + $0x2f8] sm:$0xff]  ;;  %v3486_v60 = vld [vmem:[#allocation3 + $0x388] sm:$0xff] }
 0x416   :  { %1995 = vst.msk [vmem:[#allocation3 + $0x338] sm:$0xff] %vm1352_vm2, %v1974_v9  ;;  %2757 = vrot.lane.b32.xlu0 %v11802_v63, %s14241_s2  ;;  %v8880_v20 = vpack.c.bf16 %v3468_v7, %v3466_v31  ;;  %v1979_v36 = vsel %vm14236_vm12, %v1972_v39, %v1974_v9  ;;  %vm14319_vm12 = vcmask 924672  }
 0x417   :  { %2759 = vrot.lane.b32.xlu1 %v11807_v55, %s14241_s2  ;;  %v8890_v35 = vpack.c.bf16 %v1979_v36, %v3473_v1 }
 0x418   :  { %v2017_v23 = vpop.permute.xlu0 %2016  ;;  %8881 = vmatprep.subr.bf16.mxu0 %v8880_v20  ;;  %v11844_v20 = vld [vmem:[#allocation2] sm:$0xff] }
 0x419   :  { %v2019_v18 = vpop.permute.xlu1 %2018  ;;  %8883 = vmatpush1.bf16.msra.mxu0 %v8882_v19  ;;  %v3472_v17 = vld [vmem:[#allocation3 + $0x318] sm:$0xff] }
 0x41a   :  { %2044 = vst.msk [vmem:[#allocation3 + $0x358] sm:$0xff] %vm1352_vm2, %v2019_v18  ;;  %2765 = vrot.lane.b32.xlu0 %v11567_v59, %s14241_s2  ;;  %v8884_v43 = vpack.c.bf16 %v3472_v17, %v3470_v29  ;;  %v2030_v49 = vsel %vm14317_vm15, %v2017_v23, %v2019_v18  ;;  %v3485_v18 = vld [vmem:[#allocation3 + $0x380] sm:$0xff] }
 0x41b   :  { %2767 = vrot.lane.b32.xlu1 %v11815_v50, %s14241_s2  ;;  %v8894_v21 = vpack.c.bf16 %v2030_v49, %v3477_v58  ;;  %s14247_s2 = smov 95  }
 0x41c   :  { %v2025_v5 = vpop.permute.xlu0 %2024  ;;  %8885 = vmatprep.subr.bf16.mxu0 %v8884_v43 }
 0x41d   :  { %v2027_v33 = vpop.permute.xlu1 %2026  ;;  %8887 = vmatpush1.bf16.msra.mxu0 %v8886_v25  ;;  %v3476_v2 = vld [vmem:[#allocation3 + $0x338] sm:$0xff]  ;;  %v3490_v25 = vld [vmem:[#allocation3 + $0x3a8] sm:$0xff] }
 0x41e   :  { %2048 = vst.msk [vmem:[#allocation3 + $0x378] sm:$0xff] %vm1352_vm2, %v2027_v33  ;;  %2810 = vrot.lane.b32.xlu0 %v11802_v63, %s14237_s9  ;;  %v8888_v59 = vpack.c.bf16 %v3476_v2, %v3474_v34  ;;  %v2032_v15 = vsel %vm14317_vm15, %v2025_v5, %v2027_v33  ;;  %vm14318_vm15 = vcmask 932864   ;;  %v3489_v33 = vld [vmem:[#allocation3 + $0x3a0] sm:$0xff] }
 0x41f   :  { %2812 = vrot.lane.b32.xlu1 %v11807_v55, %s14237_s9  ;;  %v8898_v39 = vpack.c.bf16 %v2032_v15, %v3481_v6 }
 0x420   :  { %v2070_v8 = vpop.permute.xlu0 %2069  ;;  %8889 = vmatprep.subr.bf16.mxu0 %v8888_v59 }
 0x421   :  { %v2072_v47 = vpop.permute.xlu1 %2071  ;;  %8891 = vmatpush1.bf16.msra.mxu0 %v8890_v35  ;;  %v3480_v22 = vld [vmem:[#allocation3 + $0x358] sm:$0xff]  ;;  %v3494_v35 = vld [vmem:[#allocation3 + $0x3c8] sm:$0xff] }
 0x422   :  { %2097 = vst.msk [vmem:[#allocation3 + $0x398] sm:$0xff] %vm1352_vm2, %v2072_v47  ;;  %2814 = vrot.lane.b32.xlu0 %v11826_v52, %s14237_s9  ;;  %v8892_v12 = vpack.c.bf16 %v3480_v22, %v3478_v41  ;;  %v2083_v9 = vsel %vm14318_vm15, %v2070_v8, %v2072_v47  ;;  %v3493_v47 = vld [vmem:[#allocation3 + $0x3c0] sm:$0xff] }
 0x423   :  { %2816 = vrot.lane.b32.xlu1 %v11831_v46, %s14237_s9  ;;  %v8902_v29 = vpack.c.bf16 %v2083_v9, %v3485_v18 }
 0x424   :  { %v2078_v11 = vpop.permute.xlu0 %2077  ;;  %8893 = vmatprep.subr.bf16.mxu0 %v8892_v12 }
 0x425   :  { %v2080_v4 = vpop.permute.xlu1 %2079  ;;  %8895 = vmatpush1.bf16.msra.mxu0 %v8894_v21  ;;  %v3484_v28 = vld [vmem:[#allocation3 + $0x378] sm:$0xff]  ;;  %v3498_v21 = vld [vmem:[#allocation3 + $0x3e8] sm:$0xff] }
 0x426   :  { %2101 = vst.msk [vmem:[#allocation3 + $0x3b8] sm:$0xff] %vm1352_vm2, %v2080_v4  ;;  %2818 = vrot.lane.b32.xlu0 %v11836_v32, %s14237_s9  ;;  %v8896_v16 = vpack.c.bf16 %v3484_v28, %v3482_v53  ;;  %v2085_v17 = vsel %vm14318_vm15, %v2078_v11, %v2080_v4  ;;  %vm14320_vm15 = vmmov %vm14319_vm12  ;;  %v3497_v4 = vld [vmem:[#allocation3 + $0x3e0] sm:$0xff] }
 0x427   :  { %2820 = vrot.lane.b32.xlu1 %v11815_v50, %s14237_s9  ;;  %v8906_v34 = vpack.c.bf16 %v2085_v17, %v3489_v33  ;;  %s14249_s9 = smov 98   ;;  %v116_v33 = vld [vmem:[%s14178_s10 + $0xb8] sm:$0xff] }
 0x428   :  { %v2123_v31 = vpop.permute.xlu0 %2122  ;;  %8897 = vmatprep.subr.bf16.mxu0 %v8896_v16 }
 0x429   :  { %v2125_v7 = vpop.permute.xlu1 %2124  ;;  %8899 = vmatpush1.bf16.msra.mxu0 %v8898_v39  ;;  %v3488_v19 = vld [vmem:[#allocation3 + $0x398] sm:$0xff]  ;;  %v3502_v39 = vld [vmem:[#allocation3 + $0x408] sm:$0xff] }
 0x42a   :  { %2150 = vst.msk [vmem:[#allocation3 + $0x3d8] sm:$0xff] %vm1352_vm2, %v2125_v7  ;;  %2859 = vrot.lane.b32.xlu0 %v11844_v20, %s14239_s28  ;;  %v8900_v23 = vpack.c.bf16 %v3488_v19, %v3486_v60  ;;  %v2136_v2 = vsel %vm14319_vm12, %v2123_v31, %v2125_v7  ;;  %vm14321_vm12 = vcmask 916480   ;;  %v95_v31 = vld [vmem:[%s14178_s10 + $0x10] sm:$0xff]  ;;  %v3501_v60 = vld [vmem:[#allocation3 + $0x400] sm:$0xff]  ;;  %v106_v19 = vld [vmem:[%s14178_s10 + $0x68] sm:$0xff] }
 0x42b   :  { %2861 = vrot.lane.b32.xlu1 %v11849_v13, %s14239_s28  ;;  %v8910_v41 = vpack.c.bf16 %v2136_v2, %v3493_v47 }
 0x42c   :  { %v2131_v43 = vpop.permute.xlu0 %2130  ;;  %8901 = vmatprep.subr.bf16.mxu0 %v8900_v23 }
 0x42d   :  { %v2133_v56 = vpop.permute.xlu1 %2132  ;;  %8903 = vmatpush1.bf16.msra.mxu0 %v8902_v29  ;;  %v3492_v36 = vld [vmem:[#allocation3 + $0x3b8] sm:$0xff] }
 0x42e   :  { %2154 = vst.msk [vmem:[#allocation3 + $0x3f8] sm:$0xff] %vm1352_vm2, %v2133_v56  ;;  %2863 = vrot.lane.b32.xlu0 %v11802_v63, %s14239_s28  ;;  %v8904_v5 = vpack.c.bf16 %v3492_v36, %v3490_v25  ;;  %v2138_v22 = vsel %vm14320_vm15, %v2131_v43, %v2133_v56  ;;  %vm14322_vm15 = vmmov %vm14321_vm12  ;;  %v3506_v43 = vld [vmem:[#allocation3 + $0x428] sm:$0xff]  ;;  %v105_v25 = vld [vmem:[%s14178_s10 + $0x60] sm:$0xff] }
 0x42f   :  { %2865 = vrot.lane.b32.xlu1 %v11807_v55, %s14239_s28  ;;  %v8914_v53 = vpack.c.bf16 %v2138_v22, %v3497_v4  ;;  %v126_v22 = vld [vmem:[%s14178_s10 + $0x108] sm:$0xff] }
 0x430   :  { %v2176_v59 = vpop.permute.xlu0 %2175  ;;  %8905 = vmatprep.subr.bf16.mxu0 %v8904_v5  ;;  %v3505_v5 = vld [vmem:[#allocation3 + $0x420] sm:$0xff] }
 0x431   :  { %v2178_v1 = vpop.permute.xlu1 %2177  ;;  %8907 = vmatpush1.bf16.msra.mxu0 %v8906_v34  ;;  %v3496_v49 = vld [vmem:[#allocation3 + $0x3d8] sm:$0xff] }
 0x432   :  { %2203 = vst.msk [vmem:[#allocation3 + $0x418] sm:$0xff] %vm1352_vm2, %v2178_v1  ;;  %2867 = vrot.lane.b32.xlu0 %v11826_v52, %s14239_s28  ;;  %v8908_v8 = vpack.c.bf16 %v3496_v49, %v3494_v35  ;;  %v2189_v28 = vsel %vm14321_vm12, %v2176_v59, %v2178_v1  ;;  %vm14323_vm12 = vcmask 908288   ;;  %v3510_v35 = vld [vmem:[#allocation3 + $0x448] sm:$0xff] }
 0x433   :  { %2869 = vrot.lane.b32.xlu1 %v11831_v46, %s14239_s28  ;;  %v8918_v23 = vpack.c.bf16 %v2189_v28, %v3501_v60  ;;  %v3518_v60 = vld [vmem:[#allocation3 + $0x488] sm:$0xff] }
 0x434   :  { %v2184_v12 = vpop.permute.xlu0 %2183  ;;  %8909 = vmatprep.subr.bf16.mxu0 %v8908_v8  ;;  %v115_v8 = vld [vmem:[%s14178_s10 + $0xb0] sm:$0xff] }
 0x435   :  { %v2186_v58 = vpop.permute.xlu1 %2185  ;;  %8911 = vmatpush1.bf16.msra.mxu0 %v8910_v41  ;;  %v3500_v15 = vld [vmem:[#allocation3 + $0x3f8] sm:$0xff]  ;;  %v3509_v41 = vld [vmem:[#allocation3 + $0x440] sm:$0xff] }
 0x436   :  { %2207 = vst.msk [vmem:[#allocation3 + $0x438] sm:$0xff] %vm1352_vm2, %v2186_v58  ;;  %2871 = vrot.lane.b32.xlu0 %v11836_v32, %s14239_s28  ;;  %v8912_v11 = vpack.c.bf16 %v3500_v15, %v3498_v21  ;;  %v2191_v18 = vsel %vm14322_vm15, %v2184_v12, %v2186_v58  ;;  %vm14324_vm15 = vmmov %vm14323_vm12 }
 0x437   :  { %2873 = vrot.lane.b32.xlu1 %v11815_v50, %s14239_s28  ;;  %v8922_v34 = vpack.c.bf16 %v2191_v18, %v3505_v5  ;;  %v3517_v18 = vld [vmem:[#allocation3 + $0x480] sm:$0xff]  ;;  %s14254_s28 = smov 92  }
 0x438   :  { %v2229_v16 = vpop.permute.xlu0 %2228  ;;  %8913 = vmatprep.subr.bf16.mxu0 %v8912_v11  ;;  %v3514_v11 = vld [vmem:[#allocation3 + $0x468] sm:$0xff] }
 0x439   :  { %v2231_v6 = vpop.permute.xlu1 %2230  ;;  %8915 = vmatpush1.bf16.msra.mxu0 %v8914_v53  ;;  %v3504_v9 = vld [vmem:[#allocation3 + $0x418] sm:$0xff]  ;;  %v125_v53 = vld [vmem:[%s14178_s10 + $0x100] sm:$0xff] }
 0x43a   :  { %2256 = vst.msk [vmem:[#allocation3 + $0x458] sm:$0xff] %vm1352_vm2, %v2231_v6  ;;  %2912 = vrot.lane.b32.xlu0 %v11844_v20, %s14249_s9  ;;  %v8916_v7 = vpack.c.bf16 %v3504_v9, %v3502_v39  ;;  %v2242_v2 = vsel %vm14323_vm12, %v2229_v16, %v2231_v6  ;;  %v3513_v16 = vld [vmem:[#allocation3 + $0x460] sm:$0xff]  ;;  %v98_v6 = vld [vmem:[%s14178_s10 + $0x28] sm:$0xff]  ;;  %vm14325_vm12 = vcmask 900096  }
 0x43b   :  { %2914 = vrot.lane.b32.xlu1 %v11849_v13, %s14249_s9  ;;  %v8926_v12 = vpack.c.bf16 %v2242_v2, %v3509_v41 }
 0x43c   :  { %v2237_v29 = vpop.permute.xlu0 %2236  ;;  %8917 = vmatprep.subr.bf16.mxu0 %v8916_v7  ;;  %3851 = vmatmul.mubr.f32.vlgmr.msra.gmra.mrb[24].mxu0 %v95_v31 }
 0x43d   :  { %v2239_v17 = vpop.permute.xlu1 %2238  ;;  %8919 = vmatpush1.bf16.msra.mxu0 %v8918_v23  ;;  %v3508_v56 = vld [vmem:[#allocation3 + $0x438] sm:$0xff]  ;;  %3856 = vmatprep.mubr.f32.mxu0 %v106_v19 }
 0x43e   :  { %2260 = vst.msk [vmem:[#allocation3 + $0x478] sm:$0xff] %vm1352_vm2, %v2239_v17  ;;  %2916 = vrot.lane.b32.xlu0 %v11802_v63, %s14249_s9  ;;  %v8920_v36 = vpack.c.bf16 %v3508_v56, %v3506_v43  ;;  %v2244_v58 = vsel %vm14324_vm15, %v2237_v29, %v2239_v17  ;;  %vm14326_vm15 = vmmov %vm14325_vm12 }
 0x43f   :  { %2918 = vrot.lane.b32.xlu1 %v11807_v55, %s14249_s9  ;;  %v8930_v39 = vpack.c.bf16 %v2244_v58, %v3513_v16 }
 0x440   :  { %v2282_v59 = vpop.permute.xlu0 %2281  ;;  %8921 = vmatprep.subr.bf16.mxu0 %v8920_v36  ;;  %3857 = vmatmul.mubr.f32.gmra.mrb[26].mxu0 %v105_v25  ;;  %v3522_v25 = vld [vmem:[#allocation3 + $0x4a8] sm:$0xff] }
 0x441   :  { %v2284_v1 = vpop.permute.xlu1 %2283  ;;  %8923 = vmatpush1.bf16.msra.mxu0 %v8922_v34  ;;  %v3512_v49 = vld [vmem:[#allocation3 + $0x458] sm:$0xff]  ;;  %3862 = vmatprep.mubr.f32.mxu0 %v116_v33  ;;  %v3521_v33 = vld [vmem:[#allocation3 + $0x4a0] sm:$0xff] }
 0x442   :  { %2309 = vst.msk [vmem:[#allocation3 + $0x498] sm:$0xff] %vm1352_vm2, %v2284_v1  ;;  %2920 = vrot.lane.b32.xlu0 %v11826_v52, %s14249_s9  ;;  %v8924_v47 = vpack.c.bf16 %v3512_v49, %v3510_v35  ;;  %v2295_v9 = vsel %vm14325_vm12, %v2282_v59, %v2284_v1  ;;  %vm14327_vm12 = vcmask 891904   ;;  %v3526_v35 = vld [vmem:[#allocation3 + $0x4c8] sm:$0xff] }
 0x443   :  { %2922 = vrot.lane.b32.xlu1 %v11831_v46, %s14249_s9  ;;  %v8934_v29 = vpack.c.bf16 %v2295_v9, %v3517_v18 }
 0x444   :  { %v2290_v21 = vpop.permute.xlu0 %2289  ;;  %8925 = vmatprep.subr.bf16.mxu0 %v8924_v47  ;;  %3863 = vmatmul.mubr.f32.gmra.mrb[28].mxu0 %v115_v8  ;;  %v3525_v47 = vld [vmem:[#allocation3 + $0x4c0] sm:$0xff] }
 0x445   :  { %v2292_v15 = vpop.permute.xlu1 %2291  ;;  %8927 = vmatpush1.bf16.msra.mxu0 %v8926_v12  ;;  %v3516_v4 = vld [vmem:[#allocation3 + $0x478] sm:$0xff]  ;;  %3868 = vmatprep.mubr.f32.mxu0 %v126_v22 }
 0x446   :  { %2313 = vst.msk [vmem:[#allocation3 + $0x4b8] sm:$0xff] %vm1352_vm2, %v2292_v15  ;;  %2924 = vrot.lane.b32.xlu0 %v11836_v32, %s14249_s9  ;;  %v8928_v28 = vpack.c.bf16 %v3516_v4, %v3514_v11  ;;  %v2297_v17 = vsel %vm14326_vm15, %v2290_v21, %v2292_v15  ;;  %vm14328_vm15 = vmmov %vm14327_vm12  ;;  %v3530_v21 = vld [vmem:[#allocation3 + $0x4e8] sm:$0xff]  ;;  %v3529_v4 = vld [vmem:[#allocation3 + $0x4e0] sm:$0xff] }
 0x447   :  { %2926 = vrot.lane.b32.xlu1 %v11815_v50, %s14249_s9  ;;  %v8938_v34 = vpack.c.bf16 %v2297_v17, %v3521_v33  ;;  %s14271_s9 = smov 91  }
 0x448   :  { %v2335_v31 = vpop.permute.xlu0 %2334  ;;  %8929 = vmatprep.subr.bf16.mxu0 %v8928_v28  ;;  %3869 = vmatmul.mubr.f32.gmra.mrb[30].mxu0 %v125_v53 }
 0x449   :  { %v2337_v7 = vpop.permute.xlu1 %2336  ;;  %8931 = vmatpush1.bf16.msra.mxu0 %v8930_v39  ;;  %v3520_v19 = vld [vmem:[#allocation3 + $0x498] sm:$0xff]  ;;  %3939 = vmatprep.mubr.f32.mxu0 %v98_v6  ;;  %v3534_v39 = vld [vmem:[#allocation3 + $0x508] sm:$0xff] }
 0x44a   :  { %2362 = vst.msk [vmem:[#allocation3 + $0x4d8] sm:$0xff] %vm1352_vm2, %v2337_v7  ;;  %2965 = vrot.lane.b32.xlu0 %v11844_v20, %s14245_s6  ;;  %v8932_v23 = vpack.c.bf16 %v3520_v19, %v3518_v60  ;;  %v2348_v2 = vsel %vm14327_vm12, %v2335_v31, %v2337_v7  ;;  %v3533_v7 = vld [vmem:[#allocation3 + $0x500] sm:$0xff]  ;;  %vm14329_vm12 = vcmask 875520  }
 0x44b   :  { %2967 = vrot.lane.b32.xlu1 %v11849_v13, %s14245_s6  ;;  %v8942_v41 = vpack.c.bf16 %v2348_v2, %v3525_v47 }
 0x44c   :  { %v2343_v43 = vpop.permute.xlu0 %2342  ;;  %8933 = vmatprep.subr.bf16.mxu0 %v8932_v23 }
 0x44d   :  { %v2345_v56 = vpop.permute.xlu1 %2344  ;;  %8935 = vmatpush1.bf16.msra.mxu0 %v8934_v29  ;;  %v3524_v36 = vld [vmem:[#allocation3 + $0x4b8] sm:$0xff]  ;;  %v3538_v29 = vld [vmem:[#allocation3 + $0x528] sm:$0xff] }
 0x44e   :  { %2366 = vst.msk [vmem:[#allocation3 + $0x4f8] sm:$0xff] %vm1352_vm2, %v2345_v56  ;;  %2969 = vrot.lane.b32.xlu0 %v11802_v63, %s14245_s6  ;;  %v8936_v5 = vpack.c.bf16 %v3524_v36, %v3522_v25  ;;  %v2350_v22 = vsel %vm14328_vm15, %v2343_v43, %v2345_v56  ;;  %v3537_v56 = vld [vmem:[#allocation3 + $0x520] sm:$0xff]  ;;  %vm14330_vm15 = vmmov %vm14329_vm12 }
 0x44f   :  { %2971 = vrot.lane.b32.xlu1 %v11807_v55, %s14245_s6  ;;  %v8946_v53 = vpack.c.bf16 %v2350_v22, %v3529_v4 }
 0x450   :  { %v2388_v59 = vpop.permute.xlu0 %2387  ;;  %8937 = vmatprep.subr.bf16.mxu0 %v8936_v5 }
 0x451   :  { %v2390_v1 = vpop.permute.xlu1 %2389  ;;  %8939 = vmatpush1.bf16.msra.mxu0 %v8938_v34  ;;  %v3528_v49 = vld [vmem:[#allocation3 + $0x4d8] sm:$0xff]  ;;  %v3542_v34 = vld [vmem:[#allocation3 + $0x548] sm:$0xff] }
 0x452   :  { %2415 = vst.msk [vmem:[#allocation3 + $0x518] sm:$0xff] %vm1352_vm2, %v2390_v1  ;;  %2973 = vrot.lane.b32.xlu0 %v11826_v52, %s14245_s6  ;;  %v8940_v8 = vpack.c.bf16 %v3528_v49, %v3526_v35  ;;  %v2401_v28 = vsel %vm14268_vm8, %v2388_v59, %v2390_v1  ;;  %v3541_v1 = vld [vmem:[#allocation3 + $0x540] sm:$0xff] }
 0x453   :  { %2975 = vrot.lane.b32.xlu1 %v11831_v46, %s14245_s6  ;;  %v8950_v60 = vpack.c.bf16 %v2401_v28, %v3533_v7 }
 0x454   :  { %v2396_v12 = vpop.permute.xlu0 %2395  ;;  %8941 = vmatprep.subr.bf16.mxu0 %v8940_v8 }
 0x455   :  { %v2398_v58 = vpop.permute.xlu1 %2397  ;;  %8943 = vmatpush1.bf16.msra.mxu0 %v8942_v41  ;;  %v3532_v15 = vld [vmem:[#allocation3 + $0x4f8] sm:$0xff]  ;;  %v3546_v41 = vld [vmem:[#allocation3 + $0x568] sm:$0xff] }
 0x456   :  { %2419 = vst.msk [vmem:[#allocation3 + $0x538] sm:$0xff] %vm1352_vm2, %v2398_v58  ;;  %2977 = vrot.lane.b32.xlu0 %v11836_v32, %s14245_s6  ;;  %v8944_v11 = vpack.c.bf16 %v3532_v15, %v3530_v21  ;;  %v2403_v19 = vsel %vm14268_vm8, %v2396_v12, %v2398_v58  ;;  %v3545_v58 = vld [vmem:[#allocation3 + $0x560] sm:$0xff] }
 0x457   :  { %2979 = vrot.lane.b32.xlu1 %v11815_v50, %s14245_s6  ;;  %v8954_v25 = vpack.c.bf16 %v2403_v19, %v3537_v56  ;;  %s14258_s6 = smov 94  }
 0x458   :  { %v2441_v16 = vpop.permute.xlu0 %2440  ;;  %8945 = vmatprep.subr.bf16.mxu0 %v8944_v11 }
 0x459   :  { %v2443_v6 = vpop.permute.xlu1 %2442  ;;  %8947 = vmatpush1.bf16.msra.mxu0 %v8946_v53  ;;  %v3536_v9 = vld [vmem:[#allocation3 + $0x518] sm:$0xff]  ;;  %v3550_v53 = vld [vmem:[#allocation3 + $0x588] sm:$0xff] }
 0x45a   :  { %2468 = vst.msk [vmem:[#allocation3 + $0x558] sm:$0xff] %vm1352_vm2, %v2443_v6  ;;  %3018 = vrot.lane.b32.xlu0 %v11844_v20, %s14243_s27  ;;  %v8948_v31 = vpack.c.bf16 %v3536_v9, %v3534_v39  ;;  %v2454_v36 = vsel %vm14329_vm12, %v2441_v16, %v2443_v6  ;;  %vm14331_vm12 = vcmask 867328   ;;  %v3549_v6 = vld [vmem:[#allocation3 + $0x580] sm:$0xff] }
 0x45b   :  { %3020 = vrot.lane.b32.xlu1 %v11849_v13, %s14243_s27  ;;  %v8958_v35 = vpack.c.bf16 %v2454_v36, %v3541_v1 }
 0x45c   :  { %v2449_v23 = vpop.permute.xlu0 %2448  ;;  %8949 = vmatprep.subr.bf16.mxu0 %v8948_v31 }
 0x45d   :  { %v2451_v18 = vpop.permute.xlu1 %2450  ;;  %8951 = vmatpush1.bf16.msra.mxu0 %v8950_v60  ;;  %v3540_v17 = vld [vmem:[#allocation3 + $0x538] sm:$0xff]  ;;  %v3554_v60 = vld [vmem:[#allocation3 + $0x5a8] sm:$0xff] }
 0x45e   :  { %2472 = vst.msk [vmem:[#allocation3 + $0x578] sm:$0xff] %vm1352_vm2, %v2451_v18  ;;  %3022 = vrot.lane.b32.xlu0 %v11802_v63, %s14243_s27  ;;  %v8952_v43 = vpack.c.bf16 %v3540_v17, %v3538_v29  ;;  %v2456_v49 = vsel %vm14330_vm15, %v2449_v23, %v2451_v18  ;;  %vm14332_vm15 = vmmov %vm14331_vm12  ;;  %v3553_v18 = vld [vmem:[#allocation3 + $0x5a0] sm:$0xff] }
 0x45f   :  { %3024 = vrot.lane.b32.xlu1 %v11807_v55, %s14243_s27  ;;  %v8962_v21 = vpack.c.bf16 %v2456_v49, %v3545_v58 }
 0x460   :  { %v2494_v5 = vpop.permute.xlu0 %2493  ;;  %8953 = vmatprep.subr.bf16.mxu0 %v8952_v43 }
 0x461   :  { %v2496_v33 = vpop.permute.xlu1 %2495  ;;  %8955 = vmatpush1.bf16.msra.mxu0 %v8954_v25  ;;  %v3544_v2 = vld [vmem:[#allocation3 + $0x558] sm:$0xff]  ;;  %v3558_v25 = vld [vmem:[#allocation3 + $0x5c8] sm:$0xff] }
 0x462   :  { %2520 = vst.msk [vmem:[#allocation3 + $0x598] sm:$0xff] %vm1352_vm2, %v2496_v33  ;;  %3026 = vrot.lane.b32.xlu0 %v11826_v52, %s14243_s27  ;;  %v8956_v59 = vpack.c.bf16 %v3544_v2, %v3542_v34  ;;  %v2506_v15 = vsel %vm14331_vm12, %v2494_v5, %v2496_v33  ;;  %vm14333_vm12 = vcmask 859136   ;;  %v3557_v33 = vld [vmem:[#allocation3 + $0x5c0] sm:$0xff] }
 0x463   :  { %3028 = vrot.lane.b32.xlu1 %v11831_v46, %s14243_s27  ;;  %v8966_v39 = vpack.c.bf16 %v2506_v15, %v3549_v6 }
 0x464   :  { %v2502_v8 = vpop.permute.xlu0 %2501  ;;  %8957 = vmatprep.subr.bf16.mxu0 %v8956_v59 }
 0x465   :  { %v2504_v47 = vpop.permute.xlu1 %2503  ;;  %8959 = vmatpush1.bf16.msra.mxu0 %v8958_v35  ;;  %v3548_v22 = vld [vmem:[#allocation3 + $0x578] sm:$0xff]  ;;  %v3562_v35 = vld [vmem:[#allocation3 + $0x5e8] sm:$0xff] }
 0x466   :  { %2524 = vst.msk [vmem:[#allocation3 + $0x5b8] sm:$0xff] %vm1352_vm2, %v2504_v47  ;;  %3030 = vrot.lane.b32.xlu0 %v11836_v32, %s14243_s27  ;;  %v8960_v12 = vpack.c.bf16 %v3548_v22, %v3546_v41  ;;  %v2508_v9 = vsel %vm14332_vm15, %v2502_v8, %v2504_v47  ;;  %vm14334_vm15 = vmmov %vm14333_vm12  ;;  %v3561_v47 = vld [vmem:[#allocation3 + $0x5e0] sm:$0xff] }
 0x467   :  { %3032 = vrot.lane.b32.xlu1 %v11815_v50, %s14243_s27  ;;  %v8970_v29 = vpack.c.bf16 %v2508_v9, %v3553_v18  ;;  %v118_v18 = vld [vmem:[%s14178_s10 + $0xc8] sm:$0xff]  ;;  %s14256_s27 = smov 93  }
 0x468   :  { %v2546_v11 = vpop.permute.xlu0 %2545  ;;  %8961 = vmatprep.subr.bf16.mxu0 %v8960_v12 }
 0x469   :  { %v2548_v4 = vpop.permute.xlu1 %2547  ;;  %8963 = vmatpush1.bf16.msra.mxu0 %v8962_v21  ;;  %v3552_v28 = vld [vmem:[#allocation3 + $0x598] sm:$0xff]  ;;  %v3566_v21 = vld [vmem:[#allocation3 + $0x608] sm:$0xff] }
 0x46a   :  { %2573 = vst.msk [vmem:[#allocation3 + $0x5d8] sm:$0xff] %vm1352_vm2, %v2548_v4  ;;  %3071 = vrot.lane.b32.xlu0 %v11844_v20, %s14247_s2  ;;  %v8964_v16 = vpack.c.bf16 %v3552_v28, %v3550_v53  ;;  %v2559_v17 = vsel %vm14333_vm12, %v2546_v11, %v2548_v4  ;;  %vm14335_vm12 = vcmask 850944   ;;  %v97_v11 = vld [vmem:[%s14178_s10 + $0x20] sm:$0xff]  ;;  %v108_v28 = vld [vmem:[%s14178_s10 + $0x78] sm:$0xff] }
 0x46b   :  { %3073 = vrot.lane.b32.xlu1 %v11849_v13, %s14247_s2  ;;  %v8974_v34 = vpack.c.bf16 %v2559_v17, %v3557_v33  ;;  %v3565_v53 = vld [vmem:[#allocation3 + $0x600] sm:$0xff]  ;;  %v128_v33 = vld [vmem:[%s14178_s10 + $0x118] sm:$0xff] }
 0x46c   :  { %v2554_v31 = vpop.permute.xlu0 %2553  ;;  %8965 = vmatprep.subr.bf16.mxu0 %v8964_v16 }
 0x46d   :  { %v2556_v7 = vpop.permute.xlu1 %2555  ;;  %8967 = vmatpush1.bf16.msra.mxu0 %v8966_v39  ;;  %v3556_v19 = vld [vmem:[#allocation3 + $0x5b8] sm:$0xff] }
 0x46e   :  { %2577 = vst.msk [vmem:[#allocation3 + $0x5f8] sm:$0xff] %vm1352_vm2, %v2556_v7  ;;  %3075 = vrot.lane.b32.xlu0 %v11802_v63, %s14247_s2  ;;  %v8968_v23 = vpack.c.bf16 %v3556_v19, %v3554_v60  ;;  %v2561_v2 = vsel %vm14334_vm15, %v2554_v31, %v2556_v7  ;;  %vm14336_vm15 = vmmov %vm14335_vm12  ;;  %v3570_v31 = vld [vmem:[#allocation3 + $0x628] sm:$0xff]  ;;  %v107_v60 = vld [vmem:[%s14178_s10 + $0x70] sm:$0xff] }
 0x46f   :  { %3077 = vrot.lane.b32.xlu1 %v11807_v55, %s14247_s2  ;;  %v8978_v41 = vpack.c.bf16 %v2561_v2, %v3561_v47  ;;  %v100_v47 = vld [vmem:[%s14178_s10 + $0x38] sm:$0xff] }
 0x470   :  { %v2599_v43 = vpop.permute.xlu0 %2598  ;;  %8969 = vmatprep.subr.bf16.mxu0 %v8968_v23  ;;  %v3569_v23 = vld [vmem:[#allocation3 + $0x620] sm:$0xff] }
 0x471   :  { %v2601_v56 = vpop.permute.xlu1 %2600  ;;  %8971 = vmatpush1.bf16.msra.mxu0 %v8970_v29  ;;  %v3560_v36 = vld [vmem:[#allocation3 + $0x5d8] sm:$0xff] }
 0x472   :  { %2626 = vst.msk [vmem:[#allocation3 + $0x618] sm:$0xff] %vm1352_vm2, %v2601_v56  ;;  %3079 = vrot.lane.b32.xlu0 %v11826_v52, %s14247_s2  ;;  %v8972_v5 = vpack.c.bf16 %v3560_v36, %v3558_v25  ;;  %v2612_v22 = vsel %vm14335_vm12, %v2599_v43, %v2601_v56  ;;  %vm14337_vm12 = vcmask 842752   ;;  %v3574_v25 = vld [vmem:[#allocation3 + $0x648] sm:$0xff] }
 0x473   :  { %3081 = vrot.lane.b32.xlu1 %v11831_v46, %s14247_s2  ;;  %v8982_v16 = vpack.c.bf16 %v2612_v22, %v3565_v53 }
 0x474   :  { %v2607_v59 = vpop.permute.xlu0 %2606  ;;  %8973 = vmatprep.subr.bf16.mxu0 %v8972_v5  ;;  %v3573_v5 = vld [vmem:[#allocation3 + $0x640] sm:$0xff] }
 0x475   :  { %v2609_v1 = vpop.permute.xlu1 %2608  ;;  %8975 = vmatpush1.bf16.msra.mxu0 %v8974_v34  ;;  %v3564_v49 = vld [vmem:[#allocation3 + $0x5f8] sm:$0xff] }
 0x476   :  { %2630 = vst.msk [vmem:[#allocation3 + $0x638] sm:$0xff] %vm1352_vm2, %v2609_v1  ;;  %3083 = vrot.lane.b32.xlu0 %v11836_v32, %s14247_s2  ;;  %v8976_v8 = vpack.c.bf16 %v3564_v49, %v3562_v35  ;;  %v2614_v6 = vsel %vm14336_vm15, %v2607_v59, %v2609_v1  ;;  %vm14338_vm15 = vmmov %vm14337_vm12  ;;  %v3578_v35 = vld [vmem:[#allocation3 + $0x668] sm:$0xff] }
 0x477   :  { %3085 = vrot.lane.b32.xlu1 %v11815_v50, %s14247_s2  ;;  %v8986_v29 = vpack.c.bf16 %v2614_v6, %v3569_v23  ;;  %v5111_v6 = vmul.f32 %v10725_v45, %v10740_v30  ;;  %v5116_v45 = vmul.f32 %v10690_v27, %v10780_v57  ;;  %v12075_v27 = vld [vmem:[#allocation2 + $0x28] sm:$0xff]  ;;  %s14348_s2 = smov 84  }
 0x478   :  { %v2652_v12 = vpop.permute.xlu0 %2651  ;;  %8977 = vmatprep.subr.bf16.mxu0 %v8976_v8  ;;  %v3577_v8 = vld [vmem:[#allocation3 + $0x660] sm:$0xff] }
 0x479   :  { %v2654_v58 = vpop.permute.xlu1 %2653  ;;  %8979 = vmatpush1.bf16.msra.mxu0 %v8978_v41  ;;  %v3568_v15 = vld [vmem:[#allocation3 + $0x618] sm:$0xff] }
 0x47a   :  { %2679 = vst.msk [vmem:[#allocation3 + $0x658] sm:$0xff] %vm1352_vm2, %v2654_v58  ;;  %3124 = vrot.lane.b32.xlu0 %v11844_v20, %s14258_s6  ;;  %v8980_v4 = vpack.c.bf16 %v3568_v15, %v3566_v21  ;;  %v2665_v17 = vsel %vm14337_vm12, %v2652_v12, %v2654_v58  ;;  %vm14339_vm12 = vcmask 834560   ;;  %v3582_v21 = vld [vmem:[#allocation3 + $0x688] sm:$0xff] }
 0x47b   :  { %3126 = vrot.lane.b32.xlu1 %v11849_v13, %s14258_s6  ;;  %v8990_v34 = vpack.c.bf16 %v2665_v17, %v3573_v5  ;;  %v5117_v17 = vmul.f32 %v10769_v38, %v10780_v57  ;;  %v3589_v5 = vld [vmem:[#allocation3 + $0x6c0] sm:$0xff] }
 0x47c   :  { %v2660_v39 = vpop.permute.xlu0 %2659  ;;  %8981 = vmatprep.subr.bf16.mxu0 %v8980_v4  ;;  %3940 = vmatmul.mubr.f32.vlgmr.msra.gmra.mrb[24].mxu0 %v97_v11  ;;  %v3581_v11 = vld [vmem:[#allocation3 + $0x680] sm:$0xff] }
 0x47d   :  { %v2662_v9 = vpop.permute.xlu1 %2661  ;;  %8983 = vmatpush1.bf16.msra.mxu0 %v8982_v16  ;;  %v3572_v7 = vld [vmem:[#allocation3 + $0x638] sm:$0xff]  ;;  %3945 = vmatprep.mubr.f32.mxu0 %v108_v28  ;;  %v14340_v4 = vld [vmem:[#allocation15_spill] sm:$0xff] }
 0x47e   :  { %2683 = vst.msk [vmem:[#allocation3 + $0x678] sm:$0xff] %vm1352_vm2, %v2662_v9  ;;  %3128 = vrot.lane.b32.xlu0 %v11802_v63, %s14258_s6  ;;  %v8984_v19 = vpack.c.bf16 %v3572_v7, %v3570_v31  ;;  %v117_v63 = vld [vmem:[%s14178_s10 + $0xc0] sm:$0xff]  ;;  %v2667_v2 = vsel %vm14338_vm15, %v2660_v39, %v2662_v9  ;;  %v5110_v53 = vmul.f32 %v14340_v4, %v10740_v30  ;;  %vm14341_vm15 = vmmov %vm14339_vm12  ;;  %v12050_v9 = vld [vmem:[#allocation2 + $0x10] sm:$0xff] }
 0x47f   :  { %3130 = vrot.lane.b32.xlu1 %v11807_v55, %s14258_s6  ;;  %v8994_v41 = vpack.c.bf16 %v2667_v2, %v3577_v8  ;;  %v5118_v4 = vmul.f32 %v10801_v3, %v10780_v57 }
 0x480   :  { %v2705_v43 = vpop.permute.xlu0 %2704  ;;  %8985 = vmatprep.subr.bf16.mxu0 %v8984_v19  ;;  %3946 = vmatmul.mubr.f32.gmra.mrb[26].mxu0 %v107_v60  ;;  %v3585_v60 = vld [vmem:[#allocation3 + $0x6a0] sm:$0xff] }
 0x481   :  { %v2707_v56 = vpop.permute.xlu1 %2706  ;;  %8987 = vmatpush1.bf16.msra.mxu0 %v8986_v29  ;;  %v3576_v36 = vld [vmem:[#allocation3 + $0x658] sm:$0xff]  ;;  %3951 = vmatprep.mubr.f32.mxu0 %v118_v18  ;;  %v12063_v29 = vadd.f32 %v5110_v53, %v10823_v37 }
 0x482   :  { %2732 = vst.msk [vmem:[#allocation3 + $0x698] sm:$0xff] %vm1352_vm2, %v2707_v56  ;;  %3132 = vrot.lane.b32.xlu0 %v11826_v52, %s14258_s6  ;;  %v8988_v55 = vpack.c.bf16 %v3576_v36, %v3574_v25  ;;  %v127_v52 = vld [vmem:[%s14178_s10 + $0x110] sm:$0xff]  ;;  %v2718_v22 = vsel %vm14339_vm12, %v2705_v43, %v2707_v56  ;;  %v12067_v56 = vld [vmem:[#allocation2 + $0x20] sm:$0xff]  ;;  %v3590_v25 = vld [vmem:[#allocation3 + $0x6c8] sm:$0xff]  ;;  %vm14253_vm12 = vcmask 809984  }
 0x483   :  { %3134 = vrot.lane.b32.xlu1 %v11831_v46, %s14258_s6  ;;  %v5182_v2 = vmin.f32 %v12063_v29, 0.0 }
 0x484   :  { %v2713_v59 = vpop.permute.xlu0 %2712  ;;  %8989 = vmatprep.subr.bf16.mxu0 %v8988_v55  ;;  %3952 = vmatmul.mubr.f32.gmra.mrb[28].mxu0 %v117_v63  ;;  %v12070_v63 = vadd.f32 %v5111_v6, %v10823_v37 }
 0x485   :  { %v2715_v1 = vpop.permute.xlu1 %2714  ;;  %8991 = vmatpush1.bf16.msra.mxu0 %v8990_v34  ;;  %v3580_v49 = vld [vmem:[#allocation3 + $0x678] sm:$0xff]  ;;  %3957 = vmatprep.mubr.f32.mxu0 %v128_v33 }
 0x486   :  { %2736 = vst.msk [vmem:[#allocation3 + $0x6b8] sm:$0xff] %vm1352_vm2, %v2715_v1  ;;  %3136 = vrot.lane.b32.xlu0 %v11836_v32, %s14258_s6  ;;  %v8992_v46 = vpack.c.bf16 %v3580_v49, %v3578_v35  ;;  %v2720_v28 = vsel %vm14341_vm15, %v2713_v59, %v2715_v1  ;;  %v12084_v59 = vadd.f32 %v5116_v45, %v10861_v10  ;;  %v14342_v1 = vld [vmem:[#allocation23_spill] sm:$0xff]  ;;  %vm5158_vm15 = vcmp.gt.f32.partialorder %v12063_v29, 0.0 }
 0x487   :  { %3138 = vrot.lane.b32.xlu1 %v11815_v50, %s14258_s6  ;;  %v8998_v50 = vpack.c.bf16 %v2718_v22, %v3581_v11  ;;  %v9002_v19 = vpack.c.bf16 %v2720_v28, %v3585_v60  ;;  %v5112_v35 = vmul.f32 %v14342_v1, %v10740_v30  ;;  %v12100_v22 = vld [vmem:[#allocation2 + $0x38] sm:$0xff]  ;;  %v5207_v11 = vmul.f32 1.442695, %v5182_v2  ;;  %v12108_v28 = vld [vmem:[#allocation2] sm:$0xff]  ;;  %s14281_s6 = smov 90  }
 0x488   :  { %v2758_v12 = vpop.permute.xlu0 %2757  ;;  %8993 = vmatprep.subr.bf16.mxu0 %v8992_v46  ;;  %3958 = vmatmul.mubr.f32.gmra.mrb[30].mxu0 %v127_v52  ;;  %v12090_v52 = vld [vmem:[#allocation2 + $0x30] sm:$0xff]  ;;  %v3594_v46 = vld [vmem:[#allocation3 + $0x6e8] sm:$0xff]  ;;  %v3597_v60 = vld [vmem:[#allocation3 + $0x700] sm:$0xff] }
 0x489   :  { %v2760_v58 = vpop.permute.xlu1 %2759  ;;  %8995 = vmatpush1.bf16.msra.mxu0 %v8994_v41  ;;  %v3584_v15 = vld [vmem:[#allocation3 + $0x698] sm:$0xff]  ;;  %4028 = vmatprep.mubr.f32.mxu0 %v100_v47  ;;  %v5183_v47 = vmin.f32 %v12070_v63, 0.0  ;;  %v12094_v41 = vadd.f32 %v5117_v17, %v10861_v10  ;;  %9619 = vpow2.f32 %v5207_v11 }
 0x48a   :  { %2785 = vst.msk [vmem:[#allocation3 + $0x6d8] sm:$0xff] %vm1352_vm2, %v2760_v58  ;;  %3177 = vrot.lane.b32.xlu0 %v11844_v20, %s14256_s27  ;;  %v8996_v32 = vpack.c.bf16 %v3584_v15, %v3582_v21  ;;  %v3586_v20 = vld [vmem:[#allocation3 + $0x6a8] sm:$0xff]  ;;  %v2771_v23 = vsel %vm14252_vm10, %v2758_v12, %v2760_v58  ;;  %v3593_v58 = vld [vmem:[#allocation3 + $0x6e0] sm:$0xff] }
 0x48b   :  { %3179 = vrot.lane.b32.xlu1 %v11849_v13, %s14256_s27  ;;  %v12055_v13 = vld [vmem:[#allocation2 + $0x18] sm:$0xff]  ;;  %v9006_v38 = vpack.c.bf16 %v2771_v23, %v3589_v5 }
 0x48c   :  { %v2766_v16 = vpop.permute.xlu0 %2765  ;;  %8997 = vmatprep.subr.bf16.mxu0 %v8996_v32 }
 0x48d   :  { %v2768_v39 = vpop.permute.xlu1 %2767  ;;  %8999 = vmatpush1.bf16.msra.mxu0 %v8998_v50  ;;  %v3588_v31 = vld [vmem:[#allocation3 + $0x6b8] sm:$0xff]  ;;  %v5188_v50 = vmin.f32 %v12084_v59, 0.0 }
 0x48e   :  { %2789 = vst.msk [vmem:[#allocation3 + $0x6f8] sm:$0xff] %vm1352_vm2, %v2768_v39  ;;  %3181 = vrot.lane.b32.xlu0 %v12050_v9, %s14256_s27  ;;  %v9000_v7 = vpack.c.bf16 %v3588_v31, %v3586_v20  ;;  %v2773_v33 = vsel %vm14252_vm10, %v2766_v16, %v2768_v39  ;;  %v3598_v16 = vld [vmem:[#allocation3 + $0x708] sm:$0xff]  ;;  %v5209_v39 = vmul.f32 1.442695, %v5183_v47  ;;  %v5189_v20 = vmin.f32 %v12094_v41, 0.0 }
 0x48f   :  { %3183 = vrot.lane.b32.xlu1 %v12055_v13, %s14256_s27  ;;  %v9010_v21 = vpack.c.bf16 %v2773_v33, %v3593_v58  ;;  %v12112_v31 = vadd.f32 %v5112_v35, %v10823_v37  ;;  %v14345_v33 = vld [vmem:[#allocation21_spill] sm:$0xff]  ;;  %v14346_v35 = vld [vmem:[#allocation7_spill] sm:$0xff]  ;;  %vm5165_vm10 = vcmp.gt.f32.partialorder %v12094_v41, 0.0 }
 0x490   :  { %v2811_v18 = vpop.permute.xlu0 %2810  ;;  %9001 = vmatprep.subr.bf16.mxu0 %v9000_v7  ;;  %v12117_v7 = vld [vmem:[#allocation2 + $0x8] sm:$0xff]  ;;  %9621 = vpow2.f32 %v5209_v39  ;;  %v5128_v2 = vmul.f32 %v14345_v33, %v10816_v26 }
 0x491   :  { %v2813_v43 = vpop.permute.xlu1 %2812  ;;  %9003 = vmatpush1.bf16.msra.mxu0 %v9002_v19  ;;  %v3592_v36 = vld [vmem:[#allocation3 + $0x6d8] sm:$0xff]  ;;  %v14343_v19 = vld [vmem:[#allocation16_spill] sm:$0xff]  ;;  %v5184_v5 = vmin.f32 %v12112_v31, 0.0 }
 0x492   :  { %2838 = vst.msk [vmem:[#allocation3 + $0x718] sm:$0xff] %vm1352_vm2, %v2813_v43  ;;  %3185 = vrot.lane.b32.xlu0 %v12067_v56, %s14256_s27  ;;  %v9004_v55 = vpack.c.bf16 %v3592_v36, %v3590_v25  ;;  %v2824_v15 = vsel %vm14251_vm7, %v2811_v18, %v2813_v43  ;;  %v5122_v45 = vmul.f32 %v14343_v19, %v10786_v51  ;;  %v14344_v18 = vld [vmem:[#allocation22_spill] sm:$0xff]  ;;  %v5219_v25 = vmul.f32 1.442695, %v5188_v50 }
 0x493   :  { %3187 = vrot.lane.b32.xlu1 %v12075_v27, %s14256_s27  ;;  %v9014_v23 = vpack.c.bf16 %v2824_v15, %v3597_v60  ;;  %v5123_v17 = vmul.f32 %v14344_v18, %v10786_v51  ;;  %v5211_v11 = vmul.f32 1.442695, %v5184_v5 }
 0x494   :  { %v12080_v34 = vpop.permute.xlu0 %2814  ;;  %9005 = vmatprep.subr.bf16.mxu0 %v9004_v55  ;;  %v5221_v55 = vmul.f32 1.442695, %v5189_v20  ;;  %v12139_v1 = vadd.f32 %v5122_v45, %v10870_v61  ;;  %9623 = vpow2.f32 %v5219_v25  ;;  %v9620_v20 = vpop.eup %9619 }
 0x495   :  { %v12088_v49 = vpop.permute.xlu1 %2816  ;;  %9007 = vmatpush1.bf16.msra.mxu0 %v9006_v38  ;;  %v3596_v8 = vld [vmem:[#allocation3 + $0x6f8] sm:$0xff]  ;;  %v12129_v38 = vadd.f32 %v5118_v4, %v10861_v10  ;;  %v8704_v5 = vadd.f32 -1.0, %v9620_v20 }
 0x496   :  { %2840 = vst.msk [vmem:[#allocation3 + $0x728] sm:$0xff] %vm1352_vm2, %v12088_v49  ;;  %3189 = vrot.lane.b32.xlu0 %v12090_v52, %s14256_s27  ;;  %v9008_v12 = vpack.c.bf16 %v3596_v8, %v3594_v46  ;;  %v5129_v46 = vmul.f32 %v14346_v35, %v10816_v26  ;;  %9625 = vpow2.f32 %v5221_v55  ;;  %v2825_v50 = vsel %vm14251_vm7, %v12080_v34, %v12088_v49 }
 0x497   :  { %3191 = vrot.lane.b32.xlu1 %v12100_v22, %s14256_s27  ;;  %9627 = vpow2.f32 %v5211_v11 }
 0x498   :  { %v2819_v32 = vpop.permute.xlu0 %2818  ;;  %9009 = vmatprep.subr.bf16.mxu0 %v9008_v12  ;;  %v12145_v12 = vadd.f32 %v5123_v17, %v10870_v61  ;;  %v12164_v49 = vadd.f32 %v5129_v46, %v10898_v48  ;;  %v5119_v17 = vmul.f32 %v10883_v54, %v10780_v57 }
 0x499   :  { %v2821_v53 = vpop.permute.xlu1 %2820  ;;  %9011 = vmatpush1.bf16.msra.mxu0 %v9010_v21  ;;  %v3600_v6 = vld [vmem:[#allocation3 + $0x718] sm:$0xff] }
 0x49a   :  { %2842 = vst.msk [vmem:[#allocation3 + $0x738] sm:$0xff] %vm1352_vm2, %v2821_v53  ;;  %3230 = vrot.lane.b32.xlu0 %v12108_v28, %s14254_s28  ;;  %v9012_v3 = vpack.c.bf16 %v3600_v6, %v3598_v16  ;;  %v2826_v8 = vsel %vm14251_vm7, %v2819_v32, %v2821_v53  ;;  %v5194_v53 = vmin.f32 %v12139_v1, 0.0  ;;  %v12158_v16 = vadd.f32 %v5128_v2, %v10898_v48 }
 0x49b   :  { %3232 = vrot.lane.b32.xlu1 %v12117_v7, %s14254_s28  ;;  %v9018_v4 = vpack.c.bf16 %v2826_v8, %v2825_v50  ;;  %v5195_v34 = vmin.f32 %v12145_v12, 0.0  ;;  %v5201_v18 = vmin.f32 %v12164_v49, 0.0  ;;  %v14347_v8 = vld [vmem:[#allocation24_spill] sm:$0xff]  ;;  %vm5159_vm7 = vcmp.gt.f32.partialorder %v12070_v63, 0.0 }
 0x49c   :  { %v12125_v43 = vpop.permute.xlu0 %2859  ;;  %9013 = vmatprep.subr.bf16.mxu0 %v9012_v3  ;;  %v9622_v3 = vpop.eup %9621  ;;  %v5231_v60 = vmul.f32 1.442695, %v5194_v53 }
 0x49d   :  { %v2862_v36 = vpop.permute.xlu1 %2861  ;;  %9015 = vmatpush1.bf16.msra.mxu0 %v9014_v23  ;;  %v3602_v21 = vld [vmem:[#allocation3 + $0x728] sm:$0xff]  ;;  %v5233_v23 = vmul.f32 1.442695, %v5195_v34  ;;  %v8705_v54 = vadd.f32 -1.0, %v9622_v3 }
 0x49e   :  { %2889 = vst.msk [vmem:[#allocation3 + $0x748] sm:$0xff] %vm1352_vm2, %v2862_v36  ;;  %3234 = vrot.lane.b32.xlu0 %v12050_v9, %s14254_s28  ;;  %v2876_v2 = vsel %vm14253_vm12, %v12125_v43, %v2862_v36  ;;  %v12200_v36 = vsel %vm5158_vm15, %v12063_v29, %v8704_v5  ;;  %v5130_v29 = vmul.f32 %v10804_v62, %v10816_v26  ;;  %vm5164_vm15 = vcmp.gt.f32.partialorder %v12084_v59, 0.0 }
 0x49f   :  { %3236 = vrot.lane.b32.xlu1 %v12055_v13, %s14254_s28  ;;  %v5190_v13 = vmin.f32 %v12129_v38, 0.0  ;;  %v5279_v50 = vsel %vm5159_vm7, %v12070_v63, %v8705_v54  ;;  %vm5160_vm7 = vcmp.gt.f32.partialorder %v12112_v31, 0.0 }
 0x4a0   :  { %v2864_v47 = vpop.permute.xlu0 %2863 }
 0x4a1   :  { %v2866_v58 = vpop.permute.xlu1 %2865  ;;  %v3604_v15 = vld [vmem:[#allocation3 + $0x738] sm:$0xff] }
 0x4a2   :  { %2891 = vst.msk [vmem:[#allocation3 + $0x758] sm:$0xff] %vm1352_vm2, %v2866_v58  ;;  %3238 = vrot.lane.b32.xlu0 %v12067_v56, %s14254_s28  ;;  %v9016_v32 = vpack.c.bf16 %v3604_v15, %v3602_v21  ;;  %v5113_v56 = vmul.f32 %v10826_v40, %v10740_v30  ;;  %v5200_v40 = vmin.f32 %v12158_v16, 0.0  ;;  %v2877_v19 = vsel %vm14253_vm12, %v2864_v47, %v2866_v58 }
 0x4a3   :  { %3240 = vrot.lane.b32.xlu1 %v12075_v27, %s14254_s28  ;;  %v5223_v27 = vmul.f32 1.442695, %v5190_v13  ;;  %v5124_v47 = vmul.f32 %v14347_v8, %v10786_v51  ;;  %v9022_v58 = vpack.c.bf16 %v2877_v19, %v2876_v2  ;;  %v12204_v13 = vadd.f32 %v5119_v17, %v10861_v10 }
 0x4a4   :  { %v12160_v6 = vpop.permute.xlu0 %2867  ;;  %9017 = vmatprep.subr.bf16.mxu0 %v9016_v32  ;;  %v12182_v33 = vadd.f32 %v5113_v56, %v10823_v37  ;;  %v5243_v21 = vmul.f32 1.442695, %v5200_v40  ;;  %v5114_v17 = vmul.f32 %v10838_v24, %v10740_v30  ;;  %v5120_v2 = vmul.f32 %v10900_v0, %v10780_v57 }
 0x4a5   :  { %v12168_v39 = vpop.permute.xlu1 %2869  ;;  %9019 = vmatpush1.bf16.msra.mxu0 %v9018_v4  ;;  %v3606_v55 = vld [vmem:[#allocation3 + $0x748] sm:$0xff]  ;;  %9629 = vpow2.f32 %v5223_v27  ;;  %v5191_v62 = vmin.f32 %v12204_v13, 0.0 }
 0x4a6   :  { %2893 = vst.msk [vmem:[#allocation3 + $0x768] sm:$0xff] %vm1352_vm2, %v12168_v39  ;;  %3242 = vrot.lane.b32.xlu0 %v12090_v52, %s14254_s28  ;;  %9631 = vpow2.f32 %v5231_v60  ;;  %v12222_v60 = vadd.f32 %v5124_v47, %v10870_v61  ;;  %v2878_v40 = vsel %vm14253_vm12, %v12160_v6, %v12168_v39  ;;  %v12237_v6 = vadd.f32 %v5130_v29, %v10898_v48 }
 0x4a7   :  { %3244 = vrot.lane.b32.xlu1 %v12100_v22, %s14254_s28  ;;  %v9624_v22 = vpop.eup %9623  ;;  %9633 = vpow2.f32 %v5233_v23  ;;  %v5125_v29 = vmul.f32 %v10829_v44, %v10786_v51  ;;  %s14349_s28 = smov 62  }
 0x4a8   :  { %v2872_v45 = vpop.permute.xlu0 %2871  ;;  %v9626_v46 = vpop.eup %9625  ;;  %v8710_v11 = vadd.f32 -1.0, %v9624_v22  ;;  %9635 = vpow2.f32 %v5243_v21 }
 0x4a9   :  { %v2874_v25 = vpop.permute.xlu1 %2873  ;;  %v3608_v52 = vld [vmem:[#allocation3 + $0x758] sm:$0xff]  ;;  %v8711_v32 = vadd.f32 -1.0, %v9626_v46  ;;  %v9628_v4 = vpop.eup %9627  ;;  %v5202_v46 = vmin.f32 %v12237_v6, 0.0 }
 0x4aa   :  { %2895 = vst.msk [vmem:[#allocation3 + $0x778] sm:$0xff] %vm1352_vm2, %v2874_v25  ;;  %3283 = vrot.lane.b32.xlu0 %v12108_v28, %s14271_s9  ;;  %v9020_v35 = vpack.c.bf16 %v3608_v52, %v3606_v55  ;;  %v5245_v28 = vmul.f32 1.442695, %v5201_v18  ;;  %v2879_v53 = vsel %vm14253_vm12, %v2872_v45, %v2874_v25  ;;  %v12218_v27 = vsel %vm5164_vm15, %v12084_v59, %v8710_v11 }
 0x4ab   :  { %3285 = vrot.lane.b32.xlu1 %v12117_v7, %s14271_s9  ;;  %v5185_v7 = vmin.f32 %v12182_v33, 0.0  ;;  %v5285_v59 = vsel %vm5165_vm10, %v12094_v41, %v8711_v32  ;;  %v8706_v45 = vadd.f32 -1.0, %v9628_v4  ;;  %v9026_v18 = vpack.c.bf16 %v2879_v53, %v2878_v40 }
 0x4ac   :  { %v12193_v15 = vpop.permute.xlu0 %2912  ;;  %9021 = vmatprep.subr.bf16.mxu0 %v9020_v35  ;;  %9637 = vpow2.f32 %v5245_v28  ;;  %v5225_v41 = vmul.f32 1.442695, %v5191_v62  ;;  %v5196_v52 = vmin.f32 %v12222_v60, 0.0  ;;  %vm14263_vm10 = vcmask 801792  }
 0x4ad   :  { %v12197_v43 = vpop.permute.xlu1 %2914  ;;  %9023 = vmatpush1.bf16.msra.mxu0 %v9022_v58  ;;  %v3610_v63 = vld [vmem:[#allocation3 + $0x768] sm:$0xff]  ;;  %v5213_v3 = vmul.f32 1.442695, %v5185_v7  ;;  %v12247_v24 = vsel %vm5160_vm7, %v12112_v31, %v8706_v45  ;;  %vm5166_vm15 = vcmp.gt.f32.partialorder %v12129_v38, 0.0  ;;  %v12257_v11 = vadd.f32 %v5114_v17, %v10823_v37 }
 0x4ae   :  { %2942 = vst.msk [vmem:[#allocation3 + $0x788] sm:$0xff] %vm1352_vm2, %v12197_v43  ;;  %5309 = vrot.lane.b32.xlu0 %v12200_v36, %s14260_s8  ;;  %v5235_v28 = vmul.f32 1.442695, %v5196_v52  ;;  %v2929_v0 = vsel %vm14263_vm10, %v12193_v15, %v12197_v43  ;;  %vm5170_vm7 = vcmp.gt.f32.partialorder %v12139_v1, 0.0  ;;  %vm5171_vm12 = vcmp.gt.f32.partialorder %v12145_v12, 0.0 }
 0x4af   :  { %5311 = vrot.lane.b32.xlu1 %v5279_v50, %s14260_s8  ;;  %v9630_v23 = vpop.eup %9629  ;;  %9639 = vpow2.f32 %v5213_v3  ;;  %v5247_v15 = vmul.f32 1.442695, %v5202_v46  ;;  %v5131_v40 = vmul.f32 %v10885_v42, %v10816_v26  ;;  %v12303_v17 = vadd.f32 %v5125_v29, %v10870_v61 }
 0x4b0   :  { %v2917_v34 = vpop.permute.xlu0 %2916  ;;  %v9632_v39 = vpop.eup %9631  ;;  %v8712_v22 = vadd.f32 -1.0, %v9630_v23  ;;  %9641 = vpow2.f32 %v5225_v41 }
 0x4b1   :  { %v2919_v56 = vpop.permute.xlu1 %2918  ;;  %v3612_v20 = vld [vmem:[#allocation3 + $0x778] sm:$0xff]  ;;  %v9634_v5 = vpop.eup %9633  ;;  %v8716_v21 = vadd.f32 -1.0, %v9632_v39  ;;  %9643 = vpow2.f32 %v5235_v28 }
 0x4b2   :  { %2944 = vst.msk [vmem:[#allocation3 + $0x798] sm:$0xff] %vm1352_vm2, %v2919_v56  ;;  %5313 = vrot.lane.b32.xlu0 %v12218_v27, %s14260_s8  ;;  %v9024_v19 = vpack.c.bf16 %v3612_v20, %v3610_v63  ;;  %v2930_v35 = vsel %vm14263_vm10, %v2917_v34, %v2919_v56  ;;  %v9636_v8 = vpop.eup %9635  ;;  %v8717_v4 = vadd.f32 -1.0, %v9634_v5  ;;  %v5186_v63 = vmin.f32 %v12257_v11, 0.0 }
 0x4b3   :  { %5315 = vrot.lane.b32.xlu1 %v5285_v59, %s14260_s8  ;;  %v9030_v53 = vpack.c.bf16 %v2930_v35, %v2929_v0  ;;  %v12281_v44 = vsel %vm5170_vm7, %v12139_v1, %v8716_v21  ;;  %v8722_v56 = vadd.f32 -1.0, %v9636_v8  ;;  %vm5177_vm7 = vcmp.gt.f32.partialorder %v12164_v49, 0.0 }
 0x4b4   :  { %v12234_v25 = vpop.permute.xlu0 %2920  ;;  %9025 = vmatprep.subr.bf16.mxu0 %v9024_v19  ;;  %v12289_v20 = vsel %vm5171_vm12, %v12145_v12, %v8717_v4  ;;  %9645 = vpow2.f32 %v5247_v15  ;;  %vm5161_vm12 = vcmp.gt.f32.partialorder %v12182_v33, 0.0 }
 0x4b5   :  { %v12239_v55 = vpop.permute.xlu1 %2922  ;;  %9027 = vmatpush1.bf16.msra.mxu0 %v9026_v18  ;;  %v3614_v58 = vld [vmem:[#allocation3 + $0x788] sm:$0xff]  ;;  %v5215_v18 = vmul.f32 1.442695, %v5186_v63 }
 0x4b6   :  { %2946 = vst.msk [vmem:[#allocation3 + $0x7a8] sm:$0xff] %vm1352_vm2, %v12239_v55  ;;  %5349 = vrot.lane.b32.xlu0 %v5279_v50, %s14348_s2  ;;  %v9638_v7 = vpop.eup %9637  ;;  %v12265_v50 = vsel %vm5166_vm15, %v12129_v38, %v8712_v22  ;;  %v12276_v38 = vadd.f32 %v5120_v2, %v10861_v10  ;;  %vm5176_vm15 = vcmp.gt.f32.partialorder %v12158_v16, 0.0  ;;  %v2931_v39 = vsel %vm14263_vm10, %v12234_v25, %v12239_v55 }
 0x4b7   :  { %5351 = vrot.lane.b32.xlu1 %v12247_v24, %s14348_s2  ;;  %v8723_v3 = vadd.f32 -1.0, %v9638_v7  ;;  %v12299_v12 = vsel %vm5176_vm15, %v12158_v16, %v8722_v56  ;;  %v5126_v2 = vmul.f32 %v10841_v14, %v10786_v51  ;;  %9647 = vpow2.f32 %v5215_v18 }
 0x4b8   :  { %v2925_v54 = vpop.permute.xlu0 %2924  ;;  %v5192_v42 = vmin.f32 %v12276_v38, 0.0  ;;  %vm14262_vm15 = vcmask 793600  }
 0x4b9   :  { %v2927_v47 = vpop.permute.xlu1 %2926  ;;  %v3616_v31 = vld [vmem:[#allocation3 + $0x798] sm:$0xff]  ;;  %v9640_v62 = vpop.eup %9639  ;;  %v12312_v16 = vsel %vm5177_vm7, %v12164_v49, %v8723_v3  ;;  %v5197_v49 = vmin.f32 %v12303_v17, 0.0  ;;  %vm5167_vm7 = vcmp.gt.f32.partialorder %v12204_v13, 0.0 }
 0x4ba   :  { %2948 = vst.msk [vmem:[#allocation3 + $0x7b8] sm:$0xff] %vm1352_vm2, %v2927_v47  ;;  %5353 = vrot.lane.b32.xlu0 %v5285_v59, %s14348_s2  ;;  %v9028_v32 = vpack.c.bf16 %v3616_v31, %v3614_v58  ;;  %v2932_v1 = vsel %vm14263_vm10, %v2925_v54, %v2927_v47  ;;  %v8707_v52 = vadd.f32 -1.0, %v9640_v62  ;;  %v9642_v5 = vpop.eup %9641  ;;  %v5227_v55 = vmul.f32 1.442695, %v5192_v42  ;;  %v14350_v47 = vld [vmem:[#allocation8_spill] sm:$0xff] }
 0x4bb   :  { %5355 = vrot.lane.b32.xlu1 %v12265_v50, %s14348_s2  ;;  %v9034_v22 = vpack.c.bf16 %v2932_v1, %v2931_v39  ;;  %v12321_v54 = vadd.f32 %v5131_v40, %v10898_v48  ;;  %v8713_v46 = vadd.f32 -1.0, %v9642_v5  ;;  %v9644_v8 = vpop.eup %9643  ;;  %v5132_v58 = vmul.f32 %v14350_v47, %v10816_v26 }
 0x4bc   :  { %v12271_v34 = vpop.permute.xlu0 %2965  ;;  %9029 = vmatprep.subr.bf16.mxu0 %v9028_v32  ;;  %v12327_v14 = vsel %vm5161_vm12, %v12182_v33, %v8707_v52  ;;  %9649 = vpow2.f32 %v5227_v55  ;;  %v5237_v33 = vmul.f32 1.442695, %v5197_v49  ;;  %v12337_v32 = vadd.f32 %v5126_v2, %v10870_v61 }
 0x4bd   :  { %v12278_v43 = vpop.permute.xlu1 %2967  ;;  %9031 = vmatpush1.bf16.msra.mxu0 %v9030_v53  ;;  %v3618_v45 = vld [vmem:[#allocation3 + $0x7a8] sm:$0xff]  ;;  %v5203_v0 = vmin.f32 %v12321_v54, 0.0  ;;  %v12346_v53 = vsel %vm5167_vm7, %v12204_v13, %v8713_v46  ;;  %v8718_v56 = vadd.f32 -1.0, %v9644_v8  ;;  %vm5172_vm12 = vcmp.gt.f32.partialorder %v12222_v60, 0.0 }
 0x4be   :  { %2995 = vst.msk [vmem:[#allocation3 + $0x7c8] sm:$0xff] %vm1352_vm2, %v12278_v43  ;;  %5317 = vrot.lane.b32.xlu0 %v12281_v44, %s14260_s8  ;;  %v9646_v4 = vpop.eup %9645  ;;  %v2982_v29 = vsel %vm14262_vm15, %v12271_v34, %v12278_v43  ;;  %9651 = vpow2.f32 %v5237_v33  ;;  %v5198_v43 = vmin.f32 %v12337_v32, 0.0  ;;  %vm5178_vm7 = vcmp.gt.f32.partialorder %v12237_v6, 0.0 }
 0x4bf   :  { %5319 = vrot.lane.b32.xlu1 %v12289_v20, %s14260_s8  ;;  %v5249_v34 = vmul.f32 1.442695, %v5203_v0  ;;  %v5292_v13 = vsel %vm5172_vm12, %v12222_v60, %v8718_v56  ;;  %v8724_v40 = vadd.f32 -1.0, %v9646_v4  ;;  %vm5162_vm12 = vcmp.gt.f32.partialorder %v12257_v11, 0.0 }
 0x4c0   :  { %v2970_v59 = vpop.permute.xlu0 %2969  ;;  %v5239_v42 = vmul.f32 1.442695, %v5198_v43 }
 0x4c1   :  { %v2972_v19 = vpop.permute.xlu1 %2971  ;;  %v3620_v23 = vld [vmem:[#allocation3 + $0x7b8] sm:$0xff]  ;;  %v9648_v1 = vpop.eup %9647  ;;  %9653 = vpow2.f32 %v5249_v34  ;;  %v5298_v60 = vsel %vm5178_vm7, %v12237_v6, %v8724_v40  ;;  %vm3034_vm7 = vcmask 785408  }
 0x4c2   :  { %2997 = vst.msk [vmem:[#allocation3 + $0x7d8] sm:$0xff] %vm1352_vm2, %v2972_v19  ;;  %5321 = vrot.lane.b32.xlu0 %v12299_v12, %s14260_s8  ;;  %v9032_v41 = vpack.c.bf16 %v3620_v23, %v3618_v45  ;;  %v2983_v31 = vsel %vm14262_vm15, %v2970_v59, %v2972_v19  ;;  %v8708_v52 = vadd.f32 -1.0, %v9648_v1  ;;  %9655 = vpow2.f32 %v5239_v42 }
 0x4c3   :  { %5323 = vrot.lane.b32.xlu1 %v12312_v16, %s14260_s8  ;;  %v9038_v63 = vpack.c.bf16 %v2983_v31, %v2982_v29  ;;  %s14351_s8 = smov 40  }
 0x4c4   :  { %v2974_v35 = vpop.permute.xlu0 %2973  ;;  %9033 = vmatprep.subr.bf16.mxu0 %v9032_v41  ;;  %v5282_v6 = vsel %vm5162_vm12, %v12257_v11, %v8708_v52  ;;  %vm5173_vm12 = vcmp.gt.f32.partialorder %v12303_v17, 0.0 }
 0x4c5   :  { %v2976_v25 = vpop.permute.xlu1 %2975  ;;  %9035 = vmatpush1.bf16.msra.mxu0 %v9034_v22  ;;  %v3622_v7 = vld [vmem:[#allocation3 + $0x7c8] sm:$0xff] }
 0x4c6   :  { %2999 = vst.msk [vmem:[#allocation3 + $0x7e8] sm:$0xff] %vm1352_vm2, %v2976_v25  ;;  %5389 = vrot.lane.b32.xlu0 %v12247_v24, %s14349_s28  ;;  %v9650_v5 = vpop.eup %9649 }
 0x4c7   :  { %5391 = vrot.lane.b32.xlu1 %v12327_v14, %s14349_s28 }
 0x4c8   :  { %v2978_v21 = vpop.permute.xlu0 %2977  ;;  %v9652_v49 = vpop.eup %9651 }
 0x4c9   :  { %v2980_v28 = vpop.permute.xlu1 %2979  ;;  %v3624_v24 = vld [vmem:[#allocation3 + $0x7d8] sm:$0xff] }
 0x4ca   :  { %3001 = vst.msk [vmem:[#allocation3 + $0x7f8] sm:$0xff] %vm1352_vm2, %v2980_v28  ;;  %5393 = vrot.lane.b32.xlu0 %v12265_v50, %s14349_s28  ;;  %v9036_v15 = vpack.c.bf16 %v3624_v24, %v3622_v7  ;;  %v12353_v50 = vadd.f32 %v5132_v58, %v10898_v48  ;;  %v2985_v59 = vsel %vm14262_vm15, %v2978_v21, %v2980_v28  ;;  %v8719_v28 = vadd.f32 -1.0, %v9652_v49 }
 0x4cb   :  { %5395 = vrot.lane.b32.xlu1 %v12346_v53, %s14349_s28  ;;  %v9654_v7 = vpop.eup %9653 }
 0x4cc   :  { %v3019_v3 = vpop.permute.xlu0 %3018  ;;  %9037 = vmatprep.subr.bf16.mxu0 %v9036_v15  ;;  %v5204_v39 = vmin.f32 %v12353_v50, 0.0  ;;  %v5293_v4 = vsel %vm5173_vm12, %v12303_v17, %v8719_v28  ;;  %v8725_v29 = vadd.f32 -1.0, %v9654_v7  ;;  %vm5174_vm12 = vcmp.gt.f32.partialorder %v12337_v32, 0.0 }
 0x4cd   :  { %v3021_v62 = vpop.permute.xlu1 %3020  ;;  %9039 = vmatpush1.bf16.msra.mxu0 %v9038_v63  ;;  %v3626_v23 = vld [vmem:[#allocation3 + $0x7e8] sm:$0xff]  ;;  %vm5180_vm10 = vcmp.gt.f32.partialorder %v12353_v50, 0.0 }
 0x4ce   :  { %3048 = vst.msk [vmem:[#allocation3 + $0x808] sm:$0xff] %vm1352_vm2, %v3021_v62  ;;  %5357 = vrot.lane.b32.xlu0 %v12289_v20, %s14348_s2  ;;  %v2984_v20 = vsel %vm14262_vm15, %v2974_v35, %v2976_v25  ;;  %v99_v35 = vld [vmem:[%s14178_s10 + $0x30] sm:$0xff]  ;;  %v8714_v25 = vadd.f32 -1.0, %v9650_v5  ;;  %vm5168_vm15 = vcmp.gt.f32.partialorder %v12276_v38, 0.0  ;;  %v3035_v21 = vsel %vm3034_vm7, %v3019_v3, %v3021_v62 }
 0x4cf   :  { %5359 = vrot.lane.b32.xlu1 %v5292_v13, %s14348_s2  ;;  %v9042_v22 = vpack.c.bf16 %v2985_v59, %v2984_v20 }
 0x4d0   :  { %v3023_v19 = vpop.permute.xlu0 %3022  ;;  %v5288_v11 = vsel %vm5168_vm15, %v12276_v38, %v8714_v25  ;;  %v9656_v38 = vpop.eup %9655  ;;  %vm5179_vm15 = vcmp.gt.f32.partialorder %v12321_v54, 0.0 }
 0x4d1   :  { %v3025_v45 = vpop.permute.xlu1 %3024  ;;  %v3628_v18 = vld [vmem:[#allocation3 + $0x7f8] sm:$0xff]  ;;  %v5299_v17 = vsel %vm5179_vm15, %v12321_v54, %v8725_v29  ;;  %v8720_v43 = vadd.f32 -1.0, %v9656_v38  ;;  %vm14267_vm15 = vcmask 777216  }
 0x4d2   :  { %3050 = vst.msk [vmem:[#allocation3 + $0x818] sm:$0xff] %vm1352_vm2, %v3025_v45  ;;  %5361 = vrot.lane.b32.xlu0 %v12312_v16, %s14348_s2  ;;  %v9040_v41 = vpack.c.bf16 %v3628_v18, %v3626_v23  ;;  %v5251_v16 = vmul.f32 1.442695, %v5204_v39  ;;  %v3036_v46 = vsel %vm3034_vm7, %v3023_v19, %v3025_v45 }
 0x4d3   :  { %5363 = vrot.lane.b32.xlu1 %v5298_v60, %s14348_s2  ;;  %v9046_v24 = vpack.c.bf16 %v3036_v46, %v3035_v21  ;;  %v5294_v19 = vsel %vm5174_vm12, %v12337_v32, %v8720_v43  ;;  %vm14266_vm12 = vcmask 760832   ;;  %s14381_s2 = smov 123  }
 0x4d4   :  { %v3027_v2 = vpop.permute.xlu0 %3026  ;;  %9041 = vmatprep.subr.bf16.mxu0 %v9040_v41  ;;  %9657 = vpow2.f32 %v5251_v16 }
 0x4d5   :  { %v3029_v55 = vpop.permute.xlu1 %3028  ;;  %9043 = vmatpush1.bf16.msra.mxu0 %v9042_v22  ;;  %v3630_v58 = vld [vmem:[#allocation3 + $0x808] sm:$0xff] }
 0x4d6   :  { %3052 = vst.msk [vmem:[#allocation3 + $0x828] sm:$0xff] %vm1352_vm2, %v3029_v55  ;;  %5429 = vrot.lane.b32.xlu0 %v12327_v14, %s14351_s8  ;;  %v3037_v62 = vsel %vm3034_vm7, %v3027_v2, %v3029_v55 }
 0x4d7   :  { %5431 = vrot.lane.b32.xlu1 %v5282_v6, %s14351_s8 }
 0x4d8   :  { %v3031_v8 = vpop.permute.xlu0 %3030  ;;  %4029 = vmatmul.mubr.f32.vlgmr.msra.gmra.mrb[24].mxu0 %v99_v35 }
 0x4d9   :  { %v3033_v47 = vpop.permute.xlu1 %3032  ;;  %v3632_v31 = vld [vmem:[#allocation3 + $0x818] sm:$0xff] }
 0x4da   :  { %3054 = vst.msk [vmem:[#allocation3 + $0x838] sm:$0xff] %vm1352_vm2, %v3033_v47  ;;  %5433 = vrot.lane.b32.xlu0 %v12346_v53, %s14351_s8  ;;  %v9044_v14 = vpack.c.bf16 %v3632_v31, %v3630_v58  ;;  %v3038_v53 = vsel %vm3034_vm7, %v3031_v8, %v3033_v47 }
 0x4db   :  { %5435 = vrot.lane.b32.xlu1 %v5288_v11, %s14351_s8  ;;  %v9050_v40 = vpack.c.bf16 %v3038_v53, %v3037_v62 }
 0x4dc   :  { %v3072_v33 = vpop.permute.xlu0 %3071  ;;  %9045 = vmatprep.subr.bf16.mxu0 %v9044_v14 }
 0x4dd   :  { %v3074_v0 = vpop.permute.xlu1 %3073  ;;  %9047 = vmatpush1.bf16.msra.mxu0 %v9046_v24  ;;  %v3634_v63 = vld [vmem:[#allocation3 + $0x828] sm:$0xff] }
 0x4de   :  { %3101 = vst.msk [vmem:[#allocation3 + $0x848] sm:$0xff] %vm1352_vm2, %v3074_v0  ;;  %5397 = vrot.lane.b32.xlu0 %v5292_v13, %s14349_s28  ;;  %v9658_v13 = vpop.eup %9657  ;;  %v3088_v20 = vsel %vm14267_vm15, %v3072_v33, %v3074_v0 }
 0x4df   :  { %5399 = vrot.lane.b32.xlu1 %v5293_v4, %s14349_s28  ;;  %v8726_v45 = vadd.f32 -1.0, %v9658_v13 }
 0x4e0   :  { %v3076_v15 = vpop.permute.xlu0 %3075 }
 0x4e1   :  { %v3078_v56 = vpop.permute.xlu1 %3077  ;;  %v3636_v3 = vld [vmem:[#allocation3 + $0x838] sm:$0xff]  ;;  %v5300_v32 = vsel %vm5180_vm10, %v12353_v50, %v8726_v45  ;;  %vm14264_vm10 = vcmask 769024  }
 0x4e2   :  { %3103 = vst.msk [vmem:[#allocation3 + $0x858] sm:$0xff] %vm1352_vm2, %v3078_v56  ;;  %5401 = vrot.lane.b32.xlu0 %v5298_v60, %s14349_s28  ;;  %v9048_v34 = vpack.c.bf16 %v3636_v3, %v3634_v63  ;;  %v3089_v54 = vsel %vm14267_vm15, %v3076_v15, %v3078_v56 }
 0x4e3   :  { %5403 = vrot.lane.b32.xlu1 %v5299_v17, %s14349_s28  ;;  %v9054_v41 = vpack.c.bf16 %v3089_v54, %v3088_v20 }
 0x4e4   :  { %v3080_v1 = vpop.permute.xlu0 %3079  ;;  %9049 = vmatprep.subr.bf16.mxu0 %v9048_v34 }
 0x4e5   :  { %v3082_v59 = vpop.permute.xlu1 %3081  ;;  %9051 = vmatpush1.bf16.msra.mxu0 %v9050_v40  ;;  %v3638_v42 = vld [vmem:[#allocation3 + $0x848] sm:$0xff] }
 0x4e6   :  { %3105 = vst.msk [vmem:[#allocation3 + $0x868] sm:$0xff] %vm1352_vm2, %v3082_v59  ;;  %5437 = vrot.lane.b32.xlu0 %v5293_v4, %s14351_s8  ;;  %v3090_v50 = vsel %vm14267_vm15, %v3080_v1, %v3082_v59 }
 0x4e7   :  { %5439 = vrot.lane.b32.xlu1 %v5294_v19, %s14351_s8 }
 0x4e8   :  { %v3084_v23 = vpop.permute.xlu0 %3083 }
 0x4e9   :  { %v3086_v18 = vpop.permute.xlu1 %3085  ;;  %v3640_v39 = vld [vmem:[#allocation3 + $0x858] sm:$0xff] }
 0x4ea   :  { %3107 = vst.msk [vmem:[#allocation3 + $0x878] sm:$0xff] %vm1352_vm2, %v3086_v18  ;;  %5441 = vrot.lane.b32.xlu0 %v5299_v17, %s14351_s8  ;;  %v9052_v60 = vpack.c.bf16 %v3640_v39, %v3638_v42  ;;  %v3091_v22 = vsel %vm14267_vm15, %v3084_v23, %v3086_v18  ;;  %vm14357_vm15 = vcmask 687104  }
 0x4eb   :  { %5443 = vrot.lane.b32.xlu1 %v5300_v32, %s14351_s8  ;;  %v9058_v25 = vpack.c.bf16 %v3091_v22, %v3090_v50  ;;  %s14363_s8 = smov 19  }
 0x4ec   :  { %v3125_v52 = vpop.permute.xlu0 %3124  ;;  %9053 = vmatprep.subr.bf16.mxu0 %v9052_v60 }
 0x4ed   :  { %v3127_v5 = vpop.permute.xlu1 %3126  ;;  %9055 = vmatpush1.bf16.msra.mxu0 %v9054_v41  ;;  %v3642_v35 = vld [vmem:[#allocation3 + $0x868] sm:$0xff] }
 0x4ee   :  { %3154 = vst.msk [vmem:[#allocation3 + $0x888] sm:$0xff] %vm1352_vm2, %v3127_v5  ;;  %3287 = vrot.lane.b32.xlu0 %v12050_v9, %s14271_s9  ;;  %v3141_v21 = vsel %vm14264_vm10, %v3125_v52, %v3127_v5 }
 0x4f0   :  { %v3129_v2 = vpop.permute.xlu0 %3128 }
 0x4f1   :  { %v3131_v55 = vpop.permute.xlu1 %3130  ;;  %v3644_v16 = vld [vmem:[#allocation3 + $0x878] sm:$0xff] }
 0x4f2   :  { %3156 = vst.msk [vmem:[#allocation3 + $0x898] sm:$0xff] %vm1352_vm2, %v3131_v55  ;;  %v9056_v6 = vpack.c.bf16 %v3644_v16, %v3642_v35  ;;  %v3142_v9 = vsel %vm14264_vm10, %v3129_v2, %v3131_v55 }
 0x4f3   :  { %v9062_v14 = vpack.c.bf16 %v3142_v9, %v3141_v21  ;;  %v14352_v21 = vld [vmem:[#allocation13_spill] sm:$0xff] }
 0x4f4   :  { %v3133_v49 = vpop.permute.xlu0 %3132  ;;  %9057 = vmatprep.subr.bf16.mxu0 %v9056_v6 }
 0x4f5   :  { %v3135_v46 = vpop.permute.xlu1 %3134  ;;  %9059 = vmatpush1.bf16.msra.mxu0 %v9058_v25  ;;  %v3646_v58 = vld [vmem:[#allocation3 + $0x888] sm:$0xff] }
 0x4f6   :  { %3158 = vst.msk [vmem:[#allocation3 + $0x8a8] sm:$0xff] %vm1352_vm2, %v3135_v46  ;;  %v3143_v38 = vsel %vm14264_vm10, %v3133_v49, %v3135_v46 }
 0x4f8   :  { %v3137_v8 = vpop.permute.xlu0 %3136 }
 0x4f9   :  { %v3139_v47 = vpop.permute.xlu1 %3138  ;;  %v3648_v31 = vld [vmem:[#allocation3 + $0x898] sm:$0xff] }
 0x4fa   :  { %3160 = vst.msk [vmem:[#allocation3 + $0x8b8] sm:$0xff] %vm1352_vm2, %v3139_v47  ;;  %v9060_v11 = vpack.c.bf16 %v3648_v31, %v3646_v58  ;;  %v3144_v24 = vsel %vm14264_vm10, %v3137_v8, %v3139_v47  ;;  %vm14265_vm10 = vcmask 752640  }
 0x4fb   :  { %v9066_v15 = vpack.c.bf16 %v3144_v24, %v3143_v38  ;;  %v14353_v24 = vld [vmem:[#allocation19_spill] sm:$0xff] }
 0x4fc   :  { %v3178_v28 = vpop.permute.xlu0 %3177  ;;  %9061 = vmatprep.subr.bf16.mxu0 %v9060_v11  ;;  %v5109_v11 = vmul.f32 %v14352_v21, %v10740_v30 }
 0x4fd   :  { %v3180_v7 = vpop.permute.xlu1 %3179  ;;  %9063 = vmatpush1.bf16.msra.mxu0 %v9062_v14  ;;  %v3650_v4 = vld [vmem:[#allocation3 + $0x8a8] sm:$0xff] }
 0x4fe   :  { %3207 = vst.msk [vmem:[#allocation3 + $0x8c8] sm:$0xff] %vm1352_vm2, %v3180_v7  ;;  %v3194_v13 = vsel %vm14266_vm12, %v3178_v28, %v3180_v7 }
 0x500   :  { %v3182_v33 = vpop.permute.xlu0 %3181 }
 0x501   :  { %v3184_v0 = vpop.permute.xlu1 %3183  ;;  %v3652_v29 = vld [vmem:[#allocation3 + $0x8b8] sm:$0xff] }
 0x502   :  { %3209 = vst.msk [vmem:[#allocation3 + $0x8d8] sm:$0xff] %vm1352_vm2, %v3184_v0  ;;  %v9064_v53 = vpack.c.bf16 %v3652_v29, %v3650_v4  ;;  %v3195_v3 = vsel %vm14266_vm12, %v3182_v33, %v3184_v0  ;;  %v5115_v33 = vmul.f32 %v14353_v24, %v10780_v57  ;;  %v5133_v0 = vadd.f32 %v5109_v11, %v10823_v37 }
 0x503   :  { %v9070_v1 = vpack.c.bf16 %v3195_v3, %v3194_v13  ;;  %v14355_v13 = vld [vmem:[#allocation20_spill] sm:$0xff] }
 0x504   :  { %v3186_v56 = vpop.permute.xlu0 %3185  ;;  %9065 = vmatprep.subr.bf16.mxu0 %v9064_v53  ;;  %v5181_v38 = vmin.f32 %v5133_v0, 0.0  ;;  %v5139_v53 = vadd.f32 %v5115_v33, %v10861_v10  ;;  %v5127_v10 = vmul.f32 %v14355_v13, %v10816_v26 }
 0x505   :  { %v3188_v63 = vpop.permute.xlu1 %3187  ;;  %9067 = vmatpush1.bf16.msra.mxu0 %v9066_v15  ;;  %v3654_v34 = vld [vmem:[#allocation3 + $0x8c8] sm:$0xff] }
 0x506   :  { %3211 = vst.msk [vmem:[#allocation3 + $0x8e8] sm:$0xff] %vm1352_vm2, %v3188_v63  ;;  %v3196_v39 = vsel %vm14266_vm12, %v3186_v56, %v3188_v63  ;;  %v5205_v63 = vmul.f32 1.442695, %v5181_v38  ;;  %v5187_v3 = vmin.f32 %v5139_v53, 0.0  ;;  %vm5163_vm1 = vcmp.gt.f32.partialorder %v5139_v53, 0.0 }
 0x508   :  { %v3190_v62 = vpop.permute.xlu0 %3189  ;;  %9659 = vpow2.f32 %v5205_v63  ;;  %v5217_v57 = vmul.f32 1.442695, %v5187_v3 }
 0x509   :  { %v3192_v17 = vpop.permute.xlu1 %3191  ;;  %v3656_v43 = vld [vmem:[#allocation3 + $0x8d8] sm:$0xff] }
 0x50a   :  { %3213 = vst.msk [vmem:[#allocation3 + $0x8f8] sm:$0xff] %vm1352_vm2, %v3192_v17  ;;  %v9068_v40 = vpack.c.bf16 %v3656_v43, %v3654_v34  ;;  %v3197_v45 = vsel %vm14266_vm12, %v3190_v62, %v3192_v17  ;;  %v14354_v17 = vld [vmem:[#allocation14_spill] sm:$0xff]  ;;  %9661 = vpow2.f32 %v5217_v57  ;;  %vm5157_vm12 = vcmp.gt.f32.partialorder %v5133_v0, 0.0 }
 0x50b   :  { %v9074_v32 = vpack.c.bf16 %v3197_v45, %v3196_v39  ;;  %v5121_v34 = vmul.f32 %v14354_v17, %v10786_v51  ;;  %v12467_v45 = vadd.f32 %v5127_v10, %v10898_v48 }
 0x50c   :  { %v3231_v59 = vpop.permute.xlu0 %3230  ;;  %9069 = vmatprep.subr.bf16.mxu0 %v9068_v40 }
 0x50d   :  { %v3233_v19 = vpop.permute.xlu1 %3232  ;;  %9071 = vmatpush1.bf16.msra.mxu0 %v9070_v1  ;;  %v3658_v18 = vld [vmem:[#allocation3 + $0x8e8] sm:$0xff]  ;;  %v12463_v40 = vadd.f32 %v5121_v34, %v10870_v61 }
 0x50e   :  { %3260 = vst.msk [vmem:[#allocation3 + $0x908] sm:$0xff] %vm1352_vm2, %v3233_v19  ;;  %v3247_v35 = vsel %vm14265_vm10, %v3231_v59, %v3233_v19 }
 0x50f   :  { %v5193_v19 = vmin.f32 %v12463_v40, 0.0 }
 0x510   :  { %v3235_v54 = vpop.permute.xlu0 %3234 }
 0x511   :  { %v3237_v23 = vpop.permute.xlu1 %3236  ;;  %v3660_v42 = vld [vmem:[#allocation3 + $0x8f8] sm:$0xff] }
 0x512   :  { %3262 = vst.msk [vmem:[#allocation3 + $0x918] sm:$0xff] %vm1352_vm2, %v3237_v23  ;;  %v9072_v20 = vpack.c.bf16 %v3660_v42, %v3658_v18  ;;  %v3248_v52 = vsel %vm14265_vm10, %v3235_v54, %v3237_v23  ;;  %v9660_v54 = vpop.eup %9659  ;;  %v5229_v18 = vmul.f32 1.442695, %v5193_v19  ;;  %v5199_v42 = vmin.f32 %v12467_v45, 0.0 }
 0x513   :  { %v9078_v50 = vpack.c.bf16 %v3248_v52, %v3247_v35  ;;  %v8703_v39 = vadd.f32 -1.0, %v9660_v54 }
 0x514   :  { %v3239_v60 = vpop.permute.xlu0 %3238  ;;  %9073 = vmatprep.subr.bf16.mxu0 %v9072_v20  ;;  %v9662_v26 = vpop.eup %9661  ;;  %9663 = vpow2.f32 %v5229_v18 }
 0x515   :  { %v3241_v41 = vpop.permute.xlu1 %3240  ;;  %9075 = vmatpush1.bf16.msra.mxu0 %v9074_v32  ;;  %v3662_v2 = vld [vmem:[#allocation3 + $0x908] sm:$0xff]  ;;  %v8709_v48 = vadd.f32 -1.0, %v9662_v26 }
 0x516   :  { %3264 = vst.msk [vmem:[#allocation3 + $0x928] sm:$0xff] %vm1352_vm2, %v3241_v41  ;;  %v3249_v58 = vsel %vm14265_vm10, %v3239_v60, %v3241_v41  ;;  %v5241_v60 = vmul.f32 1.442695, %v5199_v42  ;;  %v5277_v41 = vsel %vm5157_vm12, %v5133_v0, %v8703_v39  ;;  %vm5169_vm12 = vcmp.gt.f32.partialorder %v12463_v40, 0.0 }
 0x518   :  { %v3243_v5 = vpop.permute.xlu0 %3242  ;;  %9665 = vpow2.f32 %v5241_v60 }
 0x519   :  { %v3245_v22 = vpop.permute.xlu1 %3244  ;;  %v3664_v55 = vld [vmem:[#allocation3 + $0x918] sm:$0xff] }
 0x51a   :  { %3266 = vst.msk [vmem:[#allocation3 + $0x938] sm:$0xff] %vm1352_vm2, %v3245_v22  ;;  %v9076_v16 = vpack.c.bf16 %v3664_v55, %v3662_v2  ;;  %v3250_v49 = vsel %vm14265_vm10, %v3243_v5, %v3245_v22  ;;  %vm14356_vm10 = vcmask 867328  }
 0x51b   :  { %v9082_v14 = vpack.c.bf16 %v3250_v49, %v3249_v58  ;;  %vm14358_vm8 = vmmov %vm14356_vm10 }
 0x51c   :  { %v12436_v6 = vpop.permute.xlu0 %3283  ;;  %9077 = vmatprep.subr.bf16.mxu0 %v9076_v16 }
 0x51d   :  { %v12438_v25 = vpop.permute.xlu1 %3285  ;;  %9079 = vmatpush1.bf16.msra.mxu0 %v9078_v50  ;;  %v3666_v8 = vld [vmem:[#allocation3 + $0x928] sm:$0xff] }
 0x51e   :  { %3313 = vst.msk [vmem:[#allocation3 + $0x948] sm:$0xff] %vm1352_vm2, %v12438_v25 }
 0x520   :  { %v5310_v46 = vpop.permute.xlu0 %5309 }
 0x521   :  { %v5312_v9 = vpop.permute.xlu1 %5311  ;;  %v3668_v47 = vld [vmem:[#allocation3 + $0x938] sm:$0xff] }
 0x522   :  { %v9080_v31 = vpack.c.bf16 %v3668_v47, %v3666_v8  ;;  %v5325_v61 = vsel %vm14356_vm10, %v5310_v46, %v5312_v9  ;;  %v5338_v52 = vmax.f32 %v12200_v36, %v5312_v9  ;;  %v5283_v46 = vsel %vm5163_vm1, %v5139_v53, %v8709_v48  ;;  %vm14360_vm10 = vmmov %vm14357_vm15 }
 0x523   :  { %v5337_v2 = vmax.f32 %v5277_v41, %v5325_v61  ;;  %vm14365_vm1 = vcmask 867328  }
 0x524   :  { %v5314_v28 = vpop.permute.xlu0 %5313  ;;  %9081 = vmatprep.subr.bf16.mxu0 %v9080_v31 }
 0x525   :  { %v5316_v7 = vpop.permute.xlu1 %5315  ;;  %9083 = vmatpush1.bf16.msra.mxu0 %v9082_v14 }
 0x526   :  { %v5326_v35 = vsel %vm14358_vm8, %v5314_v28, %v5316_v7  ;;  %v5340_v8 = vmax.f32 %v12218_v27, %v5316_v7  ;;  %vm14362_vm8 = vcmask 326656   ;;  %v9664_v27 = vpop.eup %9663 }
 0x527   :  { %v5339_v58 = vmax.f32 %v5283_v46, %v5326_v35  ;;  %v8715_v63 = vadd.f32 -1.0, %v9664_v27  ;;  %v9666_v17 = vpop.eup %9665  ;;  %v3272_v46 = vld [vmem:[#allocation2 + $0x28] sm:$0xff]  ;;  %v88_v27 = vld [vmem:[%s14179_s11 + $0x18] sm:$0xff] }
 0x528   :  { %v5350_v4 = vpop.permute.xlu0 %5349 }
 0x529   :  { %v5352_v29 = vpop.permute.xlu1 %5351  ;;  %v5289_v13 = vsel %vm5169_vm12, %v12463_v40, %v8715_v63 }
 0x52a   :  { %v5365_v5 = vsel %vm14357_vm15, %v5350_v4, %v5352_v29  ;;  %v5378_v16 = vmax.f32 %v5338_v52, %v5352_v29  ;;  %vm14361_vm15 = vmmov %vm14359_vm0 }
 0x52b   :  { %v5377_v49 = vmax.f32 %v5337_v2, %v5365_v5 }
 0x52c   :  { %v5354_v15 = vpop.permute.xlu0 %5353 }
 0x52d   :  { %v5356_v56 = vpop.permute.xlu1 %5355 }
 0x52e   :  { %v5366_v47 = vsel %vm14360_vm10, %v5354_v15, %v5356_v56  ;;  %v5380_v11 = vmax.f32 %v5340_v8, %v5356_v56  ;;  %v3320_v8 = vld [vmem:[#allocation2] sm:$0xff] }
 0x52f   :  { %v5379_v33 = vmax.f32 %v5339_v58, %v5366_v47  ;;  %v3274_v47 = vld [vmem:[#allocation2 + $0x38] sm:$0xff]  ;;  %v110_v58 = vld [vmem:[%s14178_s10 + $0x88] sm:$0xff] }
 0x530   :  { %v12450_v30 = vpop.permute.xlu0 %5317  ;;  %4034 = vmatprep.mubr.f32.mxu0 %v110_v58 }
 0x531   :  { %v12452_v62 = vpop.permute.xlu1 %5319 }
 0x532   :  { %v5327_v57 = vsel %vm14365_vm1, %v12450_v30, %v12452_v62  ;;  %v5342_v10 = vmax.f32 %v12281_v44, %v12452_v62 }
 0x534   :  { %v12456_v43 = vpop.permute.xlu0 %5321 }
 0x535   :  { %v12458_v37 = vpop.permute.xlu1 %5323 }
 0x536   :  { %v5344_v44 = vmax.f32 %v12299_v12, %v12458_v37 }
 0x538   :  { %v5390_v1 = vpop.permute.xlu0 %5389 }
 0x539   :  { %v5392_v59 = vpop.permute.xlu1 %5391 }
 0x53a   :  { %v5405_v50 = vsel %vm14359_vm0, %v5390_v1, %v5392_v59  ;;  %v5418_v36 = vmax.f32 %v5378_v16, %v5392_v59  ;;  %vm14364_vm0 = vmmov %vm14362_vm8  ;;  %v8721_v1 = vadd.f32 -1.0, %v9666_v17 }
 0x53b   :  { %v5417_v31 = vmax.f32 %v5377_v49, %v5405_v50  ;;  %v3270_v50 = vld [vmem:[#allocation2 + $0x18] sm:$0xff]  ;;  %v3273_v49 = vld [vmem:[#allocation2 + $0x30] sm:$0xff] }
 0x53c   :  { %v5394_v51 = vpop.permute.xlu0 %5393 }
 0x53d   :  { %v5396_v23 = vpop.permute.xlu1 %5395 }
 0x53e   :  { %v5406_v14 = vsel %vm14361_vm15, %v5394_v51, %v5396_v23  ;;  %v5420_v4 = vmax.f32 %v5380_v11, %v5396_v23  ;;  %v5341_v51 = vmax.f32 %v5289_v13, %v5327_v57  ;;  %vm14366_vm15 = vmmov %vm14365_vm1  ;;  %v119_v11 = vld [vmem:[%s14178_s10 + $0xd0] sm:$0xff] }
 0x53f   :  { %v5419_v7 = vmax.f32 %v5379_v33, %v5406_v14  ;;  %v5328_v23 = vsel %vm14366_vm15, %v12456_v43, %v12458_v37  ;;  %vm14368_vm1 = vmmov %vm14360_vm10  ;;  %v85_v14 = vld [vmem:[%s14179_s11] sm:$0xff]  ;;  %v87_v33 = vld [vmem:[%s14179_s11 + $0x10] sm:$0xff] }
 0x540   :  { %v5358_v20 = vpop.permute.xlu0 %5357 }
 0x541   :  { %v5360_v32 = vpop.permute.xlu1 %5359 }
 0x542   :  { %v5367_v59 = vsel %vm14360_vm10, %v5358_v20, %v5360_v32  ;;  %v5382_v18 = vmax.f32 %v5342_v10, %v5360_v32  ;;  %vm14370_vm10 = vcmask 326656  }
 0x543   :  { %v5381_v42 = vmax.f32 %v5341_v51, %v5367_v59  ;;  %vm14371_vm15 = vmmov %vm14370_vm10 }
 0x544   :  { %v5362_v22 = vpop.permute.xlu0 %5361 }
 0x545   :  { %v5364_v55 = vpop.permute.xlu1 %5363 }
 0x546   :  { %v5368_v62 = vsel %vm14368_vm1, %v5362_v22, %v5364_v55  ;;  %v5384_v41 = vmax.f32 %v5344_v44, %v5364_v55  ;;  %v3271_v55 = vld [vmem:[#allocation2 + $0x20] sm:$0xff]  ;;  %vm14374_vm1 = vcmask 334848  }
 0x548   :  { %v5430_v9 = vpop.permute.xlu0 %5429 }
 0x549   :  { %v5432_v21 = vpop.permute.xlu1 %5431 }
 0x54a   :  { %v5445_v28 = vsel %vm14362_vm8, %v5430_v9, %v5432_v21  ;;  %v5458_v24 = vmax.f32 %v5418_v36, %v5432_v21  ;;  %vm14367_vm8 = vcmask 506880   ;;  %v3322_v36 = vld [vmem:[#allocation2 + $0x10] sm:$0xff]  ;;  %v3321_v9 = vld [vmem:[#allocation2 + $0x8] sm:$0xff]  ;;  %v120_v21 = vld [vmem:[%s14178_s10 + $0xd8] sm:$0xff] }
 0x54b   :  { %v5457_v0 = vmax.f32 %v5417_v31, %v5445_v28  ;;  %vm14369_vm12 = vmmov %vm14367_vm8  ;;  %v109_v31 = vld [vmem:[%s14178_s10 + $0x80] sm:$0xff]  ;;  %v130_v28 = vld [vmem:[%s14178_s10 + $0x128] sm:$0xff] }
 0x54c   :  { %5475 = vrot.lane.b32.xlu0 %v5458_v24, %s14363_s8  ;;  %v5434_v29 = vpop.permute.xlu0 %5433  ;;  %4035 = vmatmul.mubr.f32.gmra.mrb[26].mxu0 %v109_v31  ;;  %v129_v24 = vld [vmem:[%s14178_s10 + $0x120] sm:$0xff] }
 0x54d   :  { %v5436_v38 = vpop.permute.xlu1 %5435  ;;  %5473 = vrot.lane.b32.xlu1 %v5457_v0, %s14363_s8  ;;  %4040 = vmatprep.mubr.f32.mxu0 %v120_v21  ;;  %v102_v0 = vld [vmem:[%s14178_s10 + $0x48] sm:$0xff] }
 0x54e   :  { %v5446_v53 = vsel %vm14364_vm0, %v5434_v29, %v5436_v38  ;;  %v5460_v15 = vmax.f32 %v5420_v4, %v5436_v38  ;;  %vm5175_vm0 = vcmp.gt.f32.partialorder %v12467_v45, 0.0  ;;  %v86_v4 = vld [vmem:[%s14179_s11 + $0x8] sm:$0xff]  ;;  %v89_v29 = vld [vmem:[%s14180_s12] sm:$0xff] }
 0x54f   :  { %v5459_v56 = vmax.f32 %v5419_v7, %v5446_v53  ;;  %v5295_v40 = vsel %vm5175_vm0, %v12467_v45, %v8721_v1  ;;  %v91_v7 = vld [vmem:[%s14180_s12 + $0x10] sm:$0xff]  ;;  %v90_v38 = vld [vmem:[%s14180_s12 + $0x8] sm:$0xff]  ;;  %vm14373_vm0 = vcmask 1047704  }
 0x550   :  { %5479 = vrot.lane.b32.xlu0 %v5460_v15, %s14363_s8  ;;  %v5398_v3 = vpop.permute.xlu0 %5397  ;;  %v5343_v26 = vmax.f32 %v5295_v40, %v5328_v23  ;;  %4041 = vmatmul.mubr.f32.gmra.mrb[28].mxu0 %v119_v11 }
 0x551   :  { %v5400_v34 = vpop.permute.xlu1 %5399  ;;  %5477 = vrot.lane.b32.xlu1 %v5459_v56, %s14363_s8  ;;  %4046 = vmatprep.mubr.f32.mxu0 %v130_v28 }
 0x552   :  { %v5407_v30 = vsel %vm14367_vm8, %v5398_v3, %v5400_v34  ;;  %v5422_v39 = vmax.f32 %v5382_v18, %v5400_v34  ;;  %v5383_v48 = vmax.f32 %v5343_v26, %v5368_v62  ;;  %vm14372_vm8 = vcmask 154624  }
 0x553   :  { %v5421_v61 = vmax.f32 %v5381_v42, %v5407_v30 }
 0x554   :  { %v5402_v19 = vpop.permute.xlu0 %5401  ;;  %4047 = vmatmul.mubr.f32.gmra.mrb[30].mxu0 %v129_v24 }
 0x555   :  { %v5404_v54 = vpop.permute.xlu1 %5403  ;;  %8607 = vmatprep.mubr.msk.f32.mxu0 %vm3034_vm7, %v102_v0 }
 0x556   :  { %v5408_v43 = vsel %vm14369_vm12, %v5402_v19, %v5404_v54  ;;  %v5424_v2 = vmax.f32 %v5384_v41, %v5404_v54  ;;  %vm14375_vm12 = vmmov %vm14372_vm8 }
 0x557   :  { %v5423_v12 = vmax.f32 %v5383_v48, %v5408_v43  ;;  %v3670_v48 = vld [vmem:[#allocation3 + $0x948] sm:$0xff] }
 0x558   :  { %v5438_v20 = vpop.permute.xlu0 %5437 }
 0x559   :  { %v5440_v60 = vpop.permute.xlu1 %5439 }
 0x55a   :  { %v5447_v32 = vsel %vm14370_vm10, %v5438_v20, %v5440_v60  ;;  %v5462_v52 = vmax.f32 %v5422_v39, %v5440_v60  ;;  %vm14376_vm10 = vmmov %vm14373_vm0 }
 0x55b   :  { %v5461_v5 = vmax.f32 %v5421_v61, %v5447_v32 }
 0x55c   :  { %5483 = vrot.lane.b32.xlu0 %v5462_v52, %s14363_s8  ;;  %v5442_v45 = vpop.permute.xlu0 %5441 }
 0x55d   :  { %v5444_v37 = vpop.permute.xlu1 %5443  ;;  %5481 = vrot.lane.b32.xlu1 %v5461_v5, %s14363_s8 }
 0x55e   :  { %v5448_v22 = vsel %vm14371_vm15, %v5442_v45, %v5444_v37  ;;  %v5464_v35 = vmax.f32 %v5424_v2, %v5444_v37  ;;  %vm14377_vm15 = vmmov %vm14374_vm1 }
 0x55f   :  { %v5463_v16 = vmax.f32 %v5423_v12, %v5448_v22 }
 0x560   :  { %5487 = vrot.lane.b32.xlu0 %v5464_v35, %s14363_s8  ;;  %v3288_v53 = vpop.permute.xlu0 %3287 }
 0x561   :  { %5485 = vrot.lane.b32.xlu1 %v5463_v16, %s14363_s8  ;;  %s14411_s8 = smov 107  }
 0x564   :  { %3291 = vrot.lane.b32.xlu0 %v3271_v55, %s14271_s9 }
 0x565   :  { %3289 = vrot.lane.b32.xlu1 %v3270_v50, %s14271_s9 }
 0x568   :  { %3295 = vrot.lane.b32.xlu0 %v3273_v49, %s14271_s9 }
 0x569   :  { %3293 = vrot.lane.b32.xlu1 %v3272_v46, %s14271_s9 }
 0x56c   :  { %3336 = vrot.lane.b32.xlu0 %v3320_v8, %s14281_s6 }
 0x56d   :  { %3297 = vrot.lane.b32.xlu1 %v3274_v47, %s14271_s9 }
 0x570   :  { %3340 = vrot.lane.b32.xlu0 %v3322_v36, %s14281_s6 }
 0x571   :  { %3338 = vrot.lane.b32.xlu1 %v3321_v9, %s14281_s6 }
 0x574   :  { %3344 = vrot.lane.b32.xlu0 %v3271_v55, %s14281_s6 }
 0x575   :  { %3342 = vrot.lane.b32.xlu1 %v3270_v50, %s14281_s6 }
 0x578   :  { %3348 = vrot.lane.b32.xlu0 %v3273_v49, %s14281_s6 }
 0x579   :  { %3346 = vrot.lane.b32.xlu1 %v3272_v46, %s14281_s6 }
 0x57c   :  { %4144 = vperm.xlu0 %9569, %v85_v14  }
 0x57d   :  { %3350 = vrot.lane.b32.xlu1 %v3274_v47, %s14281_s6 }
 0x580   :  { %4154 = vperm.xlu0 %9569, %v87_v33  }
 0x581   :  { %4149 = vperm.xlu1 %9570, %v86_v4  }
 0x584   :  { %4172 = vperm.xlu0 %9569, %v89_v29  }
 0x585   :  { %4159 = vperm.xlu1 %9570, %v88_v27  }
 0x588   :  { %4182 = vperm.xlu0 %9569, %v91_v7  }
 0x589   :  { %4177 = vperm.xlu1 %9570, %v90_v38  }
 0x5be   :  { %v5476_v15 = vpop.permute.xlu0 %5475 }
 0x5bf   :  { %v5474_v56 = vpop.permute.xlu1 %5473 }
 0x5c0   :  { %v5489_v63 = vsel %vm14372_vm8, %v5474_v56, %v5476_v15  ;;  %5501 = vst.msk [vmem:[#allocation2] sm:$0xff] %vm14373_vm0, %v5474_v56  ;;  %v101_v56 = vld [vmem:[%s14178_s10 + $0x40] sm:$0xff] }
 0x5c1   :  { %5502 = vst.msk [vmem:[#allocation2 + $0x8] sm:$0xff] %vm14374_vm1, %v5489_v63  ;;  %v112_v63 = vld [vmem:[%s14178_s10 + $0x98] sm:$0xff] }
 0x5c2   :  { %v5480_v3 = vpop.permute.xlu0 %5479 }
 0x5c3   :  { %v5478_v17 = vpop.permute.xlu1 %5477 }
 0x5c4   :  { %v5490_v34 = vsel %vm14375_vm12, %v5478_v17, %v5480_v3  ;;  %5503 = vst.msk [vmem:[#allocation2 + $0x10] sm:$0xff] %vm14376_vm10, %v5478_v17  ;;  %vm14378_vm12 = vmmov %vm14372_vm8  ;;  %v111_v3 = vld [vmem:[%s14178_s10 + $0x90] sm:$0xff]  ;;  %v122_v17 = vld [vmem:[%s14178_s10 + $0xe8] sm:$0xff] }
 0x5c5   :  { %5504 = vst.msk [vmem:[#allocation2 + $0x18] sm:$0xff] %vm14377_vm15, %v5490_v34  ;;  %vm14379_vm10 = vmmov %vm14373_vm0  ;;  %v121_v34 = vld [vmem:[%s14178_s10 + $0xe0] sm:$0xff] }
 0x5c6   :  { %vm14380_vm15 = vmmov %vm14374_vm1 }
 0x5c7   :  { %v12570_v57 = vld [vmem:[#allocation2] sm:$0xff] }
 0x5c8   :  { %v12572_v13 = vld [vmem:[#allocation2 + $0x8] sm:$0xff]  ;;  %5541 = vrot.lane.b32.xlu1 %v12570_v57, %s9770_s29 }
 0x5c9   :  { %5518 = vst.msk [vmem:[#allocation3 + $0x8] sm:$0xff] %vm1352_vm2, %v12572_v13  ;;  %5543 = vrot.lane.b32.xlu0 %v12572_v13, %s9770_s29 }
 0x5cb   :  { %v12580_v10 = vld [vmem:[#allocation2 + $0x10] sm:$0xff] }
 0x5cc   :  { %v12582_v1 = vld [vmem:[#allocation2 + $0x18] sm:$0xff]  ;;  %5545 = vrot.lane.b32.xlu1 %v12580_v10, %s9770_s29  ;;  %v9150_v44 = vpack.c.bf16 %v12580_v10, %v12570_v57 }
 0x5cd   :  { %5520 = vst.msk [vmem:[#allocation3 + $0x18] sm:$0xff] %vm1352_vm2, %v12582_v1  ;;  %5547 = vrot.lane.b32.xlu0 %v12582_v1, %s9770_s29 }
 0x5ce   :  { %v5484_v59 = vpop.permute.xlu0 %5483 }
 0x5cf   :  { %v5482_v19 = vpop.permute.xlu1 %5481 }
 0x5d0   :  { %v5491_v51 = vsel %vm14372_vm8, %v5482_v19, %v5484_v59  ;;  %5505 = vst.msk [vmem:[#allocation2 + $0x20] sm:$0xff] %vm14373_vm0, %v5482_v19  ;;  %v7502_v30 = vld [vmem:[#allocation3 + $0x8] sm:$0xff]  ;;  %vm3299_vm8 = vcmask 744448   ;;  %vm3352_vm0 = vcmask 736256   ;;  %v132_v59 = vld [vmem:[%s14178_s10 + $0x138] sm:$0xff]  ;;  %v131_v19 = vld [vmem:[%s14178_s10 + $0x130] sm:$0xff] }
 0x5d1   :  { %5506 = vst.msk [vmem:[#allocation2 + $0x28] sm:$0xff] %vm14374_vm1, %v5491_v51  ;;  %v3300_v2 = vsel %vm3299_vm8, %v12436_v6, %v12438_v25 }
 0x5d2   :  { %v5488_v54 = vpop.permute.xlu0 %5487 }
 0x5d3   :  { %v5486_v23 = vpop.permute.xlu1 %5485 }
 0x5d4   :  { %v5492_v18 = vsel %vm14378_vm12, %v5486_v23, %v5488_v54  ;;  %5507 = vst.msk [vmem:[#allocation2 + $0x30] sm:$0xff] %vm14379_vm10, %v5486_v23  ;;  %v7504_v42 = vld [vmem:[#allocation3 + $0x18] sm:$0xff] }
 0x5d5   :  { %5508 = vst.msk [vmem:[#allocation2 + $0x38] sm:$0xff] %vm14380_vm15, %v5492_v18  ;;  %v9148_v40 = vpack.c.bf16 %v7504_v42, %v7502_v30  ;;  %vm14397_vm15 = vcmask 957440  }
 0x5d6   :  { %v3292_v39 = vpop.permute.xlu0 %3291 }
 0x5d7   :  { %v12598_v62 = vld [vmem:[#allocation2 + $0x20] sm:$0xff]  ;;  %v3290_v20 = vpop.permute.xlu1 %3289  ;;  %9149 = vmatprep.subr.bf16.mxu1 %v9148_v40 }
 0x5d8   :  { %v12600_v26 = vld [vmem:[#allocation2 + $0x28] sm:$0xff]  ;;  %3315 = vst.msk [vmem:[#allocation3 + $0x958] sm:$0xff] %vm1352_vm2, %v3290_v20  ;;  %5549 = vrot.lane.b32.xlu1 %v12598_v62, %s9770_s29  ;;  %9151 = vmatpush1.bf16.msra.mxu1 %v9150_v44  ;;  %v3301_v32 = vsel %vm3299_vm8, %v3288_v53, %v3290_v20 }
 0x5d9   :  { %5522 = vst.msk [vmem:[#allocation3 + $0x28] sm:$0xff] %vm1352_vm2, %v12600_v26  ;;  %5551 = vrot.lane.b32.xlu0 %v12600_v26, %s9770_s29  ;;  %v9086_v12 = vpack.c.bf16 %v3301_v32, %v3300_v2 }
 0x5da   :  { %v3296_v43 = vpop.permute.xlu0 %3295 }
 0x5db   :  { %v12609_v61 = vld [vmem:[#allocation2 + $0x30] sm:$0xff]  ;;  %v3294_v60 = vpop.permute.xlu1 %3293 }
 0x5dc   :  { %v12611_v41 = vld [vmem:[#allocation2 + $0x38] sm:$0xff]  ;;  %3317 = vst.msk [vmem:[#allocation3 + $0x968] sm:$0xff] %vm1352_vm2, %v3294_v60  ;;  %5553 = vrot.lane.b32.xlu1 %v12609_v61, %s9770_s29  ;;  %v9154_v55 = vpack.c.bf16 %v12609_v61, %v12598_v62  ;;  %v3302_v8 = vsel %vm3299_vm8, %v3292_v39, %v3294_v60 }
 0x5dd   :  { %5524 = vst.msk [vmem:[#allocation3 + $0x38] sm:$0xff] %vm1352_vm2, %v12611_v41  ;;  %5555 = vrot.lane.b32.xlu0 %v12611_v41, %s9770_s29 }
 0x5de   :  { %v3337_v37 = vpop.permute.xlu0 %3336 }
 0x5df   :  { %v3298_v52 = vpop.permute.xlu1 %3297  ;;  %v3672_v5 = vld [vmem:[#allocation3 + $0x958] sm:$0xff] }
 0x5e0   :  { %3319 = vst.msk [vmem:[#allocation3 + $0x978] sm:$0xff] %vm1352_vm2, %v3298_v52  ;;  %5593 = vrot.lane.b32.xlu1 %v12570_v57, %s9771_s30  ;;  %v9084_v45 = vpack.c.bf16 %v3672_v5, %v3670_v48  ;;  %v7506_v6 = vld [vmem:[#allocation3 + $0x28] sm:$0xff]  ;;  %v3303_v16 = vsel %vm3299_vm8, %v3296_v43, %v3298_v52 }
 0x5e1   :  { %5595 = vrot.lane.b32.xlu0 %v12572_v13, %s9771_s30  ;;  %v9090_v9 = vpack.c.bf16 %v3303_v16, %v3302_v8 }
 0x5e2   :  { %9085 = vmatprep.subr.bf16.mxu0 %v9084_v45  ;;  %v3341_v36 = vpop.permute.xlu0 %3340 }
 0x5e3   :  { %v3339_v22 = vpop.permute.xlu1 %3338  ;;  %9087 = vmatpush1.bf16.msra.mxu0 %v9086_v12  ;;  %v3674_v49 = vld [vmem:[#allocation3 + $0x968] sm:$0xff] }
 0x5e4   :  { %3366 = vst.msk [vmem:[#allocation3 + $0x988] sm:$0xff] %vm1352_vm2, %v3339_v22  ;;  %5597 = vrot.lane.b32.xlu1 %v12580_v10, %s9771_s30  ;;  %v7508_v25 = vld [vmem:[#allocation3 + $0x38] sm:$0xff]  ;;  %v3353_v24 = vsel %vm3352_vm0, %v3337_v37, %v3339_v22 }
 0x5e5   :  { %5599 = vrot.lane.b32.xlu0 %v12582_v1, %s9771_s30  ;;  %v9152_v35 = vpack.c.bf16 %v7508_v25, %v7506_v6 }
 0x5e6   :  { %v3345_v21 = vpop.permute.xlu0 %3344 }
 0x5e7   :  { %v3343_v50 = vpop.permute.xlu1 %3342  ;;  %9153 = vmatprep.subr.bf16.mxu1 %v9152_v35  ;;  %v3676_v46 = vld [vmem:[#allocation3 + $0x978] sm:$0xff] }
 0x5e8   :  { %3368 = vst.msk [vmem:[#allocation3 + $0x998] sm:$0xff] %vm1352_vm2, %v3343_v50  ;;  %5601 = vrot.lane.b32.xlu1 %v12598_v62, %s9771_s30  ;;  %9155 = vmatpush1.bf16.msra.mxu1 %v9154_v55  ;;  %v9088_v47 = vpack.c.bf16 %v3676_v46, %v3674_v49  ;;  %v3354_v31 = vsel %vm3352_vm0, %v3341_v36, %v3343_v50 }
 0x5e9   :  { %5603 = vrot.lane.b32.xlu0 %v12600_v26, %s9771_s30  ;;  %v9094_v0 = vpack.c.bf16 %v3354_v31, %v3353_v24 }
 0x5ea   :  { %9089 = vmatprep.subr.bf16.mxu0 %v9088_v47  ;;  %v3349_v4 = vpop.permute.xlu0 %3348 }
 0x5eb   :  { %v3347_v58 = vpop.permute.xlu1 %3346  ;;  %9091 = vmatpush1.bf16.msra.mxu0 %v9090_v9  ;;  %v3678_v14 = vld [vmem:[#allocation3 + $0x988] sm:$0xff] }
 0x5ec   :  { %3370 = vst.msk [vmem:[#allocation3 + $0x9a8] sm:$0xff] %vm1352_vm2, %v3347_v58  ;;  %5605 = vrot.lane.b32.xlu1 %v12609_v61, %s9771_s30  ;;  %v3355_v38 = vsel %vm3352_vm0, %v3345_v21, %v3347_v58 }
 0x5ed   :  { %5607 = vrot.lane.b32.xlu0 %v12611_v41, %s9771_s30 }
 0x5ef   :  { %v3351_v11 = vpop.permute.xlu1 %3350  ;;  %v3680_v28 = vld [vmem:[#allocation3 + $0x998] sm:$0xff] }
 0x5f0   :  { %3372 = vst.msk [vmem:[#allocation3 + $0x9b8] sm:$0xff] %vm1352_vm2, %v3351_v11  ;;  %5645 = vrot.lane.b32.xlu1 %v12570_v57, %s9772_s0  ;;  %v9092_v33 = vpack.c.bf16 %v3680_v28, %v3678_v14  ;;  %v3356_v29 = vsel %vm3352_vm0, %v3349_v4, %v3351_v11 }
 0x5f1   :  { %5647 = vrot.lane.b32.xlu0 %v12572_v13, %s9772_s0  ;;  %v9098_v15 = vpack.c.bf16 %v3356_v29, %v3355_v38 }
 0x5f2   :  { %9093 = vmatprep.subr.bf16.mxu0 %v9092_v33 }
 0x5f3   :  { %9095 = vmatpush1.bf16.msra.mxu0 %v9094_v0  ;;  %v3682_v27 = vld [vmem:[#allocation3 + $0x9a8] sm:$0xff] }
 0x5f4   :  { %5649 = vrot.lane.b32.xlu1 %v12580_v10, %s9772_s0 }
 0x5f5   :  { %5651 = vrot.lane.b32.xlu0 %v12582_v1, %s9772_s0 }
 0x5f7   :  { %v3684_v7 = vld [vmem:[#allocation3 + $0x9b8] sm:$0xff] }
 0x5f8   :  { %5653 = vrot.lane.b32.xlu1 %v12598_v62, %s9772_s0  ;;  %v9096_v53 = vpack.c.bf16 %v3684_v7, %v3682_v27 }
 0x5f9   :  { %5655 = vrot.lane.b32.xlu0 %v12600_v26, %s9772_s0 }
 0x5fa   :  { %9097 = vmatprep.subr.bf16.mxu0 %v9096_v53 }
 0x5fb   :  { %9099 = vmatpush1.bf16.msra.mxu0 %v9098_v15  ;;  %v12731_v51 = vpop.permute.xlu0 %4144 }
 0x5fc   :  { %5657 = vrot.lane.b32.xlu1 %v12609_v61, %s9772_s0 }
 0x5fd   :  { %5659 = vrot.lane.b32.xlu0 %v12611_v41, %s9772_s0 }
 0x5fe   :  { %4118 = vmatmul.mubr.f32.vlgmr.msra.gmra.mrb[24].mxu0 %v101_v56 }
 0x5ff   :  { %8608 = vmatprep.mubr.msk.f32.mxu0 %vm3034_vm7, %v112_v63  ;;  %v12741_v23 = vpop.permute.xlu0 %4154 }
 0x600   :  { %5697 = vrot.lane.b32.xlu1 %v12570_v57, %s9773_s1  ;;  %v12739_v54 = vpop.permute.xlu1 %4149 }
 0x601   :  { %5699 = vrot.lane.b32.xlu0 %v12572_v13, %s9773_s1 }
 0x602   :  { %4124 = vmatmul.mubr.f32.gmra.mrb[26].mxu0 %v111_v3 }
 0x603   :  { %8609 = vmatprep.mubr.msk.f32.mxu0 %vm3034_vm7, %v122_v17  ;;  %v12751_v30 = vpop.permute.xlu0 %4172 }
 0x604   :  { %5701 = vrot.lane.b32.xlu1 %v12580_v10, %s9773_s1  ;;  %v12747_v18 = vpop.permute.xlu1 %4159 }
 0x605   :  { %5703 = vrot.lane.b32.xlu0 %v12582_v1, %s9773_s1 }
 0x606   :  { %4130 = vmatmul.mubr.f32.gmra.mrb[28].mxu0 %v121_v34 }
 0x607   :  { %8610 = vmatprep.mubr.msk.f32.mxu0 %vm3034_vm7, %v132_v59  ;;  %v12761_v40 = vpop.permute.xlu0 %4182 }
 0x608   :  { %5705 = vrot.lane.b32.xlu1 %v12598_v62, %s9773_s1  ;;  %v12759_v42 = vpop.permute.xlu1 %4177 }
 0x609   :  { %5707 = vrot.lane.b32.xlu0 %v12600_v26, %s9773_s1 }
 0x60a   :  { %4136 = vmatmul.mubr.f32.gmra.mrb[30].mxu0 %v131_v19 }
 0x60c   :  { %5709 = vrot.lane.b32.xlu1 %v12609_v61, %s9773_s1 }
 0x60d   :  { %5711 = vrot.lane.b32.xlu0 %v12611_v41, %s9773_s1  ;;  %s14382_s1 = smov 122  }
 0x610   :  { %5749 = vrot.lane.b32.xlu1 %v12570_v57, %s14381_s2 }
 0x611   :  { %5751 = vrot.lane.b32.xlu0 %v12572_v13, %s14381_s2 }
 0x614   :  { %5753 = vrot.lane.b32.xlu1 %v12580_v10, %s14381_s2 }
 0x615   :  { %5755 = vrot.lane.b32.xlu0 %v12582_v1, %s14381_s2 }
 0x618   :  { %5757 = vrot.lane.b32.xlu1 %v12598_v62, %s14381_s2 }
 0x619   :  { %5759 = vrot.lane.b32.xlu0 %v12600_v26, %s14381_s2 }
 0x61c   :  { %5761 = vrot.lane.b32.xlu1 %v12609_v61, %s14381_s2 }
 0x61d   :  { %5763 = vrot.lane.b32.xlu0 %v12611_v41, %s14381_s2  ;;  %s9807_s2 = smov [#allocation4]  }
 0x620   :  { %5801 = vrot.lane.b32.xlu1 %v12570_v57, %s14382_s1 }
 0x621   :  { %5803 = vrot.lane.b32.xlu0 %v12572_v13, %s14382_s1 }
 0x624   :  { %5805 = vrot.lane.b32.xlu1 %v12580_v10, %s14382_s1 }
 0x625   :  { %5807 = vrot.lane.b32.xlu0 %v12582_v1, %s14382_s1 }
 0x628   :  { %5809 = vrot.lane.b32.xlu1 %v12598_v62, %s14382_s1 }
 0x629   :  { %5811 = vrot.lane.b32.xlu0 %v12600_v26, %s14382_s1 }
 0x62c   :  { %5813 = vrot.lane.b32.xlu1 %v12609_v61, %s14382_s1 }
 0x62d   :  { %5815 = vrot.lane.b32.xlu0 %v12611_v41, %s14382_s1  ;;  %s8521_s1 = sshll.u32 %s9807_s2, 4  ;;  %s8522_s1 = int_to_ptr.vmem [resolvable:$true] %s8521_s1 }
 0x62e   :  { %p9744_p1 = scmp.lt.s32.totalorder %s8522_s1, %s8522_s1 }
 0x630   :  { %5853 = vrot.lane.b32.xlu1 %v12570_v57, %s9776_s17 }
 0x631   :  { %5855 = vrot.lane.b32.xlu0 %v12572_v13, %s9776_s17 }
 0x634   :  { %5857 = vrot.lane.b32.xlu1 %v12580_v10, %s9776_s17 }
 0x635   :  { %5859 = vrot.lane.b32.xlu0 %v12582_v1, %s9776_s17 }
 0x638   :  { %5861 = vrot.lane.b32.xlu1 %v12598_v62, %s9776_s17 }
 0x639   :  { %5863 = vrot.lane.b32.xlu0 %v12600_v26, %s9776_s17 }
 0x63a   :  { %v5542_v44 = vpop.permute.xlu1 %5541 }
 0x63b   :  { %v5544_v39 = vpop.permute.xlu0 %5543 }
 0x63c   :  { %v5557_v20 = vsel %vm1392_vm3, %v5542_v44, %v5544_v39  ;;  %5570 = vst.msk [vmem:[#allocation3 + $0x48] sm:$0xff] %vm1352_vm2, %v5544_v39  ;;  %5865 = vrot.lane.b32.xlu1 %v12609_v61, %s9776_s17 }
 0x63d   :  { %5569 = vst [vmem:[#allocation3 + $0x40] sm:$0xff] %v5557_v20  ;;  %5867 = vrot.lane.b32.xlu0 %v12611_v41, %s9776_s17  ;;  %s14383_s17 = smov 115  }
 0x63e   :  { %v5546_v60 = vpop.permute.xlu1 %5545 }
 0x63f   :  { %v5548_v43 = vpop.permute.xlu0 %5547 }
 0x640   :  { %v5558_v32 = vsel %vm1392_vm3, %v5546_v60, %v5548_v43  ;;  %5572 = vst.msk [vmem:[#allocation3 + $0x58] sm:$0xff] %vm1352_vm2, %v5548_v43  ;;  %5905 = vrot.lane.b32.xlu1 %v12570_v57, %s9777_s18 }
 0x641   :  { %5907 = vrot.lane.b32.xlu0 %v12572_v13, %s9777_s18  ;;  %v9158_v2 = vpack.c.bf16 %v5558_v32, %v5557_v20 }
 0x643   :  { %v7510_v52 = vld [vmem:[#allocation3 + $0x48] sm:$0xff] }
 0x644   :  { %5909 = vrot.lane.b32.xlu1 %v12580_v10, %s9777_s18 }
 0x645   :  { %5911 = vrot.lane.b32.xlu0 %v12582_v1, %s9777_s18 }
 0x647   :  { %v7512_v48 = vld [vmem:[#allocation3 + $0x58] sm:$0xff] }
 0x648   :  { %5913 = vrot.lane.b32.xlu1 %v12598_v62, %s9777_s18  ;;  %v9156_v5 = vpack.c.bf16 %v7512_v48, %v7510_v52 }
 0x649   :  { %5915 = vrot.lane.b32.xlu0 %v12600_v26, %s9777_s18 }
 0x64a   :  { %v5550_v45 = vpop.permute.xlu1 %5549  ;;  %9157 = vmatprep.subr.bf16.mxu1 %v9156_v5 }
 0x64b   :  { %v5552_v12 = vpop.permute.xlu0 %5551  ;;  %9159 = vmatpush1.bf16.msra.mxu1 %v9158_v2 }
 0x64c   :  { %v5559_v37 = vsel %vm1392_vm3, %v5550_v45, %v5552_v12  ;;  %5574 = vst.msk [vmem:[#allocation3 + $0x68] sm:$0xff] %vm1352_vm2, %v5552_v12  ;;  %5917 = vrot.lane.b32.xlu1 %v12609_v61, %s9777_s18 }
 0x64d   :  { %5573 = vst [vmem:[#allocation3 + $0x60] sm:$0xff] %v5559_v37  ;;  %5919 = vrot.lane.b32.xlu0 %v12611_v41, %s9777_s18  ;;  %s14384_s18 = smov 114  }
 0x64e   :  { %v5554_v22 = vpop.permute.xlu1 %5553 }
 0x64f   :  { %v5556_v6 = vpop.permute.xlu0 %5555 }
 0x650   :  { %v5560_v25 = vsel %vm1392_vm3, %v5554_v22, %v5556_v6  ;;  %5576 = vst.msk [vmem:[#allocation3 + $0x78] sm:$0xff] %vm1352_vm2, %v5556_v6  ;;  %5957 = vrot.lane.b32.xlu1 %v12570_v57, %s9778_s19 }
 0x651   :  { %5959 = vrot.lane.b32.xlu0 %v12572_v13, %s9778_s19  ;;  %v9162_v9 = vpack.c.bf16 %v5560_v25, %v5559_v37 }
 0x652   :  { %v5594_v35 = vpop.permute.xlu1 %5593 }
 0x653   :  { %v5596_v16 = vpop.permute.xlu0 %5595  ;;  %v7514_v46 = vld [vmem:[#allocation3 + $0x68] sm:$0xff] }
 0x654   :  { %v5609_v55 = vsel %vm1445_vm4, %v5594_v35, %v5596_v16  ;;  %5622 = vst.msk [vmem:[#allocation3 + $0x88] sm:$0xff] %vm1352_vm2, %v5596_v16  ;;  %5961 = vrot.lane.b32.xlu1 %v12580_v10, %s9778_s19 }
 0x655   :  { %5621 = vst [vmem:[#allocation3 + $0x80] sm:$0xff] %v5609_v55  ;;  %5963 = vrot.lane.b32.xlu0 %v12582_v1, %s9778_s19 }
 0x656   :  { %v5598_v50 = vpop.permute.xlu1 %5597 }
 0x657   :  { %v5600_v49 = vpop.permute.xlu0 %5599  ;;  %v7516_v8 = vld [vmem:[#allocation3 + $0x78] sm:$0xff] }
 0x658   :  { %v5610_v47 = vsel %vm1445_vm4, %v5598_v50, %v5600_v49  ;;  %5624 = vst.msk [vmem:[#allocation3 + $0x98] sm:$0xff] %vm1352_vm2, %v5600_v49  ;;  %5965 = vrot.lane.b32.xlu1 %v12598_v62, %s9778_s19  ;;  %v9160_v36 = vpack.c.bf16 %v7516_v8, %v7514_v46 }
 0x659   :  { %5967 = vrot.lane.b32.xlu0 %v12600_v26, %s9778_s19  ;;  %v9166_v4 = vpack.c.bf16 %v5610_v47, %v5609_v55 }
 0x65a   :  { %v5602_v58 = vpop.permute.xlu1 %5601  ;;  %9161 = vmatprep.subr.bf16.mxu1 %v9160_v36 }
 0x65b   :  { %v5604_v31 = vpop.permute.xlu0 %5603  ;;  %9163 = vmatpush1.bf16.msra.mxu1 %v9162_v9  ;;  %v7518_v28 = vld [vmem:[#allocation3 + $0x88] sm:$0xff] }
 0x65c   :  { %v5611_v21 = vsel %vm1445_vm4, %v5602_v58, %v5604_v31  ;;  %5626 = vst.msk [vmem:[#allocation3 + $0xa8] sm:$0xff] %vm1352_vm2, %v5604_v31  ;;  %5969 = vrot.lane.b32.xlu1 %v12609_v61, %s9778_s19 }
 0x65d   :  { %5625 = vst [vmem:[#allocation3 + $0xa0] sm:$0xff] %v5611_v21  ;;  %5971 = vrot.lane.b32.xlu0 %v12611_v41, %s9778_s19  ;;  %s14385_s19 = smov 113  }
 0x65e   :  { %v5606_v11 = vpop.permute.xlu1 %5605 }
 0x65f   :  { %v5608_v14 = vpop.permute.xlu0 %5607  ;;  %v7520_v24 = vld [vmem:[#allocation3 + $0x98] sm:$0xff] }
 0x660   :  { %v5612_v33 = vsel %vm1445_vm4, %v5606_v11, %v5608_v14  ;;  %5628 = vst.msk [vmem:[#allocation3 + $0xb8] sm:$0xff] %vm1352_vm2, %v5608_v14  ;;  %6009 = vrot.lane.b32.xlu1 %v12570_v57, %s9779_s20  ;;  %v9164_v0 = vpack.c.bf16 %v7520_v24, %v7518_v28 }
 0x661   :  { %6011 = vrot.lane.b32.xlu0 %v12572_v13, %s9779_s20  ;;  %v9170_v17 = vpack.c.bf16 %v5612_v33, %v5611_v21 }
 0x662   :  { %v5646_v29 = vpop.permute.xlu1 %5645  ;;  %9165 = vmatprep.subr.bf16.mxu1 %v9164_v0 }
 0x663   :  { %v5648_v27 = vpop.permute.xlu0 %5647  ;;  %9167 = vmatpush1.bf16.msra.mxu1 %v9166_v4  ;;  %v7522_v15 = vld [vmem:[#allocation3 + $0xa8] sm:$0xff] }
 0x664   :  { %v5661_v7 = vsel %vm1498_vm5, %v5646_v29, %v5648_v27  ;;  %5674 = vst.msk [vmem:[#allocation3 + $0xc8] sm:$0xff] %vm1352_vm2, %v5648_v27  ;;  %6013 = vrot.lane.b32.xlu1 %v12580_v10, %s9779_s20 }
 0x665   :  { %5673 = vst [vmem:[#allocation3 + $0xc0] sm:$0xff] %v5661_v7  ;;  %6015 = vrot.lane.b32.xlu0 %v12582_v1, %s9779_s20 }
 0x666   :  { %v5650_v38 = vpop.permute.xlu1 %5649 }
 0x667   :  { %v5652_v53 = vpop.permute.xlu0 %5651  ;;  %v7524_v56 = vld [vmem:[#allocation3 + $0xb8] sm:$0xff] }
 0x668   :  { %v5662_v63 = vsel %vm1498_vm5, %v5650_v38, %v5652_v53  ;;  %5676 = vst.msk [vmem:[#allocation3 + $0xd8] sm:$0xff] %vm1352_vm2, %v5652_v53  ;;  %6017 = vrot.lane.b32.xlu1 %v12598_v62, %s9779_s20  ;;  %v9168_v3 = vpack.c.bf16 %v7524_v56, %v7522_v15 }
 0x669   :  { %6019 = vrot.lane.b32.xlu0 %v12600_v26, %s9779_s20  ;;  %v9174_v52 = vpack.c.bf16 %v5662_v63, %v5661_v7 }
 0x66a   :  { %v5654_v34 = vpop.permute.xlu1 %5653  ;;  %9169 = vmatprep.subr.bf16.mxu1 %v9168_v3 }
 0x66b   :  { %v5656_v59 = vpop.permute.xlu0 %5655  ;;  %9171 = vmatpush1.bf16.msra.mxu1 %v9170_v17  ;;  %v7526_v20 = vld [vmem:[#allocation3 + $0xc8] sm:$0xff] }
 0x66c   :  { %v5663_v19 = vsel %vm1498_vm5, %v5654_v34, %v5656_v59  ;;  %5678 = vst.msk [vmem:[#allocation3 + $0xe8] sm:$0xff] %vm1352_vm2, %v5656_v59  ;;  %6021 = vrot.lane.b32.xlu1 %v12609_v61, %s9779_s20 }
 0x66d   :  { %5677 = vst [vmem:[#allocation3 + $0xe0] sm:$0xff] %v5663_v19  ;;  %6023 = vrot.lane.b32.xlu0 %v12611_v41, %s9779_s20  ;;  %s14396_s20 = smov 110  }
 0x66e   :  { %v5658_v44 = vpop.permute.xlu1 %5657 }
 0x66f   :  { %v5660_v39 = vpop.permute.xlu0 %5659  ;;  %v7528_v60 = vld [vmem:[#allocation3 + $0xd8] sm:$0xff] }
 0x670   :  { %v5664_v43 = vsel %vm1498_vm5, %v5658_v44, %v5660_v39  ;;  %5680 = vst.msk [vmem:[#allocation3 + $0xf8] sm:$0xff] %vm1352_vm2, %v5660_v39  ;;  %6061 = vrot.lane.b32.xlu1 %v12570_v57, %s9780_s21  ;;  %v9172_v32 = vpack.c.bf16 %v7528_v60, %v7526_v20 }
 0x671   :  { %6063 = vrot.lane.b32.xlu0 %v12572_v13, %s9780_s21  ;;  %v9178_v35 = vpack.c.bf16 %v5664_v43, %v5663_v19 }
 0x672   :  { %v5698_v48 = vpop.permute.xlu1 %5697  ;;  %9173 = vmatprep.subr.bf16.mxu1 %v9172_v32 }
 0x673   :  { %v5700_v5 = vpop.permute.xlu0 %5699  ;;  %9175 = vmatpush1.bf16.msra.mxu1 %v9174_v52  ;;  %v7530_v37 = vld [vmem:[#allocation3 + $0xe8] sm:$0xff]  ;;  %v12911_v52 = vld [vmem:[#allocation2 + $0x38] sm:$0xff] }
 0x674   :  { %v5713_v2 = vsel %vm1551_vm6, %v5698_v48, %v5700_v5  ;;  %5726 = vst.msk [vmem:[#allocation3 + $0x108] sm:$0xff] %vm1352_vm2, %v5700_v5  ;;  %6065 = vrot.lane.b32.xlu1 %v12580_v10, %s9780_s21  ;;  %v12915_v48 = vld [vmem:[#allocation2] sm:$0xff] }
 0x675   :  { %5725 = vst [vmem:[#allocation3 + $0x100] sm:$0xff] %v5713_v2  ;;  %6067 = vrot.lane.b32.xlu0 %v12582_v1, %s9780_s21 }
 0x676   :  { %v5702_v45 = vpop.permute.xlu1 %5701 }
 0x677   :  { %v5704_v12 = vpop.permute.xlu0 %5703  ;;  %v7532_v22 = vld [vmem:[#allocation3 + $0xf8] sm:$0xff] }
 0x678   :  { %v5714_v6 = vsel %vm1551_vm6, %v5702_v45, %v5704_v12  ;;  %5728 = vst.msk [vmem:[#allocation3 + $0x118] sm:$0xff] %vm1352_vm2, %v5704_v12  ;;  %6069 = vrot.lane.b32.xlu1 %v12598_v62, %s9780_s21  ;;  %v9176_v25 = vpack.c.bf16 %v7532_v22, %v7530_v37 }
 0x679   :  { %6071 = vrot.lane.b32.xlu0 %v12600_v26, %s9780_s21  ;;  %v9182_v58 = vpack.c.bf16 %v5714_v6, %v5713_v2 }
 0x67a   :  { %v5706_v16 = vpop.permute.xlu1 %5705  ;;  %9177 = vmatprep.subr.bf16.mxu1 %v9176_v25  ;;  %v12925_v25 = vld [vmem:[#allocation2 + $0x10] sm:$0xff] }
 0x67b   :  { %v5708_v55 = vpop.permute.xlu0 %5707  ;;  %9179 = vmatpush1.bf16.msra.mxu1 %v9178_v35  ;;  %v7534_v8 = vld [vmem:[#allocation3 + $0x108] sm:$0xff] }
 0x67c   :  { %v5715_v50 = vsel %vm1551_vm6, %v5706_v16, %v5708_v55  ;;  %5730 = vst.msk [vmem:[#allocation3 + $0x128] sm:$0xff] %vm1352_vm2, %v5708_v55  ;;  %6073 = vrot.lane.b32.xlu1 %v12609_v61, %s9780_s21  ;;  %v12931_v16 = vld [vmem:[#allocation2 + $0x18] sm:$0xff] }
 0x67d   :  { %5729 = vst [vmem:[#allocation3 + $0x120] sm:$0xff] %v5715_v50  ;;  %6075 = vrot.lane.b32.xlu0 %v12611_v41, %s9780_s21  ;;  %s14401_s21 = smov 109  }
 0x67e   :  { %v5710_v49 = vpop.permute.xlu1 %5709 }
 0x67f   :  { %v5712_v46 = vpop.permute.xlu0 %5711  ;;  %v7536_v47 = vld [vmem:[#allocation3 + $0x118] sm:$0xff] }
 0x680   :  { %v5716_v36 = vsel %vm1551_vm6, %v5710_v49, %v5712_v46  ;;  %5732 = vst.msk [vmem:[#allocation3 + $0x138] sm:$0xff] %vm1352_vm2, %v5712_v46  ;;  %6113 = vrot.lane.b32.xlu1 %v12570_v57, %s9781_s7  ;;  %v9180_v9 = vpack.c.bf16 %v7536_v47, %v7534_v8  ;;  %v12935_v49 = vld [vmem:[#allocation2 + $0x20] sm:$0xff]  ;;  %vm14387_vm6 = vcmask 973824  }
 0x681   :  { %6115 = vrot.lane.b32.xlu0 %v12572_v13, %s9781_s7  ;;  %v9186_v29 = vpack.c.bf16 %v5716_v36, %v5715_v50  ;;  %v12941_v36 = vld [vmem:[#allocation2 + $0x28] sm:$0xff] }
 0x682   :  { %v5750_v31 = vpop.permute.xlu1 %5749  ;;  %9181 = vmatprep.subr.bf16.mxu1 %v9180_v9 }
 0x683   :  { %v5752_v21 = vpop.permute.xlu0 %5751  ;;  %9183 = vmatpush1.bf16.msra.mxu1 %v9182_v58  ;;  %v7538_v24 = vld [vmem:[#allocation3 + $0x128] sm:$0xff] }
 0x684   :  { %v5765_v11 = vsel %vm1604_vm9, %v5750_v31, %v5752_v21  ;;  %5778 = vst.msk [vmem:[#allocation3 + $0x148] sm:$0xff] %vm1352_vm2, %v5752_v21  ;;  %6117 = vrot.lane.b32.xlu1 %v12580_v10, %s9781_s7 }
 0x685   :  { %5777 = vst [vmem:[#allocation3 + $0x140] sm:$0xff] %v5765_v11  ;;  %6119 = vrot.lane.b32.xlu0 %v12582_v1, %s9781_s7 }
 0x686   :  { %v5754_v14 = vpop.permute.xlu1 %5753 }
 0x687   :  { %v5756_v28 = vpop.permute.xlu0 %5755  ;;  %v7540_v33 = vld [vmem:[#allocation3 + $0x138] sm:$0xff] }
 0x688   :  { %v5766_v0 = vsel %vm1604_vm9, %v5754_v14, %v5756_v28  ;;  %5780 = vst.msk [vmem:[#allocation3 + $0x158] sm:$0xff] %vm1352_vm2, %v5756_v28  ;;  %6121 = vrot.lane.b32.xlu1 %v12598_v62, %s9781_s7  ;;  %v9184_v4 = vpack.c.bf16 %v7540_v33, %v7538_v24 }
 0x689   :  { %6123 = vrot.lane.b32.xlu0 %v12600_v26, %s9781_s7  ;;  %v9190_v34 = vpack.c.bf16 %v5766_v0, %v5765_v11  ;;  %v12945_v11 = vld [vmem:[#allocation2 + $0x30] sm:$0xff] }
 0x68a   :  { %v5758_v27 = vpop.permute.xlu1 %5757  ;;  %9185 = vmatprep.subr.bf16.mxu1 %v9184_v4 }
 0x68b   :  { %v5760_v7 = vpop.permute.xlu0 %5759  ;;  %9187 = vmatpush1.bf16.msra.mxu1 %v9186_v29  ;;  %v7542_v56 = vld [vmem:[#allocation3 + $0x148] sm:$0xff] }
 0x68c   :  { %v5767_v38 = vsel %vm1604_vm9, %v5758_v27, %v5760_v7  ;;  %5782 = vst.msk [vmem:[#allocation3 + $0x168] sm:$0xff] %vm1352_vm2, %v5760_v7  ;;  %6125 = vrot.lane.b32.xlu1 %v12609_v61, %s9781_s7 }
 0x68d   :  { %5781 = vst [vmem:[#allocation3 + $0x160] sm:$0xff] %v5767_v38  ;;  %6127 = vrot.lane.b32.xlu0 %v12611_v41, %s9781_s7  ;;  %s14406_s7 = smov 108  }
 0x68e   :  { %v5762_v53 = vpop.permute.xlu1 %5761 }
 0x68f   :  { %v5764_v15 = vpop.permute.xlu0 %5763  ;;  %v7544_v63 = vld [vmem:[#allocation3 + $0x158] sm:$0xff] }
 0x690   :  { %v5768_v3 = vsel %vm1604_vm9, %v5762_v53, %v5764_v15  ;;  %5784 = vst.msk [vmem:[#allocation3 + $0x178] sm:$0xff] %vm1352_vm2, %v5764_v15  ;;  %6165 = vrot.lane.b32.xlu1 %v12570_v57, %s14383_s17  ;;  %v9188_v17 = vpack.c.bf16 %v7544_v63, %v7542_v56  ;;  %vm14388_vm9 = vmmov %vm14387_vm6 }
 0x691   :  { %6167 = vrot.lane.b32.xlu0 %v12572_v13, %s14383_s17 }
 0x692   :  { %v5802_v59 = vpop.permute.xlu1 %5801  ;;  %9189 = vmatprep.subr.bf16.mxu1 %v9188_v17 }
 0x693   :  { %v5804_v19 = vpop.permute.xlu0 %5803  ;;  %9191 = vmatpush1.bf16.msra.mxu1 %v9190_v34  ;;  %v7546_v39 = vld [vmem:[#allocation3 + $0x168] sm:$0xff] }
 0x694   :  { %v5817_v41 = vsel %vm1657_vm11, %v5802_v59, %v5804_v19  ;;  %5830 = vst.msk [vmem:[#allocation3 + $0x188] sm:$0xff] %vm1352_vm2, %v5804_v19  ;;  %6169 = vrot.lane.b32.xlu1 %v12580_v10, %s14383_s17  ;;  %v9194_v10 = vpack.c.bf16 %v5768_v3, %v5767_v38 }
 0x695   :  { %5829 = vst [vmem:[#allocation3 + $0x180] sm:$0xff] %v5817_v41  ;;  %6171 = vrot.lane.b32.xlu0 %v12582_v1, %s14383_s17 }
 0x696   :  { %v5806_v57 = vpop.permute.xlu1 %5805 }
 0x697   :  { %v5808_v44 = vpop.permute.xlu0 %5807  ;;  %v7548_v13 = vld [vmem:[#allocation3 + $0x178] sm:$0xff] }
 0x698   :  { %v5818_v20 = vsel %vm1657_vm11, %v5806_v57, %v5808_v44  ;;  %5832 = vst.msk [vmem:[#allocation3 + $0x198] sm:$0xff] %vm1352_vm2, %v5808_v44  ;;  %6173 = vrot.lane.b32.xlu1 %v12598_v62, %s14383_s17  ;;  %v9192_v60 = vpack.c.bf16 %v7548_v13, %v7546_v39  ;;  %v9700_v39 = vld [vmem:[%s14178_s10] sm:$0xff] }
 0x699   :  { %6175 = vrot.lane.b32.xlu0 %v12600_v26, %s14383_s17  ;;  %v9198_v37 = vpack.c.bf16 %v5818_v20, %v5817_v41 }
 0x69a   :  { %v5810_v43 = vpop.permute.xlu1 %5809  ;;  %9193 = vmatprep.subr.bf16.mxu1 %v9192_v60 }
 0x69b   :  { %v5812_v32 = vpop.permute.xlu0 %5811  ;;  %9195 = vmatpush1.bf16.msra.mxu1 %v9194_v10  ;;  %v7550_v5 = vld [vmem:[#allocation3 + $0x188] sm:$0xff]  ;;  %v9701_v10 = vld [vmem:[%s14178_s10 + $0x58] sm:$0xff] }
 0x69c   :  { %v5819_v1 = vsel %vm1657_vm11, %v5810_v43, %v5812_v32  ;;  %5834 = vst.msk [vmem:[#allocation3 + $0x1a8] sm:$0xff] %vm1352_vm2, %v5812_v32  ;;  %6177 = vrot.lane.b32.xlu1 %v12609_v61, %s14383_s17  ;;  %v12921_v61 = vld [vmem:[#allocation2 + $0x8] sm:$0xff] }
 0x69d   :  { %5833 = vst [vmem:[#allocation3 + $0x1a0] sm:$0xff] %v5819_v1  ;;  %6179 = vrot.lane.b32.xlu0 %v12911_v52, %s14383_s17  ;;  %s9739_s17 = scalar_lea.vmem %s8522_s1, 32 }
 0x69e   :  { %v5814_v62 = vpop.permute.xlu1 %5813  ;;  %p9740_p0 = scmp.ne.s32.totalorder %s8522_s1, %s9739_s17  ;;  %p9745_p2 = scmp.lt.s32.totalorder %s9739_s17, %s9739_s17 }
 0x69f   :  { %v5816_v26 = vpop.permute.xlu0 %5815  ;;  %v7552_v2 = vld [vmem:[#allocation3 + $0x198] sm:$0xff] }
 0x6a0   :  { %v5820_v45 = vsel %vm1657_vm11, %v5814_v62, %v5816_v26  ;;  %5836 = vst.msk [vmem:[#allocation3 + $0x1b8] sm:$0xff] %vm1352_vm2, %v5816_v26  ;;  %6217 = vrot.lane.b32.xlu1 %v12915_v48, %s14384_s18  ;;  %v9196_v12 = vpack.c.bf16 %v7552_v2, %v7550_v5  ;;  %v9702_v26 = vld [vmem:[%s14178_s10 + $0x50] sm:$0xff]  ;;  %v9703_v2 = vld [vmem:[%s14178_s10 + $0xa8] sm:$0xff]  ;;  %vm14389_vm11 = vmmov %vm14387_vm6  ;;  %p9746_p3 = por %p9745_p2, %p9744_p1 }
 0x6a1   :  { %6219 = vrot.lane.b32.xlu0 %v12921_v61, %s14384_s18  ;;  %v9202_v58 = vpack.c.bf16 %v5820_v45, %v5819_v1 }
 0x6a2   :  { %v5854_v22 = vpop.permute.xlu1 %5853  ;;  %9197 = vmatprep.subr.bf16.mxu1 %v9196_v12  ;;  %p9747_p4 = pnand %p9746_p3, %p9740_p0 }
 0x6a3   :  { %v5856_v6 = vpop.permute.xlu0 %5855  ;;  %9199 = vmatpush1.bf16.msra.mxu1 %v9198_v37  ;;  %v7554_v46 = vld [vmem:[#allocation3 + $0x1a8] sm:$0xff]  ;;  %v9704_v37 = vld [vmem:[%s14178_s10 + $0xa0] sm:$0xff] }
 0x6a4   :  { %v5869_v35 = vsel %vm1710_vm13, %v5854_v22, %v5856_v6  ;;  %5882 = vst.msk [vmem:[#allocation3 + $0x1c8] sm:$0xff] %vm1352_vm2, %v5856_v6  ;;  %6221 = vrot.lane.b32.xlu1 %v12925_v25, %s14384_s18 }
 0x6a5   :  { %5881 = vst [vmem:[#allocation3 + $0x1c0] sm:$0xff] %v5869_v35  ;;  %6223 = vrot.lane.b32.xlu0 %v12931_v16, %s14384_s18 }
 0x6a6   :  { %v5858_v55 = vpop.permute.xlu1 %5857 }
 0x6a7   :  { %v5860_v50 = vpop.permute.xlu0 %5859  ;;  %v7556_v8 = vld [vmem:[#allocation3 + $0x1b8] sm:$0xff] }
 0x6a8   :  { %v5870_v47 = vsel %vm1710_vm13, %v5858_v55, %v5860_v50  ;;  %5884 = vst.msk [vmem:[#allocation3 + $0x1d8] sm:$0xff] %vm1352_vm2, %v5860_v50  ;;  %6225 = vrot.lane.b32.xlu1 %v12935_v49, %s14384_s18  ;;  %v9200_v9 = vpack.c.bf16 %v7556_v8, %v7554_v46  ;;  %v9705_v55 = vld [vmem:[%s14178_s10 + $0xf8] sm:$0xff] }
 0x6a9   :  { %6227 = vrot.lane.b32.xlu0 %v12941_v36, %s14384_s18  ;;  %v9206_v27 = vpack.c.bf16 %v5870_v47, %v5869_v35 }
 0x6aa   :  { %v5862_v31 = vpop.permute.xlu1 %5861  ;;  %9201 = vmatprep.subr.bf16.mxu1 %v9200_v9  ;;  %v9706_v9 = vld [vmem:[%s14178_s10 + $0xf0] sm:$0xff] }
 0x6ab   :  { %v5864_v21 = vpop.permute.xlu0 %5863  ;;  %9203 = vmatpush1.bf16.msra.mxu1 %v9202_v58  ;;  %v7558_v33 = vld [vmem:[#allocation3 + $0x1c8] sm:$0xff] }
 0x6ac   :  { %v5871_v14 = vsel %vm1710_vm13, %v5862_v31, %v5864_v21  ;;  %5886 = vst.msk [vmem:[#allocation3 + $0x1e8] sm:$0xff] %vm1352_vm2, %v5864_v21  ;;  %6229 = vrot.lane.b32.xlu1 %v12945_v11, %s14384_s18  ;;  %v9707_v31 = vld [vmem:[%s14178_s10 + $0x18] sm:$0xff] }
 0x6ad   :  { %5885 = vst [vmem:[#allocation3 + $0x1e0] sm:$0xff] %v5871_v14  ;;  %6231 = vrot.lane.b32.xlu0 %v12911_v52, %s14384_s18 }
 0x6ae   :  { %v5866_v28 = vpop.permute.xlu1 %5865 }
 0x6af   :  { %v5868_v24 = vpop.permute.xlu0 %5867  ;;  %v7560_v0 = vld [vmem:[#allocation3 + $0x1d8] sm:$0xff] }
 0x6b0   :  { %v5872_v4 = vsel %vm1710_vm13, %v5866_v28, %v5868_v24  ;;  %5888 = vst.msk [vmem:[#allocation3 + $0x1f8] sm:$0xff] %vm1352_vm2, %v5868_v24  ;;  %6269 = vrot.lane.b32.xlu1 %v12915_v48, %s14385_s19  ;;  %v9204_v29 = vpack.c.bf16 %v7560_v0, %v7558_v33  ;;  %vm14390_vm13 = vmmov %vm14387_vm6 }
 0x6b1   :  { %6271 = vrot.lane.b32.xlu0 %v12921_v61, %s14385_s19  ;;  %v9210_v59 = vpack.c.bf16 %v5872_v4, %v5871_v14 }
 0x6b2   :  { %v5906_v7 = vpop.permute.xlu1 %5905  ;;  %9205 = vmatprep.subr.bf16.mxu1 %v9204_v29 }
 0x6b3   :  { %v5908_v38 = vpop.permute.xlu0 %5907  ;;  %9207 = vmatpush1.bf16.msra.mxu1 %v9206_v27  ;;  %v7562_v63 = vld [vmem:[#allocation3 + $0x1e8] sm:$0xff] }
 0x6b4   :  { %v5921_v53 = vsel %vm1763_vm14, %v5906_v7, %v5908_v38  ;;  %5934 = vst.msk [vmem:[#allocation3 + $0x208] sm:$0xff] %vm1352_vm2, %v5908_v38  ;;  %6273 = vrot.lane.b32.xlu1 %v12925_v25, %s14385_s19 }
 0x6b5   :  { %5933 = vst [vmem:[#allocation3 + $0x200] sm:$0xff] %v5921_v53  ;;  %6275 = vrot.lane.b32.xlu0 %v12931_v16, %s14385_s19 }
 0x6b6   :  { %v5910_v15 = vpop.permute.xlu1 %5909 }
 0x6b7   :  { %v5912_v56 = vpop.permute.xlu0 %5911  ;;  %v7564_v3 = vld [vmem:[#allocation3 + $0x1f8] sm:$0xff] }
 0x6b8   :  { %v5922_v17 = vsel %vm1763_vm14, %v5910_v15, %v5912_v56  ;;  %5936 = vst.msk [vmem:[#allocation3 + $0x218] sm:$0xff] %vm1352_vm2, %v5912_v56  ;;  %6277 = vrot.lane.b32.xlu1 %v12935_v49, %s14385_s19  ;;  %v9208_v34 = vpack.c.bf16 %v7564_v3, %v7562_v63 }
 0x6b9   :  { %6279 = vrot.lane.b32.xlu0 %v12941_v36, %s14385_s19  ;;  %v9214_v1 = vpack.c.bf16 %v5922_v17, %v5921_v53 }
 0x6ba   :  { %v5914_v19 = vpop.permute.xlu1 %5913  ;;  %9209 = vmatprep.subr.bf16.mxu1 %v9208_v34 }
 0x6bb   :  { %v5916_v41 = vpop.permute.xlu0 %5915  ;;  %9211 = vmatpush1.bf16.msra.mxu1 %v9210_v59  ;;  %v7566_v20 = vld [vmem:[#allocation3 + $0x208] sm:$0xff] }
 0x6bc   :  { %v5923_v57 = vsel %vm1763_vm14, %v5914_v19, %v5916_v41  ;;  %5938 = vst.msk [vmem:[#allocation3 + $0x228] sm:$0xff] %vm1352_vm2, %v5916_v41  ;;  %6281 = vrot.lane.b32.xlu1 %v12945_v11, %s14385_s19 }
 0x6bd   :  { %5937 = vst [vmem:[#allocation3 + $0x220] sm:$0xff] %v5923_v57  ;;  %6283 = vrot.lane.b32.xlu0 %v12911_v52, %s14385_s19  ;;  %s14391_s19 = smov 111  }
 0x6be   :  { %v5918_v44 = vpop.permute.xlu1 %5917  ;;  %7878 = vmatmul.mubr.f32.vlgmr.msra.gmra.mrb[24].mxu1 %v9700_v39 }
 0x6bf   :  { %v5920_v13 = vpop.permute.xlu0 %5919  ;;  %v7568_v60 = vld [vmem:[#allocation3 + $0x218] sm:$0xff]  ;;  %7883 = vmatprep.mubr.f32.mxu1 %v9701_v10 }
 0x6c0   :  { %v5924_v43 = vsel %vm1763_vm14, %v5918_v44, %v5920_v13  ;;  %5940 = vst.msk [vmem:[#allocation3 + $0x238] sm:$0xff] %vm1352_vm2, %v5920_v13  ;;  %6321 = vrot.lane.b32.xlu1 %v12915_v48, %s14386_s4  ;;  %v9212_v32 = vpack.c.bf16 %v7568_v60, %v7566_v20  ;;  %vm14392_vm14 = vcmask 965632  }
 0x6c1   :  { %6323 = vrot.lane.b32.xlu0 %v12921_v61, %s14386_s4  ;;  %v9218_v8 = vpack.c.bf16 %v5924_v43, %v5923_v57  ;;  %vm14393_vm1 = vmmov %vm14392_vm14 }
 0x6c2   :  { %v5958_v62 = vpop.permute.xlu1 %5957  ;;  %9213 = vmatprep.subr.bf16.mxu1 %v9212_v32  ;;  %7884 = vmatmul.mubr.f32.gmra.mrb[26].mxu1 %v9702_v26  ;;  %vm14394_vm12 = vmmov %vm14393_vm1 }
 0x6c3   :  { %v5960_v5 = vpop.permute.xlu0 %5959  ;;  %9215 = vmatpush1.bf16.msra.mxu1 %v9214_v1  ;;  %7889 = vmatprep.mubr.f32.mxu1 %v9703_v2  ;;  %v7570_v6 = vld [vmem:[#allocation3 + $0x228] sm:$0xff]  ;;  %vm14395_vm10 = vmmov %vm14393_vm1 }
 0x6c4   :  { %v5973_v45 = vsel %vm14387_vm6, %v5958_v62, %v5960_v5  ;;  %5986 = vst.msk [vmem:[#allocation3 + $0x248] sm:$0xff] %vm1352_vm2, %v5960_v5  ;;  %6325 = vrot.lane.b32.xlu1 %v12925_v25, %s14386_s4  ;;  %vm14398_vm6 = vmmov %vm14397_vm15 }
 0x6c5   :  { %5985 = vst [vmem:[#allocation3 + $0x240] sm:$0xff] %v5973_v45  ;;  %6327 = vrot.lane.b32.xlu0 %v12931_v16, %s14386_s4 }
 0x6c6   :  { %v5962_v12 = vpop.permute.xlu1 %5961  ;;  %7890 = vmatmul.mubr.f32.gmra.mrb[28].mxu1 %v9704_v37 }
 0x6c7   :  { %v5964_v22 = vpop.permute.xlu0 %5963  ;;  %v7572_v35 = vld [vmem:[#allocation3 + $0x238] sm:$0xff]  ;;  %7895 = vmatprep.mubr.f32.mxu1 %v9705_v55 }
 0x6c8   :  { %v5974_v50 = vsel %vm14388_vm9, %v5962_v12, %v5964_v22  ;;  %5988 = vst.msk [vmem:[#allocation3 + $0x258] sm:$0xff] %vm1352_vm2, %v5964_v22  ;;  %6329 = vrot.lane.b32.xlu1 %v12935_v49, %s14386_s4  ;;  %v9216_v46 = vpack.c.bf16 %v7572_v35, %v7570_v6  ;;  %vm14399_vm9 = vmmov %vm14398_vm6 }
 0x6c9   :  { %6331 = vrot.lane.b32.xlu0 %v12941_v36, %s14386_s4  ;;  %v9222_v27 = vpack.c.bf16 %v5974_v50, %v5973_v45 }
 0x6ca   :  { %v5966_v47 = vpop.permute.xlu1 %5965  ;;  %9217 = vmatprep.subr.bf16.mxu1 %v9216_v46  ;;  %7896 = vmatmul.mubr.f32.gmra.mrb[30].mxu1 %v9706_v9 }
 0x6cb   :  { %v5968_v58 = vpop.permute.xlu0 %5967  ;;  %9219 = vmatpush1.bf16.msra.mxu1 %v9218_v8  ;;  %7966 = vmatprep.mubr.f32.mxu1 %v9707_v31  ;;  %v7574_v24 = vld [vmem:[#allocation3 + $0x248] sm:$0xff] }
 0x6cc   :  { %v5975_v21 = vsel %vm14389_vm11, %v5966_v47, %v5968_v58  ;;  %5990 = vst.msk [vmem:[#allocation3 + $0x268] sm:$0xff] %vm1352_vm2, %v5968_v58  ;;  %6333 = vrot.lane.b32.xlu1 %v12945_v11, %s14386_s4  ;;  %vm14400_vm11 = vmmov %vm14398_vm6 }
 0x6cd   :  { %5989 = vst [vmem:[#allocation3 + $0x260] sm:$0xff] %v5975_v21  ;;  %6335 = vrot.lane.b32.xlu0 %v12911_v52, %s14386_s4  ;;  %s14416_s4 = smov 106  }
 0x6ce   :  { %v5970_v14 = vpop.permute.xlu1 %5969 }
 0x6cf   :  { %v5972_v28 = vpop.permute.xlu0 %5971  ;;  %v7576_v33 = vld [vmem:[#allocation3 + $0x258] sm:$0xff] }
 0x6d0   :  { %v5976_v0 = vsel %vm14390_vm13, %v5970_v14, %v5972_v28  ;;  %5992 = vst.msk [vmem:[#allocation3 + $0x278] sm:$0xff] %vm1352_vm2, %v5972_v28  ;;  %6373 = vrot.lane.b32.xlu1 %v12915_v48, %s14391_s19  ;;  %v9220_v4 = vpack.c.bf16 %v7576_v33, %v7574_v24  ;;  %vm14402_vm13 = vcmask 949248  }
 0x6d1   :  { %6375 = vrot.lane.b32.xlu0 %v12921_v61, %s14391_s19  ;;  %v13031_v29 = vpop.f32.mrb[24].mxu0  ;;  %v9226_v44 = vpack.c.bf16 %v5976_v0, %v5975_v21 }
 0x6d2   :  { %v6010_v7 = vpop.permute.xlu1 %6009  ;;  %v13033_v38 = vpop.f32.mrb[25].mxu0  ;;  %9221 = vmatprep.subr.bf16.mxu1 %v9220_v4 }
 0x6d3   :  { %v6012_v53 = vpop.permute.xlu0 %6011  ;;  %9223 = vmatpush1.bf16.msra.mxu1 %v9222_v27  ;;  %v7578_v34 = vld [vmem:[#allocation3 + $0x268] sm:$0xff] }
 0x6d4   :  { %v6025_v15 = vsel %vm14392_vm14, %v6010_v7, %v6012_v53  ;;  %6038 = vst.msk [vmem:[#allocation3 + $0x288] sm:$0xff] %vm1352_vm2, %v6012_v53  ;;  %6377 = vrot.lane.b32.xlu1 %v12925_v25, %s14391_s19  ;;  %vm14403_vm14 = vmmov %vm14402_vm13 }
 0x6d5   :  { %6037 = vst [vmem:[#allocation3 + $0x280] sm:$0xff] %v6025_v15  ;;  %6379 = vrot.lane.b32.xlu0 %v12931_v16, %s14391_s19  ;;  %v13041_v56 = vpop.f32.mrb[26].mxu0 }
 0x6d6   :  { %v6014_v63 = vpop.permute.xlu1 %6013  ;;  %v13043_v3 = vpop.f32.mrb[27].mxu0 }
 0x6d7   :  { %v6016_v17 = vpop.permute.xlu0 %6015  ;;  %v7580_v59 = vld [vmem:[#allocation3 + $0x278] sm:$0xff] }
 0x6d8   :  { %v6026_v19 = vsel %vm14393_vm1, %v6014_v63, %v6016_v17  ;;  %6040 = vst.msk [vmem:[#allocation3 + $0x298] sm:$0xff] %vm1352_vm2, %v6016_v17  ;;  %6381 = vrot.lane.b32.xlu1 %v12935_v49, %s14391_s19  ;;  %v9224_v41 = vpack.c.bf16 %v7580_v59, %v7578_v34  ;;  %vm14404_vm1 = vmmov %vm14402_vm13 }
 0x6d9   :  { %6383 = vrot.lane.b32.xlu0 %v12941_v36, %s14391_s19  ;;  %v13051_v57 = vpop.f32.mrb[28].mxu0  ;;  %v9230_v45 = vpack.c.bf16 %v6026_v19, %v6025_v15 }
 0x6da   :  { %v6018_v39 = vpop.permute.xlu1 %6017  ;;  %v13053_v13 = vpop.f32.mrb[29].mxu0  ;;  %9225 = vmatprep.subr.bf16.mxu1 %v9224_v41 }
 0x6db   :  { %v6020_v20 = vpop.permute.xlu0 %6019  ;;  %9227 = vmatpush1.bf16.msra.mxu1 %v9226_v44  ;;  %v7582_v62 = vld [vmem:[#allocation3 + $0x288] sm:$0xff] }
 0x6dc   :  { %v6027_v60 = vsel %vm14394_vm12, %v6018_v39, %v6020_v20  ;;  %6042 = vst.msk [vmem:[#allocation3 + $0x2a8] sm:$0xff] %vm1352_vm2, %v6020_v20  ;;  %6385 = vrot.lane.b32.xlu1 %v12945_v11, %s14391_s19  ;;  %vm14405_vm12 = vmmov %vm14404_vm1 }
 0x6dd   :  { %6041 = vst [vmem:[#allocation3 + $0x2a0] sm:$0xff] %v6027_v60  ;;  %6387 = vrot.lane.b32.xlu0 %v12911_v52, %s14391_s19  ;;  %v13061_v10 = vpop.f32.mrb[30].mxu0 }
 0x6de   :  { %v6022_v43 = vpop.permute.xlu1 %6021  ;;  %v13063_v32 = vpop.f32.mrb[31].mxu0 }
 0x6df   :  { %v6024_v1 = vpop.permute.xlu0 %6023  ;;  %v7584_v26 = vld [vmem:[#allocation3 + $0x298] sm:$0xff] }
 0x6e0   :  { %v6028_v5 = vsel %vm14395_vm10, %v6022_v43, %v6024_v1  ;;  %6044 = vst.msk [vmem:[#allocation3 + $0x2b8] sm:$0xff] %vm1352_vm2, %v6024_v1  ;;  %6425 = vrot.lane.b32.xlu1 %v12915_v48, %s14396_s20  ;;  %v9228_v2 = vpack.c.bf16 %v7584_v26, %v7582_v62  ;;  %vm14407_vm10 = vcmask 941056  }
 0x6e1   :  { %6427 = vrot.lane.b32.xlu0 %v12921_v61, %s14396_s20  ;;  %v9234_v47 = vpack.c.bf16 %v6028_v5, %v6027_v60 }
 0x6e2   :  { %v6062_v12 = vpop.permute.xlu1 %6061  ;;  %9229 = vmatprep.subr.bf16.mxu1 %v9228_v2 }
 0x6e3   :  { %v6064_v37 = vpop.permute.xlu0 %6063  ;;  %9231 = vmatpush1.bf16.msra.mxu1 %v9230_v45  ;;  %v7586_v55 = vld [vmem:[#allocation3 + $0x2a8] sm:$0xff] }
 0x6e4   :  { %v6077_v22 = vsel %vm14397_vm15, %v6062_v12, %v6064_v37  ;;  %6090 = vst.msk [vmem:[#allocation3 + $0x2c8] sm:$0xff] %vm1352_vm2, %v6064_v37  ;;  %6429 = vrot.lane.b32.xlu1 %v12925_v25, %s14396_s20  ;;  %vm14408_vm15 = vmmov %vm14407_vm10 }
 0x6e5   :  { %6089 = vst [vmem:[#allocation3 + $0x2c0] sm:$0xff] %v6077_v22  ;;  %6431 = vrot.lane.b32.xlu0 %v12931_v16, %s14396_s20 }
 0x6e6   :  { %v6066_v6 = vpop.permute.xlu1 %6065 }
 0x6e7   :  { %v6068_v35 = vpop.permute.xlu0 %6067  ;;  %v7588_v50 = vld [vmem:[#allocation3 + $0x2b8] sm:$0xff] }
 0x6e8   :  { %v6078_v46 = vsel %vm14398_vm6, %v6066_v6, %v6068_v35  ;;  %6092 = vst.msk [vmem:[#allocation3 + $0x2d8] sm:$0xff] %vm1352_vm2, %v6068_v35  ;;  %6433 = vrot.lane.b32.xlu1 %v12935_v49, %s14396_s20  ;;  %v9232_v8 = vpack.c.bf16 %v7588_v50, %v7586_v55  ;;  %vm14409_vm6 = vmmov %vm14407_vm10 }
 0x6e9   :  { %6435 = vrot.lane.b32.xlu0 %v12941_v36, %s14396_s20  ;;  %v9238_v4 = vpack.c.bf16 %v6078_v46, %v6077_v22 }
 0x6ea   :  { %v6070_v9 = vpop.permute.xlu1 %6069  ;;  %9233 = vmatprep.subr.bf16.mxu1 %v9232_v8 }
 0x6eb   :  { %v6072_v58 = vpop.permute.xlu0 %6071  ;;  %9235 = vmatpush1.bf16.msra.mxu1 %v9234_v47  ;;  %v7590_v28 = vld [vmem:[#allocation3 + $0x2c8] sm:$0xff] }
 0x6ec   :  { %v6079_v31 = vsel %vm14399_vm9, %v6070_v9, %v6072_v58  ;;  %6094 = vst.msk [vmem:[#allocation3 + $0x2e8] sm:$0xff] %vm1352_vm2, %v6072_v58  ;;  %6437 = vrot.lane.b32.xlu1 %v12945_v11, %s14396_s20  ;;  %vm14410_vm9 = vmmov %vm14409_vm6 }
 0x6ed   :  { %6093 = vst [vmem:[#allocation3 + $0x2e0] sm:$0xff] %v6079_v31  ;;  %6439 = vrot.lane.b32.xlu0 %v12911_v52, %s14396_s20 }
 0x6ee   :  { %v6074_v21 = vpop.permute.xlu1 %6073 }
 0x6ef   :  { %v6076_v14 = vpop.permute.xlu0 %6075  ;;  %v7592_v24 = vld [vmem:[#allocation3 + $0x2d8] sm:$0xff] }
 0x6f0   :  { %v6080_v33 = vsel %vm14400_vm11, %v6074_v21, %v6076_v14  ;;  %6096 = vst.msk [vmem:[#allocation3 + $0x2f8] sm:$0xff] %vm1352_vm2, %v6076_v14  ;;  %6477 = vrot.lane.b32.xlu1 %v12915_v48, %s14401_s21  ;;  %v9236_v0 = vpack.c.bf16 %v7592_v24, %v7590_v28  ;;  %vm14412_vm11 = vcmask 932864  }
 0x6f1   :  { %6479 = vrot.lane.b32.xlu0 %v12921_v61, %s14401_s21  ;;  %v9242_v41 = vpack.c.bf16 %v6080_v33, %v6079_v31 }
 0x6f2   :  { %v6114_v27 = vpop.permute.xlu1 %6113  ;;  %9237 = vmatprep.subr.bf16.mxu1 %v9236_v0 }
 0x6f3   :  { %v6116_v7 = vpop.permute.xlu0 %6115  ;;  %9239 = vmatpush1.bf16.msra.mxu1 %v9238_v4  ;;  %v7594_v17 = vld [vmem:[#allocation3 + $0x2e8] sm:$0xff] }
 0x6f4   :  { %v6129_v53 = vsel %vm14402_vm13, %v6114_v27, %v6116_v7  ;;  %6142 = vst.msk [vmem:[#allocation3 + $0x308] sm:$0xff] %vm1352_vm2, %v6116_v7  ;;  %6481 = vrot.lane.b32.xlu1 %v12925_v25, %s14401_s21  ;;  %vm14413_vm13 = vmmov %vm14412_vm11 }
 0x6f5   :  { %6141 = vst [vmem:[#allocation3 + $0x300] sm:$0xff] %v6129_v53  ;;  %6483 = vrot.lane.b32.xlu0 %v12931_v16, %s14401_s21 }
 0x6f6   :  { %v6118_v15 = vpop.permute.xlu1 %6117 }
 0x6f7   :  { %v6120_v63 = vpop.permute.xlu0 %6119  ;;  %v7596_v34 = vld [vmem:[#allocation3 + $0x2f8] sm:$0xff] }
 0x6f8   :  { %v6130_v59 = vsel %vm14403_vm14, %v6118_v15, %v6120_v63  ;;  %6144 = vst.msk [vmem:[#allocation3 + $0x318] sm:$0xff] %vm1352_vm2, %v6120_v63  ;;  %6485 = vrot.lane.b32.xlu1 %v12935_v49, %s14401_s21  ;;  %v9240_v19 = vpack.c.bf16 %v7596_v34, %v7594_v17  ;;  %vm14414_vm14 = vmmov %vm14412_vm11 }
 0x6f9   :  { %6487 = vrot.lane.b32.xlu0 %v12941_v36, %s14401_s21  ;;  %v9246_v2 = vpack.c.bf16 %v6130_v59, %v6129_v53 }
 0x6fa   :  { %v6122_v44 = vpop.permute.xlu1 %6121  ;;  %9241 = vmatprep.subr.bf16.mxu1 %v9240_v19 }
 0x6fb   :  { %v6124_v39 = vpop.permute.xlu0 %6123  ;;  %9243 = vmatpush1.bf16.msra.mxu1 %v9242_v41  ;;  %v7598_v1 = vld [vmem:[#allocation3 + $0x308] sm:$0xff] }
 0x6fc   :  { %v6131_v20 = vsel %vm14404_vm1, %v6122_v44, %v6124_v39  ;;  %6146 = vst.msk [vmem:[#allocation3 + $0x328] sm:$0xff] %vm1352_vm2, %v6124_v39  ;;  %6489 = vrot.lane.b32.xlu1 %v12945_v11, %s14401_s21  ;;  %vm14415_vm1 = vmmov %vm14412_vm11 }
 0x6fd   :  { %6145 = vst [vmem:[#allocation3 + $0x320] sm:$0xff] %v6131_v20  ;;  %6491 = vrot.lane.b32.xlu0 %v12911_v52, %s14401_s21 }
 0x6fe   :  { %v6126_v60 = vpop.permute.xlu1 %6125 }
 0x6ff   :  { %v6128_v43 = vpop.permute.xlu0 %6127  ;;  %v7600_v62 = vld [vmem:[#allocation3 + $0x318] sm:$0xff] }
 0x700   :  { %v6132_v26 = vsel %vm14405_vm12, %v6126_v60, %v6128_v43  ;;  %6148 = vst.msk [vmem:[#allocation3 + $0x338] sm:$0xff] %vm1352_vm2, %v6128_v43  ;;  %6529 = vrot.lane.b32.xlu1 %v12915_v48, %s14406_s7  ;;  %v9244_v5 = vpack.c.bf16 %v7600_v62, %v7598_v1  ;;  %vm14417_vm12 = vcmask 924672  }
 0x701   :  { %6531 = vrot.lane.b32.xlu0 %v12921_v61, %s14406_s7  ;;  %v9250_v8 = vpack.c.bf16 %v6132_v26, %v6131_v20 }
 0x702   :  { %v6166_v45 = vpop.permute.xlu1 %6165  ;;  %9245 = vmatprep.subr.bf16.mxu1 %v9244_v5 }
 0x703   :  { %v6168_v12 = vpop.permute.xlu0 %6167  ;;  %9247 = vmatpush1.bf16.msra.mxu1 %v9246_v2  ;;  %v7602_v35 = vld [vmem:[#allocation3 + $0x328] sm:$0xff] }
 0x704   :  { %v6181_v37 = vsel %vm14407_vm10, %v6166_v45, %v6168_v12  ;;  %6194 = vst.msk [vmem:[#allocation3 + $0x348] sm:$0xff] %vm1352_vm2, %v6168_v12  ;;  %6533 = vrot.lane.b32.xlu1 %v12925_v25, %s14406_s7  ;;  %vm14418_vm10 = vmmov %vm14417_vm12 }
 0x705   :  { %6193 = vst [vmem:[#allocation3 + $0x340] sm:$0xff] %v6181_v37  ;;  %6535 = vrot.lane.b32.xlu0 %v12931_v16, %s14406_s7 }
 0x706   :  { %v6170_v22 = vpop.permute.xlu1 %6169 }
 0x707   :  { %v6172_v6 = vpop.permute.xlu0 %6171  ;;  %v7604_v55 = vld [vmem:[#allocation3 + $0x338] sm:$0xff] }
 0x708   :  { %v6182_v50 = vsel %vm14408_vm15, %v6170_v22, %v6172_v6  ;;  %6196 = vst.msk [vmem:[#allocation3 + $0x358] sm:$0xff] %vm1352_vm2, %v6172_v6  ;;  %6537 = vrot.lane.b32.xlu1 %v12935_v49, %s14406_s7  ;;  %v9248_v46 = vpack.c.bf16 %v7604_v55, %v7602_v35  ;;  %vm14419_vm15 = vmmov %vm14418_vm10 }
 0x709   :  { %6539 = vrot.lane.b32.xlu0 %v12941_v36, %s14406_s7  ;;  %v9254_v0 = vpack.c.bf16 %v6182_v50, %v6181_v37 }
 0x70a   :  { %v6174_v47 = vpop.permute.xlu1 %6173  ;;  %9249 = vmatprep.subr.bf16.mxu1 %v9248_v46 }
 0x70b   :  { %v6176_v9 = vpop.permute.xlu0 %6175  ;;  %9251 = vmatpush1.bf16.msra.mxu1 %v9250_v8  ;;  %v7606_v14 = vld [vmem:[#allocation3 + $0x348] sm:$0xff] }
 0x70c   :  { %v6183_v58 = vsel %vm14409_vm6, %v6174_v47, %v6176_v9  ;;  %6198 = vst.msk [vmem:[#allocation3 + $0x368] sm:$0xff] %vm1352_vm2, %v6176_v9  ;;  %6541 = vrot.lane.b32.xlu1 %v12945_v11, %s14406_s7  ;;  %vm14420_vm6 = vmmov %vm14418_vm10 }
 0x70d   :  { %6197 = vst [vmem:[#allocation3 + $0x360] sm:$0xff] %v6183_v58  ;;  %6543 = vrot.lane.b32.xlu0 %v12911_v52, %s14406_s7  ;;  %s14452_s7 = smov 98  }
 0x70e   :  { %v6178_v31 = vpop.permute.xlu1 %6177 }
 0x70f   :  { %v6180_v21 = vpop.permute.xlu0 %6179  ;;  %v7608_v28 = vld [vmem:[#allocation3 + $0x358] sm:$0xff] }
 0x710   :  { %v6184_v24 = vsel %vm14410_vm9, %v6178_v31, %v6180_v21  ;;  %6200 = vst.msk [vmem:[#allocation3 + $0x378] sm:$0xff] %vm1352_vm2, %v6180_v21  ;;  %6581 = vrot.lane.b32.xlu1 %v12915_v48, %s14411_s8  ;;  %v9252_v33 = vpack.c.bf16 %v7608_v28, %v7606_v14  ;;  %vm14421_vm9 = vcmask 916480  }
 0x711   :  { %6583 = vrot.lane.b32.xlu0 %v12921_v61, %s14411_s8  ;;  %v9258_v19 = vpack.c.bf16 %v6184_v24, %v6183_v58 }
 0x712   :  { %v6218_v4 = vpop.permute.xlu1 %6217  ;;  %9253 = vmatprep.subr.bf16.mxu1 %v9252_v33 }
 0x713   :  { %v6220_v27 = vpop.permute.xlu0 %6219  ;;  %9255 = vmatpush1.bf16.msra.mxu1 %v9254_v0  ;;  %v7610_v63 = vld [vmem:[#allocation3 + $0x368] sm:$0xff] }
 0x714   :  { %v6233_v7 = vsel %vm14412_vm11, %v6218_v4, %v6220_v27  ;;  %6246 = vst.msk [vmem:[#allocation3 + $0x388] sm:$0xff] %vm1352_vm2, %v6220_v27  ;;  %6585 = vrot.lane.b32.xlu1 %v12925_v25, %s14411_s8  ;;  %vm14422_vm11 = vmmov %vm14421_vm9 }
 0x715   :  { %6245 = vst [vmem:[#allocation3 + $0x380] sm:$0xff] %v6233_v7  ;;  %6587 = vrot.lane.b32.xlu0 %v12931_v16, %s14411_s8 }
 0x716   :  { %v6222_v53 = vpop.permute.xlu1 %6221 }
 0x717   :  { %v6224_v15 = vpop.permute.xlu0 %6223  ;;  %v7612_v17 = vld [vmem:[#allocation3 + $0x378] sm:$0xff] }
 0x718   :  { %v6234_v34 = vsel %vm14413_vm13, %v6222_v53, %v6224_v15  ;;  %6248 = vst.msk [vmem:[#allocation3 + $0x398] sm:$0xff] %vm1352_vm2, %v6224_v15  ;;  %6589 = vrot.lane.b32.xlu1 %v12935_v49, %s14411_s8  ;;  %v9256_v59 = vpack.c.bf16 %v7612_v17, %v7610_v63  ;;  %vm14423_vm13 = vmmov %vm14421_vm9 }
 0x719   :  { %6591 = vrot.lane.b32.xlu0 %v12941_v36, %s14411_s8  ;;  %v9262_v5 = vpack.c.bf16 %v6234_v34, %v6233_v7  ;;  %v13209_v34 = vld [vmem:[#allocation2 + $0x38] sm:$0xff] }
 0x71a   :  { %v6226_v41 = vpop.permute.xlu1 %6225  ;;  %9257 = vmatprep.subr.bf16.mxu1 %v9256_v59 }
 0x71b   :  { %v6228_v44 = vpop.permute.xlu0 %6227  ;;  %9259 = vmatpush1.bf16.msra.mxu1 %v9258_v19  ;;  %v7614_v43 = vld [vmem:[#allocation3 + $0x388] sm:$0xff]  ;;  %v13216_v19 = vld [vmem:[#allocation2] sm:$0xff] }
 0x71c   :  { %v6235_v39 = vsel %vm14414_vm14, %v6226_v41, %v6228_v44  ;;  %6250 = vst.msk [vmem:[#allocation3 + $0x3a8] sm:$0xff] %vm1352_vm2, %v6228_v44  ;;  %6593 = vrot.lane.b32.xlu1 %v12945_v11, %s14411_s8  ;;  %vm14424_vm14 = vmmov %vm14421_vm9 }
 0x71d   :  { %6249 = vst [vmem:[#allocation3 + $0x3a0] sm:$0xff] %v6235_v39  ;;  %6595 = vrot.lane.b32.xlu0 %v12911_v52, %s14411_s8  ;;  %s14457_s8 = smov 97  }
 0x71e   :  { %v6230_v20 = vpop.permute.xlu1 %6229 }
 0x71f   :  { %v6232_v60 = vpop.permute.xlu0 %6231  ;;  %v7616_v1 = vld [vmem:[#allocation3 + $0x398] sm:$0xff] }
 0x720   :  { %v6236_v62 = vsel %vm14415_vm1, %v6230_v20, %v6232_v60  ;;  %6252 = vst.msk [vmem:[#allocation3 + $0x3b8] sm:$0xff] %vm1352_vm2, %v6232_v60  ;;  %6633 = vrot.lane.b32.xlu1 %v12915_v48, %s14416_s4  ;;  %v9260_v26 = vpack.c.bf16 %v7616_v1, %v7614_v43  ;;  %v13225_v60 = vld [vmem:[#allocation2 + $0x8] sm:$0xff]  ;;  %vm14425_vm1 = vcmask 908288  }
 0x721   :  { %6635 = vrot.lane.b32.xlu0 %v12921_v61, %s14416_s4  ;;  %v9266_v46 = vpack.c.bf16 %v6236_v62, %v6235_v39  ;;  %v9709_v39 = vld [vmem:[%s14178_s10 + $0x68] sm:$0xff] }
 0x722   :  { %v6270_v2 = vpop.permute.xlu1 %6269  ;;  %9261 = vmatprep.subr.bf16.mxu1 %v9260_v26  ;;  %v9710_v26 = vld [vmem:[%s14178_s10 + $0x60] sm:$0xff] }
 0x723   :  { %v6272_v45 = vpop.permute.xlu0 %6271  ;;  %9263 = vmatpush1.bf16.msra.mxu1 %v9262_v5  ;;  %v7618_v6 = vld [vmem:[#allocation3 + $0x3a8] sm:$0xff] }
 0x724   :  { %v6285_v12 = vsel %vm14417_vm12, %v6270_v2, %v6272_v45  ;;  %6298 = vst.msk [vmem:[#allocation3 + $0x3c8] sm:$0xff] %vm1352_vm2, %v6272_v45  ;;  %6637 = vrot.lane.b32.xlu1 %v12925_v25, %s14416_s4  ;;  %v13232_v2 = vld [vmem:[#allocation2 + $0x10] sm:$0xff]  ;;  %v9711_v45 = vld [vmem:[%s14178_s10 + $0xb8] sm:$0xff]  ;;  %vm14426_vm12 = vmmov %vm14425_vm1 }
 0x725   :  { %6297 = vst [vmem:[#allocation3 + $0x3c0] sm:$0xff] %v6285_v12  ;;  %6639 = vrot.lane.b32.xlu0 %v12931_v16, %s14416_s4 }
 0x726   :  { %v6274_v37 = vpop.permute.xlu1 %6273 }
 0x727   :  { %v6276_v22 = vpop.permute.xlu0 %6275  ;;  %v7620_v35 = vld [vmem:[#allocation3 + $0x3b8] sm:$0xff] }
 0x728   :  { %v6286_v55 = vsel %vm14418_vm10, %v6274_v37, %v6276_v22  ;;  %6300 = vst.msk [vmem:[#allocation3 + $0x3d8] sm:$0xff] %vm1352_vm2, %v6276_v22  ;;  %6641 = vrot.lane.b32.xlu1 %v12935_v49, %s14416_s4  ;;  %v9264_v50 = vpack.c.bf16 %v7620_v35, %v7618_v6  ;;  %v13241_v37 = vld [vmem:[#allocation2 + $0x18] sm:$0xff]  ;;  %v9712_v6 = vld [vmem:[%s14178_s10 + $0xb0] sm:$0xff]  ;;  %vm14427_vm10 = vmmov %vm14425_vm1 }
 0x729   :  { %6643 = vrot.lane.b32.xlu0 %v12941_v36, %s14416_s4 }
 0x72a   :  { %v6278_v8 = vpop.permute.xlu1 %6277  ;;  %9265 = vmatprep.subr.bf16.mxu1 %v9264_v50 }
 0x72b   :  { %v6280_v47 = vpop.permute.xlu0 %6279  ;;  %9267 = vmatpush1.bf16.msra.mxu1 %v9266_v46  ;;  %v7622_v21 = vld [vmem:[#allocation3 + $0x3c8] sm:$0xff] }
 0x72c   :  { %v6287_v9 = vsel %vm14419_vm15, %v6278_v8, %v6280_v47  ;;  %6302 = vst.msk [vmem:[#allocation3 + $0x3e8] sm:$0xff] %vm1352_vm2, %v6280_v47  ;;  %6645 = vrot.lane.b32.xlu1 %v12945_v11, %s14416_s4  ;;  %v9270_v11 = vpack.c.bf16 %v6286_v55, %v6285_v12  ;;  %v13248_v55 = vld [vmem:[#allocation2 + $0x20] sm:$0xff]  ;;  %v9713_v8 = vld [vmem:[%s14178_s10 + $0x108] sm:$0xff]  ;;  %vm14428_vm15 = vmmov %vm14425_vm1 }
 0x72d   :  { %6301 = vst [vmem:[#allocation3 + $0x3e0] sm:$0xff] %v6287_v9  ;;  %6647 = vrot.lane.b32.xlu0 %v12911_v52, %s14416_s4  ;;  %s14492_s4 = smov 90  }
 0x72e   :  { %v6282_v58 = vpop.permute.xlu1 %6281 }
 0x72f   :  { %v6284_v31 = vpop.permute.xlu0 %6283  ;;  %v7624_v14 = vld [vmem:[#allocation3 + $0x3d8] sm:$0xff] }
 0x730   :  { %v6288_v28 = vsel %vm14420_vm6, %v6282_v58, %v6284_v31  ;;  %6304 = vst.msk [vmem:[#allocation3 + $0x3f8] sm:$0xff] %vm1352_vm2, %v6284_v31  ;;  %6685 = vrot.lane.b32.xlu1 %v12915_v48, %s14313_s3  ;;  %v9268_v24 = vpack.c.bf16 %v7624_v14, %v7622_v21  ;;  %v9714_v14 = vld [vmem:[%s14178_s10 + $0x100] sm:$0xff]  ;;  %vm14429_vm6 = vcmask 900096  }
 0x731   :  { %6687 = vrot.lane.b32.xlu0 %v12921_v61, %s14313_s3 }
 0x732   :  { %v6322_v33 = vpop.permute.xlu1 %6321  ;;  %9269 = vmatprep.subr.bf16.mxu1 %v9268_v24  ;;  %v9715_v24 = vld [vmem:[%s14178_s10 + $0x28] sm:$0xff] }
 0x733   :  { %v6324_v0 = vpop.permute.xlu0 %6323  ;;  %9271 = vmatpush1.bf16.msra.mxu1 %v9270_v11  ;;  %v7626_v27 = vld [vmem:[#allocation3 + $0x3e8] sm:$0xff] }
 0x734   :  { %v6337_v52 = vsel %vm14421_vm9, %v6322_v33, %v6324_v0  ;;  %6350 = vst.msk [vmem:[#allocation3 + $0x408] sm:$0xff] %vm1352_vm2, %v6324_v0  ;;  %6689 = vrot.lane.b32.xlu1 %v12925_v25, %s14313_s3  ;;  %v9274_v25 = vpack.c.bf16 %v6288_v28, %v6287_v9  ;;  %v13257_v9 = vld [vmem:[#allocation2 + $0x28] sm:$0xff]  ;;  %vm14430_vm9 = vmmov %vm14429_vm6 }
 0x735   :  { %6349 = vst [vmem:[#allocation3 + $0x400] sm:$0xff] %v6337_v52  ;;  %6691 = vrot.lane.b32.xlu0 %v12931_v16, %s14313_s3  ;;  %v13203_v16 = vld [vmem:[#allocation2 + $0x30] sm:$0xff] }
 0x736   :  { %v6326_v48 = vpop.permute.xlu1 %6325 }
 0x737   :  { %v6328_v4 = vpop.permute.xlu0 %6327  ;;  %v7628_v61 = vld [vmem:[#allocation3 + $0x3f8] sm:$0xff] }
 0x738   :  { %v6338_v7 = vsel %vm14422_vm11, %v6326_v48, %v6328_v4  ;;  %6352 = vst.msk [vmem:[#allocation3 + $0x418] sm:$0xff] %vm1352_vm2, %v6328_v4  ;;  %6693 = vrot.lane.b32.xlu1 %v12935_v49, %s14313_s3  ;;  %v9272_v53 = vpack.c.bf16 %v7628_v61, %v7626_v27  ;;  %vm14431_vm11 = vmmov %vm14429_vm6 }
 0x739   :  { %6695 = vrot.lane.b32.xlu0 %v12941_v36, %s14313_s3  ;;  %v9708_v36 = vld [vmem:[%s14178_s10 + $0x10] sm:$0xff]  ;;  %v9278_v1 = vpack.c.bf16 %v6338_v7, %v6337_v52 }
 0x73a   :  { %v6330_v15 = vpop.permute.xlu1 %6329  ;;  %9273 = vmatprep.subr.bf16.mxu1 %v9272_v53 }
 0x73b   :  { %v6332_v63 = vpop.permute.xlu0 %6331  ;;  %9275 = vmatpush1.bf16.msra.mxu1 %v9274_v25  ;;  %v7630_v41 = vld [vmem:[#allocation3 + $0x408] sm:$0xff] }
 0x73c   :  { %v6339_v17 = vsel %vm14423_vm13, %v6330_v15, %v6332_v63  ;;  %6354 = vst.msk [vmem:[#allocation3 + $0x428] sm:$0xff] %vm1352_vm2, %v6332_v63  ;;  %6697 = vrot.lane.b32.xlu1 %v13203_v16, %s14313_s3  ;;  %vm14432_vm13 = vmmov %vm14429_vm6 }
 0x73d   :  { %6353 = vst [vmem:[#allocation3 + $0x420] sm:$0xff] %v6339_v17  ;;  %6699 = vrot.lane.b32.xlu0 %v13209_v34, %s14313_s3 }
 0x73e   :  { %v6334_v49 = vpop.permute.xlu1 %6333  ;;  %7967 = vmatmul.mubr.f32.vlgmr.msra.gmra.mrb[24].mxu1 %v9708_v36 }
 0x73f   :  { %v6336_v59 = vpop.permute.xlu0 %6335  ;;  %v7632_v44 = vld [vmem:[#allocation3 + $0x418] sm:$0xff]  ;;  %7972 = vmatprep.mubr.f32.mxu1 %v9709_v39 }
 0x740   :  { %v6340_v20 = vsel %vm14424_vm14, %v6334_v49, %v6336_v59  ;;  %6356 = vst.msk [vmem:[#allocation3 + $0x438] sm:$0xff] %vm1352_vm2, %v6336_v59  ;;  %6737 = vrot.lane.b32.xlu1 %v13216_v19, %s14314_s5  ;;  %v9276_v43 = vpack.c.bf16 %v7632_v44, %v7630_v41  ;;  %vm14433_vm14 = vcmask 891904  }
 0x741   :  { %6739 = vrot.lane.b32.xlu0 %v13225_v60, %s14314_s5  ;;  %v9282_v31 = vpack.c.bf16 %v6340_v20, %v6339_v17 }
 0x742   :  { %v6374_v62 = vpop.permute.xlu1 %6373  ;;  %9277 = vmatprep.subr.bf16.mxu1 %v9276_v43  ;;  %7973 = vmatmul.mubr.f32.gmra.mrb[26].mxu1 %v9710_v26 }
 0x743   :  { %v6376_v5 = vpop.permute.xlu0 %6375  ;;  %9279 = vmatpush1.bf16.msra.mxu1 %v9278_v1  ;;  %7978 = vmatprep.mubr.f32.mxu1 %v9711_v45  ;;  %v7634_v50 = vld [vmem:[#allocation3 + $0x428] sm:$0xff] }
 0x744   :  { %v6389_v12 = vsel %vm14425_vm1, %v6374_v62, %v6376_v5  ;;  %6402 = vst.msk [vmem:[#allocation3 + $0x448] sm:$0xff] %vm1352_vm2, %v6376_v5  ;;  %6741 = vrot.lane.b32.xlu1 %v13232_v2, %s14314_s5  ;;  %vm14434_vm1 = vmmov %vm14433_vm14 }
 0x745   :  { %6401 = vst [vmem:[#allocation3 + $0x440] sm:$0xff] %v6389_v12  ;;  %6743 = vrot.lane.b32.xlu0 %v13241_v37, %s14314_s5 }
 0x746   :  { %v6378_v22 = vpop.permute.xlu1 %6377  ;;  %7979 = vmatmul.mubr.f32.gmra.mrb[28].mxu1 %v9712_v6 }
 0x747   :  { %v6380_v35 = vpop.permute.xlu0 %6379  ;;  %v7636_v46 = vld [vmem:[#allocation3 + $0x438] sm:$0xff]  ;;  %7984 = vmatprep.mubr.f32.mxu1 %v9713_v8 }
 0x748   :  { %v6390_v47 = vsel %vm14426_vm12, %v6378_v22, %v6380_v35  ;;  %6404 = vst.msk [vmem:[#allocation3 + $0x458] sm:$0xff] %vm1352_vm2, %v6380_v35  ;;  %6745 = vrot.lane.b32.xlu1 %v13248_v55, %s14314_s5  ;;  %v9280_v58 = vpack.c.bf16 %v7636_v46, %v7634_v50  ;;  %vm14435_vm12 = vmmov %vm14434_vm1 }
 0x749   :  { %6747 = vrot.lane.b32.xlu0 %v13257_v9, %s14314_s5  ;;  %v9286_v61 = vpack.c.bf16 %v6390_v47, %v6389_v12 }
 0x74a   :  { %v6382_v21 = vpop.permute.xlu1 %6381  ;;  %9281 = vmatprep.subr.bf16.mxu1 %v9280_v58  ;;  %7985 = vmatmul.mubr.f32.gmra.mrb[30].mxu1 %v9714_v14 }
 0x74b   :  { %v6384_v28 = vpop.permute.xlu0 %6383  ;;  %9283 = vmatpush1.bf16.msra.mxu1 %v9282_v31  ;;  %8055 = vmatprep.mubr.f32.mxu1 %v9715_v24  ;;  %v7638_v52 = vld [vmem:[#allocation3 + $0x448] sm:$0xff] }
 0x74c   :  { %v6391_v11 = vsel %vm14427_vm10, %v6382_v21, %v6384_v28  ;;  %6406 = vst.msk [vmem:[#allocation3 + $0x468] sm:$0xff] %vm1352_vm2, %v6384_v28  ;;  %6749 = vrot.lane.b32.xlu1 %v13203_v16, %s14314_s5  ;;  %vm14436_vm10 = vmmov %vm14434_vm1 }
 0x74d   :  { %6405 = vst [vmem:[#allocation3 + $0x460] sm:$0xff] %v6391_v11  ;;  %6751 = vrot.lane.b32.xlu0 %v13209_v34, %s14314_s5  ;;  %s14437_s5 = smov 101  }
 0x74e   :  { %v6386_v33 = vpop.permute.xlu1 %6385 }
 0x74f   :  { %v6388_v0 = vpop.permute.xlu0 %6387  ;;  %v7640_v48 = vld [vmem:[#allocation3 + $0x458] sm:$0xff] }
 0x750   :  { %v6392_v4 = vsel %vm14428_vm15, %v6386_v33, %v6388_v0  ;;  %6408 = vst.msk [vmem:[#allocation3 + $0x478] sm:$0xff] %vm1352_vm2, %v6388_v0  ;;  %6789 = vrot.lane.b32.xlu1 %v13216_v19, %s14315_s23  ;;  %v9284_v27 = vpack.c.bf16 %v7640_v48, %v7638_v52  ;;  %vm14438_vm15 = vcmask 883712  }
 0x751   :  { %6791 = vrot.lane.b32.xlu0 %v13225_v60, %s14315_s23  ;;  %v9290_v41 = vpack.c.bf16 %v6392_v4, %v6391_v11 }
 0x752   :  { %v6426_v7 = vpop.permute.xlu1 %6425  ;;  %9285 = vmatprep.subr.bf16.mxu1 %v9284_v27 }
 0x753   :  { %v6428_v53 = vpop.permute.xlu0 %6427  ;;  %9287 = vmatpush1.bf16.msra.mxu1 %v9286_v61  ;;  %v7642_v17 = vld [vmem:[#allocation3 + $0x468] sm:$0xff] }
 0x754   :  { %v6441_v25 = vsel %vm14429_vm6, %v6426_v7, %v6428_v53  ;;  %6454 = vst.msk [vmem:[#allocation3 + $0x488] sm:$0xff] %vm1352_vm2, %v6428_v53  ;;  %6793 = vrot.lane.b32.xlu1 %v13232_v2, %s14315_s23  ;;  %vm14439_vm6 = vmmov %vm14438_vm15 }
 0x755   :  { %6453 = vst [vmem:[#allocation3 + $0x480] sm:$0xff] %v6441_v25  ;;  %6795 = vrot.lane.b32.xlu0 %v13241_v37, %s14315_s23 }
 0x756   :  { %v6430_v15 = vpop.permute.xlu1 %6429 }
 0x757   :  { %v6432_v63 = vpop.permute.xlu0 %6431  ;;  %v7644_v49 = vld [vmem:[#allocation3 + $0x478] sm:$0xff] }
 0x758   :  { %v6442_v36 = vsel %vm14430_vm9, %v6430_v15, %v6432_v63  ;;  %6456 = vst.msk [vmem:[#allocation3 + $0x498] sm:$0xff] %vm1352_vm2, %v6432_v63  ;;  %6797 = vrot.lane.b32.xlu1 %v13248_v55, %s14315_s23  ;;  %v9288_v59 = vpack.c.bf16 %v7644_v49, %v7642_v17  ;;  %vm14440_vm9 = vmmov %vm14439_vm6 }
 0x759   :  { %6799 = vrot.lane.b32.xlu0 %v13257_v9, %s14315_s23  ;;  %v9294_v12 = vpack.c.bf16 %v6442_v36, %v6441_v25 }
 0x75a   :  { %v6434_v44 = vpop.permute.xlu1 %6433  ;;  %9289 = vmatprep.subr.bf16.mxu1 %v9288_v59 }
 0x75b   :  { %v6436_v39 = vpop.permute.xlu0 %6435  ;;  %9291 = vmatpush1.bf16.msra.mxu1 %v9290_v41  ;;  %v7646_v62 = vld [vmem:[#allocation3 + $0x488] sm:$0xff] }
 0x75c   :  { %v6443_v20 = vsel %vm14431_vm11, %v6434_v44, %v6436_v39  ;;  %6458 = vst.msk [vmem:[#allocation3 + $0x4a8] sm:$0xff] %vm1352_vm2, %v6436_v39  ;;  %6801 = vrot.lane.b32.xlu1 %v13203_v16, %s14315_s23  ;;  %vm14441_vm11 = vmmov %vm14439_vm6 }
 0x75d   :  { %6457 = vst [vmem:[#allocation3 + $0x4a0] sm:$0xff] %v6443_v20  ;;  %6803 = vrot.lane.b32.xlu0 %v13209_v34, %s14315_s23  ;;  %s14442_s23 = smov 100  }
 0x75e   :  { %v6438_v43 = vpop.permute.xlu1 %6437 }
 0x75f   :  { %v6440_v1 = vpop.permute.xlu0 %6439  ;;  %v7648_v26 = vld [vmem:[#allocation3 + $0x498] sm:$0xff] }
 0x760   :  { %v6444_v5 = vsel %vm14432_vm13, %v6438_v43, %v6440_v1  ;;  %6460 = vst.msk [vmem:[#allocation3 + $0x4b8] sm:$0xff] %vm1352_vm2, %v6440_v1  ;;  %6841 = vrot.lane.b32.xlu1 %v13216_v19, %s14316_s26  ;;  %v9292_v45 = vpack.c.bf16 %v7648_v26, %v7646_v62  ;;  %vm14443_vm13 = vcmask 875520  }
 0x761   :  { %6843 = vrot.lane.b32.xlu0 %v13225_v60, %s14316_s26  ;;  %v9298_v21 = vpack.c.bf16 %v6444_v5, %v6443_v20 }
 0x762   :  { %v6478_v22 = vpop.permute.xlu1 %6477  ;;  %9293 = vmatprep.subr.bf16.mxu1 %v9292_v45 }
 0x763   :  { %v6480_v6 = vpop.permute.xlu0 %6479  ;;  %9295 = vmatpush1.bf16.msra.mxu1 %v9294_v12  ;;  %v7650_v8 = vld [vmem:[#allocation3 + $0x4a8] sm:$0xff] }
 0x764   :  { %v6493_v35 = vsel %vm14433_vm14, %v6478_v22, %v6480_v6  ;;  %6506 = vst.msk [vmem:[#allocation3 + $0x4c8] sm:$0xff] %vm1352_vm2, %v6480_v6  ;;  %6845 = vrot.lane.b32.xlu1 %v13232_v2, %s14316_s26  ;;  %vm14444_vm14 = vmmov %vm14443_vm13 }
 0x765   :  { %6505 = vst [vmem:[#allocation3 + $0x4c0] sm:$0xff] %v6493_v35  ;;  %6847 = vrot.lane.b32.xlu0 %v13241_v37, %s14316_s26 }
 0x766   :  { %v6482_v50 = vpop.permute.xlu1 %6481 }
 0x767   :  { %v6484_v46 = vpop.permute.xlu0 %6483  ;;  %v7652_v47 = vld [vmem:[#allocation3 + $0x4b8] sm:$0xff] }
 0x768   :  { %v6494_v58 = vsel %vm14434_vm1, %v6482_v50, %v6484_v46  ;;  %6508 = vst.msk [vmem:[#allocation3 + $0x4d8] sm:$0xff] %vm1352_vm2, %v6484_v46  ;;  %6849 = vrot.lane.b32.xlu1 %v13248_v55, %s14316_s26  ;;  %v9296_v31 = vpack.c.bf16 %v7652_v47, %v7650_v8  ;;  %vm14445_vm1 = vmmov %vm14443_vm13 }
 0x769   :  { %6851 = vrot.lane.b32.xlu0 %v13257_v9, %s14316_s26  ;;  %v9302_v27 = vpack.c.bf16 %v6494_v58, %v6493_v35 }
 0x76a   :  { %v6486_v14 = vpop.permute.xlu1 %6485  ;;  %9297 = vmatprep.subr.bf16.mxu1 %v9296_v31 }
 0x76b   :  { %v6488_v28 = vpop.permute.xlu0 %6487  ;;  %9299 = vmatpush1.bf16.msra.mxu1 %v9298_v21  ;;  %v7654_v0 = vld [vmem:[#allocation3 + $0x4c8] sm:$0xff] }
 0x76c   :  { %v6495_v24 = vsel %vm14435_vm12, %v6486_v14, %v6488_v28  ;;  %6510 = vst.msk [vmem:[#allocation3 + $0x4e8] sm:$0xff] %vm1352_vm2, %v6488_v28  ;;  %6853 = vrot.lane.b32.xlu1 %v13203_v16, %s14316_s26  ;;  %vm14446_vm12 = vmmov %vm14445_vm1 }
 0x76d   :  { %6509 = vst [vmem:[#allocation3 + $0x4e0] sm:$0xff] %v6495_v24  ;;  %6855 = vrot.lane.b32.xlu0 %v13209_v34, %s14316_s26  ;;  %s14447_s26 = smov 99  }
 0x76e   :  { %v6490_v11 = vpop.permute.xlu1 %6489 }
 0x76f   :  { %v6492_v33 = vpop.permute.xlu0 %6491  ;;  %v7656_v52 = vld [vmem:[#allocation3 + $0x4d8] sm:$0xff] }
 0x770   :  { %v6496_v48 = vsel %vm14436_vm10, %v6490_v11, %v6492_v33  ;;  %6512 = vst.msk [vmem:[#allocation3 + $0x4f8] sm:$0xff] %vm1352_vm2, %v6492_v33  ;;  %6893 = vrot.lane.b32.xlu1 %v13216_v19, %s14437_s5  ;;  %v9300_v4 = vpack.c.bf16 %v7656_v52, %v7654_v0  ;;  %vm14448_vm10 = vcmask 867328  }
 0x771   :  { %6895 = vrot.lane.b32.xlu0 %v13225_v60, %s14437_s5  ;;  %v9306_v59 = vpack.c.bf16 %v6496_v48, %v6495_v24 }
 0x772   :  { %v6530_v61 = vpop.permute.xlu1 %6529  ;;  %9301 = vmatprep.subr.bf16.mxu1 %v9300_v4 }
 0x773   :  { %v6532_v7 = vpop.permute.xlu0 %6531  ;;  %9303 = vmatpush1.bf16.msra.mxu1 %v9302_v27  ;;  %v7658_v63 = vld [vmem:[#allocation3 + $0x4e8] sm:$0xff] }
 0x774   :  { %v6545_v53 = vsel %vm14438_vm15, %v6530_v61, %v6532_v7  ;;  %6558 = vst.msk [vmem:[#allocation3 + $0x508] sm:$0xff] %vm1352_vm2, %v6532_v7  ;;  %6897 = vrot.lane.b32.xlu1 %v13232_v2, %s14437_s5  ;;  %vm14449_vm15 = vmmov %vm14448_vm10 }
 0x775   :  { %6557 = vst [vmem:[#allocation3 + $0x500] sm:$0xff] %v6545_v53  ;;  %6899 = vrot.lane.b32.xlu0 %v13241_v37, %s14437_s5 }
 0x776   :  { %v6534_v25 = vpop.permute.xlu1 %6533 }
 0x777   :  { %v6536_v15 = vpop.permute.xlu0 %6535  ;;  %v7660_v17 = vld [vmem:[#allocation3 + $0x4f8] sm:$0xff] }
 0x778   :  { %v6546_v49 = vsel %vm14439_vm6, %v6534_v25, %v6536_v15  ;;  %6560 = vst.msk [vmem:[#allocation3 + $0x518] sm:$0xff] %vm1352_vm2, %v6536_v15  ;;  %6901 = vrot.lane.b32.xlu1 %v13248_v55, %s14437_s5  ;;  %v9304_v36 = vpack.c.bf16 %v7660_v17, %v7658_v63  ;;  %vm14450_vm6 = vmmov %vm14448_vm10 }
 0x779   :  { %6903 = vrot.lane.b32.xlu0 %v13257_v9, %s14437_s5  ;;  %v9310_v45 = vpack.c.bf16 %v6546_v49, %v6545_v53 }
 0x77a   :  { %v6538_v41 = vpop.permute.xlu1 %6537  ;;  %9305 = vmatprep.subr.bf16.mxu1 %v9304_v36 }
 0x77b   :  { %v6540_v44 = vpop.permute.xlu0 %6539  ;;  %9307 = vmatpush1.bf16.msra.mxu1 %v9306_v59  ;;  %v7662_v1 = vld [vmem:[#allocation3 + $0x508] sm:$0xff] }
 0x77c   :  { %v6547_v39 = vsel %vm14440_vm9, %v6538_v41, %v6540_v44  ;;  %6562 = vst.msk [vmem:[#allocation3 + $0x528] sm:$0xff] %vm1352_vm2, %v6540_v44  ;;  %6905 = vrot.lane.b32.xlu1 %v13203_v16, %s14437_s5  ;;  %vm14451_vm9 = vmmov %vm14450_vm6 }
 0x77d   :  { %6561 = vst [vmem:[#allocation3 + $0x520] sm:$0xff] %v6547_v39  ;;  %6907 = vrot.lane.b32.xlu0 %v13209_v34, %s14437_s5  ;;  %s14467_s5 = smov 95  }
 0x77e   :  { %v6542_v20 = vpop.permute.xlu1 %6541 }
 0x77f   :  { %v6544_v43 = vpop.permute.xlu0 %6543  ;;  %v7664_v62 = vld [vmem:[#allocation3 + $0x518] sm:$0xff] }
 0x780   :  { %v6548_v26 = vsel %vm14441_vm11, %v6542_v20, %v6544_v43  ;;  %6564 = vst.msk [vmem:[#allocation3 + $0x538] sm:$0xff] %vm1352_vm2, %v6544_v43  ;;  %6945 = vrot.lane.b32.xlu1 %v13216_v19, %s14442_s23  ;;  %v9308_v5 = vpack.c.bf16 %v7664_v62, %v7662_v1  ;;  %vm14453_vm11 = vcmask 859136  }
 0x781   :  { %6947 = vrot.lane.b32.xlu0 %v13225_v60, %s14442_s23  ;;  %v9314_v31 = vpack.c.bf16 %v6548_v26, %v6547_v39 }
 0x782   :  { %v6582_v12 = vpop.permute.xlu1 %6581  ;;  %9309 = vmatprep.subr.bf16.mxu1 %v9308_v5 }
 0x783   :  { %v6584_v22 = vpop.permute.xlu0 %6583  ;;  %9311 = vmatpush1.bf16.msra.mxu1 %v9310_v45  ;;  %v7666_v46 = vld [vmem:[#allocation3 + $0x528] sm:$0xff] }
 0x784   :  { %v6597_v6 = vsel %vm14443_vm13, %v6582_v12, %v6584_v22  ;;  %6610 = vst.msk [vmem:[#allocation3 + $0x548] sm:$0xff] %vm1352_vm2, %v6584_v22  ;;  %6949 = vrot.lane.b32.xlu1 %v13232_v2, %s14442_s23  ;;  %vm14454_vm13 = vmmov %vm14453_vm11 }
 0x785   :  { %6609 = vst [vmem:[#allocation3 + $0x540] sm:$0xff] %v6597_v6  ;;  %6951 = vrot.lane.b32.xlu0 %v13241_v37, %s14442_s23 }
 0x786   :  { %v6586_v35 = vpop.permute.xlu1 %6585 }
 0x787   :  { %v6588_v50 = vpop.permute.xlu0 %6587  ;;  %v7668_v8 = vld [vmem:[#allocation3 + $0x538] sm:$0xff] }
 0x788   :  { %v6598_v47 = vsel %vm14444_vm14, %v6586_v35, %v6588_v50  ;;  %6612 = vst.msk [vmem:[#allocation3 + $0x558] sm:$0xff] %vm1352_vm2, %v6588_v50  ;;  %6953 = vrot.lane.b32.xlu1 %v13248_v55, %s14442_s23  ;;  %v9312_v58 = vpack.c.bf16 %v7668_v8, %v7666_v46  ;;  %vm14455_vm14 = vmmov %vm14453_vm11 }
 0x789   :  { %6955 = vrot.lane.b32.xlu0 %v13257_v9, %s14442_s23  ;;  %v9318_v4 = vpack.c.bf16 %v6598_v47, %v6597_v6 }
 0x78a   :  { %v6590_v21 = vpop.permute.xlu1 %6589  ;;  %9313 = vmatprep.subr.bf16.mxu1 %v9312_v58 }
 0x78b   :  { %v6592_v14 = vpop.permute.xlu0 %6591  ;;  %9315 = vmatpush1.bf16.msra.mxu1 %v9314_v31  ;;  %v7670_v33 = vld [vmem:[#allocation3 + $0x548] sm:$0xff] }
 0x78c   :  { %v6599_v28 = vsel %vm14445_vm1, %v6590_v21, %v6592_v14  ;;  %6614 = vst.msk [vmem:[#allocation3 + $0x568] sm:$0xff] %vm1352_vm2, %v6592_v14  ;;  %6957 = vrot.lane.b32.xlu1 %v13203_v16, %s14442_s23  ;;  %vm14456_vm1 = vmmov %vm14453_vm11 }
 0x78d   :  { %6613 = vst [vmem:[#allocation3 + $0x560] sm:$0xff] %v6599_v28  ;;  %6959 = vrot.lane.b32.xlu0 %v13209_v34, %s14442_s23  ;;  %s14472_s23 = smov 94  }
 0x78e   :  { %v6594_v24 = vpop.permute.xlu1 %6593 }
 0x78f   :  { %v6596_v11 = vpop.permute.xlu0 %6595  ;;  %v7672_v0 = vld [vmem:[#allocation3 + $0x558] sm:$0xff] }
 0x790   :  { %v6600_v52 = vsel %vm14446_vm12, %v6594_v24, %v6596_v11  ;;  %6616 = vst.msk [vmem:[#allocation3 + $0x578] sm:$0xff] %vm1352_vm2, %v6596_v11  ;;  %6997 = vrot.lane.b32.xlu1 %v13216_v19, %s14447_s26  ;;  %v9316_v48 = vpack.c.bf16 %v7672_v0, %v7670_v33  ;;  %vm14458_vm12 = vcmask 850944  }
 0x791   :  { %6999 = vrot.lane.b32.xlu0 %v13225_v60, %s14447_s26  ;;  %v9322_v36 = vpack.c.bf16 %v6600_v52, %v6599_v28 }
 0x792   :  { %v6634_v27 = vpop.permute.xlu1 %6633  ;;  %9317 = vmatprep.subr.bf16.mxu1 %v9316_v48 }
 0x793   :  { %v6636_v61 = vpop.permute.xlu0 %6635  ;;  %9319 = vmatpush1.bf16.msra.mxu1 %v9318_v4  ;;  %v7674_v15 = vld [vmem:[#allocation3 + $0x568] sm:$0xff] }
 0x794   :  { %v6649_v7 = vsel %vm14448_vm10, %v6634_v27, %v6636_v61  ;;  %6662 = vst.msk [vmem:[#allocation3 + $0x588] sm:$0xff] %vm1352_vm2, %v6636_v61  ;;  %7001 = vrot.lane.b32.xlu1 %v13232_v2, %s14447_s26  ;;  %vm14459_vm10 = vmmov %vm14458_vm12 }
 0x795   :  { %6661 = vst [vmem:[#allocation3 + $0x580] sm:$0xff] %v6649_v7  ;;  %7003 = vrot.lane.b32.xlu0 %v13241_v37, %s14447_s26 }
 0x796   :  { %v6638_v53 = vpop.permute.xlu1 %6637 }
 0x797   :  { %v6640_v25 = vpop.permute.xlu0 %6639  ;;  %v7676_v63 = vld [vmem:[#allocation3 + $0x578] sm:$0xff] }
 0x798   :  { %v6650_v17 = vsel %vm14449_vm15, %v6638_v53, %v6640_v25  ;;  %6664 = vst.msk [vmem:[#allocation3 + $0x598] sm:$0xff] %vm1352_vm2, %v6640_v25  ;;  %7005 = vrot.lane.b32.xlu1 %v13248_v55, %s14447_s26  ;;  %v9320_v49 = vpack.c.bf16 %v7676_v63, %v7674_v15  ;;  %vm14460_vm15 = vmmov %vm14459_vm10 }
 0x799   :  { %7007 = vrot.lane.b32.xlu0 %v13257_v9, %s14447_s26  ;;  %v9326_v5 = vpack.c.bf16 %v6650_v17, %v6649_v7 }
 0x79a   :  { %v6642_v59 = vpop.permute.xlu1 %6641  ;;  %9321 = vmatprep.subr.bf16.mxu1 %v9320_v49 }
 0x79b   :  { %v6644_v41 = vpop.permute.xlu0 %6643  ;;  %9323 = vmatpush1.bf16.msra.mxu1 %v9322_v36  ;;  %v7678_v43 = vld [vmem:[#allocation3 + $0x588] sm:$0xff] }
 0x79c   :  { %v6651_v44 = vsel %vm14450_vm6, %v6642_v59, %v6644_v41  ;;  %6666 = vst.msk [vmem:[#allocation3 + $0x5a8] sm:$0xff] %vm1352_vm2, %v6644_v41  ;;  %7009 = vrot.lane.b32.xlu1 %v13203_v16, %s14447_s26  ;;  %vm14461_vm6 = vmmov %vm14459_vm10 }
 0x79d   :  { %6665 = vst [vmem:[#allocation3 + $0x5a0] sm:$0xff] %v6651_v44  ;;  %7011 = vrot.lane.b32.xlu0 %v13209_v34, %s14447_s26  ;;  %s14477_s26 = smov 93  }
 0x79e   :  { %v6646_v39 = vpop.permute.xlu1 %6645 }
 0x79f   :  { %v6648_v20 = vpop.permute.xlu0 %6647  ;;  %v7680_v1 = vld [vmem:[#allocation3 + $0x598] sm:$0xff] }
 0x7a0   :  { %v6652_v62 = vsel %vm14451_vm9, %v6646_v39, %v6648_v20  ;;  %6668 = vst.msk [vmem:[#allocation3 + $0x5b8] sm:$0xff] %vm1352_vm2, %v6648_v20  ;;  %7049 = vrot.lane.b32.xlu1 %v13216_v19, %s14452_s7  ;;  %v9324_v26 = vpack.c.bf16 %v7680_v1, %v7678_v43  ;;  %v9716_v39 = vld [vmem:[%s14178_s10 + $0x20] sm:$0xff]  ;;  %vm14463_vm9 = vcmask 842752  }
 0x7a1   :  { %7051 = vrot.lane.b32.xlu0 %v13225_v60, %s14452_s7  ;;  %v9330_v58 = vpack.c.bf16 %v6652_v62, %v6651_v44  ;;  %v9717_v62 = vld [vmem:[%s14178_s10 + $0x78] sm:$0xff] }
 0x7a2   :  { %v6686_v45 = vpop.permute.xlu1 %6685  ;;  %9325 = vmatprep.subr.bf16.mxu1 %v9324_v26 }
 0x7a3   :  { %v6688_v12 = vpop.permute.xlu0 %6687  ;;  %9327 = vmatpush1.bf16.msra.mxu1 %v9326_v5  ;;  %v7682_v50 = vld [vmem:[#allocation3 + $0x5a8] sm:$0xff] }
 0x7a4   :  { %v6701_v22 = vsel %vm14453_vm11, %v6686_v45, %v6688_v12  ;;  %6714 = vst.msk [vmem:[#allocation3 + $0x5c8] sm:$0xff] %vm1352_vm2, %v6688_v12  ;;  %7053 = vrot.lane.b32.xlu1 %v13232_v2, %s14452_s7  ;;  %vm14464_vm11 = vmmov %vm14463_vm9 }
 0x7a5   :  { %6713 = vst [vmem:[#allocation3 + $0x5c0] sm:$0xff] %v6701_v22  ;;  %7055 = vrot.lane.b32.xlu0 %v13241_v37, %s14452_s7 }
 0x7a6   :  { %v6690_v6 = vpop.permute.xlu1 %6689 }
 0x7a7   :  { %v6692_v35 = vpop.permute.xlu0 %6691  ;;  %v7684_v46 = vld [vmem:[#allocation3 + $0x5b8] sm:$0xff] }
 0x7a8   :  { %v6702_v8 = vsel %vm14454_vm13, %v6690_v6, %v6692_v35  ;;  %6716 = vst.msk [vmem:[#allocation3 + $0x5d8] sm:$0xff] %vm1352_vm2, %v6692_v35  ;;  %7057 = vrot.lane.b32.xlu1 %v13248_v55, %s14452_s7  ;;  %v9328_v47 = vpack.c.bf16 %v7684_v46, %v7682_v50  ;;  %v9719_v35 = vld [vmem:[%s14178_s10 + $0xc8] sm:$0xff]  ;;  %vm14465_vm13 = vmmov %vm14463_vm9 }
 0x7a9   :  { %7059 = vrot.lane.b32.xlu0 %v13257_v9, %s14452_s7  ;;  %v9334_v48 = vpack.c.bf16 %v6702_v8, %v6701_v22  ;;  %v9718_v22 = vld [vmem:[%s14178_s10 + $0x70] sm:$0xff]  ;;  %v9720_v8 = vld [vmem:[%s14178_s10 + $0xc0] sm:$0xff] }
 0x7aa   :  { %v6694_v31 = vpop.permute.xlu1 %6693  ;;  %9329 = vmatprep.subr.bf16.mxu1 %v9328_v47 }
 0x7ab   :  { %v6696_v21 = vpop.permute.xlu0 %6695  ;;  %9331 = vmatpush1.bf16.msra.mxu1 %v9330_v58  ;;  %v7686_v11 = vld [vmem:[#allocation3 + $0x5c8] sm:$0xff] }
 0x7ac   :  { %v6703_v14 = vsel %vm14455_vm14, %v6694_v31, %v6696_v21  ;;  %6718 = vst.msk [vmem:[#allocation3 + $0x5e8] sm:$0xff] %vm1352_vm2, %v6696_v21  ;;  %7061 = vrot.lane.b32.xlu1 %v13203_v16, %s14452_s7  ;;  %v9721_v21 = vld [vmem:[%s14178_s10 + $0x118] sm:$0xff]  ;;  %vm14466_vm14 = vmmov %vm14463_vm9 }
 0x7ad   :  { %6717 = vst [vmem:[#allocation3 + $0x5e0] sm:$0xff] %v6703_v14  ;;  %7063 = vrot.lane.b32.xlu0 %v13209_v34, %s14452_s7  ;;  %s14482_s7 = smov 92  }
 0x7ae   :  { %v6698_v28 = vpop.permute.xlu1 %6697 }
 0x7af   :  { %v6700_v24 = vpop.permute.xlu0 %6699  ;;  %v7688_v33 = vld [vmem:[#allocation3 + $0x5d8] sm:$0xff] }
 0x7b0   :  { %v6704_v0 = vsel %vm14456_vm1, %v6698_v28, %v6700_v24  ;;  %6720 = vst.msk [vmem:[#allocation3 + $0x5f8] sm:$0xff] %vm1352_vm2, %v6700_v24  ;;  %7101 = vrot.lane.b32.xlu1 %v13216_v19, %s14457_s8  ;;  %v9332_v52 = vpack.c.bf16 %v7688_v33, %v7686_v11  ;;  %v9722_v33 = vld [vmem:[%s14178_s10 + $0x110] sm:$0xff]  ;;  %vm14468_vm1 = vcmask 834560  }
 0x7b1   :  { %7103 = vrot.lane.b32.xlu0 %v13225_v60, %s14457_s8  ;;  %v9338_v49 = vpack.c.bf16 %v6704_v0, %v6703_v14 }
 0x7b2   :  { %v6738_v4 = vpop.permute.xlu1 %6737  ;;  %9333 = vmatprep.subr.bf16.mxu1 %v9332_v52  ;;  %v9723_v52 = vld [vmem:[%s14178_s10 + $0x38] sm:$0xff] }
 0x7b3   :  { %v6740_v27 = vpop.permute.xlu0 %6739  ;;  %9335 = vmatpush1.bf16.msra.mxu1 %v9334_v48  ;;  %v7690_v25 = vld [vmem:[#allocation3 + $0x5e8] sm:$0xff] }
 0x7b4   :  { %v6753_v61 = vsel %vm14458_vm12, %v6738_v4, %v6740_v27  ;;  %6766 = vst.msk [vmem:[#allocation3 + $0x608] sm:$0xff] %vm1352_vm2, %v6740_v27  ;;  %7105 = vrot.lane.b32.xlu1 %v13232_v2, %s14457_s8  ;;  %vm14469_vm12 = vmmov %vm14468_vm1 }
 0x7b5   :  { %6765 = vst [vmem:[#allocation3 + $0x600] sm:$0xff] %v6753_v61  ;;  %7107 = vrot.lane.b32.xlu0 %v13241_v37, %s14457_s8 }
 0x7b6   :  { %v6742_v7 = vpop.permute.xlu1 %6741 }
 0x7b7   :  { %v6744_v53 = vpop.permute.xlu0 %6743  ;;  %v7692_v15 = vld [vmem:[#allocation3 + $0x5f8] sm:$0xff] }
 0x7b8   :  { %v6754_v63 = vsel %vm14459_vm10, %v6742_v7, %v6744_v53  ;;  %6768 = vst.msk [vmem:[#allocation3 + $0x618] sm:$0xff] %vm1352_vm2, %v6744_v53  ;;  %7109 = vrot.lane.b32.xlu1 %v13248_v55, %s14457_s8  ;;  %v9336_v17 = vpack.c.bf16 %v7692_v15, %v7690_v25  ;;  %vm14470_vm10 = vmmov %vm14468_vm1 }
 0x7b9   :  { %7111 = vrot.lane.b32.xlu0 %v13257_v9, %s14457_s8  ;;  %v9342_v45 = vpack.c.bf16 %v6754_v63, %v6753_v61 }
 0x7ba   :  { %v6746_v36 = vpop.permute.xlu1 %6745  ;;  %9337 = vmatprep.subr.bf16.mxu1 %v9336_v17 }
 0x7bb   :  { %v6748_v59 = vpop.permute.xlu0 %6747  ;;  %9339 = vmatpush1.bf16.msra.mxu1 %v9338_v49  ;;  %v7694_v43 = vld [vmem:[#allocation3 + $0x608] sm:$0xff] }
 0x7bc   :  { %v6755_v41 = vsel %vm14460_vm15, %v6746_v36, %v6748_v59  ;;  %6770 = vst.msk [vmem:[#allocation3 + $0x628] sm:$0xff] %vm1352_vm2, %v6748_v59  ;;  %7113 = vrot.lane.b32.xlu1 %v13203_v16, %s14457_s8  ;;  %vm14471_vm15 = vmmov %vm14468_vm1 }
 0x7bd   :  { %6769 = vst [vmem:[#allocation3 + $0x620] sm:$0xff] %v6755_v41  ;;  %7115 = vrot.lane.b32.xlu0 %v13209_v34, %s14457_s8  ;;  %s14487_s8 = smov 91  }
 0x7be   :  { %v6750_v44 = vpop.permute.xlu1 %6749  ;;  %8056 = vmatmul.mubr.f32.vlgmr.msra.gmra.mrb[24].mxu1 %v9716_v39 }
 0x7bf   :  { %v6752_v20 = vpop.permute.xlu0 %6751  ;;  %v7696_v1 = vld [vmem:[#allocation3 + $0x618] sm:$0xff]  ;;  %8061 = vmatprep.mubr.f32.mxu1 %v9717_v62 }
 0x7c0   :  { %v6756_v26 = vsel %vm14461_vm6, %v6750_v44, %v6752_v20  ;;  %6772 = vst.msk [vmem:[#allocation3 + $0x638] sm:$0xff] %vm1352_vm2, %v6752_v20  ;;  %7153 = vrot.lane.b32.xlu1 %v13216_v19, %s14462_s25  ;;  %v9340_v5 = vpack.c.bf16 %v7696_v1, %v7694_v43  ;;  %v13513_v20 = vld [vmem:[#allocation2 + $0x38] sm:$0xff]  ;;  %v13517_v43 = vld [vmem:[#allocation2] sm:$0xff]  ;;  %vm14473_vm6 = vcmask 826368  }
 0x7c1   :  { %7155 = vrot.lane.b32.xlu0 %v13225_v60, %s14462_s25  ;;  %v9346_v24 = vpack.c.bf16 %v6756_v26, %v6755_v41 }
 0x7c2   :  { %v6790_v12 = vpop.permute.xlu1 %6789  ;;  %9341 = vmatprep.subr.bf16.mxu1 %v9340_v5  ;;  %8062 = vmatmul.mubr.f32.gmra.mrb[26].mxu1 %v9718_v22  ;;  %v13523_v5 = vld [vmem:[#allocation2 + $0x8] sm:$0xff] }
 0x7c3   :  { %v6792_v6 = vpop.permute.xlu0 %6791  ;;  %9343 = vmatpush1.bf16.msra.mxu1 %v9342_v45  ;;  %8067 = vmatprep.mubr.f32.mxu1 %v9719_v35  ;;  %v7698_v58 = vld [vmem:[#allocation3 + $0x628] sm:$0xff]  ;;  %v13527_v35 = vld [vmem:[#allocation2 + $0x10] sm:$0xff] }
 0x7c4   :  { %v6805_v50 = vsel %vm14463_vm9, %v6790_v12, %v6792_v6  ;;  %6818 = vst.msk [vmem:[#allocation3 + $0x648] sm:$0xff] %vm1352_vm2, %v6792_v6  ;;  %7157 = vrot.lane.b32.xlu1 %v13232_v2, %s14462_s25  ;;  %vm14474_vm9 = vmmov %vm14473_vm6 }
 0x7c5   :  { %6817 = vst [vmem:[#allocation3 + $0x640] sm:$0xff] %v6805_v50  ;;  %7159 = vrot.lane.b32.xlu0 %v13241_v37, %s14462_s25 }
 0x7c6   :  { %v6794_v46 = vpop.permute.xlu1 %6793  ;;  %8068 = vmatmul.mubr.f32.gmra.mrb[28].mxu1 %v9720_v8 }
 0x7c7   :  { %v6796_v47 = vpop.permute.xlu0 %6795  ;;  %v7700_v31 = vld [vmem:[#allocation3 + $0x638] sm:$0xff]  ;;  %8073 = vmatprep.mubr.f32.mxu1 %v9721_v21 }
 0x7c8   :  { %v6806_v14 = vsel %vm14464_vm11, %v6794_v46, %v6796_v47  ;;  %6820 = vst.msk [vmem:[#allocation3 + $0x658] sm:$0xff] %vm1352_vm2, %v6796_v47  ;;  %7161 = vrot.lane.b32.xlu1 %v13248_v55, %s14462_s25  ;;  %v9344_v28 = vpack.c.bf16 %v7700_v31, %v7698_v58  ;;  %v13533_v46 = vld [vmem:[#allocation2 + $0x18] sm:$0xff]  ;;  %v13537_v58 = vld [vmem:[#allocation2 + $0x20] sm:$0xff]  ;;  %vm14475_vm11 = vmmov %vm14473_vm6 }
 0x7c9   :  { %7163 = vrot.lane.b32.xlu0 %v13257_v9, %s14462_s25 }
 0x7ca   :  { %v6798_v11 = vpop.permute.xlu1 %6797  ;;  %9345 = vmatprep.subr.bf16.mxu1 %v9344_v28  ;;  %8074 = vmatmul.mubr.f32.gmra.mrb[30].mxu1 %v9722_v33  ;;  %v13543_v28 = vld [vmem:[#allocation2 + $0x28] sm:$0xff] }
 0x7cb   :  { %v6800_v0 = vpop.permute.xlu0 %6799  ;;  %9347 = vmatpush1.bf16.msra.mxu1 %v9346_v24  ;;  %8144 = vmatprep.mubr.f32.mxu1 %v9723_v52  ;;  %v7702_v61 = vld [vmem:[#allocation3 + $0x648] sm:$0xff] }
 0x7cc   :  { %v6807_v48 = vsel %vm14465_vm13, %v6798_v11, %v6800_v0  ;;  %6822 = vst.msk [vmem:[#allocation3 + $0x668] sm:$0xff] %vm1352_vm2, %v6800_v0  ;;  %7165 = vrot.lane.b32.xlu1 %v13203_v16, %s14462_s25  ;;  %v9350_v16 = vpack.c.bf16 %v6806_v14, %v6805_v50  ;;  %vm14476_vm13 = vmmov %vm14473_vm6 }
 0x7cd   :  { %6821 = vst [vmem:[#allocation3 + $0x660] sm:$0xff] %v6807_v48  ;;  %7167 = vrot.lane.b32.xlu0 %v13209_v34, %s14462_s25 }
 0x7ce   :  { %v6802_v4 = vpop.permute.xlu1 %6801 }
 0x7cf   :  { %v6804_v27 = vpop.permute.xlu0 %6803  ;;  %v7704_v7 = vld [vmem:[#allocation3 + $0x658] sm:$0xff] }
 0x7d0   :  { %v6808_v53 = vsel %vm14466_vm14, %v6802_v4, %v6804_v27  ;;  %6824 = vst.msk [vmem:[#allocation3 + $0x678] sm:$0xff] %vm1352_vm2, %v6804_v27  ;;  %7205 = vrot.lane.b32.xlu1 %v13216_v19, %s14467_s5  ;;  %v9348_v25 = vpack.c.bf16 %v7704_v7, %v7702_v61  ;;  %vm14478_vm14 = vcmask 818176  }
 0x7d1   :  { %7207 = vrot.lane.b32.xlu0 %v13225_v60, %s14467_s5 }
 0x7d2   :  { %v6842_v15 = vpop.permute.xlu1 %6841  ;;  %9349 = vmatprep.subr.bf16.mxu1 %v9348_v25 }
 0x7d3   :  { %v6844_v63 = vpop.permute.xlu0 %6843  ;;  %9351 = vmatpush1.bf16.msra.mxu1 %v9350_v16  ;;  %v7706_v49 = vld [vmem:[#allocation3 + $0x668] sm:$0xff] }
 0x7d4   :  { %v6857_v34 = vsel %vm14468_vm1, %v6842_v15, %v6844_v63  ;;  %6870 = vst.msk [vmem:[#allocation3 + $0x688] sm:$0xff] %vm1352_vm2, %v6844_v63  ;;  %7209 = vrot.lane.b32.xlu1 %v13232_v2, %s14467_s5  ;;  %v9354_v2 = vpack.c.bf16 %v6808_v53, %v6807_v48  ;;  %vm14479_vm1 = vmmov %vm14478_vm14 }
 0x7d5   :  { %6869 = vst [vmem:[#allocation3 + $0x680] sm:$0xff] %v6857_v34  ;;  %7211 = vrot.lane.b32.xlu0 %v13241_v37, %s14467_s5  ;;  %v13507_v37 = vld [vmem:[#allocation2 + $0x30] sm:$0xff] }
 0x7d6   :  { %v6846_v19 = vpop.permute.xlu1 %6845 }
 0x7d7   :  { %v6848_v17 = vpop.permute.xlu0 %6847  ;;  %v7708_v60 = vld [vmem:[#allocation3 + $0x678] sm:$0xff] }
 0x7d8   :  { %v6858_v36 = vsel %vm14469_vm12, %v6846_v19, %v6848_v17  ;;  %6872 = vst.msk [vmem:[#allocation3 + $0x698] sm:$0xff] %vm1352_vm2, %v6848_v17  ;;  %7213 = vrot.lane.b32.xlu1 %v13248_v55, %s14467_s5  ;;  %v9352_v59 = vpack.c.bf16 %v7708_v60, %v7706_v49  ;;  %vm14480_vm12 = vmmov %vm14479_vm1 }
 0x7d9   :  { %7215 = vrot.lane.b32.xlu0 %v13257_v9, %s14467_s5  ;;  %v9358_v12 = vpack.c.bf16 %v6858_v36, %v6857_v34 }
 0x7da   :  { %v6850_v41 = vpop.permute.xlu1 %6849  ;;  %9353 = vmatprep.subr.bf16.mxu1 %v9352_v59 }
 0x7db   :  { %v6852_v44 = vpop.permute.xlu0 %6851  ;;  %9355 = vmatpush1.bf16.msra.mxu1 %v9354_v2  ;;  %v7710_v1 = vld [vmem:[#allocation3 + $0x688] sm:$0xff] }
 0x7dc   :  { %v6859_v39 = vsel %vm14470_vm10, %v6850_v41, %v6852_v44  ;;  %6874 = vst.msk [vmem:[#allocation3 + $0x6a8] sm:$0xff] %vm1352_vm2, %v6852_v44  ;;  %7217 = vrot.lane.b32.xlu1 %v13507_v37, %s14467_s5  ;;  %vm14481_vm10 = vmmov %vm14479_vm1 }
 0x7dd   :  { %6873 = vst [vmem:[#allocation3 + $0x6a0] sm:$0xff] %v6859_v39  ;;  %7219 = vrot.lane.b32.xlu0 %v13513_v20, %s14467_s5 }
 0x7de   :  { %v6854_v55 = vpop.permute.xlu1 %6853 }
 0x7df   :  { %v6856_v9 = vpop.permute.xlu0 %6855  ;;  %v7712_v62 = vld [vmem:[#allocation3 + $0x698] sm:$0xff] }
 0x7e0   :  { %v6860_v26 = vsel %vm14471_vm15, %v6854_v55, %v6856_v9  ;;  %6876 = vst.msk [vmem:[#allocation3 + $0x6b8] sm:$0xff] %vm1352_vm2, %v6856_v9  ;;  %7257 = vrot.lane.b32.xlu1 %v13517_v43, %s14472_s23  ;;  %v9356_v45 = vpack.c.bf16 %v7712_v62, %v7710_v1  ;;  %vm14483_vm15 = vcmask 809984  }
 0x7e1   :  { %7259 = vrot.lane.b32.xlu0 %v13523_v5, %s14472_s23  ;;  %v9362_v11 = vpack.c.bf16 %v6860_v26, %v6859_v39 }
 0x7e2   :  { %v6894_v22 = vpop.permute.xlu1 %6893  ;;  %9357 = vmatprep.subr.bf16.mxu1 %v9356_v45 }
 0x7e3   :  { %v6896_v6 = vpop.permute.xlu0 %6895  ;;  %9359 = vmatpush1.bf16.msra.mxu1 %v9358_v12  ;;  %v7714_v31 = vld [vmem:[#allocation3 + $0x6a8] sm:$0xff] }
 0x7e4   :  { %v6909_v50 = vsel %vm14473_vm6, %v6894_v22, %v6896_v6  ;;  %6922 = vst.msk [vmem:[#allocation3 + $0x6c8] sm:$0xff] %vm1352_vm2, %v6896_v6  ;;  %7261 = vrot.lane.b32.xlu1 %v13527_v35, %s14472_s23  ;;  %vm14484_vm6 = vmmov %vm14483_vm15 }
 0x7e5   :  { %6921 = vst [vmem:[#allocation3 + $0x6c0] sm:$0xff] %v6909_v50  ;;  %7263 = vrot.lane.b32.xlu0 %v13533_v46, %s14472_s23 }
 0x7e6   :  { %v6898_v8 = vpop.permute.xlu1 %6897 }
 0x7e7   :  { %v6900_v47 = vpop.permute.xlu0 %6899  ;;  %v7716_v21 = vld [vmem:[#allocation3 + $0x6b8] sm:$0xff] }
 0x7e8   :  { %v6910_v14 = vsel %vm14474_vm9, %v6898_v8, %v6900_v47  ;;  %6924 = vst.msk [vmem:[#allocation3 + $0x6d8] sm:$0xff] %vm1352_vm2, %v6900_v47  ;;  %7265 = vrot.lane.b32.xlu1 %v13537_v58, %s14472_s23  ;;  %v9360_v24 = vpack.c.bf16 %v7716_v21, %v7714_v31  ;;  %vm14485_vm9 = vmmov %vm14484_vm6 }
 0x7e9   :  { %7267 = vrot.lane.b32.xlu0 %v13543_v28, %s14472_s23  ;;  %v9366_v25 = vpack.c.bf16 %v6910_v14, %v6909_v50 }
 0x7ea   :  { %v6902_v33 = vpop.permute.xlu1 %6901  ;;  %9361 = vmatprep.subr.bf16.mxu1 %v9360_v24 }
 0x7eb   :  { %v6904_v0 = vpop.permute.xlu0 %6903  ;;  %9363 = vmatpush1.bf16.msra.mxu1 %v9362_v11  ;;  %v7718_v27 = vld [vmem:[#allocation3 + $0x6c8] sm:$0xff] }
 0x7ec   :  { %v6911_v52 = vsel %vm14475_vm11, %v6902_v33, %v6904_v0  ;;  %6926 = vst.msk [vmem:[#allocation3 + $0x6e8] sm:$0xff] %vm1352_vm2, %v6904_v0  ;;  %7269 = vrot.lane.b32.xlu1 %v13507_v37, %s14472_s23  ;;  %vm14486_vm11 = vmmov %vm14484_vm6 }
 0x7ed   :  { %6925 = vst [vmem:[#allocation3 + $0x6e0] sm:$0xff] %v6911_v52  ;;  %7271 = vrot.lane.b32.xlu0 %v13513_v20, %s14472_s23 }
 0x7ee   :  { %v6906_v48 = vpop.permute.xlu1 %6905 }
 0x7ef   :  { %v6908_v4 = vpop.permute.xlu0 %6907  ;;  %v7720_v61 = vld [vmem:[#allocation3 + $0x6d8] sm:$0xff] }
 0x7f0   :  { %v6912_v7 = vsel %vm14476_vm13, %v6906_v48, %v6908_v4  ;;  %6928 = vst.msk [vmem:[#allocation3 + $0x6f8] sm:$0xff] %vm1352_vm2, %v6908_v4  ;;  %7309 = vrot.lane.b32.xlu1 %v13517_v43, %s14477_s26  ;;  %v9364_v53 = vpack.c.bf16 %v7720_v61, %v7718_v27  ;;  %v4162_v48 = vmul.f32 %v12731_v51, %v13031_v29  ;;  %vm14488_vm13 = vcmask 801792  }
 0x7f1   :  { %7311 = vrot.lane.b32.xlu0 %v13523_v5, %s14477_s26  ;;  %v9370_v59 = vpack.c.bf16 %v6912_v7, %v6911_v52 }
 0x7f2   :  { %v6946_v16 = vpop.permute.xlu1 %6945  ;;  %9365 = vmatprep.subr.bf16.mxu1 %v9364_v53  ;;  %v13612_v29 = vadd.f32 %v12751_v30, %v4162_v48 }
 0x7f3   :  { %v6948_v15 = vpop.permute.xlu0 %6947  ;;  %9367 = vmatpush1.bf16.msra.mxu1 %v9366_v25  ;;  %v7722_v17 = vld [vmem:[#allocation3 + $0x6e8] sm:$0xff] }
 0x7f4   :  { %v6961_v63 = vsel %vm14478_vm14, %v6946_v16, %v6948_v15  ;;  %6974 = vst.msk [vmem:[#allocation3 + $0x708] sm:$0xff] %vm1352_vm2, %v6948_v15  ;;  %7313 = vrot.lane.b32.xlu1 %v13527_v35, %s14477_s26  ;;  %v4163_v16 = vmul.f32 %v12731_v51, %v13033_v38  ;;  %vm14489_vm14 = vmmov %vm14488_vm13 }
 0x7f5   :  { %6973 = vst [vmem:[#allocation3 + $0x700] sm:$0xff] %v6961_v63  ;;  %7315 = vrot.lane.b32.xlu0 %v13533_v46, %s14477_s26 }
 0x7f6   :  { %v6950_v34 = vpop.permute.xlu1 %6949  ;;  %v13623_v38 = vadd.f32 %v12751_v30, %v4163_v16 }
 0x7f7   :  { %v6952_v19 = vpop.permute.xlu0 %6951  ;;  %v7724_v49 = vld [vmem:[#allocation3 + $0x6f8] sm:$0xff] }
 0x7f8   :  { %v6962_v60 = vsel %vm14479_vm1, %v6950_v34, %v6952_v19  ;;  %6976 = vst.msk [vmem:[#allocation3 + $0x718] sm:$0xff] %vm1352_vm2, %v6952_v19  ;;  %7317 = vrot.lane.b32.xlu1 %v13537_v58, %s14477_s26  ;;  %v9368_v36 = vpack.c.bf16 %v7724_v49, %v7722_v17  ;;  %v4165_v17 = vmul.f32 %v12739_v54, %v13043_v3  ;;  %vm14490_vm1 = vmmov %vm14488_vm13 }
 0x7f9   :  { %7319 = vrot.lane.b32.xlu0 %v13543_v28, %s14477_s26  ;;  %v9374_v45 = vpack.c.bf16 %v6962_v60, %v6961_v63  ;;  %v4164_v63 = vmul.f32 %v12739_v54, %v13041_v56  ;;  %v4206_v56 = vmin.f32 %v13612_v29, 0.0 }
 0x7fa   :  { %v6954_v2 = vpop.permute.xlu1 %6953  ;;  %9369 = vmatprep.subr.bf16.mxu1 %v9368_v36 }
 0x7fb   :  { %v6956_v41 = vpop.permute.xlu0 %6955  ;;  %9371 = vmatpush1.bf16.msra.mxu1 %v9370_v59  ;;  %v7726_v9 = vld [vmem:[#allocation3 + $0x708] sm:$0xff]  ;;  %v13629_v60 = vadd.f32 %v12759_v42, %v4164_v63 }
 0x7fc   :  { %v6963_v44 = vsel %vm14480_vm12, %v6954_v2, %v6956_v41  ;;  %6978 = vst.msk [vmem:[#allocation3 + $0x728] sm:$0xff] %vm1352_vm2, %v6956_v41  ;;  %7321 = vrot.lane.b32.xlu1 %v13507_v37, %s14477_s26  ;;  %vm14491_vm12 = vmmov %vm14490_vm1 }
 0x7fd   :  { %7323 = vrot.lane.b32.xlu0 %v13513_v20, %s14477_s26 }
 0x7fe   :  { %v6958_v39 = vpop.permute.xlu1 %6957 }
 0x7ff   :  { %v6960_v55 = vpop.permute.xlu0 %6959  ;;  %v7728_v1 = vld [vmem:[#allocation3 + $0x718] sm:$0xff] }
 0x800   :  { %v6964_v62 = vsel %vm14481_vm10, %v6958_v39, %v6960_v55  ;;  %6980 = vst.msk [vmem:[#allocation3 + $0x738] sm:$0xff] %vm1352_vm2, %v6960_v55  ;;  %7361 = vrot.lane.b32.xlu1 %v13517_v43, %s14482_s7  ;;  %v9372_v26 = vpack.c.bf16 %v7728_v1, %v7726_v9  ;;  %v4207_v39 = vmin.f32 %v13623_v38, 0.0  ;;  %v13639_v55 = vadd.f32 %v12759_v42, %v4165_v17 }
 0x801   :  { %7363 = vrot.lane.b32.xlu0 %v13523_v5, %s14482_s7  ;;  %v9378_v24 = vpack.c.bf16 %v6964_v62, %v6963_v44  ;;  %v4214_v1 = vmul.f32 1.442695, %v4206_v56  ;;  %v4208_v62 = vmin.f32 %v13629_v60, 0.0  ;;  %vm14493_vm10 = vcmask 793600  }
 0x802   :  { %v6998_v12 = vpop.permute.xlu1 %6997  ;;  %9373 = vmatprep.subr.bf16.mxu1 %v9372_v26 }
 0x803   :  { %v7000_v22 = vpop.permute.xlu0 %6999  ;;  %9375 = vmatpush1.bf16.msra.mxu1 %v9374_v45  ;;  %v7730_v47 = vld [vmem:[#allocation3 + $0x728] sm:$0xff]  ;;  %9667 = vpow2.f32 %v4214_v1 }
 0x804   :  { %v7013_v6 = vsel %vm14483_vm15, %v6998_v12, %v7000_v22  ;;  %7026 = vst.msk [vmem:[#allocation3 + $0x748] sm:$0xff] %vm1352_vm2, %v7000_v22  ;;  %7365 = vrot.lane.b32.xlu1 %v13527_v35, %s14482_s7  ;;  %v4216_v12 = vmul.f32 1.442695, %v4207_v39  ;;  %v4209_v22 = vmin.f32 %v13639_v55, 0.0  ;;  %vm14494_vm15 = vmmov %vm14493_vm10 }
 0x805   :  { %7367 = vrot.lane.b32.xlu0 %v13533_v46, %s14482_s7 }
 0x806   :  { %v7002_v50 = vpop.permute.xlu1 %7001  ;;  %9669 = vpow2.f32 %v4216_v12 }
 0x807   :  { %v7004_v8 = vpop.permute.xlu0 %7003  ;;  %v7732_v31 = vld [vmem:[#allocation3 + $0x738] sm:$0xff] }
 0x808   :  { %v7014_v21 = vsel %vm14484_vm6, %v7002_v50, %v7004_v8  ;;  %7028 = vst.msk [vmem:[#allocation3 + $0x758] sm:$0xff] %vm1352_vm2, %v7004_v8  ;;  %7369 = vrot.lane.b32.xlu1 %v13537_v58, %s14482_s7  ;;  %v9376_v14 = vpack.c.bf16 %v7732_v31, %v7730_v47  ;;  %v4218_v50 = vmul.f32 1.442695, %v4208_v62  ;;  %vm14495_vm6 = vmmov %vm14493_vm10 }
 0x809   :  { %7371 = vrot.lane.b32.xlu0 %v13543_v28, %s14482_s7  ;;  %v9382_v25 = vpack.c.bf16 %v7014_v21, %v7013_v6 }
 0x80a   :  { %v7006_v11 = vpop.permute.xlu1 %7005  ;;  %9377 = vmatprep.subr.bf16.mxu1 %v9376_v14  ;;  %9671 = vpow2.f32 %v4218_v50 }
 0x80b   :  { %v7008_v33 = vpop.permute.xlu0 %7007  ;;  %9379 = vmatpush1.bf16.msra.mxu1 %v9378_v24  ;;  %v7734_v27 = vld [vmem:[#allocation3 + $0x748] sm:$0xff] }
 0x80c   :  { %v7015_v0 = vsel %vm14485_vm9, %v7006_v11, %v7008_v33  ;;  %7030 = vst.msk [vmem:[#allocation3 + $0x768] sm:$0xff] %vm1352_vm2, %v7008_v33  ;;  %7373 = vrot.lane.b32.xlu1 %v13507_v37, %s14482_s7  ;;  %v4220_v11 = vmul.f32 1.442695, %v4209_v22  ;;  %vm4198_vm9 = vcmp.gt.f32.partialorder %v13612_v29, 0.0 }
 0x80d   :  { %7375 = vrot.lane.b32.xlu0 %v13513_v20, %s14482_s7 }
 0x80e   :  { %v7010_v52 = vpop.permute.xlu1 %7009  ;;  %9673 = vpow2.f32 %v4220_v11 }
 0x80f   :  { %v7012_v4 = vpop.permute.xlu0 %7011  ;;  %v7736_v61 = vld [vmem:[#allocation3 + $0x758] sm:$0xff] }
 0x810   :  { %v7016_v7 = vsel %vm14486_vm11, %v7010_v52, %v7012_v4  ;;  %7032 = vst.msk [vmem:[#allocation3 + $0x778] sm:$0xff] %vm1352_vm2, %v7012_v4  ;;  %7413 = vrot.lane.b32.xlu1 %v13517_v43, %s14487_s8  ;;  %v9380_v53 = vpack.c.bf16 %v7736_v61, %v7734_v27  ;;  %vm14496_vm11 = vmmov %vm14495_vm6 }
 0x811   :  { %7415 = vrot.lane.b32.xlu0 %v13523_v5, %s14487_s8  ;;  %v9386_v3 = vpack.c.bf16 %v7016_v7, %v7015_v0  ;;  %v9668_v7 = vpop.eup %9667 }
 0x812   :  { %v7050_v15 = vpop.permute.xlu1 %7049  ;;  %9381 = vmatprep.subr.bf16.mxu1 %v9380_v53 }
 0x813   :  { %v7052_v34 = vpop.permute.xlu0 %7051  ;;  %9383 = vmatpush1.bf16.msra.mxu1 %v9382_v25  ;;  %v7738_v59 = vld [vmem:[#allocation3 + $0x768] sm:$0xff]  ;;  %v9670_v25 = vpop.eup %9669 }
 0x814   :  { %v7065_v19 = vsel %vm14488_vm13, %v7050_v15, %v7052_v34  ;;  %7078 = vst.msk [vmem:[#allocation3 + $0x788] sm:$0xff] %vm1352_vm2, %v7052_v34  ;;  %7417 = vrot.lane.b32.xlu1 %v13527_v35, %s14487_s8  ;;  %v8611_v15 = vadd.f32 -1.0, %v9668_v7  ;;  %vm4199_vm13 = vcmp.gt.f32.partialorder %v13623_v38, 0.0 }
 0x815   :  { %7419 = vrot.lane.b32.xlu0 %v13533_v46, %s14487_s8 }
 0x816   :  { %v7054_v49 = vpop.permute.xlu1 %7053 }
 0x817   :  { %v7056_v36 = vpop.permute.xlu0 %7055  ;;  %v7740_v2 = vld [vmem:[#allocation3 + $0x778] sm:$0xff] }
 0x818   :  { %v7066_v41 = vsel %vm14489_vm14, %v7054_v49, %v7056_v36  ;;  %7080 = vst.msk [vmem:[#allocation3 + $0x798] sm:$0xff] %vm1352_vm2, %v7056_v36  ;;  %7421 = vrot.lane.b32.xlu1 %v13537_v58, %s14487_s8  ;;  %v9384_v44 = vpack.c.bf16 %v7740_v2, %v7738_v59  ;;  %v8612_v49 = vadd.f32 -1.0, %v9670_v25  ;;  %vm4200_vm14 = vcmp.gt.f32.partialorder %v13629_v60, 0.0 }
 0x819   :  { %7423 = vrot.lane.b32.xlu0 %v13543_v28, %s14487_s8  ;;  %v9390_v24 = vpack.c.bf16 %v7066_v41, %v7065_v19 }
 0x81a   :  { %v7058_v9 = vpop.permute.xlu1 %7057  ;;  %9385 = vmatprep.subr.bf16.mxu1 %v9384_v44 }
 0x81b   :  { %v7060_v26 = vpop.permute.xlu0 %7059  ;;  %9387 = vmatpush1.bf16.msra.mxu1 %v9386_v3  ;;  %v7742_v47 = vld [vmem:[#allocation3 + $0x788] sm:$0xff]  ;;  %v13686_v3 = vsel %vm4199_vm13, %v13623_v38, %v8612_v49 }
 0x81c   :  { %v7067_v45 = vsel %vm14490_vm1, %v7058_v9, %v7060_v26  ;;  %7082 = vst.msk [vmem:[#allocation3 + $0x7a8] sm:$0xff] %vm1352_vm2, %v7060_v26  ;;  %7425 = vrot.lane.b32.xlu1 %v13507_v37, %s14487_s8  ;;  %vm4201_vm1 = vcmp.gt.f32.partialorder %v13639_v55, 0.0 }
 0x81d   :  { %7427 = vrot.lane.b32.xlu0 %v13513_v20, %s14487_s8 }
 0x81e   :  { %v7062_v6 = vpop.permute.xlu1 %7061 }
 0x81f   :  { %v7064_v8 = vpop.permute.xlu0 %7063  ;;  %v7744_v31 = vld [vmem:[#allocation3 + $0x798] sm:$0xff] }
 0x820   :  { %v7068_v21 = vsel %vm14491_vm12, %v7062_v6, %v7064_v8  ;;  %7084 = vst.msk [vmem:[#allocation3 + $0x7b8] sm:$0xff] %vm1352_vm2, %v7064_v8  ;;  %7465 = vrot.lane.b32.xlu1 %v13517_v43, %s14492_s4  ;;  %v9388_v14 = vpack.c.bf16 %v7744_v31, %v7742_v47  ;;  %v9724_v47 = vld [vmem:[%s14178_s10 + $0x30] sm:$0xff]  ;;  %vm14497_vm12 = vcmask 777216  }
 0x821   :  { %7467 = vrot.lane.b32.xlu0 %v13523_v5, %s14492_s4 }
 0x822   :  { %v7102_v33 = vpop.permute.xlu1 %7101  ;;  %9389 = vmatprep.subr.bf16.mxu1 %v9388_v14 }
 0x823   :  { %v7104_v0 = vpop.permute.xlu0 %7103  ;;  %9391 = vmatpush1.bf16.msra.mxu1 %v9390_v24  ;;  %v7746_v48 = vld [vmem:[#allocation3 + $0x7a8] sm:$0xff] }
 0x824   :  { %v7117_v52 = vsel %vm14493_vm10, %v7102_v33, %v7104_v0  ;;  %7130 = vst.msk [vmem:[#allocation3 + $0x7c8] sm:$0xff] %vm1352_vm2, %v7104_v0  ;;  %7469 = vrot.lane.b32.xlu1 %v13527_v35, %s14492_s4  ;;  %v9394_v35 = vpack.c.bf16 %v7068_v21, %v7067_v45  ;;  %v9725_v24 = vld [vmem:[%s14178_s10 + $0x88] sm:$0xff]  ;;  %vm14498_vm10 = vmmov %vm14497_vm12 }
 0x825   :  { %7471 = vrot.lane.b32.xlu0 %v13533_v46, %s14492_s4 }
 0x826   :  { %v7106_v43 = vpop.permute.xlu1 %7105 }
 0x827   :  { %v7108_v5 = vpop.permute.xlu0 %7107  ;;  %v7748_v4 = vld [vmem:[#allocation3 + $0x7b8] sm:$0xff] }
 0x828   :  { %v7118_v27 = vsel %vm14494_vm15, %v7106_v43, %v7108_v5  ;;  %7132 = vst.msk [vmem:[#allocation3 + $0x7d8] sm:$0xff] %vm1352_vm2, %v7108_v5  ;;  %7473 = vrot.lane.b32.xlu1 %v13537_v58, %s14492_s4  ;;  %v9392_v61 = vpack.c.bf16 %v7748_v4, %v7746_v48  ;;  %v9672_v58 = vpop.eup %9671  ;;  %v9726_v43 = vld [vmem:[%s14178_s10 + $0x80] sm:$0xff]  ;;  %v9727_v48 = vld [vmem:[%s14178_s10 + $0xd8] sm:$0xff]  ;;  %vm14499_vm15 = vmmov %vm14498_vm10 }
 0x829   :  { %7475 = vrot.lane.b32.xlu0 %v13543_v28, %s14492_s4  ;;  %v92_v28 = vld [vmem:[%s14180_s12 + $0x18] sm:$0xff]  ;;  %v9674_v56 = vpop.eup %9673  ;;  %v8613_v59 = vadd.f32 -1.0, %v9672_v58  ;;  %v9398_v2 = vpack.c.bf16 %v7118_v27, %v7117_v52 }
 0x82a   :  { %v7110_v53 = vpop.permute.xlu1 %7109  ;;  %9393 = vmatprep.subr.bf16.mxu1 %v9392_v61  ;;  %v8614_v39 = vadd.f32 -1.0, %v9674_v56  ;;  %v9728_v61 = vld [vmem:[%s14178_s10 + $0xd0] sm:$0xff] }
 0x82b   :  { %v7112_v46 = vpop.permute.xlu0 %7111  ;;  %9395 = vmatpush1.bf16.msra.mxu1 %v9394_v35  ;;  %v7750_v19 = vld [vmem:[#allocation3 + $0x7c8] sm:$0xff]  ;;  %v13694_v9 = vsel %vm4200_vm14, %v13629_v60, %v8613_v59 }
 0x82c   :  { %v7119_v16 = vsel %vm14495_vm6, %v7110_v53, %v7112_v46  ;;  %7134 = vst.msk [vmem:[#allocation3 + $0x7e8] sm:$0xff] %vm1352_vm2, %v7112_v46  ;;  %7477 = vrot.lane.b32.xlu1 %v13507_v37, %s14492_s4  ;;  %v13680_v37 = vsel %vm4198_vm9, %v13612_v29, %v8611_v15  ;;  %v13700_v62 = vsel %vm4201_vm1, %v13639_v55, %v8614_v39  ;;  %v9729_v46 = vld [vmem:[%s14178_s10 + $0x128] sm:$0xff]  ;;  %vm14500_vm6 = vmmov %vm14498_vm10  ;;  %vm14501_vm9 = vcmask 769024  }
 0x82d   :  { %7479 = vrot.lane.b32.xlu0 %v13513_v20, %s14492_s4  ;;  %vm14503_vm13 = vmmov %vm14501_vm9  ;;  %vm14505_vm1 = vcmask 760832  }
 0x82e   :  { %v7114_v63 = vpop.permute.xlu1 %7113  ;;  %vm14504_vm14 = vmmov %vm14501_vm9 }
 0x82f   :  { %v7116_v34 = vpop.permute.xlu0 %7115  ;;  %v7752_v17 = vld [vmem:[#allocation3 + $0x7d8] sm:$0xff] }
 0x830   :  { %v7120_v36 = vsel %vm14496_vm11, %v7114_v63, %v7116_v34  ;;  %7136 = vst.msk [vmem:[#allocation3 + $0x7f8] sm:$0xff] %vm1352_vm2, %v7116_v34  ;;  %4187 = vperm.xlu1 %9570, %v92_v28   ;;  %v9396_v20 = vpack.c.bf16 %v7752_v17, %v7750_v19  ;;  %v9730_v28 = vld [vmem:[%s14178_s10 + $0x120] sm:$0xff]  ;;  %v9731_v34 = vld [vmem:[%s14178_s10 + $0x48] sm:$0xff]  ;;  %vm14502_vm11 = vmmov %vm14501_vm9 }
 0x831   :  { %4254 = vrot.lane.b32.xlu0 %v13680_v37, %s9770_s29  ;;  %v9402_v22 = vpack.c.bf16 %v7120_v36, %v7119_v16 }
 0x832   :  { %v7154_v41 = vpop.permute.xlu1 %7153  ;;  %9397 = vmatprep.subr.bf16.mxu1 %v9396_v20 }
 0x833   :  { %v7156_v44 = vpop.permute.xlu0 %7155  ;;  %9399 = vmatpush1.bf16.msra.mxu1 %v9398_v2  ;;  %v7754_v26 = vld [vmem:[#allocation3 + $0x7e8] sm:$0xff] }
 0x834   :  { %v7169_v29 = vsel %vm3034_vm7, %v7154_v41, %v7156_v44  ;;  %7182 = vst.msk [vmem:[#allocation3 + $0x808] sm:$0xff] %vm1352_vm2, %v7156_v44  ;;  %4256 = vrot.lane.b32.xlu1 %v13686_v3, %s9770_s29 }
 0x835   :  { %4258 = vrot.lane.b32.xlu0 %v13694_v9, %s9770_s29 }
 0x836   :  { %v7158_v1 = vpop.permute.xlu1 %7157 }
 0x837   :  { %v7160_v38 = vpop.permute.xlu0 %7159  ;;  %v7756_v45 = vld [vmem:[#allocation3 + $0x7f8] sm:$0xff] }
 0x838   :  { %v7170_v12 = vsel %vm3034_vm7, %v7158_v1, %v7160_v38  ;;  %7184 = vst.msk [vmem:[#allocation3 + $0x818] sm:$0xff] %vm1352_vm2, %v7160_v38  ;;  %4260 = vrot.lane.b32.xlu1 %v13700_v62, %s9770_s29  ;;  %v9400_v60 = vpack.c.bf16 %v7756_v45, %v7754_v26 }
 0x839   :  { %v9406_v0 = vpack.c.bf16 %v7170_v12, %v7169_v29 }
 0x83a   :  { %v7162_v6 = vpop.permute.xlu1 %7161  ;;  %9401 = vmatprep.subr.bf16.mxu1 %v9400_v60 }
 0x83b   :  { %v7164_v50 = vpop.permute.xlu0 %7163  ;;  %9403 = vmatpush1.bf16.msra.mxu1 %v9402_v22  ;;  %v7758_v21 = vld [vmem:[#allocation3 + $0x808] sm:$0xff] }
 0x83c   :  { %v7171_v8 = vsel %vm3034_vm7, %v7162_v6, %v7164_v50  ;;  %7186 = vst.msk [vmem:[#allocation3 + $0x828] sm:$0xff] %vm1352_vm2, %v7164_v50 }
 0x83e   :  { %v7166_v55 = vpop.permute.xlu1 %7165  ;;  %8145 = vmatmul.mubr.f32.vlgmr.msra.gmra.mrb[24].mxu1 %v9724_v47 }
 0x83f   :  { %v7168_v31 = vpop.permute.xlu0 %7167  ;;  %v7760_v14 = vld [vmem:[#allocation3 + $0x818] sm:$0xff]  ;;  %8150 = vmatprep.mubr.f32.mxu1 %v9725_v24 }
 0x840   :  { %v7172_v11 = vsel %vm3034_vm7, %v7166_v55, %v7168_v31  ;;  %7188 = vst.msk [vmem:[#allocation3 + $0x838] sm:$0xff] %vm1352_vm2, %v7168_v31  ;;  %v9404_v33 = vpack.c.bf16 %v7760_v14, %v7758_v21 }
 0x841   :  { %v9410_v15 = vpack.c.bf16 %v7172_v11, %v7171_v8 }
 0x842   :  { %v7206_v52 = vpop.permute.xlu1 %7205  ;;  %9405 = vmatprep.subr.bf16.mxu1 %v9404_v33  ;;  %8151 = vmatmul.mubr.f32.gmra.mrb[26].mxu1 %v9726_v43 }
 0x843   :  { %v7208_v5 = vpop.permute.xlu0 %7207  ;;  %9407 = vmatpush1.bf16.msra.mxu1 %v9406_v0  ;;  %8156 = vmatprep.mubr.f32.mxu1 %v9727_v48  ;;  %v7762_v35 = vld [vmem:[#allocation3 + $0x828] sm:$0xff] }
 0x844   :  { %v7221_v4 = vsel %vm14497_vm12, %v7206_v52, %v7208_v5  ;;  %7234 = vst.msk [vmem:[#allocation3 + $0x848] sm:$0xff] %vm1352_vm2, %v7208_v5  ;;  %vm14506_vm12 = vmmov %vm14505_vm1 }
 0x846   :  { %v7210_v27 = vpop.permute.xlu1 %7209  ;;  %8157 = vmatmul.mubr.f32.gmra.mrb[28].mxu1 %v9728_v61 }
 0x847   :  { %v7212_v7 = vpop.permute.xlu0 %7211  ;;  %v7764_v53 = vld [vmem:[#allocation3 + $0x838] sm:$0xff]  ;;  %8162 = vmatprep.mubr.f32.mxu1 %v9729_v46 }
 0x848   :  { %v7222_v25 = vsel %vm14498_vm10, %v7210_v27, %v7212_v7  ;;  %7236 = vst.msk [vmem:[#allocation3 + $0x858] sm:$0xff] %vm1352_vm2, %v7212_v7  ;;  %v9408_v16 = vpack.c.bf16 %v7764_v53, %v7762_v35  ;;  %vm14507_vm10 = vmmov %vm14505_vm1 }
 0x849   :  { %v9414_v2 = vpack.c.bf16 %v7222_v25, %v7221_v4 }
 0x84a   :  { %v7214_v58 = vpop.permute.xlu1 %7213  ;;  %9409 = vmatprep.subr.bf16.mxu1 %v9408_v16  ;;  %8163 = vmatmul.mubr.f32.gmra.mrb[30].mxu1 %v9730_v28 }
 0x84b   :  { %v7216_v63 = vpop.permute.xlu0 %7215  ;;  %9411 = vmatpush1.bf16.msra.mxu1 %v9410_v15  ;;  %8727 = vmatprep.mubr.msk.f32.mxu1 %vm3034_vm7, %v9731_v34  ;;  %v7766_v56 = vld [vmem:[#allocation3 + $0x848] sm:$0xff] }
 0x84c   :  { %v7223_v19 = vsel %vm14499_vm15, %v7214_v58, %v7216_v63  ;;  %7238 = vst.msk [vmem:[#allocation3 + $0x868] sm:$0xff] %vm1352_vm2, %v7216_v63  ;;  %vm14508_vm15 = vmmov %vm14505_vm1 }
 0x84e   :  { %v7218_v17 = vpop.permute.xlu1 %7217 }
 0x84f   :  { %v7220_v49 = vpop.permute.xlu0 %7219  ;;  %v7768_v36 = vld [vmem:[#allocation3 + $0x858] sm:$0xff] }
 0x850   :  { %v7224_v20 = vsel %vm14500_vm6, %v7218_v17, %v7220_v49  ;;  %7240 = vst.msk [vmem:[#allocation3 + $0x878] sm:$0xff] %vm1352_vm2, %v7220_v49  ;;  %v9412_v59 = vpack.c.bf16 %v7768_v36, %v7766_v56  ;;  %vm14509_vm6 = vcmask 752640  }
 0x851   :  { %v9418_v60 = vpack.c.bf16 %v7224_v20, %v7223_v19 }
 0x852   :  { %v7258_v41 = vpop.permute.xlu1 %7257  ;;  %9413 = vmatprep.subr.bf16.mxu1 %v9412_v59 }
 0x853   :  { %v7260_v44 = vpop.permute.xlu0 %7259  ;;  %9415 = vmatpush1.bf16.msra.mxu1 %v9414_v2  ;;  %v7770_v38 = vld [vmem:[#allocation3 + $0x868] sm:$0xff] }
 0x854   :  { %v7273_v39 = vsel %vm14501_vm9, %v7258_v41, %v7260_v44  ;;  %7286 = vst.msk [vmem:[#allocation3 + $0x888] sm:$0xff] %vm1352_vm2, %v7260_v44  ;;  %vm14510_vm9 = vmmov %vm14509_vm6 }
 0x856   :  { %v7262_v29 = vpop.permute.xlu1 %7261 }
 0x857   :  { %v7264_v1 = vpop.permute.xlu0 %7263  ;;  %v7772_v26 = vld [vmem:[#allocation3 + $0x878] sm:$0xff] }
 0x858   :  { %v7274_v45 = vsel %vm14502_vm11, %v7262_v29, %v7264_v1  ;;  %7288 = vst.msk [vmem:[#allocation3 + $0x898] sm:$0xff] %vm1352_vm2, %v7264_v1  ;;  %v9416_v12 = vpack.c.bf16 %v7772_v26, %v7770_v38  ;;  %vm14511_vm11 = vmmov %vm14509_vm6 }
 0x859   :  { %v9422_v24 = vpack.c.bf16 %v7274_v45, %v7273_v39 }
 0x85a   :  { %v7266_v22 = vpop.permute.xlu1 %7265  ;;  %9417 = vmatprep.subr.bf16.mxu1 %v9416_v12 }
 0x85b   :  { %v7268_v6 = vpop.permute.xlu0 %7267  ;;  %9419 = vmatpush1.bf16.msra.mxu1 %v9418_v60  ;;  %v7774_v47 = vld [vmem:[#allocation3 + $0x888] sm:$0xff] }
 0x85c   :  { %v7275_v50 = vsel %vm14503_vm13, %v7266_v22, %v7268_v6  ;;  %7290 = vst.msk [vmem:[#allocation3 + $0x8a8] sm:$0xff] %vm1352_vm2, %v7268_v6  ;;  %vm14512_vm13 = vmmov %vm14509_vm6 }
 0x85e   :  { %v7270_v8 = vpop.permute.xlu1 %7269 }
 0x85f   :  { %v7272_v55 = vpop.permute.xlu0 %7271  ;;  %v7776_v31 = vld [vmem:[#allocation3 + $0x898] sm:$0xff] }
 0x860   :  { %v7276_v21 = vsel %vm14504_vm14, %v7270_v8, %v7272_v55  ;;  %7292 = vst.msk [vmem:[#allocation3 + $0x8b8] sm:$0xff] %vm1352_vm2, %v7272_v55  ;;  %v9420_v14 = vpack.c.bf16 %v7776_v31, %v7774_v47 }
 0x861   :  { %v9426_v61 = vpack.c.bf16 %v7276_v21, %v7275_v50 }
 0x862   :  { %v7310_v11 = vpop.permute.xlu1 %7309  ;;  %9421 = vmatprep.subr.bf16.mxu1 %v9420_v14 }
 0x863   :  { %v7312_v33 = vpop.permute.xlu0 %7311  ;;  %9423 = vmatpush1.bf16.msra.mxu1 %v9422_v24  ;;  %v7778_v5 = vld [vmem:[#allocation3 + $0x8a8] sm:$0xff] }
 0x864   :  { %v7325_v0 = vsel %vm14505_vm1, %v7310_v11, %v7312_v33  ;;  %7338 = vst.msk [vmem:[#allocation3 + $0x8c8] sm:$0xff] %vm1352_vm2, %v7312_v33 }
 0x866   :  { %v7314_v52 = vpop.permute.xlu1 %7313 }
 0x867   :  { %v7316_v43 = vpop.permute.xlu0 %7315  ;;  %v7780_v48 = vld [vmem:[#allocation3 + $0x8b8] sm:$0xff] }
 0x868   :  { %v7326_v4 = vsel %vm14506_vm12, %v7314_v52, %v7316_v43  ;;  %7340 = vst.msk [vmem:[#allocation3 + $0x8d8] sm:$0xff] %vm1352_vm2, %v7316_v43  ;;  %v9424_v27 = vpack.c.bf16 %v7780_v48, %v7778_v5 }
 0x869   :  { %v9430_v63 = vpack.c.bf16 %v7326_v4, %v7325_v0 }
 0x86a   :  { %v7318_v7 = vpop.permute.xlu1 %7317  ;;  %9425 = vmatprep.subr.bf16.mxu1 %v9424_v27 }
 0x86b   :  { %v7320_v35 = vpop.permute.xlu0 %7319  ;;  %9427 = vmatpush1.bf16.msra.mxu1 %v9426_v61  ;;  %v7782_v16 = vld [vmem:[#allocation3 + $0x8c8] sm:$0xff] }
 0x86c   :  { %v7327_v53 = vsel %vm14507_vm10, %v7318_v7, %v7320_v35  ;;  %7342 = vst.msk [vmem:[#allocation3 + $0x8e8] sm:$0xff] %vm1352_vm2, %v7320_v35 }
 0x86e   :  { %v7322_v46 = vpop.permute.xlu1 %7321 }
 0x86f   :  { %v7324_v25 = vpop.permute.xlu0 %7323  ;;  %v7784_v15 = vld [vmem:[#allocation3 + $0x8d8] sm:$0xff] }
 0x870   :  { %v7328_v58 = vsel %vm14508_vm15, %v7322_v46, %v7324_v25  ;;  %7344 = vst.msk [vmem:[#allocation3 + $0x8f8] sm:$0xff] %vm1352_vm2, %v7324_v25  ;;  %v9428_v28 = vpack.c.bf16 %v7784_v15, %v7782_v16 }
 0x871   :  { %v9434_v41 = vpack.c.bf16 %v7328_v58, %v7327_v53 }
 0x872   :  { %v7362_v34 = vpop.permute.xlu1 %7361  ;;  %9429 = vmatprep.subr.bf16.mxu1 %v9428_v28 }
 0x873   :  { %v7364_v19 = vpop.permute.xlu0 %7363  ;;  %9431 = vmatpush1.bf16.msra.mxu1 %v9430_v63  ;;  %v7786_v36 = vld [vmem:[#allocation3 + $0x8e8] sm:$0xff] }
 0x874   :  { %v7377_v17 = vsel %vm14509_vm6, %v7362_v34, %v7364_v19  ;;  %7390 = vst.msk [vmem:[#allocation3 + $0x908] sm:$0xff] %vm1352_vm2, %v7364_v19 }
 0x876   :  { %v7366_v49 = vpop.permute.xlu1 %7365 }
 0x877   :  { %v7368_v56 = vpop.permute.xlu0 %7367  ;;  %v7788_v20 = vld [vmem:[#allocation3 + $0x8f8] sm:$0xff] }
 0x878   :  { %v7378_v59 = vsel %vm14510_vm9, %v7366_v49, %v7368_v56  ;;  %7392 = vst.msk [vmem:[#allocation3 + $0x918] sm:$0xff] %vm1352_vm2, %v7368_v56  ;;  %v9432_v2 = vpack.c.bf16 %v7788_v20, %v7786_v36 }
 0x879   :  { %v9438_v22 = vpack.c.bf16 %v7378_v59, %v7377_v17 }
 0x87a   :  { %v7370_v44 = vpop.permute.xlu1 %7369  ;;  %9433 = vmatprep.subr.bf16.mxu1 %v9432_v2 }
 0x87b   :  { %v7372_v39 = vpop.permute.xlu0 %7371  ;;  %9435 = vmatpush1.bf16.msra.mxu1 %v9434_v41  ;;  %v7790_v26 = vld [vmem:[#allocation3 + $0x908] sm:$0xff] }
 0x87c   :  { %v7379_v29 = vsel %vm14511_vm11, %v7370_v44, %v7372_v39  ;;  %7394 = vst.msk [vmem:[#allocation3 + $0x928] sm:$0xff] %vm1352_vm2, %v7372_v39 }
 0x87e   :  { %v7374_v1 = vpop.permute.xlu1 %7373 }
 0x87f   :  { %v7376_v38 = vpop.permute.xlu0 %7375  ;;  %v7792_v45 = vld [vmem:[#allocation3 + $0x918] sm:$0xff] }
 0x880   :  { %v7380_v12 = vsel %vm14512_vm13, %v7374_v1, %v7376_v38  ;;  %7396 = vst.msk [vmem:[#allocation3 + $0x938] sm:$0xff] %vm1352_vm2, %v7376_v38  ;;  %v9436_v60 = vpack.c.bf16 %v7792_v45, %v7790_v26  ;;  %v9732_v26 = vld [vmem:[%s14178_s10 + $0x40] sm:$0xff]  ;;  %v9733_v45 = vld [vmem:[%s14178_s10 + $0x98] sm:$0xff]  ;;  %vm14513_vm13 = vcmask 154624  }
 0x881   :  { %v9442_v11 = vpack.c.bf16 %v7380_v12, %v7379_v29  ;;  %v9734_v12 = vld [vmem:[%s14178_s10 + $0x90] sm:$0xff] }
 0x882   :  { %v7414_v6 = vpop.permute.xlu1 %7413  ;;  %9437 = vmatprep.subr.bf16.mxu1 %v9436_v60  ;;  %v9735_v60 = vld [vmem:[%s14178_s10 + $0xe8] sm:$0xff] }
 0x883   :  { %v7416_v50 = vpop.permute.xlu0 %7415  ;;  %9439 = vmatpush1.bf16.msra.mxu1 %v9438_v22  ;;  %v7794_v31 = vld [vmem:[#allocation3 + $0x928] sm:$0xff]  ;;  %v9736_v22 = vld [vmem:[%s14178_s10 + $0xe0] sm:$0xff] }
 0x884   :  { %v7429_v8 = vsel %vm3299_vm8, %v7414_v6, %v7416_v50  ;;  %7442 = vst.msk [vmem:[#allocation3 + $0x948] sm:$0xff] %vm1352_vm2, %v7416_v50  ;;  %v9737_v6 = vld [vmem:[%s14178_s10 + $0x138] sm:$0xff]  ;;  %v9738_v50 = vld [vmem:[%s14178_s10 + $0x130] sm:$0xff] }
 0x886   :  { %v7418_v55 = vpop.permute.xlu1 %7417 }
 0x887   :  { %v7420_v47 = vpop.permute.xlu0 %7419  ;;  %v7796_v21 = vld [vmem:[#allocation3 + $0x938] sm:$0xff] }
 0x888   :  { %v7430_v14 = vsel %vm3299_vm8, %v7418_v55, %v7420_v47  ;;  %7444 = vst.msk [vmem:[#allocation3 + $0x958] sm:$0xff] %vm1352_vm2, %v7420_v47  ;;  %v9440_v24 = vpack.c.bf16 %v7796_v21, %v7794_v31  ;;  %v4167_v55 = vmul.f32 %v12741_v23, %v13053_v13 }
 0x889   :  { %v9446_v7 = vpack.c.bf16 %v7430_v14, %v7429_v8  ;;  %v4166_v8 = vmul.f32 %v12741_v23, %v13051_v57 }
 0x88a   :  { %v7422_v33 = vpop.permute.xlu1 %7421  ;;  %9441 = vmatprep.subr.bf16.mxu1 %v9440_v24  ;;  %v13815_v31 = vadd.f32 %v12761_v40, %v4167_v55 }
 0x88b   :  { %v7424_v0 = vpop.permute.xlu0 %7423  ;;  %9443 = vmatpush1.bf16.msra.mxu1 %v9442_v11  ;;  %v7798_v48 = vld [vmem:[#allocation3 + $0x948] sm:$0xff]  ;;  %v13812_v47 = vadd.f32 %v12761_v40, %v4166_v8 }
 0x88c   :  { %v7431_v52 = vsel %vm3299_vm8, %v7422_v33, %v7424_v0  ;;  %7446 = vst.msk [vmem:[#allocation3 + $0x968] sm:$0xff] %vm1352_vm2, %v7424_v0  ;;  %v4211_v57 = vmin.f32 %v13815_v31, 0.0  ;;  %vm4203_vm1 = vcmp.gt.f32.partialorder %v13815_v31, 0.0 }
 0x88d   :  { %v4210_v33 = vmin.f32 %v13812_v47, 0.0  ;;  %vm4202_vm14 = vcmp.gt.f32.partialorder %v13812_v47, 0.0 }
 0x88e   :  { %v7426_v43 = vpop.permute.xlu1 %7425 }
 0x88f   :  { %v7428_v5 = vpop.permute.xlu0 %7427  ;;  %v7800_v4 = vld [vmem:[#allocation3 + $0x958] sm:$0xff] }
 0x890   :  { %v7432_v27 = vsel %vm3299_vm8, %v7426_v43, %v7428_v5  ;;  %7448 = vst.msk [vmem:[#allocation3 + $0x978] sm:$0xff] %vm1352_vm2, %v7428_v5  ;;  %v9444_v61 = vpack.c.bf16 %v7800_v4, %v7798_v48 }
 0x891   :  { %v9450_v34 = vpack.c.bf16 %v7432_v27, %v7431_v52 }
 0x892   :  { %v7466_v35 = vpop.permute.xlu1 %7465  ;;  %9445 = vmatprep.subr.bf16.mxu1 %v9444_v61  ;;  %v4222_v61 = vmul.f32 1.442695, %v4210_v33 }
 0x893   :  { %v7468_v53 = vpop.permute.xlu0 %7467  ;;  %9447 = vmatpush1.bf16.msra.mxu1 %v9446_v7  ;;  %v7802_v15 = vld [vmem:[#allocation3 + $0x968] sm:$0xff] }
 0x894   :  { %v7481_v46 = vsel %vm3352_vm0, %v7466_v35, %v7468_v53  ;;  %7494 = vst.msk [vmem:[#allocation3 + $0x988] sm:$0xff] %vm1352_vm2, %v7468_v53  ;;  %v4224_v35 = vmul.f32 1.442695, %v4211_v57 }
 0x896   :  { %v7470_v25 = vpop.permute.xlu1 %7469 }
 0x897   :  { %v7472_v16 = vpop.permute.xlu0 %7471  ;;  %v7804_v58 = vld [vmem:[#allocation3 + $0x978] sm:$0xff] }
 0x898   :  { %v7482_v28 = vsel %vm3352_vm0, %v7470_v25, %v7472_v16  ;;  %7496 = vst.msk [vmem:[#allocation3 + $0x998] sm:$0xff] %vm1352_vm2, %v7472_v16  ;;  %v9448_v63 = vpack.c.bf16 %v7804_v58, %v7802_v15 }
 0x899   :  { %v9454_v44 = vpack.c.bf16 %v7482_v28, %v7481_v46 }
 0x89a   :  { %v7474_v19 = vpop.permute.xlu1 %7473  ;;  %9449 = vmatprep.subr.bf16.mxu1 %v9448_v63 }
 0x89b   :  { %v7476_v17 = vpop.permute.xlu0 %7475  ;;  %9451 = vmatpush1.bf16.msra.mxu1 %v9450_v34  ;;  %v7806_v20 = vld [vmem:[#allocation3 + $0x988] sm:$0xff] }
 0x89c   :  { %v7483_v49 = vsel %vm3352_vm0, %v7474_v19, %v7476_v17  ;;  %7498 = vst.msk [vmem:[#allocation3 + $0x9a8] sm:$0xff] %vm1352_vm2, %v7476_v17 }
 0x89e   :  { %v7478_v56 = vpop.permute.xlu1 %7477 }
 0x89f   :  { %v7480_v36 = vpop.permute.xlu0 %7479  ;;  %v7808_v59 = vld [vmem:[#allocation3 + $0x998] sm:$0xff] }
 0x8a0   :  { %v7484_v2 = vsel %vm3352_vm0, %v7478_v56, %v7480_v36  ;;  %7500 = vst.msk [vmem:[#allocation3 + $0x9b8] sm:$0xff] %vm1352_vm2, %v7480_v36  ;;  %v9452_v41 = vpack.c.bf16 %v7808_v59, %v7806_v20 }
 0x8a1   :  { %v9458_v38 = vpack.c.bf16 %v7484_v2, %v7483_v49 }
 0x8a2   :  { %9453 = vmatprep.subr.bf16.mxu1 %v9452_v41 }
 0x8a3   :  { %9455 = vmatpush1.bf16.msra.mxu1 %v9454_v44  ;;  %v7810_v39 = vld [vmem:[#allocation3 + $0x9a8] sm:$0xff] }
 0x8a7   :  { %v7812_v29 = vld [vmem:[#allocation3 + $0x9b8] sm:$0xff] }
 0x8a8   :  { %v9456_v1 = vpack.c.bf16 %v7812_v29, %v7810_v39 }
 0x8aa   :  { %9457 = vmatprep.subr.bf16.mxu1 %v9456_v1 }
 0x8ab   :  { %9459 = vmatpush1.bf16.msra.mxu1 %v9458_v38 }
 0x8ae   :  { %8234 = vmatmul.mubr.f32.vlgmr.msra.gmra.mrb[24].mxu1 %v9732_v26 }
 0x8af   :  { %8728 = vmatprep.mubr.msk.f32.mxu1 %vm3034_vm7, %v9733_v45  ;;  %v4188_v39 = vpop.permute.xlu1 %4187 }
 0x8b2   :  { %8240 = vmatmul.mubr.f32.gmra.mrb[26].mxu1 %v9734_v12  ;;  %v4169_v12 = vmul.f32 %v12747_v18, %v13063_v32 }
 0x8b3   :  { %8729 = vmatprep.mubr.msk.f32.mxu1 %vm3034_vm7, %v9735_v60 }
 0x8b4   :  { %v4197_v8 = vadd.f32 %v4188_v39, %v4169_v12 }
 0x8b6   :  { %8246 = vmatmul.mubr.f32.gmra.mrb[28].mxu1 %v9736_v22  ;;  %vm4205_vm6 = vcmp.gt.f32.partialorder %v4197_v8, 0.0 }
 0x8b7   :  { %8730 = vmatprep.mubr.msk.f32.mxu1 %vm3034_vm7, %v9737_v6 }
 0x8ba   :  { %8252 = vmatmul.mubr.f32.gmra.mrb[30].mxu1 %v9738_v50 }
 0x981   :  { %v8235_v21 = vpop.f32.mrb[24].mxu1 }
 0x982   :  { %v8258_v14 = vmul.f32 %v8235_v21, %v12731_v51  ;;  %v8237_v24 = vpop.f32.mrb[25].mxu1 }
 0x983   :  { %v8259_v11 = vmul.f32 %v8237_v24, %v12731_v51 }
 0x984   :  { %v8266_v0 = vadd.f32 %v8258_v14, %v12751_v30  ;;  %v4213_v14 = vmin.f32 %v4197_v8, 0.0 }
 0x985   :  { %v8267_v13 = vadd.f32 %v8259_v11, %v12751_v30  ;;  %v8241_v52 = vpop.f32.mrb[26].mxu1 }
 0x986   :  { %v8282_v43 = vmin.f32 %v8266_v0, 0.0  ;;  %v8260_v5 = vmul.f32 %v8241_v52, %v12739_v54  ;;  %v8243_v48 = vpop.f32.mrb[27].mxu1  ;;  %vm8274_vm2 = vcmp.gt.f32.partialorder %v8266_v0, 0.0 }
 0x987   :  { %v8283_v4 = vmin.f32 %v8267_v13, 0.0  ;;  %v8261_v27 = vmul.f32 %v8243_v48, %v12739_v54  ;;  %vm8275_vm7 = vcmp.gt.f32.partialorder %v8267_v13, 0.0 }
 0x988   :  { %v8290_v7 = vmul.f32 1.442695, %v8282_v43  ;;  %v8268_v51 = vadd.f32 %v8260_v5, %v12759_v42 }
 0x989   :  { %v8292_v53 = vmul.f32 1.442695, %v8283_v4  ;;  %v8269_v46 = vadd.f32 %v8261_v27, %v12759_v42  ;;  %v8247_v25 = vpop.f32.mrb[28].mxu1 }
 0x98a   :  { %9675 = vpow2.f32 %v8290_v7  ;;  %v8284_v16 = vmin.f32 %v8268_v51, 0.0  ;;  %v8262_v30 = vmul.f32 %v8247_v25, %v12741_v23  ;;  %v8249_v15 = vpop.f32.mrb[29].mxu1  ;;  %vm8276_vm8 = vcmp.gt.f32.partialorder %v8268_v51, 0.0 }
 0x98b   :  { %9677 = vpow2.f32 %v8292_v53  ;;  %v8285_v58 = vmin.f32 %v8269_v46, 0.0  ;;  %v8263_v28 = vmul.f32 %v8249_v15, %v12741_v23  ;;  %vm8277_vm0 = vcmp.gt.f32.partialorder %v8269_v46, 0.0 }
 0x98c   :  { %9679 = vpow2.f32 %v4222_v61  ;;  %v8294_v54 = vmul.f32 1.442695, %v8284_v16  ;;  %v13830_v19 = vadd.f32 %v8262_v30, %v12761_v40 }
 0x98d   :  { %9681 = vpow2.f32 %v4224_v35  ;;  %v8296_v63 = vmul.f32 1.442695, %v8285_v58  ;;  %v8253_v34 = vpop.f32.mrb[30].mxu1  ;;  %v13833_v17 = vadd.f32 %v8263_v28, %v12761_v40  ;;  %v4168_v40 = vmul.f32 %v12747_v18, %v13061_v10 }
 0x98e   :  { %9683 = vpow2.f32 %v8294_v54  ;;  %v8255_v42 = vpop.f32.mrb[31].mxu1  ;;  %v8286_v49 = vmin.f32 %v13830_v19, 0.0  ;;  %vm8278_vm12 = vcmp.gt.f32.partialorder %v13830_v19, 0.0 }
 0x98f   :  { %9685 = vpow2.f32 %v8296_v63  ;;  %v8287_v56 = vmin.f32 %v13833_v17, 0.0  ;;  %v4196_v6 = vadd.f32 %v4188_v39, %v4168_v40  ;;  %v8265_v52 = vmul.f32 %v8255_v42, %v12747_v18  ;;  %v4257_v42 = vpop.permute.xlu1 %4256 }
 0x990   :  { %v8298_v2 = vmul.f32 1.442695, %v8286_v49  ;;  %vm8279_vm10 = vcmp.gt.f32.partialorder %v13833_v17, 0.0 }
 0x991   :  { %v8300_v29 = vmul.f32 1.442695, %v8287_v56  ;;  %v4212_v21 = vmin.f32 %v4196_v6, 0.0  ;;  %v8273_v48 = vadd.f32 %v8265_v52, %v4188_v39  ;;  %vm4204_vm15 = vcmp.gt.f32.partialorder %v4196_v6, 0.0 }
 0x992   :  { %9687 = vpow2.f32 %v8298_v2 }
 0x993   :  { %9689 = vpow2.f32 %v8300_v29  ;;  %v4226_v33 = vmul.f32 1.442695, %v4212_v21  ;;  %v8289_v61 = vmin.f32 %v8273_v48, 0.0  ;;  %vm8281_vm11 = vcmp.gt.f32.partialorder %v8273_v48, 0.0  ;;  %v4261_v49 = vpop.permute.xlu1 %4260 }
 0x994   :  { %v9676_v36 = vpop.eup %9675 }
 0x995   :  { %v9678_v23 = vpop.eup %9677  ;;  %v8731_v20 = vadd.f32 -1.0, %v9676_v36  ;;  %9691 = vpow2.f32 %v4226_v33  ;;  %v8304_v53 = vmul.f32 1.442695, %v8289_v61 }
 0x996   :  { %v9680_v59 = vpop.eup %9679  ;;  %v8732_v41 = vadd.f32 -1.0, %v9678_v23 }
 0x997   :  { %v9682_v44 = vpop.eup %9681  ;;  %v13837_v1 = vsel %vm8274_vm2, %v8266_v0, %v8731_v20  ;;  %v8615_v22 = vadd.f32 -1.0, %v9680_v59  ;;  %v4228_v0 = vmul.f32 1.442695, %v4213_v14  ;;  %v4283_v14 = vmax.f32 %v13686_v3, %v4257_v42  ;;  %vm14514_vm2 = vmmov %vm14513_vm13 }
 0x998   :  { %v9684_v38 = vpop.eup %9683  ;;  %8330 = vrot.lane.b32.xlu0 %v13837_v1, %s9770_s29  ;;  %v13843_v26 = vsel %vm8275_vm7, %v8267_v13, %v8732_v41  ;;  %v8616_v32 = vadd.f32 -1.0, %v9682_v44  ;;  %vm14515_vm7 = vmmov %vm14514_vm2 }
 0x999   :  { %v9686_v45 = vpop.eup %9685  ;;  %8332 = vrot.lane.b32.xlu1 %v13843_v26, %s9770_s29  ;;  %v8733_v60 = vadd.f32 -1.0, %v9684_v38  ;;  %v13859_v24 = vsel %vm4202_vm14, %v13812_v47, %v8615_v22  ;;  %v8264_v47 = vmul.f32 %v8253_v34, %v12747_v18  ;;  %9693 = vpow2.f32 %v4228_v0 }
 0x99a   :  { %v8734_v50 = vadd.f32 -1.0, %v9686_v45  ;;  %v13865_v11 = vsel %vm4203_vm1, %v13815_v31, %v8616_v32 }
 0x99b   :  { %v13849_v10 = vsel %vm8276_vm8, %v8268_v51, %v8733_v60  ;;  %v8272_v5 = vadd.f32 %v8264_v47, %v4188_v39  ;;  %vm14516_vm8 = vmmov %vm14514_vm2 }
 0x99c   :  { %8334 = vrot.lane.b32.xlu0 %v13849_v10, %s9770_s29  ;;  %v13853_v55 = vsel %vm8277_vm0, %v8269_v46, %v8734_v50  ;;  %v9688_v57 = vpop.eup %9687  ;;  %vm14517_vm0 = vmmov %vm14514_vm2 }
 0x99d   :  { %8336 = vrot.lane.b32.xlu1 %v13853_v55, %s9770_s29  ;;  %v9690_v13 = vpop.eup %9689  ;;  %v8735_v31 = vadd.f32 -1.0, %v9688_v57  ;;  %v8288_v27 = vmin.f32 %v8272_v5, 0.0  ;;  %vm8280_vm9 = vcmp.gt.f32.partialorder %v8272_v5, 0.0  ;;  %vm14518_vm14 = vmmov %vm14517_vm0 }
 0x99e   :  { %v8736_v43 = vadd.f32 -1.0, %v9690_v13  ;;  %vm14519_vm1 = vmmov %vm14517_vm0 }
 0x99f   :  { %v13881_v4 = vsel %vm8278_vm12, %v13830_v19, %v8735_v31  ;;  %v9692_v7 = vpop.eup %9691  ;;  %v8302_v35 = vmul.f32 1.442695, %v8288_v27  ;;  %v4255_v19 = vpop.permute.xlu0 %4254  ;;  %v134_v31 = vld [vmem:[%s14181_s13 + $0x8] sm:$0xff]  ;;  %vm14520_vm12 = vmmov %vm14517_vm0 }
 0x9a0   :  { %4262 = vrot.lane.b32.xlu0 %v13859_v24, %s9770_s29  ;;  %v13887_v18 = vsel %vm8279_vm10, %v13833_v17, %v8736_v43  ;;  %v8617_v46 = vadd.f32 -1.0, %v9692_v7  ;;  %v142_v43 = vld [vmem:[%s14182_s14 + $0x8] sm:$0xff]  ;;  %vm14521_vm10 = vmmov %vm14517_vm0 }
 0x9a1   :  { %4264 = vrot.lane.b32.xlu1 %v13865_v11, %s9770_s29  ;;  %9695 = vpow2.f32 %v8302_v35 }
 0x9a2   :  { %9697 = vpow2.f32 %v8304_v53  ;;  %v13899_v16 = vsel %vm4204_vm15, %v4196_v6, %v8617_v46  ;;  %v141_v53 = vld [vmem:[%s14182_s14] sm:$0xff]  ;;  %vm14522_vm15 = vmmov %vm14517_vm0 }
 0x9a3   :  { %v9694_v51 = vpop.eup %9693  ;;  %v4259_v17 = vpop.permute.xlu0 %4258 }
 0x9a4   :  { %4290 = vrot.lane.b32.xlu0 %v13680_v37, %s9771_s30  ;;  %v8618_v25 = vadd.f32 -1.0, %v9694_v51  ;;  %v4271_v57 = vsel %vm1392_vm3, %v4259_v17, %v4261_v49 }
 0x9a5   :  { %4292 = vrot.lane.b32.xlu1 %v13686_v3, %s9771_s30  ;;  %v4284_v7 = vmax.f32 %v13694_v9, %v4271_v57 }
 0x9a6   :  { %v13903_v30 = vsel %vm4205_vm6, %v4197_v8, %v8618_v25  ;;  %v4270_v8 = vsel %vm1392_vm3, %v4255_v19, %v4257_v42  ;;  %v135_v19 = vld [vmem:[%s14181_s13 + $0x10] sm:$0xff]  ;;  %vm14525_vm6 = vmmov %vm14517_vm0 }
 0x9a7   :  { %v4282_v0 = vmax.f32 %v13680_v37, %v4270_v8 }
 0x9a8   :  { %4294 = vrot.lane.b32.xlu0 %v13694_v9, %s9771_s30 }
 0x9a9   :  { %4296 = vrot.lane.b32.xlu1 %v13700_v62, %s9771_s30 }
 0x9ab   :  { %v9696_v15 = vpop.eup %9695 }
 0x9ac   :  { %8338 = vrot.lane.b32.xlu0 %v13881_v4, %s9770_s29  ;;  %v9698_v58 = vpop.eup %9697  ;;  %v8737_v28 = vadd.f32 -1.0, %v9696_v15 }
 0x9ad   :  { %8340 = vrot.lane.b32.xlu1 %v13887_v18, %s9770_s29  ;;  %v8738_v54 = vadd.f32 -1.0, %v9698_v58 }
 0x9ae   :  { %v13919_v63 = vsel %vm8280_vm9, %v8272_v5, %v8737_v28  ;;  %v136_v28 = vld [vmem:[%s14181_s13 + $0x18] sm:$0xff]  ;;  %vm14526_vm9 = vmmov %vm14517_vm0 }
 0x9af   :  { %v13923_v34 = vsel %vm8281_vm11, %v8273_v48, %v8738_v54  ;;  %v144_v54 = vld [vmem:[%s14182_s14 + $0x18] sm:$0xff]  ;;  %vm14527_vm11 = vmmov %vm14517_vm0 }
 0x9b0   :  { %8366 = vrot.lane.b32.xlu0 %v13837_v1, %s9771_s30 }
 0x9b1   :  { %8368 = vrot.lane.b32.xlu1 %v13843_v26, %s9771_s30 }
 0x9b4   :  { %8370 = vrot.lane.b32.xlu0 %v13849_v10, %s9771_s30 }
 0x9b5   :  { %8372 = vrot.lane.b32.xlu1 %v13853_v55, %s9771_s30 }
 0x9b8   :  { %4266 = vrot.lane.b32.xlu0 %v13899_v16, %s9770_s29 }
 0x9b9   :  { %4268 = vrot.lane.b32.xlu1 %v13903_v30, %s9770_s29 }
 0x9bc   :  { %4298 = vrot.lane.b32.xlu0 %v13859_v24, %s9771_s30 }
 0x9bd   :  { %4300 = vrot.lane.b32.xlu1 %v13865_v11, %s9771_s30 }
 0x9c0   :  { %4326 = vrot.lane.b32.xlu0 %v13680_v37, %s9772_s0  ;;  %v133_v37 = vld [vmem:[%s14181_s13] sm:$0xff] }
 0x9c1   :  { %4328 = vrot.lane.b32.xlu1 %v13686_v3, %s9772_s0  ;;  %v4285_v3 = vmax.f32 %v13700_v62, %v4261_v49 }
 0x9c4   :  { %4330 = vrot.lane.b32.xlu0 %v13694_v9, %s9772_s0 }
 0x9c5   :  { %4332 = vrot.lane.b32.xlu1 %v13700_v62, %s9772_s0 }
 0x9c8   :  { %8342 = vrot.lane.b32.xlu0 %v13919_v63, %s9770_s29 }
 0x9c9   :  { %8344 = vrot.lane.b32.xlu1 %v13923_v34, %s9770_s29 }
 0x9cc   :  { %8374 = vrot.lane.b32.xlu0 %v13881_v4, %s9771_s30 }
 0x9cd   :  { %8376 = vrot.lane.b32.xlu1 %v13887_v18, %s9771_s30 }
 0x9d0   :  { %8402 = vrot.lane.b32.xlu0 %v13837_v1, %s9772_s0 }
 0x9d1   :  { %8404 = vrot.lane.b32.xlu1 %v13843_v26, %s9772_s0 }
 0x9d4   :  { %8406 = vrot.lane.b32.xlu0 %v13849_v10, %s9772_s0 }
 0x9d5   :  { %8408 = vrot.lane.b32.xlu1 %v13853_v55, %s9772_s0 }
 0x9d8   :  { %4302 = vrot.lane.b32.xlu0 %v13899_v16, %s9771_s30 }
 0x9d9   :  { %4304 = vrot.lane.b32.xlu1 %v13903_v30, %s9771_s30 }
 0x9dc   :  { %4334 = vrot.lane.b32.xlu0 %v13859_v24, %s9772_s0 }
 0x9dd   :  { %4336 = vrot.lane.b32.xlu1 %v13865_v11, %s9772_s0 }
 0x9e0   :  { %8378 = vrot.lane.b32.xlu0 %v13919_v63, %s9771_s30 }
 0x9e1   :  { %8380 = vrot.lane.b32.xlu1 %v13923_v34, %s9771_s30 }
 0x9e4   :  { %8410 = vrot.lane.b32.xlu0 %v13881_v4, %s9772_s0 }
 0x9e5   :  { %8412 = vrot.lane.b32.xlu1 %v13887_v18, %s9772_s0 }
 0x9e8   :  { %4338 = vrot.lane.b32.xlu0 %v13899_v16, %s9772_s0 }
 0x9e9   :  { %4340 = vrot.lane.b32.xlu1 %v13903_v30, %s9772_s0 }
 0x9ec   :  { %8414 = vrot.lane.b32.xlu0 %v13919_v63, %s9772_s0 }
 0x9ed   :  { %8416 = vrot.lane.b32.xlu1 %v13923_v34, %s9772_s0 }
 0xa0a   :  { %v13963_v56 = vpop.permute.xlu0 %8330 }
 0xa0b   :  { %v13965_v36 = vpop.permute.xlu1 %8332 }
 0xa0e   :  { %v13967_v23 = vpop.permute.xlu0 %8334 }
 0xa0f   :  { %v13969_v20 = vpop.permute.xlu1 %8336 }
 0xa12   :  { %v13971_v59 = vpop.permute.xlu0 %4262 }
 0xa13   :  { %v13973_v2 = vpop.permute.xlu1 %4264 }
 0xa16   :  { %v4291_v41 = vpop.permute.xlu0 %4290 }
 0xa17   :  { %v4293_v44 = vpop.permute.xlu1 %4292 }
 0xa18   :  { %v4306_v33 = vsel %vm1445_vm4, %v4291_v41, %v4293_v44  ;;  %v4319_v13 = vmax.f32 %v4283_v14, %v4293_v44 }
 0xa19   :  { %v4318_v52 = vmax.f32 %v4282_v0, %v4306_v33 }
 0xa1a   :  { %v4295_v39 = vpop.permute.xlu0 %4294 }
 0xa1b   :  { %v4297_v29 = vpop.permute.xlu1 %4296 }
 0xa1c   :  { %v4307_v48 = vsel %vm1445_vm4, %v4295_v39, %v4297_v29  ;;  %v4321_v35 = vmax.f32 %v4285_v3, %v4297_v29  ;;  %v143_v29 = vld [vmem:[%s14182_s14 + $0x10] sm:$0xff] }
 0xa1d   :  { %v4320_v15 = vmax.f32 %v4284_v7, %v4307_v48  ;;  %v8346_v48 = vsel %vm1392_vm3, %v13963_v56, %v13965_v36  ;;  %v8347_v56 = vsel %vm1392_vm3, %v13967_v23, %v13969_v20 }
 0xa1e   :  { %v13975_v38 = vpop.permute.xlu0 %8338 }
 0xa1f   :  { %v13977_v40 = vpop.permute.xlu1 %8340 }
 0xa22   :  { %v13979_v45 = vpop.permute.xlu0 %8366 }
 0xa23   :  { %v13981_v12 = vpop.permute.xlu1 %8368 }
 0xa26   :  { %v13983_v60 = vpop.permute.xlu0 %8370 }
 0xa27   :  { %v13985_v22 = vpop.permute.xlu1 %8372 }
 0xa2a   :  { %v13987_v6 = vpop.permute.xlu0 %4266 }
 0xa2b   :  { %v13989_v50 = vpop.permute.xlu1 %4268 }
 0xa2e   :  { %v13992_v32 = vpop.permute.xlu0 %4298 }
 0xa2f   :  { %v13994_v21 = vpop.permute.xlu1 %4300 }
 0xa32   :  { %v4327_v47 = vpop.permute.xlu0 %4326 }
 0xa33   :  { %v4329_v5 = vpop.permute.xlu1 %4328 }
 0xa34   :  { %v4342_v27 = vsel %vm1498_vm5, %v4327_v47, %v4329_v5  ;;  %v4355_v61 = vmax.f32 %v4319_v13, %v4329_v5 }
 0xa35   :  { %v4354_v51 = vmax.f32 %v4318_v52, %v4342_v27 }
 0xa36   :  { %v4363_v46 = vmul.f32 %v4355_v61, %v134_v31  ;;  %v4387_v25 = vmul.f32 %v4355_v61, %v142_v43  ;;  %v4331_v62 = vpop.permute.xlu0 %4330 }
 0xa37   :  { %v4362_v58 = vmul.f32 %v4354_v51, %v133_v37  ;;  %v4333_v9 = vpop.permute.xlu1 %4332  ;;  %v4386_v41 = vmul.f32 %v4354_v51, %v141_v53  ;;  %v8359_v51 = vmax.f32 %v13843_v26, %v13965_v36  ;;  %v8361_v26 = vmax.f32 %v13853_v55, %v13969_v20 }
 0xa38   :  { %v4343_v42 = vsel %vm1498_vm5, %v4331_v62, %v4333_v9  ;;  %v4357_v17 = vmax.f32 %v4321_v35, %v4333_v9  ;;  %v4370_v49 = vsel %vm14513_vm13, %v4363_v46, 0.0  ;;  %v4394_v0 = vsel %vm14514_vm2, %v4387_v25, 0.0  ;;  %vm14528_vm13 = vmmov %vm14517_vm0 }
 0xa39   :  { %v4356_v44 = vmax.f32 %v4320_v15, %v4343_v42  ;;  %v4371_v39 = vadd.f32 %v4370_v49, %v4362_v58  ;;  %v4395_v5 = vadd.f32 %v4394_v0, %v4386_v41  ;;  %v8382_v35 = vsel %vm1445_vm4, %v13979_v45, %v13981_v12 }
 0xa3a   :  { %v4365_v8 = vmul.f32 %v4357_v17, %v136_v28  ;;  %v4389_v14 = vmul.f32 %v4357_v17, %v144_v54  ;;  %v14030_v33 = vpop.permute.xlu0 %8342  ;;  %v8358_v46 = vmax.f32 %v13837_v1, %v8346_v48  ;;  %v8395_v62 = vmax.f32 %v8359_v51, %v13981_v12 }
 0xa3b   :  { %v4364_v57 = vmul.f32 %v4356_v44, %v135_v19  ;;  %4372 = vadd.xlane.f32.xlu0 %v4371_v39  ;;  %v14033_v13 = vpop.permute.xlu1 %8344  ;;  %v4388_v52 = vmul.f32 %v4356_v44, %v143_v29  ;;  %v8383_v36 = vsel %vm1445_vm4, %v13983_v60, %v13985_v22  ;;  %v8360_v42 = vmax.f32 %v13849_v10, %v8347_v56 }
 0xa3c   :  { %v4374_v47 = vsel %vm14515_vm7, %v4365_v8, 0.0  ;;  %v4398_v61 = vsel %vm14516_vm8, %v4389_v14, 0.0  ;;  %v8394_v58 = vmax.f32 %v8358_v46, %v8382_v35  ;;  %v8397_v23 = vmax.f32 %v8361_v26, %v13985_v22 }
 0xa3d   :  { %v4375_v3 = vadd.f32 %v4374_v47, %v4364_v57  ;;  %v4399_v25 = vadd.f32 %v4398_v61, %v4388_v52  ;;  %v8396_v44 = vmax.f32 %v8360_v42, %v8383_v36  ;;  %v4272_v10 = vsel %vm1392_vm3, %v13971_v59, %v13973_v2 }
 0xa3e   :  { %v14039_v27 = vpop.permute.xlu0 %8374  ;;  %v4286_v48 = vmax.f32 %v13859_v24, %v4272_v10  ;;  %vm4415_vm2 = vcmask 15360   ;;  %vm8503_vm7 = vcmask 1040384   ;;  %vm8513_vm8 = vcmask 9216  }
 0xa3f   :  { %4396 = vadd.xlane.f32.xlu0 %v4395_v5  ;;  %4376 = vadd.xlane.f32.xlu1 %v4375_v3  ;;  %v14042_v7 = vpop.permute.xlu1 %8376  ;;  %v4287_v5 = vmax.f32 %v13865_v11, %v13973_v2  ;;  %v138_v11 = vld [vmem:[%s14181_s13 + $0x28] sm:$0xff] }
 0xa40   :  { %v146_v2 = vld [vmem:[%s14182_s14 + $0x28] sm:$0xff]  ;;  %v8384_v42 = vsel %vm1445_vm4, %v14039_v27, %v14042_v7  ;;  %v4289_v27 = vmax.f32 %v13903_v30, %v13989_v50 }
 0xa41   :  { %v4323_v61 = vmax.f32 %v4287_v5, %v13994_v21 }
 0xa42   :  { %v8403_v15 = vpop.permute.xlu0 %8402 }
 0xa43   :  { %4400 = vadd.xlane.f32.xlu0 %v4399_v25  ;;  %v8405_v9 = vpop.permute.xlu1 %8404 }
 0xa44   :  { %v8418_v1 = vsel %vm1498_vm5, %v8403_v15, %v8405_v9  ;;  %v8431_v45 = vmax.f32 %v8395_v62, %v8405_v9  ;;  %v8348_v62 = vsel %vm1392_vm3, %v13975_v38, %v13977_v40 }
 0xa45   :  { %v8430_v17 = vmax.f32 %v8394_v58, %v8418_v1  ;;  %v8362_v38 = vmax.f32 %v13881_v4, %v8348_v62 }
 0xa46   :  { %v8439_v12 = vmul.f32 %v8431_v45, %v134_v31  ;;  %v8463_v49 = vmul.f32 %v8431_v45, %v142_v43  ;;  %v8407_v41 = vpop.permute.xlu0 %8406  ;;  %v8363_v45 = vmax.f32 %v13887_v18, %v13977_v40 }
 0xa47   :  { %v8438_v39 = vmul.f32 %v8430_v17, %v133_v37  ;;  %v8409_v8 = vpop.permute.xlu1 %8408  ;;  %v8462_v60 = vmul.f32 %v8430_v17, %v141_v53  ;;  %v4308_v53 = vsel %vm1445_vm4, %v13992_v32, %v13994_v21  ;;  %v137_v32 = vld [vmem:[%s14181_s13 + $0x20] sm:$0xff]  ;;  %v8398_v18 = vmax.f32 %v8362_v38, %v8384_v42 }
 0xa48   :  { %v8419_v55 = vsel %vm1498_vm5, %v8407_v41, %v8409_v8  ;;  %v8433_v20 = vmax.f32 %v8397_v23, %v8409_v8  ;;  %v8446_v14 = vsel %vm14517_vm0, %v8439_v12, 0.0  ;;  %v8470_v43 = vsel %vm14518_vm14, %v8463_v49, 0.0  ;;  %v145_v21 = vld [vmem:[%s14182_s14 + $0x20] sm:$0xff] }
 0xa49   :  { %v8432_v0 = vmax.f32 %v8396_v44, %v8419_v55  ;;  %v8447_v57 = vadd.f32 %v8446_v14, %v8438_v39  ;;  %v4322_v35 = vmax.f32 %v4286_v48, %v4308_v53  ;;  %v4273_v41 = vsel %vm1392_vm3, %v13987_v6, %v13989_v50 }
 0xa4a   :  { %v8441_v47 = vmul.f32 %v8433_v20, %v136_v28  ;;  %v8465_v22 = vmul.f32 %v8433_v20, %v144_v54  ;;  %v4303_v31 = vpop.permute.xlu0 %4302  ;;  %v8471_v28 = vadd.f32 %v8470_v43, %v8462_v60  ;;  %v8399_v44 = vmax.f32 %v8363_v45, %v14042_v7 }
 0xa4b   :  { %v8440_v52 = vmul.f32 %v8432_v0, %v135_v19  ;;  %8448 = vadd.xlane.f32.xlu1 %v8447_v57  ;;  %v4305_v37 = vpop.permute.xlu1 %4304  ;;  %v8464_v59 = vmul.f32 %v8432_v0, %v143_v29  ;;  %v4288_v20 = vmax.f32 %v13899_v16, %v4273_v41  ;;  %v8349_v6 = vsel %vm1392_vm3, %v14030_v33, %v14033_v13  ;;  %v140_v16 = vld [vmem:[%s14181_s13 + $0x38] sm:$0xff]  ;;  %vm14523_vm3 = vmmov %vm14517_vm0 }
 0xa4c   :  { %v8450_v3 = vsel %vm14519_vm1, %v8441_v47, 0.0  ;;  %v8474_v19 = vsel %vm14520_vm12, %v8465_v22, 0.0  ;;  %v4309_v8 = vsel %vm1445_vm4, %v4303_v31, %v4305_v37  ;;  %v8365_v14 = vmax.f32 %v13923_v34, %v14033_v13  ;;  %v148_v33 = vld [vmem:[%s14182_s14 + $0x38] sm:$0xff]  ;;  %v139_v34 = vld [vmem:[%s14181_s13 + $0x30] sm:$0xff] }
 0xa4d   :  { %v8451_v54 = vadd.f32 %v8450_v3, %v8440_v52  ;;  %v8475_v56 = vadd.f32 %v8474_v19, %v8464_v59  ;;  %v4325_v60 = vmax.f32 %v4289_v27, %v4305_v37  ;;  %v4324_v30 = vmax.f32 %v4288_v20, %v4309_v8  ;;  %v147_v13 = vld [vmem:[%s14182_s14 + $0x30] sm:$0xff] }
 0xa4e   :  { %v4335_v51 = vpop.permute.xlu0 %4334  ;;  %v8364_v53 = vmax.f32 %v13919_v63, %v8349_v6 }
 0xa4f   :  { %8472 = vadd.xlane.f32.xlu1 %v8471_v28  ;;  %8452 = vadd.xlane.f32.xlu0 %v8451_v54  ;;  %v4337_v24 = vpop.permute.xlu1 %4336 }
 0xa50   :  { %v4344_v29 = vsel %vm1498_vm5, %v4335_v51, %v4337_v24  ;;  %v4359_v46 = vmax.f32 %v4323_v61, %v4337_v24 }
 0xa51   :  { %v4358_v25 = vmax.f32 %v4322_v35, %v4344_v29 }
 0xa52   :  { %v4367_v15 = vmul.f32 %v4359_v46, %v138_v11  ;;  %v4391_v58 = vmul.f32 %v4359_v46, %v146_v2  ;;  %v8379_v9 = vpop.permute.xlu0 %8378 }
 0xa53   :  { %v4366_v26 = vmul.f32 %v4358_v25, %v137_v32  ;;  %v4390_v36 = vmul.f32 %v4358_v25, %v145_v21  ;;  %8476 = vadd.xlane.f32.xlu0 %v8475_v56  ;;  %v8381_v1 = vpop.permute.xlu1 %8380 }
 0xa54   :  { %v4402_v17 = vsel %vm14521_vm10, %v4391_v58, 0.0  ;;  %v4378_v23 = vsel %vm14522_vm15, %v4367_v15, 0.0  ;;  %v8385_v50 = vsel %vm1445_vm4, %v8379_v9, %v8381_v1  ;;  %vm14524_vm4 = vmmov %vm14517_vm0  ;;  %v8401_v28 = vmax.f32 %v8365_v14, %v8381_v1 }
 0xa55   :  { %v4403_v12 = vadd.f32 %v4402_v17, %v4390_v36  ;;  %v4379_v49 = vadd.f32 %v4378_v23, %v4366_v26  ;;  %v8400_v19 = vmax.f32 %v8364_v53, %v8385_v50 }
 0xa56   :  { %v8411_v39 = vpop.permute.xlu0 %8410 }
 0xa57   :  { %4404 = vadd.xlane.f32.xlu0 %v4403_v12  ;;  %4380 = vadd.xlane.f32.xlu1 %v4379_v49  ;;  %v8413_v40 = vpop.permute.xlu1 %8412 }
 0xa58   :  { %v8420_v4 = vsel %vm1498_vm5, %v8411_v39, %v8413_v40  ;;  %v8435_v55 = vmax.f32 %v8399_v44, %v8413_v40 }
 0xa59   :  { %v8434_v7 = vmax.f32 %v8398_v18, %v8420_v4 }
 0xa5a   :  { %v8443_v0 = vmul.f32 %v8435_v55, %v138_v11  ;;  %v8467_v57 = vmul.f32 %v8435_v55, %v146_v2  ;;  %v4339_v10 = vpop.permute.xlu0 %4338 }
 0xa5b   :  { %v8442_v47 = vmul.f32 %v8434_v7, %v137_v32  ;;  %v8466_v22 = vmul.f32 %v8434_v7, %v145_v21  ;;  %v4341_v31 = vpop.permute.xlu1 %4340 }
 0xa5c   :  { %v4345_v43 = vsel %vm1498_vm5, %v4339_v10, %v4341_v31  ;;  %v4361_v52 = vmax.f32 %v4325_v60, %v4341_v31  ;;  %v8478_v37 = vsel %vm14523_vm3, %v8467_v57, 0.0  ;;  %v8454_v5 = vsel %vm14524_vm4, %v8443_v0, 0.0 }
 0xa5d   :  { %v4360_v3 = vmax.f32 %v4324_v30, %v4345_v43  ;;  %v8479_v48 = vadd.f32 %v8478_v37, %v8466_v22  ;;  %v8455_v59 = vadd.f32 %v8454_v5, %v8442_v47 }
 0xa5e   :  { %v4369_v54 = vmul.f32 %v4361_v52, %v140_v16  ;;  %v4393_v61 = vmul.f32 %v4361_v52, %v148_v33  ;;  %v8415_v51 = vpop.permute.xlu0 %8414 }
 0xa5f   :  { %v4368_v35 = vmul.f32 %v4360_v3, %v139_v34  ;;  %v4392_v11 = vmul.f32 %v4360_v3, %v147_v13  ;;  %8480 = vadd.xlane.f32.xlu0 %v8479_v48  ;;  %8456 = vadd.xlane.f32.xlu1 %v8455_v59  ;;  %v8417_v2 = vpop.permute.xlu1 %8416 }
 0xa60   :  { %v8421_v24 = vsel %vm1498_vm5, %v8415_v51, %v8417_v2  ;;  %v8437_v32 = vmax.f32 %v8401_v28, %v8417_v2  ;;  %v4406_v21 = vsel %vm14525_vm6, %v4393_v61, 0.0  ;;  %v4382_v63 = vsel %vm14526_vm9, %v4369_v54, 0.0 }
 0xa61   :  { %v8436_v29 = vmax.f32 %v8400_v19, %v8421_v24  ;;  %v4407_v46 = vadd.f32 %v4406_v21, %v4392_v11  ;;  %v4383_v25 = vadd.f32 %v4382_v63, %v4368_v35  ;;  %vm4410_vm5 = vcmask 7168  }
 0xa62   :  { %v8445_v56 = vmul.f32 %v8437_v32, %v140_v16  ;;  %v8469_v62 = vmul.f32 %v8437_v32, %v148_v33  ;;  %v8739_v32 = vld [vmem:[%s14183_s15] ss:$0 sm:$0xff] }
 0xa63   :  { %v8444_v15 = vmul.f32 %v8436_v29, %v139_v34  ;;  %v8468_v58 = vmul.f32 %v8436_v29, %v147_v13  ;;  %4408 = vadd.xlane.f32.xlu0 %v4407_v46  ;;  %4384 = vadd.xlane.f32.xlu1 %v4383_v25 }
 0xa64   :  { %v8482_v9 = vsel %vm14527_vm11, %v8469_v62, 0.0  ;;  %v8458_v26 = vsel %vm14528_vm13, %v8445_v56, 0.0 }
 0xa65   :  { %v8483_v36 = vadd.f32 %v8482_v9, %v8468_v58  ;;  %v8459_v1 = vadd.f32 %v8458_v26, %v8444_v15 }
 0xa67   :  { %8484 = vadd.xlane.f32.xlu0 %v8483_v36  ;;  %8460 = vadd.xlane.f32.xlu1 %v8459_v1 }
 0xac8   :  { %v4373_v45 = vpop.xlane.xlu0 %4372 }
 0xacc   :  { %v4397_v42 = vpop.xlane.xlu0 %4396  ;;  %v4377_v23 = vpop.xlane.xlu1 %4376 }
 0xacd   :  { %v4411_v40 = vsel %vm4410_vm5, %v4373_v45, %v4397_v42 }
 0xace   :  { %v4416_v6 = vsel %vm4415_vm2, %v4411_v40, 0.0 }
 0xad0   :  { %v4401_v17 = vpop.xlane.xlu0 %4400 }
 0xad1   :  { %v4412_v18 = vsel %vm4410_vm5, %v4377_v23, %v4401_v17 }
 0xad2   :  { %v4417_v8 = vsel %vm4415_vm2, %v4412_v18, 0.0 }
 0xad3   :  { %v4418_v14 = vadd.f32 %v4417_v8, %v4416_v6 }
 0xad8   :  { %v8449_v12 = vpop.xlane.xlu1 %8448 }
 0xadc   :  { %v8453_v38 = vpop.xlane.xlu0 %8452  ;;  %v8473_v41 = vpop.xlane.xlu1 %8472 }
 0xadd   :  { %v8486_v60 = vsel %vm4410_vm5, %v8449_v12, %v8473_v41 }
 0xade   :  { %v8490_v22 = vsel %vm4415_vm2, %v8486_v60, 0.0 }
 0xae0   :  { %v8477_v49 = vpop.xlane.xlu0 %8476 }
 0xae1   :  { %v8487_v20 = vsel %vm4410_vm5, %v8453_v38, %v8477_v49 }
 0xae2   :  { %v8491_v57 = vsel %vm4415_vm2, %v8487_v20, 0.0 }
 0xae3   :  { %v8492_v31 = vadd.f32 %v8491_v57, %v8490_v22 }
 0xae4   :  { %v4405_v44 = vpop.xlane.xlu0 %4404  ;;  %v4381_v39 = vpop.xlane.xlu1 %4380 }
 0xae5   :  { %v4413_v27 = vsel %vm4410_vm5, %v4381_v39, %v4405_v44 }
 0xae6   :  { %v4419_v7 = vsel %vm4415_vm2, %v4413_v27, 0.0 }
 0xae7   :  { %v4420_v50 = vadd.f32 %v4419_v7, %v4418_v14 }
 0xaec   :  { %v8481_v4 = vpop.xlane.xlu0 %8480  ;;  %v8457_v55 = vpop.xlane.xlu1 %8456 }
 0xaed   :  { %v8488_v0 = vsel %vm4410_vm5, %v8457_v55, %v8481_v4 }
 0xaee   :  { %v8493_v16 = vsel %vm4415_vm2, %v8488_v0, 0.0 }
 0xaef   :  { %v8494_v52 = vadd.f32 %v8493_v16, %v8492_v31 }
 0xaf0   :  { %v4409_v10 = vpop.xlane.xlu0 %4408  ;;  %v4385_v30 = vpop.xlane.xlu1 %4384 }
 0xaf1   :  { %v4414_v47 = vsel %vm4410_vm5, %v4385_v30, %v4409_v10 }
 0xaf2   :  { %v4421_v33 = vsel %vm4415_vm2, %v4414_v47, 0.0 }
 0xaf3   :  { %v4422_v34 = vadd.f32 %v4421_v33, %v4420_v50 }
 0xaf4   :  { %v8485_v13 = vpop.xlane.xlu0 %8484  ;;  %v8461_v43 = vpop.xlane.xlu1 %8460 }
 0xaf5   :  { %v4423_v37 = vrot.slane %v4422_v34, 4  ;;  %v8489_v5 = vsel %vm4410_vm5, %v8461_v43, %v8485_v13 }
 0xaf6   :  { %v8495_v53 = vsel %vm4415_vm2, %v8489_v5, 0.0 }
 0xaf7   :  { %v4424_v3 = vadd.f32 %v4423_v37, %v4422_v34  ;;  %v8496_v48 = vadd.f32 %v8495_v53, %v8494_v52 }
 0xaf9   :  { %v4425_v59 = vrot.slane %v4424_v3, 2  ;;  %v8497_v28 = vrot.slane %v8496_v48, 4 }
 0xafb   :  { %v4426_v54 = vadd.f32 %v4425_v59, %v4424_v3  ;;  %v8498_v61 = vadd.f32 %v8497_v28, %v8496_v48 }
 0xafd   :  { %v8499_v51 = vrot.slane %v8498_v61, 2  ;;  %v4427_v19 = vrot.slane %v4426_v54, 1 }
 0xaff   :  { %v8500_v35 = vadd.f32 %v8499_v51, %v8498_v61  ;;  %v4428_v2 = vadd.f32 %v4427_v19, %v4426_v54 }
 0xb01   :  { %v8501_v11 = vrot.slane %v8500_v35, 1 }
 0xb03   :  { %v8502_v24 = vadd.f32 %v8501_v11, %v8500_v35 }
 0xb05   :  { %v8504_v21 = vsel %vm8503_vm7, %v4428_v2, %v8502_v24 }
 0xb06   :  { %v8512_v63 = vadd.f32 %v8739_v32, %v8504_v21 }
 0xb08   :  { %8514 = vst.msk [vmem:[#allocation4] sm:$0x3] %vm8513_vm8, %v8512_v63 }
 0xb09   :  { %9750 = shalt.err (!%p9747_p4)
}
 0xb0a   :  { %s9751_s20 = scalar_lea.hbm %s14184_s16, 32 }
 0xb0b   :  { %p9752_p5 = scmp.ne.s32.totalorder %s14184_s16, %s9751_s20  ;;  %p9755_p6 = scmp.lt.u32.totalorder %s9751_s20, %s14184_s16 }
 0xb0d   :  { %p9757_p7 = pnand %p9755_p6, %p9752_p5 }
 0xb0f   :  { %9760 = shalt.err (!%p9757_p7)
}
 0xb10   :  { %8524 = dma.vmem_to_hbm [thread:$0]  %s8522_s1, 32, %s14184_s16, [#allocation5]  }
 0xb11   :  { %9761 = dma.done.wait [#allocation5], 32  }
 0xb12   :  { %9762 = vsyncadd [#allocation5], 4294967264 }
 0xb13   :  { %8528 = vsyncpa [#allocation5], 1 }

</bundles_post_ra>
